<compile_context>
chip_gen: v7x
topology: tpu7x:2x2x1
jax: 0.10.0
libtpu: 0.0.40
codegen_flags: <defaults>
</compile_context>

<pallas_src>
import jax
import jax.numpy as jnp
from jax import lax
from jax.experimental import pallas as pl
from jax.experimental.pallas import tpu as pltpu

# ----------------------------- static geometry -----------------------------

H = W = 32                      # CIFAR input spatial size
C_IN = 3
C1_OUT, C2_OUT = 6, 16
KS = 5                          # conv kernel size
FC1_OUT, FC2_OUT, FC3_OUT = 120, 84, 10

LANES = 128                     # channel padding -> lane-dense tiles everywhere
TM = 128                        # rows per conv matmul chunk (register-resident f32 acc)

# slab row budgets (row = h*W + w per image)
X_ROWS = 1160                   # 1024 image rows + >= 132 (max conv1 shift), mult of 8
C1_ROWS = 1024                  # conv1 rows computed (8 chunks of 128)
P1_ROWS = 912                   # pool1 rows computed (>= conv2 max read 903)
C2_ROWS = 640                   # conv2 rows computed (5 chunks of 128)
P2_ROWS = 536                   # pool2 rows computed (>= fc1 max read 535)

C1_CHUNKS = C1_ROWS // TM       # 8
C2_CHUNKS = C2_ROWS // TM       # 5

# conv taps are pure row shifts thanks to the width-32 row indexing
CONV1_SHIFTS = tuple(kh * W + kw for kh in range(KS) for kw in range(KS))        # <= 132
CONV2_SHIFTS = tuple(64 * kh + 2 * kw for kh in range(KS) for kw in range(KS))   # <= 264
POOL1_OFFS = (0, 1, W, W + 1)            # 2x2 window on the 28x28 conv1 image
POOL2_OFFS = (0, 2, 2 * W, 2 * W + 2)    # 2x2 window on the stride-2 indexed conv2 image
FC_TAP_OFFS = tuple(128 * ph + 4 * pw for ph in range(5) for pw in range(5))     # <= 528


# ------------------------------ fused kernel -------------------------------

def _lenet_kernel(x_ref, w1_ref, b1_ref, w2_ref, b2_ref,
                  wf1_ref, bf1_ref, wf2_ref, bf2_ref, wf3_ref, bf3_ref,
                  out_ref, c1_scr, p1_scr, c2_scr, p2_scr):
    f32 = jnp.float32

    def conv_layer(n_chunks, load_lhs, w_ref, b_ref, dst_scr, shifts):
        """dst[r] = relu(bias + sum_t src[r + shift_t] @ w[t]) for r in [0, n_chunks*TM)."""
        def chunk(mi, carry):
            m = pl.multiple_of(mi * TM, TM)
            acc = jnp.zeros((TM, LANES), f32)
            for t, sh in enumerate(shifts):
                acc = acc + jnp.dot(load_lhs(m + sh), w_ref[t],
                                    preferred_element_type=f32)
            dst_scr[pl.ds(m, TM), :] = jnp.maximum(acc + b_ref[...], 0.0)
            return carry
        lax.fori_loop(0, n_chunks, chunk, 0)

    # conv1 + ReLU : input slab -> c1 (valid pixel (oh, ow) at row 32*oh + ow)
    conv_layer(C1_CHUNKS, lambda s: x_ref[0, pl.ds(s, TM), :],
               w1_ref, b1_ref, c1_scr, CONV1_SHIFTS)

    # pool1 (2x2 / stride 2) : c1 -> p1 (pooled pixel (ph, pw) at row 64*ph + 2*pw)
    p1_scr[...] = jnp.maximum(
        jnp.maximum(c1_scr[POOL1_OFFS[0]:POOL1_OFFS[0] + P1_ROWS, :],
                    c1_scr[POOL1_OFFS[1]:POOL1_OFFS[1] + P1_ROWS, :]),
        jnp.maximum(c1_scr[POOL1_OFFS[2]:POOL1_OFFS[2] + P1_ROWS, :],
                    c1_scr[POOL1_OFFS[3]:POOL1_OFFS[3] + P1_ROWS, :]))

    # conv2 + ReLU : p1 -> c2 (output pixel (oh, ow) at row 64*oh + 2*ow)
    conv_layer(C2_CHUNKS, lambda s: p1_scr[pl.ds(s, TM), :],
               w2_ref, b2_ref, c2_scr, CONV2_SHIFTS)

    # pool2 (2x2 / stride 2) : c2 -> p2 (pooled pixel (ph, pw) at row 128*ph + 4*pw)
    p2_scr[...] = jnp.maximum(
        jnp.maximum(c2_scr[POOL2_OFFS[0]:POOL2_OFFS[0] + P2_ROWS, :],
                    c2_scr[POOL2_OFFS[1]:POOL2_OFFS[1] + P2_ROWS, :]),
        jnp.maximum(c2_scr[POOL2_OFFS[2]:POOL2_OFFS[2] + P2_ROWS, :],
                    c2_scr[POOL2_OFFS[3]:POOL2_OFFS[3] + P2_ROWS, :]))

    # fc1 as 25 spatial-tap matmuls (no (C,H,W) flatten transpose), then fc2 / fc3.
    # Row 0 of every (8, 128) tile is the real sample; rows 1..7 are don't-care filler
    # that keep all matmuls sublane-aligned (sliced away on the host).
    acc = jnp.zeros((8, LANES), f32)
    for t, off in enumerate(FC_TAP_OFFS):
        acc = acc + jnp.dot(p2_scr[off:off + 8, :], wf1_ref[t],
                            preferred_element_type=f32)
    h = jnp.maximum(acc + bf1_ref[...], 0.0)
    h = jnp.maximum(jnp.dot(h, wf2_ref[...], preferred_element_type=f32)
                    + bf2_ref[...], 0.0)
    out_ref[0] = jnp.dot(h, wf3_ref[...], preferred_element_type=f32) + bf3_ref[...]


def _lenet_pallas(x_slab, kp):
    B = x_slab.shape[0]
    f32 = jnp.float32
    wspec3 = pl.BlockSpec((KS * KS, LANES, LANES), lambda b: (0, 0, 0))
    wspec2 = pl.BlockSpec((LANES, LANES), lambda b: (0, 0))
    bspec = pl.BlockSpec((1, LANES), lambda b: (0, 0))
    return pl.pallas_call(
        _lenet_kernel,
        out_shape=jax.ShapeDtypeStruct((B, 8, LANES), f32),
        grid_spec=pltpu.PrefetchScalarGridSpec(
            num_scalar_prefetch=0,
            grid=(B,),
            in_specs=[
                pl.BlockSpec((1, X_ROWS, LANES), lambda b: (b, 0, 0)),   # input slab
                wspec3, bspec,          # conv1 taps + bias
                wspec3, bspec,          # conv2 taps + bias
                wspec3, bspec,          # fc1 taps + bias
                wspec2, bspec,          # fc2
                wspec2, bspec,          # fc3
            ],
            out_specs=pl.BlockSpec((1, 8, LANES), lambda b: (b, 0, 0)),
            scratch_shapes=[
                pltpu.VMEM((C1_ROWS, LANES), f32),
                pltpu.VMEM((P1_ROWS, LANES), f32),
                pltpu.VMEM((C2_ROWS, LANES), f32),
                pltpu.VMEM((P2_ROWS, LANES), f32),
            ],
        ),
        compiler_params=pltpu.CompilerParams(
            dimension_semantics=("parallel",),
            vmem_limit_bytes=32 * 1024 * 1024,
        ),
    )(x_slab, kp["w1"], kp["b1"], kp["w2"], kp["b2"],
      kp["wf1"], kp["bf1"], kp["wf2"], kp["bf2"], kp["wf3"], kp["bf3"])


# ----------------------------- params / wrapper -----------------------------

def init_params(key):
    ks = jax.random.split(key, 10)

    def u(k, shape, fan_in):
        bound = 1.0 / jnp.sqrt(jnp.float32(fan_in))
        return jax.random.uniform(k, shape, jnp.float32, -bound, bound)

    return {
        "conv1_w": u(ks[0], (C1_OUT, C_IN, KS, KS), C_IN * KS * KS),
        "conv1_b": u(ks[1], (C1_OUT,), C_IN * KS * KS),
        "conv2_w": u(ks[2], (C2_OUT, C1_OUT, KS, KS), C1_OUT * KS * KS),
        "conv2_b": u(ks[3], (C2_OUT,), C1_OUT * KS * KS),
        "fc1_w": u(ks[4], (C2_OUT * 5 * 5, FC1_OUT), C2_OUT * 5 * 5),   # stored (in, out)
        "fc1_b": u(ks[5], (FC1_OUT,), C2_OUT * 5 * 5),
        "fc2_w": u(ks[6], (FC1_OUT, FC2_OUT), FC1_OUT),
        "fc2_b": u(ks[7], (FC2_OUT,), FC1_OUT),
        "fc3_w": u(ks[8], (FC2_OUT, FC3_OUT), FC2_OUT),
        "fc3_b": u(ks[9], (FC3_OUT,), FC2_OUT),
    }


def prepare_kernel_params(p):
    """Pack weights/biases once into zero-padded, GEMM-ready 128-lane tiles."""
    f32 = jnp.float32

    def pad_bias(b):
        return jnp.zeros((1, LANES), f32).at[0, :b.shape[0]].set(b)

    def conv_taps(w_oihw):
        cout, cin = w_oihw.shape[0], w_oihw.shape[1]
        taps = jnp.transpose(w_oihw, (2, 3, 1, 0)).reshape(KS * KS, cin, cout)
        return jnp.zeros((KS * KS, LANES, LANES), f32).at[:, :cin, :cout].set(taps)

    def pad_mat(w):
        ki, ko = w.shape
        return jnp.zeros((LANES, LANES), f32).at[:ki, :ko].set(w)

    # fc1 input index is c*25 + ph*5 + pw (PyTorch NCHW flatten); regroup per spatial tap
    # so fc1 becomes 25 row-gathered matmuls in the kernel.
    fc1_taps = jnp.transpose(p["fc1_w"].reshape(C2_OUT, 25, FC1_OUT), (1, 0, 2))
    wf1 = jnp.zeros((25, LANES, LANES), f32).at[:, :C2_OUT, :FC1_OUT].set(fc1_taps)

    return {
        "w1": conv_taps(p["conv1_w"]), "b1": pad_bias(p["conv1_b"]),
        "w2": conv_taps(p["conv2_w"]), "b2": pad_bias(p["conv2_b"]),
        "wf1": wf1, "bf1": pad_bias(p["fc1_b"]),
        "wf2": pad_mat(p["fc2_w"]), "bf2": pad_bias(p["fc2_b"]),
        "wf3": pad_mat(p["fc3_w"]), "bf3": pad_bias(p["fc3_b"]),
    }


@jax.jit
def net_forward(kparams, x):
    """x: (B, 3, 32, 32) NCHW float32 -> (B, 10) logits."""
    B = x.shape[0]
    x_rows = jnp.transpose(x, (0, 2, 3, 1)).reshape(B, H * W, C_IN)      # row = h*32 + w
    x_slab = jnp.pad(x_rows, ((0, 0), (0, X_ROWS - H * W), (0, LANES - C_IN)))
    out = _lenet_pallas(x_slab, kparams)
    return out[:, 0, :FC3_OUT]


def reference_forward(params, x):
    """Pure-JAX reference with identical semantics to the PyTorch Net."""
    hi = lax.Precision.HIGHEST

    def conv(h, w, b):
        y = lax.conv_general_dilated(h, w, (1, 1), "VALID",
                                     dimension_numbers=("NCHW", "OIHW", "NCHW"),
                                     precision=hi)
        return jax.nn.relu(y + b[None, :, None, None])

    def pool(h):
        return lax.reduce_window(h, -jnp.inf, lax.max,
                                 (1, 1, 2, 2), (1, 1, 2, 2), "VALID")

    h = pool(conv(x, params["conv1_w"], params["conv1_b"]))
    h = pool(conv(h, params["conv2_w"], params["conv2_b"]))
    h = h.reshape(x.shape[0], C2_OUT * 5 * 5)            # (C, H, W) flatten, as in torch
    h = jax.nn.relu(jnp.dot(h, params["fc1_w"], precision=hi) + params["fc1_b"])
    h = jax.nn.relu(jnp.dot(h, params["fc2_w"], precision=hi) + params["fc2_b"])
    return jnp.dot(h, params["fc3_w"], precision=hi) + params["fc3_b"]


if __name__ == "__main__":
    key = jax.random.PRNGKey(0)
    k_params, k_x = jax.random.split(key)
    params = init_params(k_params)
    kparams = prepare_kernel_params(params)
    x = jax.random.normal(k_x, (2, C_IN, H, W), jnp.float32)

    logits = net_forward(kparams, x)
    jax.block_until_ready(logits)

    assert logits.shape == (2, FC3_OUT), logits.shape
    assert logits.dtype == jnp.float32

    ref = reference_forward(params, x)
    err = float(jnp.max(jnp.abs(logits - ref)))
    assert err < 5e-3, f"max |pallas - reference| = {err}"

    print("KERNEL_OK")
</pallas_src>

<mosaic_0001>
module attributes {stable_mosaic.version = 11 : i64} {
  func.func @_lenet_kernel(%arg0: i32, %arg1: memref<1x1160x128xf32, #tpu.memory_space<vmem>>, %arg2: memref<25x128x128xf32, #tpu.memory_space<vmem>>, %arg3: memref<1x128xf32, #tpu.memory_space<vmem>>, %arg4: memref<25x128x128xf32, #tpu.memory_space<vmem>>, %arg5: memref<1x128xf32, #tpu.memory_space<vmem>>, %arg6: memref<25x128x128xf32, #tpu.memory_space<vmem>>, %arg7: memref<1x128xf32, #tpu.memory_space<vmem>>, %arg8: memref<128x128xf32, #tpu.memory_space<vmem>>, %arg9: memref<1x128xf32, #tpu.memory_space<vmem>>, %arg10: memref<128x128xf32, #tpu.memory_space<vmem>>, %arg11: memref<1x128xf32, #tpu.memory_space<vmem>>, %arg12: memref<1x8x128xf32, #tpu.memory_space<vmem>>, %arg13: memref<1024x128xf32, #tpu.memory_space<vmem>>, %arg14: memref<912x128xf32, #tpu.memory_space<vmem>>, %arg15: memref<640x128xf32, #tpu.memory_space<vmem>>, %arg16: memref<536x128xf32, #tpu.memory_space<vmem>>) attributes {dimension_semantics = [#tpu.dimension_semantics<parallel>], iteration_bounds = array<i64: 2>, scalar_prefetch = 0 : i64, scratch_operands = 4 : i64, tpu.core_type = #tpu.core_type<tc>, window_params = [{transform_indices = @transform_0, window_bounds = array<i64: 1, 1160, 128>}, {pipeline_mode = #tpu.pipeline_mode<synchronous>, transform_indices = @transform_1, window_bounds = array<i64: 25, 128, 128>}, {pipeline_mode = #tpu.pipeline_mode<synchronous>, transform_indices = @transform_2, window_bounds = array<i64: 1, 128>}, {pipeline_mode = #tpu.pipeline_mode<synchronous>, transform_indices = @transform_3, window_bounds = array<i64: 25, 128, 128>}, {pipeline_mode = #tpu.pipeline_mode<synchronous>, transform_indices = @transform_4, window_bounds = array<i64: 1, 128>}, {pipeline_mode = #tpu.pipeline_mode<synchronous>, transform_indices = @transform_5, window_bounds = array<i64: 25, 128, 128>}, {pipeline_mode = #tpu.pipeline_mode<synchronous>, transform_indices = @transform_6, window_bounds = array<i64: 1, 128>}, {pipeline_mode = #tpu.pipeline_mode<synchronous>, transform_indices = @transform_7, window_bounds = array<i64: 128, 128>}, {pipeline_mode = #tpu.pipeline_mode<synchronous>, transform_indices = @transform_8, window_bounds = array<i64: 1, 128>}, {pipeline_mode = #tpu.pipeline_mode<synchronous>, transform_indices = @transform_9, window_bounds = array<i64: 128, 128>}, {pipeline_mode = #tpu.pipeline_mode<synchronous>, transform_indices = @transform_10, window_bounds = array<i64: 1, 128>}, {transform_indices = @transform_11, window_bounds = array<i64: 1, 8, 128>}]} {
    %c0_i32 = arith.constant 0 : i32
    %c8_i32 = arith.constant 8 : i32
    %0 = arith.addi %c0_i32, %c8_i32 : i32
    %c1_i32 = arith.constant 1 : i32
    scf.for %arg17 = %c0_i32 to %0 step %c1_i32  : i32 {
      %c128_i32 = arith.constant 128 : i32
      %164 = arith.muli %arg17, %c128_i32 : i32
      %165 = tpu.assume_multiple %164, 128 : i32
      %cst_142 = arith.constant 0.000000e+00 : f32
      %166 = vector.broadcast %cst_142 : f32 to vector<128x128xf32>
      %c0_i32_143 = arith.constant 0 : i32
      %167 = arith.addi %165, %c0_i32_143 : i32
      %c0_144 = arith.constant 0 : index
      %168 = arith.index_cast %167 : i32 to index
      %c0_145 = arith.constant 0 : index
      %169 = vector.load %arg1[%c0_144, %168, %c0_145] : memref<1x1160x128xf32, #tpu.memory_space<vmem>>, vector<1x128x128xf32>
      %170 = vector.shape_cast %169 : vector<1x128x128xf32> to vector<128x128xf32>
      %c0_146 = arith.constant 0 : index
      %c0_147 = arith.constant 0 : index
      %c0_148 = arith.constant 0 : index
      %171 = vector.load %arg2[%c0_146, %c0_147, %c0_148] : memref<25x128x128xf32, #tpu.memory_space<vmem>>, vector<1x128x128xf32>
      %172 = vector.shape_cast %171 : vector<1x128x128xf32> to vector<128x128xf32>
      %cst_149 = arith.constant dense<0.000000e+00> : vector<128x128xf32>
      %173 = tpu.matmul %170, %172, %cst_149 {dimension_numbers = #tpu.dot_dimension_numbers<[1], [0], [0], [1], [0, 0, 1, 1], [], []>} : vector<128x128xf32>, vector<128x128xf32>, vector<128x128xf32> -> vector<128x128xf32>
      %174 = arith.addf %166, %173 : vector<128x128xf32>
      %c1_i32_150 = arith.constant 1 : i32
      %175 = arith.addi %165, %c1_i32_150 : i32
      %c0_151 = arith.constant 0 : index
      %176 = arith.index_cast %175 : i32 to index
      %c0_152 = arith.constant 0 : index
      %177 = vector.load %arg1[%c0_151, %176, %c0_152] : memref<1x1160x128xf32, #tpu.memory_space<vmem>>, vector<1x128x128xf32>
      %178 = vector.shape_cast %177 : vector<1x128x128xf32> to vector<128x128xf32>
      %c1_153 = arith.constant 1 : index
      %c0_154 = arith.constant 0 : index
      %c0_155 = arith.constant 0 : index
      %179 = vector.load %arg2[%c1_153, %c0_154, %c0_155] : memref<25x128x128xf32, #tpu.memory_space<vmem>>, vector<1x128x128xf32>
      %180 = vector.shape_cast %179 : vector<1x128x128xf32> to vector<128x128xf32>
      %cst_156 = arith.constant dense<0.000000e+00> : vector<128x128xf32>
      %181 = tpu.matmul %178, %180, %cst_156 {dimension_numbers = #tpu.dot_dimension_numbers<[1], [0], [0], [1], [0, 0, 1, 1], [], []>} : vector<128x128xf32>, vector<128x128xf32>, vector<128x128xf32> -> vector<128x128xf32>
      %182 = arith.addf %174, %181 : vector<128x128xf32>
      %c2_i32 = arith.constant 2 : i32
      %183 = arith.addi %165, %c2_i32 : i32
      %c0_157 = arith.constant 0 : index
      %184 = arith.index_cast %183 : i32 to index
      %c0_158 = arith.constant 0 : index
      %185 = vector.load %arg1[%c0_157, %184, %c0_158] : memref<1x1160x128xf32, #tpu.memory_space<vmem>>, vector<1x128x128xf32>
      %186 = vector.shape_cast %185 : vector<1x128x128xf32> to vector<128x128xf32>
      %c2_159 = arith.constant 2 : index
      %c0_160 = arith.constant 0 : index
      %c0_161 = arith.constant 0 : index
      %187 = vector.load %arg2[%c2_159, %c0_160, %c0_161] : memref<25x128x128xf32, #tpu.memory_space<vmem>>, vector<1x128x128xf32>
      %188 = vector.shape_cast %187 : vector<1x128x128xf32> to vector<128x128xf32>
      %cst_162 = arith.constant dense<0.000000e+00> : vector<128x128xf32>
      %189 = tpu.matmul %186, %188, %cst_162 {dimension_numbers = #tpu.dot_dimension_numbers<[1], [0], [0], [1], [0, 0, 1, 1], [], []>} : vector<128x128xf32>, vector<128x128xf32>, vector<128x128xf32> -> vector<128x128xf32>
      %190 = arith.addf %182, %189 : vector<128x128xf32>
      %c3_i32 = arith.constant 3 : i32
      %191 = arith.addi %165, %c3_i32 : i32
      %c0_163 = arith.constant 0 : index
      %192 = arith.index_cast %191 : i32 to index
      %c0_164 = arith.constant 0 : index
      %193 = vector.load %arg1[%c0_163, %192, %c0_164] : memref<1x1160x128xf32, #tpu.memory_space<vmem>>, vector<1x128x128xf32>
      %194 = vector.shape_cast %193 : vector<1x128x128xf32> to vector<128x128xf32>
      %c3_165 = arith.constant 3 : index
      %c0_166 = arith.constant 0 : index
      %c0_167 = arith.constant 0 : index
      %195 = vector.load %arg2[%c3_165, %c0_166, %c0_167] : memref<25x128x128xf32, #tpu.memory_space<vmem>>, vector<1x128x128xf32>
      %196 = vector.shape_cast %195 : vector<1x128x128xf32> to vector<128x128xf32>
      %cst_168 = arith.constant dense<0.000000e+00> : vector<128x128xf32>
      %197 = tpu.matmul %194, %196, %cst_168 {dimension_numbers = #tpu.dot_dimension_numbers<[1], [0], [0], [1], [0, 0, 1, 1], [], []>} : vector<128x128xf32>, vector<128x128xf32>, vector<128x128xf32> -> vector<128x128xf32>
      %198 = arith.addf %190, %197 : vector<128x128xf32>
      %c4_i32 = arith.constant 4 : i32
      %199 = arith.addi %165, %c4_i32 : i32
      %c0_169 = arith.constant 0 : index
      %200 = arith.index_cast %199 : i32 to index
      %c0_170 = arith.constant 0 : index
      %201 = vector.load %arg1[%c0_169, %200, %c0_170] : memref<1x1160x128xf32, #tpu.memory_space<vmem>>, vector<1x128x128xf32>
      %202 = vector.shape_cast %201 : vector<1x128x128xf32> to vector<128x128xf32>
      %c4_171 = arith.constant 4 : index
      %c0_172 = arith.constant 0 : index
      %c0_173 = arith.constant 0 : index
      %203 = vector.load %arg2[%c4_171, %c0_172, %c0_173] : memref<25x128x128xf32, #tpu.memory_space<vmem>>, vector<1x128x128xf32>
      %204 = vector.shape_cast %203 : vector<1x128x128xf32> to vector<128x128xf32>
      %cst_174 = arith.constant dense<0.000000e+00> : vector<128x128xf32>
      %205 = tpu.matmul %202, %204, %cst_174 {dimension_numbers = #tpu.dot_dimension_numbers<[1], [0], [0], [1], [0, 0, 1, 1], [], []>} : vector<128x128xf32>, vector<128x128xf32>, vector<128x128xf32> -> vector<128x128xf32>
      %206 = arith.addf %198, %205 : vector<128x128xf32>
      %c32_i32 = arith.constant 32 : i32
      %207 = arith.addi %165, %c32_i32 : i32
      %c0_175 = arith.constant 0 : index
      %208 = arith.index_cast %207 : i32 to index
      %c0_176 = arith.constant 0 : index
      %209 = vector.load %arg1[%c0_175, %208, %c0_176] : memref<1x1160x128xf32, #tpu.memory_space<vmem>>, vector<1x128x128xf32>
      %210 = vector.shape_cast %209 : vector<1x128x128xf32> to vector<128x128xf32>
      %c5_177 = arith.constant 5 : index
      %c0_178 = arith.constant 0 : index
      %c0_179 = arith.constant 0 : index
      %211 = vector.load %arg2[%c5_177, %c0_178, %c0_179] : memref<25x128x128xf32, #tpu.memory_space<vmem>>, vector<1x128x128xf32>
      %212 = vector.shape_cast %211 : vector<1x128x128xf32> to vector<128x128xf32>
      %cst_180 = arith.constant dense<0.000000e+00> : vector<128x128xf32>
      %213 = tpu.matmul %210, %212, %cst_180 {dimension_numbers = #tpu.dot_dimension_numbers<[1], [0], [0], [1], [0, 0, 1, 1], [], []>} : vector<128x128xf32>, vector<128x128xf32>, vector<128x128xf32> -> vector<128x128xf32>
      %214 = arith.addf %206, %213 : vector<128x128xf32>
      %c33_i32 = arith.constant 33 : i32
      %215 = arith.addi %165, %c33_i32 : i32
      %c0_181 = arith.constant 0 : index
      %216 = arith.index_cast %215 : i32 to index
      %c0_182 = arith.constant 0 : index
      %217 = vector.load %arg1[%c0_181, %216, %c0_182] : memref<1x1160x128xf32, #tpu.memory_space<vmem>>, vector<1x128x128xf32>
      %218 = vector.shape_cast %217 : vector<1x128x128xf32> to vector<128x128xf32>
      %c6_183 = arith.constant 6 : index
      %c0_184 = arith.constant 0 : index
      %c0_185 = arith.constant 0 : index
      %219 = vector.load %arg2[%c6_183, %c0_184, %c0_185] : memref<25x128x128xf32, #tpu.memory_space<vmem>>, vector<1x128x128xf32>
      %220 = vector.shape_cast %219 : vector<1x128x128xf32> to vector<128x128xf32>
      %cst_186 = arith.constant dense<0.000000e+00> : vector<128x128xf32>
      %221 = tpu.matmul %218, %220, %cst_186 {dimension_numbers = #tpu.dot_dimension_numbers<[1], [0], [0], [1], [0, 0, 1, 1], [], []>} : vector<128x128xf32>, vector<128x128xf32>, vector<128x128xf32> -> vector<128x128xf32>
      %222 = arith.addf %214, %221 : vector<128x128xf32>
      %c34_i32 = arith.constant 34 : i32
      %223 = arith.addi %165, %c34_i32 : i32
      %c0_187 = arith.constant 0 : index
      %224 = arith.index_cast %223 : i32 to index
      %c0_188 = arith.constant 0 : index
      %225 = vector.load %arg1[%c0_187, %224, %c0_188] : memref<1x1160x128xf32, #tpu.memory_space<vmem>>, vector<1x128x128xf32>
      %226 = vector.shape_cast %225 : vector<1x128x128xf32> to vector<128x128xf32>
      %c7_189 = arith.constant 7 : index
      %c0_190 = arith.constant 0 : index
      %c0_191 = arith.constant 0 : index
      %227 = vector.load %arg2[%c7_189, %c0_190, %c0_191] : memref<25x128x128xf32, #tpu.memory_space<vmem>>, vector<1x128x128xf32>
      %228 = vector.shape_cast %227 : vector<1x128x128xf32> to vector<128x128xf32>
      %cst_192 = arith.constant dense<0.000000e+00> : vector<128x128xf32>
      %229 = tpu.matmul %226, %228, %cst_192 {dimension_numbers = #tpu.dot_dimension_numbers<[1], [0], [0], [1], [0, 0, 1, 1], [], []>} : vector<128x128xf32>, vector<128x128xf32>, vector<128x128xf32> -> vector<128x128xf32>
      %230 = arith.addf %222, %229 : vector<128x128xf32>
      %c35_i32 = arith.constant 35 : i32
      %231 = arith.addi %165, %c35_i32 : i32
      %c0_193 = arith.constant 0 : index
      %232 = arith.index_cast %231 : i32 to index
      %c0_194 = arith.constant 0 : index
      %233 = vector.load %arg1[%c0_193, %232, %c0_194] : memref<1x1160x128xf32, #tpu.memory_space<vmem>>, vector<1x128x128xf32>
      %234 = vector.shape_cast %233 : vector<1x128x128xf32> to vector<128x128xf32>
      %c8_195 = arith.constant 8 : index
      %c0_196 = arith.constant 0 : index
      %c0_197 = arith.constant 0 : index
      %235 = vector.load %arg2[%c8_195, %c0_196, %c0_197] : memref<25x128x128xf32, #tpu.memory_space<vmem>>, vector<1x128x128xf32>
      %236 = vector.shape_cast %235 : vector<1x128x128xf32> to vector<128x128xf32>
      %cst_198 = arith.constant dense<0.000000e+00> : vector<128x128xf32>
      %237 = tpu.matmul %234, %236, %cst_198 {dimension_numbers = #tpu.dot_dimension_numbers<[1], [0], [0], [1], [0, 0, 1, 1], [], []>} : vector<128x128xf32>, vector<128x128xf32>, vector<128x128xf32> -> vector<128x128xf32>
      %238 = arith.addf %230, %237 : vector<128x128xf32>
      %c36_i32 = arith.constant 36 : i32
      %239 = arith.addi %165, %c36_i32 : i32
      %c0_199 = arith.constant 0 : index
      %240 = arith.index_cast %239 : i32 to index
      %c0_200 = arith.constant 0 : index
      %241 = vector.load %arg1[%c0_199, %240, %c0_200] : memref<1x1160x128xf32, #tpu.memory_space<vmem>>, vector<1x128x128xf32>
      %242 = vector.shape_cast %241 : vector<1x128x128xf32> to vector<128x128xf32>
      %c9_201 = arith.constant 9 : index
      %c0_202 = arith.constant 0 : index
      %c0_203 = arith.constant 0 : index
      %243 = vector.load %arg2[%c9_201, %c0_202, %c0_203] : memref<25x128x128xf32, #tpu.memory_space<vmem>>, vector<1x128x128xf32>
      %244 = vector.shape_cast %243 : vector<1x128x128xf32> to vector<128x128xf32>
      %cst_204 = arith.constant dense<0.000000e+00> : vector<128x128xf32>
      %245 = tpu.matmul %242, %244, %cst_204 {dimension_numbers = #tpu.dot_dimension_numbers<[1], [0], [0], [1], [0, 0, 1, 1], [], []>} : vector<128x128xf32>, vector<128x128xf32>, vector<128x128xf32> -> vector<128x128xf32>
      %246 = arith.addf %238, %245 : vector<128x128xf32>
      %c64_i32 = arith.constant 64 : i32
      %247 = arith.addi %165, %c64_i32 : i32
      %c0_205 = arith.constant 0 : index
      %248 = arith.index_cast %247 : i32 to index
      %c0_206 = arith.constant 0 : index
      %249 = vector.load %arg1[%c0_205, %248, %c0_206] : memref<1x1160x128xf32, #tpu.memory_space<vmem>>, vector<1x128x128xf32>
      %250 = vector.shape_cast %249 : vector<1x128x128xf32> to vector<128x128xf32>
      %c10_207 = arith.constant 10 : index
      %c0_208 = arith.constant 0 : index
      %c0_209 = arith.constant 0 : index
      %251 = vector.load %arg2[%c10_207, %c0_208, %c0_209] : memref<25x128x128xf32, #tpu.memory_space<vmem>>, vector<1x128x128xf32>
      %252 = vector.shape_cast %251 : vector<1x128x128xf32> to vector<128x128xf32>
      %cst_210 = arith.constant dense<0.000000e+00> : vector<128x128xf32>
      %253 = tpu.matmul %250, %252, %cst_210 {dimension_numbers = #tpu.dot_dimension_numbers<[1], [0], [0], [1], [0, 0, 1, 1], [], []>} : vector<128x128xf32>, vector<128x128xf32>, vector<128x128xf32> -> vector<128x128xf32>
      %254 = arith.addf %246, %253 : vector<128x128xf32>
      %c65_i32 = arith.constant 65 : i32
      %255 = arith.addi %165, %c65_i32 : i32
      %c0_211 = arith.constant 0 : index
      %256 = arith.index_cast %255 : i32 to index
      %c0_212 = arith.constant 0 : index
      %257 = vector.load %arg1[%c0_211, %256, %c0_212] : memref<1x1160x128xf32, #tpu.memory_space<vmem>>, vector<1x128x128xf32>
      %258 = vector.shape_cast %257 : vector<1x128x128xf32> to vector<128x128xf32>
      %c11_213 = arith.constant 11 : index
      %c0_214 = arith.constant 0 : index
      %c0_215 = arith.constant 0 : index
      %259 = vector.load %arg2[%c11_213, %c0_214, %c0_215] : memref<25x128x128xf32, #tpu.memory_space<vmem>>, vector<1x128x128xf32>
      %260 = vector.shape_cast %259 : vector<1x128x128xf32> to vector<128x128xf32>
      %cst_216 = arith.constant dense<0.000000e+00> : vector<128x128xf32>
      %261 = tpu.matmul %258, %260, %cst_216 {dimension_numbers = #tpu.dot_dimension_numbers<[1], [0], [0], [1], [0, 0, 1, 1], [], []>} : vector<128x128xf32>, vector<128x128xf32>, vector<128x128xf32> -> vector<128x128xf32>
      %262 = arith.addf %254, %261 : vector<128x128xf32>
      %c66_i32 = arith.constant 66 : i32
      %263 = arith.addi %165, %c66_i32 : i32
      %c0_217 = arith.constant 0 : index
      %264 = arith.index_cast %263 : i32 to index
      %c0_218 = arith.constant 0 : index
      %265 = vector.load %arg1[%c0_217, %264, %c0_218] : memref<1x1160x128xf32, #tpu.memory_space<vmem>>, vector<1x128x128xf32>
      %266 = vector.shape_cast %265 : vector<1x128x128xf32> to vector<128x128xf32>
      %c12_219 = arith.constant 12 : index
      %c0_220 = arith.constant 0 : index
      %c0_221 = arith.constant 0 : index
      %267 = vector.load %arg2[%c12_219, %c0_220, %c0_221] : memref<25x128x128xf32, #tpu.memory_space<vmem>>, vector<1x128x128xf32>
      %268 = vector.shape_cast %267 : vector<1x128x128xf32> to vector<128x128xf32>
      %cst_222 = arith.constant dense<0.000000e+00> : vector<128x128xf32>
      %269 = tpu.matmul %266, %268, %cst_222 {dimension_numbers = #tpu.dot_dimension_numbers<[1], [0], [0], [1], [0, 0, 1, 1], [], []>} : vector<128x128xf32>, vector<128x128xf32>, vector<128x128xf32> -> vector<128x128xf32>
      %270 = arith.addf %262, %269 : vector<128x128xf32>
      %c67_i32 = arith.constant 67 : i32
      %271 = arith.addi %165, %c67_i32 : i32
      %c0_223 = arith.constant 0 : index
      %272 = arith.index_cast %271 : i32 to index
      %c0_224 = arith.constant 0 : index
      %273 = vector.load %arg1[%c0_223, %272, %c0_224] : memref<1x1160x128xf32, #tpu.memory_space<vmem>>, vector<1x128x128xf32>
      %274 = vector.shape_cast %273 : vector<1x128x128xf32> to vector<128x128xf32>
      %c13_225 = arith.constant 13 : index
      %c0_226 = arith.constant 0 : index
      %c0_227 = arith.constant 0 : index
      %275 = vector.load %arg2[%c13_225, %c0_226, %c0_227] : memref<25x128x128xf32, #tpu.memory_space<vmem>>, vector<1x128x128xf32>
      %276 = vector.shape_cast %275 : vector<1x128x128xf32> to vector<128x128xf32>
      %cst_228 = arith.constant dense<0.000000e+00> : vector<128x128xf32>
      %277 = tpu.matmul %274, %276, %cst_228 {dimension_numbers = #tpu.dot_dimension_numbers<[1], [0], [0], [1], [0, 0, 1, 1], [], []>} : vector<128x128xf32>, vector<128x128xf32>, vector<128x128xf32> -> vector<128x128xf32>
      %278 = arith.addf %270, %277 : vector<128x128xf32>
      %c68_i32 = arith.constant 68 : i32
      %279 = arith.addi %165, %c68_i32 : i32
      %c0_229 = arith.constant 0 : index
      %280 = arith.index_cast %279 : i32 to index
      %c0_230 = arith.constant 0 : index
      %281 = vector.load %arg1[%c0_229, %280, %c0_230] : memref<1x1160x128xf32, #tpu.memory_space<vmem>>, vector<1x128x128xf32>
      %282 = vector.shape_cast %281 : vector<1x128x128xf32> to vector<128x128xf32>
      %c14_231 = arith.constant 14 : index
      %c0_232 = arith.constant 0 : index
      %c0_233 = arith.constant 0 : index
      %283 = vector.load %arg2[%c14_231, %c0_232, %c0_233] : memref<25x128x128xf32, #tpu.memory_space<vmem>>, vector<1x128x128xf32>
      %284 = vector.shape_cast %283 : vector<1x128x128xf32> to vector<128x128xf32>
      %cst_234 = arith.constant dense<0.000000e+00> : vector<128x128xf32>
      %285 = tpu.matmul %282, %284, %cst_234 {dimension_numbers = #tpu.dot_dimension_numbers<[1], [0], [0], [1], [0, 0, 1, 1], [], []>} : vector<128x128xf32>, vector<128x128xf32>, vector<128x128xf32> -> vector<128x128xf32>
      %286 = arith.addf %278, %285 : vector<128x128xf32>
      %c96_i32 = arith.constant 96 : i32
      %287 = arith.addi %165, %c96_i32 : i32
      %c0_235 = arith.constant 0 : index
      %288 = arith.index_cast %287 : i32 to index
      %c0_236 = arith.constant 0 : index
      %289 = vector.load %arg1[%c0_235, %288, %c0_236] : memref<1x1160x128xf32, #tpu.memory_space<vmem>>, vector<1x128x128xf32>
      %290 = vector.shape_cast %289 : vector<1x128x128xf32> to vector<128x128xf32>
      %c15_237 = arith.constant 15 : index
      %c0_238 = arith.constant 0 : index
      %c0_239 = arith.constant 0 : index
      %291 = vector.load %arg2[%c15_237, %c0_238, %c0_239] : memref<25x128x128xf32, #tpu.memory_space<vmem>>, vector<1x128x128xf32>
      %292 = vector.shape_cast %291 : vector<1x128x128xf32> to vector<128x128xf32>
      %cst_240 = arith.constant dense<0.000000e+00> : vector<128x128xf32>
      %293 = tpu.matmul %290, %292, %cst_240 {dimension_numbers = #tpu.dot_dimension_numbers<[1], [0], [0], [1], [0, 0, 1, 1], [], []>} : vector<128x128xf32>, vector<128x128xf32>, vector<128x128xf32> -> vector<128x128xf32>
      %294 = arith.addf %286, %293 : vector<128x128xf32>
      %c97_i32 = arith.constant 97 : i32
      %295 = arith.addi %165, %c97_i32 : i32
      %c0_241 = arith.constant 0 : index
      %296 = arith.index_cast %295 : i32 to index
      %c0_242 = arith.constant 0 : index
      %297 = vector.load %arg1[%c0_241, %296, %c0_242] : memref<1x1160x128xf32, #tpu.memory_space<vmem>>, vector<1x128x128xf32>
      %298 = vector.shape_cast %297 : vector<1x128x128xf32> to vector<128x128xf32>
      %c16_243 = arith.constant 16 : index
      %c0_244 = arith.constant 0 : index
      %c0_245 = arith.constant 0 : index
      %299 = vector.load %arg2[%c16_243, %c0_244, %c0_245] : memref<25x128x128xf32, #tpu.memory_space<vmem>>, vector<1x128x128xf32>
      %300 = vector.shape_cast %299 : vector<1x128x128xf32> to vector<128x128xf32>
      %cst_246 = arith.constant dense<0.000000e+00> : vector<128x128xf32>
      %301 = tpu.matmul %298, %300, %cst_246 {dimension_numbers = #tpu.dot_dimension_numbers<[1], [0], [0], [1], [0, 0, 1, 1], [], []>} : vector<128x128xf32>, vector<128x128xf32>, vector<128x128xf32> -> vector<128x128xf32>
      %302 = arith.addf %294, %301 : vector<128x128xf32>
      %c98_i32 = arith.constant 98 : i32
      %303 = arith.addi %165, %c98_i32 : i32
      %c0_247 = arith.constant 0 : index
      %304 = arith.index_cast %303 : i32 to index
      %c0_248 = arith.constant 0 : index
      %305 = vector.load %arg1[%c0_247, %304, %c0_248] : memref<1x1160x128xf32, #tpu.memory_space<vmem>>, vector<1x128x128xf32>
      %306 = vector.shape_cast %305 : vector<1x128x128xf32> to vector<128x128xf32>
      %c17_249 = arith.constant 17 : index
      %c0_250 = arith.constant 0 : index
      %c0_251 = arith.constant 0 : index
      %307 = vector.load %arg2[%c17_249, %c0_250, %c0_251] : memref<25x128x128xf32, #tpu.memory_space<vmem>>, vector<1x128x128xf32>
      %308 = vector.shape_cast %307 : vector<1x128x128xf32> to vector<128x128xf32>
      %cst_252 = arith.constant dense<0.000000e+00> : vector<128x128xf32>
      %309 = tpu.matmul %306, %308, %cst_252 {dimension_numbers = #tpu.dot_dimension_numbers<[1], [0], [0], [1], [0, 0, 1, 1], [], []>} : vector<128x128xf32>, vector<128x128xf32>, vector<128x128xf32> -> vector<128x128xf32>
      %310 = arith.addf %302, %309 : vector<128x128xf32>
      %c99_i32 = arith.constant 99 : i32
      %311 = arith.addi %165, %c99_i32 : i32
      %c0_253 = arith.constant 0 : index
      %312 = arith.index_cast %311 : i32 to index
      %c0_254 = arith.constant 0 : index
      %313 = vector.load %arg1[%c0_253, %312, %c0_254] : memref<1x1160x128xf32, #tpu.memory_space<vmem>>, vector<1x128x128xf32>
      %314 = vector.shape_cast %313 : vector<1x128x128xf32> to vector<128x128xf32>
      %c18_255 = arith.constant 18 : index
      %c0_256 = arith.constant 0 : index
      %c0_257 = arith.constant 0 : index
      %315 = vector.load %arg2[%c18_255, %c0_256, %c0_257] : memref<25x128x128xf32, #tpu.memory_space<vmem>>, vector<1x128x128xf32>
      %316 = vector.shape_cast %315 : vector<1x128x128xf32> to vector<128x128xf32>
      %cst_258 = arith.constant dense<0.000000e+00> : vector<128x128xf32>
      %317 = tpu.matmul %314, %316, %cst_258 {dimension_numbers = #tpu.dot_dimension_numbers<[1], [0], [0], [1], [0, 0, 1, 1], [], []>} : vector<128x128xf32>, vector<128x128xf32>, vector<128x128xf32> -> vector<128x128xf32>
      %318 = arith.addf %310, %317 : vector<128x128xf32>
      %c100_i32 = arith.constant 100 : i32
      %319 = arith.addi %165, %c100_i32 : i32
      %c0_259 = arith.constant 0 : index
      %320 = arith.index_cast %319 : i32 to index
      %c0_260 = arith.constant 0 : index
      %321 = vector.load %arg1[%c0_259, %320, %c0_260] : memref<1x1160x128xf32, #tpu.memory_space<vmem>>, vector<1x128x128xf32>
      %322 = vector.shape_cast %321 : vector<1x128x128xf32> to vector<128x128xf32>
      %c19_261 = arith.constant 19 : index
      %c0_262 = arith.constant 0 : index
      %c0_263 = arith.constant 0 : index
      %323 = vector.load %arg2[%c19_261, %c0_262, %c0_263] : memref<25x128x128xf32, #tpu.memory_space<vmem>>, vector<1x128x128xf32>
      %324 = vector.shape_cast %323 : vector<1x128x128xf32> to vector<128x128xf32>
      %cst_264 = arith.constant dense<0.000000e+00> : vector<128x128xf32>
      %325 = tpu.matmul %322, %324, %cst_264 {dimension_numbers = #tpu.dot_dimension_numbers<[1], [0], [0], [1], [0, 0, 1, 1], [], []>} : vector<128x128xf32>, vector<128x128xf32>, vector<128x128xf32> -> vector<128x128xf32>
      %326 = arith.addf %318, %325 : vector<128x128xf32>
      %c128_i32_265 = arith.constant 128 : i32
      %327 = arith.addi %165, %c128_i32_265 : i32
      %c0_266 = arith.constant 0 : index
      %328 = arith.index_cast %327 : i32 to index
      %c0_267 = arith.constant 0 : index
      %329 = vector.load %arg1[%c0_266, %328, %c0_267] : memref<1x1160x128xf32, #tpu.memory_space<vmem>>, vector<1x128x128xf32>
      %330 = vector.shape_cast %329 : vector<1x128x128xf32> to vector<128x128xf32>
      %c20_268 = arith.constant 20 : index
      %c0_269 = arith.constant 0 : index
      %c0_270 = arith.constant 0 : index
      %331 = vector.load %arg2[%c20_268, %c0_269, %c0_270] : memref<25x128x128xf32, #tpu.memory_space<vmem>>, vector<1x128x128xf32>
      %332 = vector.shape_cast %331 : vector<1x128x128xf32> to vector<128x128xf32>
      %cst_271 = arith.constant dense<0.000000e+00> : vector<128x128xf32>
      %333 = tpu.matmul %330, %332, %cst_271 {dimension_numbers = #tpu.dot_dimension_numbers<[1], [0], [0], [1], [0, 0, 1, 1], [], []>} : vector<128x128xf32>, vector<128x128xf32>, vector<128x128xf32> -> vector<128x128xf32>
      %334 = arith.addf %326, %333 : vector<128x128xf32>
      %c129_i32 = arith.constant 129 : i32
      %335 = arith.addi %165, %c129_i32 : i32
      %c0_272 = arith.constant 0 : index
      %336 = arith.index_cast %335 : i32 to index
      %c0_273 = arith.constant 0 : index
      %337 = vector.load %arg1[%c0_272, %336, %c0_273] : memref<1x1160x128xf32, #tpu.memory_space<vmem>>, vector<1x128x128xf32>
      %338 = vector.shape_cast %337 : vector<1x128x128xf32> to vector<128x128xf32>
      %c21_274 = arith.constant 21 : index
      %c0_275 = arith.constant 0 : index
      %c0_276 = arith.constant 0 : index
      %339 = vector.load %arg2[%c21_274, %c0_275, %c0_276] : memref<25x128x128xf32, #tpu.memory_space<vmem>>, vector<1x128x128xf32>
      %340 = vector.shape_cast %339 : vector<1x128x128xf32> to vector<128x128xf32>
      %cst_277 = arith.constant dense<0.000000e+00> : vector<128x128xf32>
      %341 = tpu.matmul %338, %340, %cst_277 {dimension_numbers = #tpu.dot_dimension_numbers<[1], [0], [0], [1], [0, 0, 1, 1], [], []>} : vector<128x128xf32>, vector<128x128xf32>, vector<128x128xf32> -> vector<128x128xf32>
      %342 = arith.addf %334, %341 : vector<128x128xf32>
      %c130_i32 = arith.constant 130 : i32
      %343 = arith.addi %165, %c130_i32 : i32
      %c0_278 = arith.constant 0 : index
      %344 = arith.index_cast %343 : i32 to index
      %c0_279 = arith.constant 0 : index
      %345 = vector.load %arg1[%c0_278, %344, %c0_279] : memref<1x1160x128xf32, #tpu.memory_space<vmem>>, vector<1x128x128xf32>
      %346 = vector.shape_cast %345 : vector<1x128x128xf32> to vector<128x128xf32>
      %c22_280 = arith.constant 22 : index
      %c0_281 = arith.constant 0 : index
      %c0_282 = arith.constant 0 : index
      %347 = vector.load %arg2[%c22_280, %c0_281, %c0_282] : memref<25x128x128xf32, #tpu.memory_space<vmem>>, vector<1x128x128xf32>
      %348 = vector.shape_cast %347 : vector<1x128x128xf32> to vector<128x128xf32>
      %cst_283 = arith.constant dense<0.000000e+00> : vector<128x128xf32>
      %349 = tpu.matmul %346, %348, %cst_283 {dimension_numbers = #tpu.dot_dimension_numbers<[1], [0], [0], [1], [0, 0, 1, 1], [], []>} : vector<128x128xf32>, vector<128x128xf32>, vector<128x128xf32> -> vector<128x128xf32>
      %350 = arith.addf %342, %349 : vector<128x128xf32>
      %c131_i32 = arith.constant 131 : i32
      %351 = arith.addi %165, %c131_i32 : i32
      %c0_284 = arith.constant 0 : index
      %352 = arith.index_cast %351 : i32 to index
      %c0_285 = arith.constant 0 : index
      %353 = vector.load %arg1[%c0_284, %352, %c0_285] : memref<1x1160x128xf32, #tpu.memory_space<vmem>>, vector<1x128x128xf32>
      %354 = vector.shape_cast %353 : vector<1x128x128xf32> to vector<128x128xf32>
      %c23_286 = arith.constant 23 : index
      %c0_287 = arith.constant 0 : index
      %c0_288 = arith.constant 0 : index
      %355 = vector.load %arg2[%c23_286, %c0_287, %c0_288] : memref<25x128x128xf32, #tpu.memory_space<vmem>>, vector<1x128x128xf32>
      %356 = vector.shape_cast %355 : vector<1x128x128xf32> to vector<128x128xf32>
      %cst_289 = arith.constant dense<0.000000e+00> : vector<128x128xf32>
      %357 = tpu.matmul %354, %356, %cst_289 {dimension_numbers = #tpu.dot_dimension_numbers<[1], [0], [0], [1], [0, 0, 1, 1], [], []>} : vector<128x128xf32>, vector<128x128xf32>, vector<128x128xf32> -> vector<128x128xf32>
      %358 = arith.addf %350, %357 : vector<128x128xf32>
      %c132_i32 = arith.constant 132 : i32
      %359 = arith.addi %165, %c132_i32 : i32
      %c0_290 = arith.constant 0 : index
      %360 = arith.index_cast %359 : i32 to index
      %c0_291 = arith.constant 0 : index
      %361 = vector.load %arg1[%c0_290, %360, %c0_291] : memref<1x1160x128xf32, #tpu.memory_space<vmem>>, vector<1x128x128xf32>
      %362 = vector.shape_cast %361 : vector<1x128x128xf32> to vector<128x128xf32>
      %c24_292 = arith.constant 24 : index
      %c0_293 = arith.constant 0 : index
      %c0_294 = arith.constant 0 : index
      %363 = vector.load %arg2[%c24_292, %c0_293, %c0_294] : memref<25x128x128xf32, #tpu.memory_space<vmem>>, vector<1x128x128xf32>
      %364 = vector.shape_cast %363 : vector<1x128x128xf32> to vector<128x128xf32>
      %cst_295 = arith.constant dense<0.000000e+00> : vector<128x128xf32>
      %365 = tpu.matmul %362, %364, %cst_295 {dimension_numbers = #tpu.dot_dimension_numbers<[1], [0], [0], [1], [0, 0, 1, 1], [], []>} : vector<128x128xf32>, vector<128x128xf32>, vector<128x128xf32> -> vector<128x128xf32>
      %366 = arith.addf %358, %365 : vector<128x128xf32>
      %c0_296 = arith.constant 0 : index
      %c0_297 = arith.constant 0 : index
      %367 = vector.load %arg3[%c0_296, %c0_297] : memref<1x128xf32, #tpu.memory_space<vmem>>, vector<1x128xf32>
      %368 = vector.broadcast %367 : vector<1x128xf32> to vector<128x128xf32>
      %369 = arith.addf %366, %368 : vector<128x128xf32>
      %cst_298 = arith.constant 0.000000e+00 : f32
      %370 = vector.broadcast %cst_298 : f32 to vector<128x128xf32>
      %371 = arith.maximumf %369, %370 : vector<128x128xf32>
      %372 = arith.index_cast %165 : i32 to index
      %c0_299 = arith.constant 0 : index
      %373 = vector.load %arg13[%372, %c0_299] : memref<1024x128xf32, #tpu.memory_space<vmem>>, vector<128x128xf32>
      tpu.vector_store %arg13[%372, %c0_299], %371 {strides = array<i32>} : memref<1024x128xf32, #tpu.memory_space<vmem>>, vector<128x128xf32>,
    }
    %c8_i32_0 = arith.constant 8 : i32
    %c0 = arith.constant 0 : index
    %c0_1 = arith.constant 0 : index
    %1 = vector.load %arg13[%c0, %c0_1] : memref<1024x128xf32, #tpu.memory_space<vmem>>, vector<912x128xf32>
    %c1 = arith.constant 1 : index
    %c0_2 = arith.constant 0 : index
    %2 = vector.load %arg13[%c1, %c0_2] : memref<1024x128xf32, #tpu.memory_space<vmem>>, vector<912x128xf32>
    %3 = arith.maximumf %1, %2 : vector<912x128xf32>
    %c32 = arith.constant 32 : index
    %c0_3 = arith.constant 0 : index
    %4 = vector.load %arg13[%c32, %c0_3] : memref<1024x128xf32, #tpu.memory_space<vmem>>, vector<912x128xf32>
    %c33 = arith.constant 33 : index
    %c0_4 = arith.constant 0 : index
    %5 = vector.load %arg13[%c33, %c0_4] : memref<1024x128xf32, #tpu.memory_space<vmem>>, vector<912x128xf32>
    %6 = arith.maximumf %4, %5 : vector<912x128xf32>
    %7 = arith.maximumf %3, %6 : vector<912x128xf32>
    %c0_5 = arith.constant 0 : index
    %c0_6 = arith.constant 0 : index
    %8 = vector.load %arg14[%c0_5, %c0_6] : memref<912x128xf32, #tpu.memory_space<vmem>>, vector<912x128xf32>
    tpu.vector_store %arg14[%c0_5, %c0_6], %7 {strides = array<i32>} : memref<912x128xf32, #tpu.memory_space<vmem>>, vector<912x128xf32>,
    %c0_i32_7 = arith.constant 0 : i32
    %c5_i32 = arith.constant 5 : i32
    %9 = arith.addi %c0_i32_7, %c5_i32 : i32
    %c1_i32_8 = arith.constant 1 : i32
    scf.for %arg17 = %c0_i32_7 to %9 step %c1_i32_8  : i32 {
      %c128_i32 = arith.constant 128 : i32
      %164 = arith.muli %arg17, %c128_i32 : i32
      %165 = tpu.assume_multiple %164, 128 : i32
      %cst_142 = arith.constant 0.000000e+00 : f32
      %166 = vector.broadcast %cst_142 : f32 to vector<128x128xf32>
      %c0_i32_143 = arith.constant 0 : i32
      %167 = arith.addi %165, %c0_i32_143 : i32
      %168 = arith.index_cast %167 : i32 to index
      %c0_144 = arith.constant 0 : index
      %169 = vector.load %arg14[%168, %c0_144] : memref<912x128xf32, #tpu.memory_space<vmem>>, vector<128x128xf32>
      %c0_145 = arith.constant 0 : index
      %c0_146 = arith.constant 0 : index
      %c0_147 = arith.constant 0 : index
      %170 = vector.load %arg4[%c0_145, %c0_146, %c0_147] : memref<25x128x128xf32, #tpu.memory_space<vmem>>, vector<1x128x128xf32>
      %171 = vector.shape_cast %170 : vector<1x128x128xf32> to vector<128x128xf32>
      %cst_148 = arith.constant dense<0.000000e+00> : vector<128x128xf32>
      %172 = tpu.matmul %169, %171, %cst_148 {dimension_numbers = #tpu.dot_dimension_numbers<[1], [0], [0], [1], [0, 0, 1, 1], [], []>} : vector<128x128xf32>, vector<128x128xf32>, vector<128x128xf32> -> vector<128x128xf32>
      %173 = arith.addf %166, %172 : vector<128x128xf32>
      %c2_i32 = arith.constant 2 : i32
      %174 = arith.addi %165, %c2_i32 : i32
      %175 = arith.index_cast %174 : i32 to index
      %c0_149 = arith.constant 0 : index
      %176 = vector.load %arg14[%175, %c0_149] : memref<912x128xf32, #tpu.memory_space<vmem>>, vector<128x128xf32>
      %c1_150 = arith.constant 1 : index
      %c0_151 = arith.constant 0 : index
      %c0_152 = arith.constant 0 : index
      %177 = vector.load %arg4[%c1_150, %c0_151, %c0_152] : memref<25x128x128xf32, #tpu.memory_space<vmem>>, vector<1x128x128xf32>
      %178 = vector.shape_cast %177 : vector<1x128x128xf32> to vector<128x128xf32>
      %cst_153 = arith.constant dense<0.000000e+00> : vector<128x128xf32>
      %179 = tpu.matmul %176, %178, %cst_153 {dimension_numbers = #tpu.dot_dimension_numbers<[1], [0], [0], [1], [0, 0, 1, 1], [], []>} : vector<128x128xf32>, vector<128x128xf32>, vector<128x128xf32> -> vector<128x128xf32>
      %180 = arith.addf %173, %179 : vector<128x128xf32>
      %c4_i32 = arith.constant 4 : i32
      %181 = arith.addi %165, %c4_i32 : i32
      %182 = arith.index_cast %181 : i32 to index
      %c0_154 = arith.constant 0 : index
      %183 = vector.load %arg14[%182, %c0_154] : memref<912x128xf32, #tpu.memory_space<vmem>>, vector<128x128xf32>
      %c2_155 = arith.constant 2 : index
      %c0_156 = arith.constant 0 : index
      %c0_157 = arith.constant 0 : index
      %184 = vector.load %arg4[%c2_155, %c0_156, %c0_157] : memref<25x128x128xf32, #tpu.memory_space<vmem>>, vector<1x128x128xf32>
      %185 = vector.shape_cast %184 : vector<1x128x128xf32> to vector<128x128xf32>
      %cst_158 = arith.constant dense<0.000000e+00> : vector<128x128xf32>
      %186 = tpu.matmul %183, %185, %cst_158 {dimension_numbers = #tpu.dot_dimension_numbers<[1], [0], [0], [1], [0, 0, 1, 1], [], []>} : vector<128x128xf32>, vector<128x128xf32>, vector<128x128xf32> -> vector<128x128xf32>
      %187 = arith.addf %180, %186 : vector<128x128xf32>
      %c6_i32 = arith.constant 6 : i32
      %188 = arith.addi %165, %c6_i32 : i32
      %189 = arith.index_cast %188 : i32 to index
      %c0_159 = arith.constant 0 : index
      %190 = vector.load %arg14[%189, %c0_159] : memref<912x128xf32, #tpu.memory_space<vmem>>, vector<128x128xf32>
      %c3_160 = arith.constant 3 : index
      %c0_161 = arith.constant 0 : index
      %c0_162 = arith.constant 0 : index
      %191 = vector.load %arg4[%c3_160, %c0_161, %c0_162] : memref<25x128x128xf32, #tpu.memory_space<vmem>>, vector<1x128x128xf32>
      %192 = vector.shape_cast %191 : vector<1x128x128xf32> to vector<128x128xf32>
      %cst_163 = arith.constant dense<0.000000e+00> : vector<128x128xf32>
      %193 = tpu.matmul %190, %192, %cst_163 {dimension_numbers = #tpu.dot_dimension_numbers<[1], [0], [0], [1], [0, 0, 1, 1], [], []>} : vector<128x128xf32>, vector<128x128xf32>, vector<128x128xf32> -> vector<128x128xf32>
      %194 = arith.addf %187, %193 : vector<128x128xf32>
      %c8_i32_164 = arith.constant 8 : i32
      %195 = arith.addi %165, %c8_i32_164 : i32
      %196 = arith.index_cast %195 : i32 to index
      %c0_165 = arith.constant 0 : index
      %197 = vector.load %arg14[%196, %c0_165] : memref<912x128xf32, #tpu.memory_space<vmem>>, vector<128x128xf32>
      %c4_166 = arith.constant 4 : index
      %c0_167 = arith.constant 0 : index
      %c0_168 = arith.constant 0 : index
      %198 = vector.load %arg4[%c4_166, %c0_167, %c0_168] : memref<25x128x128xf32, #tpu.memory_space<vmem>>, vector<1x128x128xf32>
      %199 = vector.shape_cast %198 : vector<1x128x128xf32> to vector<128x128xf32>
      %cst_169 = arith.constant dense<0.000000e+00> : vector<128x128xf32>
      %200 = tpu.matmul %197, %199, %cst_169 {dimension_numbers = #tpu.dot_dimension_numbers<[1], [0], [0], [1], [0, 0, 1, 1], [], []>} : vector<128x128xf32>, vector<128x128xf32>, vector<128x128xf32> -> vector<128x128xf32>
      %201 = arith.addf %194, %200 : vector<128x128xf32>
      %c64_i32 = arith.constant 64 : i32
      %202 = arith.addi %165, %c64_i32 : i32
      %203 = arith.index_cast %202 : i32 to index
      %c0_170 = arith.constant 0 : index
      %204 = vector.load %arg14[%203, %c0_170] : memref<912x128xf32, #tpu.memory_space<vmem>>, vector<128x128xf32>
      %c5_171 = arith.constant 5 : index
      %c0_172 = arith.constant 0 : index
      %c0_173 = arith.constant 0 : index
      %205 = vector.load %arg4[%c5_171, %c0_172, %c0_173] : memref<25x128x128xf32, #tpu.memory_space<vmem>>, vector<1x128x128xf32>
      %206 = vector.shape_cast %205 : vector<1x128x128xf32> to vector<128x128xf32>
      %cst_174 = arith.constant dense<0.000000e+00> : vector<128x128xf32>
      %207 = tpu.matmul %204, %206, %cst_174 {dimension_numbers = #tpu.dot_dimension_numbers<[1], [0], [0], [1], [0, 0, 1, 1], [], []>} : vector<128x128xf32>, vector<128x128xf32>, vector<128x128xf32> -> vector<128x128xf32>
      %208 = arith.addf %201, %207 : vector<128x128xf32>
      %c66_i32 = arith.constant 66 : i32
      %209 = arith.addi %165, %c66_i32 : i32
      %210 = arith.index_cast %209 : i32 to index
      %c0_175 = arith.constant 0 : index
      %211 = vector.load %arg14[%210, %c0_175] : memref<912x128xf32, #tpu.memory_space<vmem>>, vector<128x128xf32>
      %c6_176 = arith.constant 6 : index
      %c0_177 = arith.constant 0 : index
      %c0_178 = arith.constant 0 : index
      %212 = vector.load %arg4[%c6_176, %c0_177, %c0_178] : memref<25x128x128xf32, #tpu.memory_space<vmem>>, vector<1x128x128xf32>
      %213 = vector.shape_cast %212 : vector<1x128x128xf32> to vector<128x128xf32>
      %cst_179 = arith.constant dense<0.000000e+00> : vector<128x128xf32>
      %214 = tpu.matmul %211, %213, %cst_179 {dimension_numbers = #tpu.dot_dimension_numbers<[1], [0], [0], [1], [0, 0, 1, 1], [], []>} : vector<128x128xf32>, vector<128x128xf32>, vector<128x128xf32> -> vector<128x128xf32>
      %215 = arith.addf %208, %214 : vector<128x128xf32>
      %c68_i32 = arith.constant 68 : i32
      %216 = arith.addi %165, %c68_i32 : i32
      %217 = arith.index_cast %216 : i32 to index
      %c0_180 = arith.constant 0 : index
      %218 = vector.load %arg14[%217, %c0_180] : memref<912x128xf32, #tpu.memory_space<vmem>>, vector<128x128xf32>
      %c7_181 = arith.constant 7 : index
      %c0_182 = arith.constant 0 : index
      %c0_183 = arith.constant 0 : index
      %219 = vector.load %arg4[%c7_181, %c0_182, %c0_183] : memref<25x128x128xf32, #tpu.memory_space<vmem>>, vector<1x128x128xf32>
      %220 = vector.shape_cast %219 : vector<1x128x128xf32> to vector<128x128xf32>
      %cst_184 = arith.constant dense<0.000000e+00> : vector<128x128xf32>
      %221 = tpu.matmul %218, %220, %cst_184 {dimension_numbers = #tpu.dot_dimension_numbers<[1], [0], [0], [1], [0, 0, 1, 1], [], []>} : vector<128x128xf32>, vector<128x128xf32>, vector<128x128xf32> -> vector<128x128xf32>
      %222 = arith.addf %215, %221 : vector<128x128xf32>
      %c70_i32 = arith.constant 70 : i32
      %223 = arith.addi %165, %c70_i32 : i32
      %224 = arith.index_cast %223 : i32 to index
      %c0_185 = arith.constant 0 : index
      %225 = vector.load %arg14[%224, %c0_185] : memref<912x128xf32, #tpu.memory_space<vmem>>, vector<128x128xf32>
      %c8_186 = arith.constant 8 : index
      %c0_187 = arith.constant 0 : index
      %c0_188 = arith.constant 0 : index
      %226 = vector.load %arg4[%c8_186, %c0_187, %c0_188] : memref<25x128x128xf32, #tpu.memory_space<vmem>>, vector<1x128x128xf32>
      %227 = vector.shape_cast %226 : vector<1x128x128xf32> to vector<128x128xf32>
      %cst_189 = arith.constant dense<0.000000e+00> : vector<128x128xf32>
      %228 = tpu.matmul %225, %227, %cst_189 {dimension_numbers = #tpu.dot_dimension_numbers<[1], [0], [0], [1], [0, 0, 1, 1], [], []>} : vector<128x128xf32>, vector<128x128xf32>, vector<128x128xf32> -> vector<128x128xf32>
      %229 = arith.addf %222, %228 : vector<128x128xf32>
      %c72_i32 = arith.constant 72 : i32
      %230 = arith.addi %165, %c72_i32 : i32
      %231 = arith.index_cast %230 : i32 to index
      %c0_190 = arith.constant 0 : index
      %232 = vector.load %arg14[%231, %c0_190] : memref<912x128xf32, #tpu.memory_space<vmem>>, vector<128x128xf32>
      %c9_191 = arith.constant 9 : index
      %c0_192 = arith.constant 0 : index
      %c0_193 = arith.constant 0 : index
      %233 = vector.load %arg4[%c9_191, %c0_192, %c0_193] : memref<25x128x128xf32, #tpu.memory_space<vmem>>, vector<1x128x128xf32>
      %234 = vector.shape_cast %233 : vector<1x128x128xf32> to vector<128x128xf32>
      %cst_194 = arith.constant dense<0.000000e+00> : vector<128x128xf32>
      %235 = tpu.matmul %232, %234, %cst_194 {dimension_numbers = #tpu.dot_dimension_numbers<[1], [0], [0], [1], [0, 0, 1, 1], [], []>} : vector<128x128xf32>, vector<128x128xf32>, vector<128x128xf32> -> vector<128x128xf32>
      %236 = arith.addf %229, %235 : vector<128x128xf32>
      %c128_i32_195 = arith.constant 128 : i32
      %237 = arith.addi %165, %c128_i32_195 : i32
      %238 = arith.index_cast %237 : i32 to index
      %c0_196 = arith.constant 0 : index
      %239 = vector.load %arg14[%238, %c0_196] : memref<912x128xf32, #tpu.memory_space<vmem>>, vector<128x128xf32>
      %c10_197 = arith.constant 10 : index
      %c0_198 = arith.constant 0 : index
      %c0_199 = arith.constant 0 : index
      %240 = vector.load %arg4[%c10_197, %c0_198, %c0_199] : memref<25x128x128xf32, #tpu.memory_space<vmem>>, vector<1x128x128xf32>
      %241 = vector.shape_cast %240 : vector<1x128x128xf32> to vector<128x128xf32>
      %cst_200 = arith.constant dense<0.000000e+00> : vector<128x128xf32>
      %242 = tpu.matmul %239, %241, %cst_200 {dimension_numbers = #tpu.dot_dimension_numbers<[1], [0], [0], [1], [0, 0, 1, 1], [], []>} : vector<128x128xf32>, vector<128x128xf32>, vector<128x128xf32> -> vector<128x128xf32>
      %243 = arith.addf %236, %242 : vector<128x128xf32>
      %c130_i32 = arith.constant 130 : i32
      %244 = arith.addi %165, %c130_i32 : i32
      %245 = arith.index_cast %244 : i32 to index
      %c0_201 = arith.constant 0 : index
      %246 = vector.load %arg14[%245, %c0_201] : memref<912x128xf32, #tpu.memory_space<vmem>>, vector<128x128xf32>
      %c11_202 = arith.constant 11 : index
      %c0_203 = arith.constant 0 : index
      %c0_204 = arith.constant 0 : index
      %247 = vector.load %arg4[%c11_202, %c0_203, %c0_204] : memref<25x128x128xf32, #tpu.memory_space<vmem>>, vector<1x128x128xf32>
      %248 = vector.shape_cast %247 : vector<1x128x128xf32> to vector<128x128xf32>
      %cst_205 = arith.constant dense<0.000000e+00> : vector<128x128xf32>
      %249 = tpu.matmul %246, %248, %cst_205 {dimension_numbers = #tpu.dot_dimension_numbers<[1], [0], [0], [1], [0, 0, 1, 1], [], []>} : vector<128x128xf32>, vector<128x128xf32>, vector<128x128xf32> -> vector<128x128xf32>
      %250 = arith.addf %243, %249 : vector<128x128xf32>
      %c132_i32 = arith.constant 132 : i32
      %251 = arith.addi %165, %c132_i32 : i32
      %252 = arith.index_cast %251 : i32 to index
      %c0_206 = arith.constant 0 : index
      %253 = vector.load %arg14[%252, %c0_206] : memref<912x128xf32, #tpu.memory_space<vmem>>, vector<128x128xf32>
      %c12_207 = arith.constant 12 : index
      %c0_208 = arith.constant 0 : index
      %c0_209 = arith.constant 0 : index
      %254 = vector.load %arg4[%c12_207, %c0_208, %c0_209] : memref<25x128x128xf32, #tpu.memory_space<vmem>>, vector<1x128x128xf32>
      %255 = vector.shape_cast %254 : vector<1x128x128xf32> to vector<128x128xf32>
      %cst_210 = arith.constant dense<0.000000e+00> : vector<128x128xf32>
      %256 = tpu.matmul %253, %255, %cst_210 {dimension_numbers = #tpu.dot_dimension_numbers<[1], [0], [0], [1], [0, 0, 1, 1], [], []>} : vector<128x128xf32>, vector<128x128xf32>, vector<128x128xf32> -> vector<128x128xf32>
      %257 = arith.addf %250, %256 : vector<128x128xf32>
      %c134_i32 = arith.constant 134 : i32
      %258 = arith.addi %165, %c134_i32 : i32
      %259 = arith.index_cast %258 : i32 to index
      %c0_211 = arith.constant 0 : index
      %260 = vector.load %arg14[%259, %c0_211] : memref<912x128xf32, #tpu.memory_space<vmem>>, vector<128x128xf32>
      %c13_212 = arith.constant 13 : index
      %c0_213 = arith.constant 0 : index
      %c0_214 = arith.constant 0 : index
      %261 = vector.load %arg4[%c13_212, %c0_213, %c0_214] : memref<25x128x128xf32, #tpu.memory_space<vmem>>, vector<1x128x128xf32>
      %262 = vector.shape_cast %261 : vector<1x128x128xf32> to vector<128x128xf32>
      %cst_215 = arith.constant dense<0.000000e+00> : vector<128x128xf32>
      %263 = tpu.matmul %260, %262, %cst_215 {dimension_numbers = #tpu.dot_dimension_numbers<[1], [0], [0], [1], [0, 0, 1, 1], [], []>} : vector<128x128xf32>, vector<128x128xf32>, vector<128x128xf32> -> vector<128x128xf32>
      %264 = arith.addf %257, %263 : vector<128x128xf32>
      %c136_i32 = arith.constant 136 : i32
      %265 = arith.addi %165, %c136_i32 : i32
      %266 = arith.index_cast %265 : i32 to index
      %c0_216 = arith.constant 0 : index
      %267 = vector.load %arg14[%266, %c0_216] : memref<912x128xf32, #tpu.memory_space<vmem>>, vector<128x128xf32>
      %c14_217 = arith.constant 14 : index
      %c0_218 = arith.constant 0 : index
      %c0_219 = arith.constant 0 : index
      %268 = vector.load %arg4[%c14_217, %c0_218, %c0_219] : memref<25x128x128xf32, #tpu.memory_space<vmem>>, vector<1x128x128xf32>
      %269 = vector.shape_cast %268 : vector<1x128x128xf32> to vector<128x128xf32>
      %cst_220 = arith.constant dense<0.000000e+00> : vector<128x128xf32>
      %270 = tpu.matmul %267, %269, %cst_220 {dimension_numbers = #tpu.dot_dimension_numbers<[1], [0], [0], [1], [0, 0, 1, 1], [], []>} : vector<128x128xf32>, vector<128x128xf32>, vector<128x128xf32> -> vector<128x128xf32>
      %271 = arith.addf %264, %270 : vector<128x128xf32>
      %c192_i32 = arith.constant 192 : i32
      %272 = arith.addi %165, %c192_i32 : i32
      %273 = arith.index_cast %272 : i32 to index
      %c0_221 = arith.constant 0 : index
      %274 = vector.load %arg14[%273, %c0_221] : memref<912x128xf32, #tpu.memory_space<vmem>>, vector<128x128xf32>
      %c15_222 = arith.constant 15 : index
      %c0_223 = arith.constant 0 : index
      %c0_224 = arith.constant 0 : index
      %275 = vector.load %arg4[%c15_222, %c0_223, %c0_224] : memref<25x128x128xf32, #tpu.memory_space<vmem>>, vector<1x128x128xf32>
      %276 = vector.shape_cast %275 : vector<1x128x128xf32> to vector<128x128xf32>
      %cst_225 = arith.constant dense<0.000000e+00> : vector<128x128xf32>
      %277 = tpu.matmul %274, %276, %cst_225 {dimension_numbers = #tpu.dot_dimension_numbers<[1], [0], [0], [1], [0, 0, 1, 1], [], []>} : vector<128x128xf32>, vector<128x128xf32>, vector<128x128xf32> -> vector<128x128xf32>
      %278 = arith.addf %271, %277 : vector<128x128xf32>
      %c194_i32 = arith.constant 194 : i32
      %279 = arith.addi %165, %c194_i32 : i32
      %280 = arith.index_cast %279 : i32 to index
      %c0_226 = arith.constant 0 : index
      %281 = vector.load %arg14[%280, %c0_226] : memref<912x128xf32, #tpu.memory_space<vmem>>, vector<128x128xf32>
      %c16_227 = arith.constant 16 : index
      %c0_228 = arith.constant 0 : index
      %c0_229 = arith.constant 0 : index
      %282 = vector.load %arg4[%c16_227, %c0_228, %c0_229] : memref<25x128x128xf32, #tpu.memory_space<vmem>>, vector<1x128x128xf32>
      %283 = vector.shape_cast %282 : vector<1x128x128xf32> to vector<128x128xf32>
      %cst_230 = arith.constant dense<0.000000e+00> : vector<128x128xf32>
      %284 = tpu.matmul %281, %283, %cst_230 {dimension_numbers = #tpu.dot_dimension_numbers<[1], [0], [0], [1], [0, 0, 1, 1], [], []>} : vector<128x128xf32>, vector<128x128xf32>, vector<128x128xf32> -> vector<128x128xf32>
      %285 = arith.addf %278, %284 : vector<128x128xf32>
      %c196_i32 = arith.constant 196 : i32
      %286 = arith.addi %165, %c196_i32 : i32
      %287 = arith.index_cast %286 : i32 to index
      %c0_231 = arith.constant 0 : index
      %288 = vector.load %arg14[%287, %c0_231] : memref<912x128xf32, #tpu.memory_space<vmem>>, vector<128x128xf32>
      %c17_232 = arith.constant 17 : index
      %c0_233 = arith.constant 0 : index
      %c0_234 = arith.constant 0 : index
      %289 = vector.load %arg4[%c17_232, %c0_233, %c0_234] : memref<25x128x128xf32, #tpu.memory_space<vmem>>, vector<1x128x128xf32>
      %290 = vector.shape_cast %289 : vector<1x128x128xf32> to vector<128x128xf32>
      %cst_235 = arith.constant dense<0.000000e+00> : vector<128x128xf32>
      %291 = tpu.matmul %288, %290, %cst_235 {dimension_numbers = #tpu.dot_dimension_numbers<[1], [0], [0], [1], [0, 0, 1, 1], [], []>} : vector<128x128xf32>, vector<128x128xf32>, vector<128x128xf32> -> vector<128x128xf32>
      %292 = arith.addf %285, %291 : vector<128x128xf32>
      %c198_i32 = arith.constant 198 : i32
      %293 = arith.addi %165, %c198_i32 : i32
      %294 = arith.index_cast %293 : i32 to index
      %c0_236 = arith.constant 0 : index
      %295 = vector.load %arg14[%294, %c0_236] : memref<912x128xf32, #tpu.memory_space<vmem>>, vector<128x128xf32>
      %c18_237 = arith.constant 18 : index
      %c0_238 = arith.constant 0 : index
      %c0_239 = arith.constant 0 : index
      %296 = vector.load %arg4[%c18_237, %c0_238, %c0_239] : memref<25x128x128xf32, #tpu.memory_space<vmem>>, vector<1x128x128xf32>
      %297 = vector.shape_cast %296 : vector<1x128x128xf32> to vector<128x128xf32>
      %cst_240 = arith.constant dense<0.000000e+00> : vector<128x128xf32>
      %298 = tpu.matmul %295, %297, %cst_240 {dimension_numbers = #tpu.dot_dimension_numbers<[1], [0], [0], [1], [0, 0, 1, 1], [], []>} : vector<128x128xf32>, vector<128x128xf32>, vector<128x128xf32> -> vector<128x128xf32>
      %299 = arith.addf %292, %298 : vector<128x128xf32>
      %c200_i32 = arith.constant 200 : i32
      %300 = arith.addi %165, %c200_i32 : i32
      %301 = arith.index_cast %300 : i32 to index
      %c0_241 = arith.constant 0 : index
      %302 = vector.load %arg14[%301, %c0_241] : memref<912x128xf32, #tpu.memory_space<vmem>>, vector<128x128xf32>
      %c19_242 = arith.constant 19 : index
      %c0_243 = arith.constant 0 : index
      %c0_244 = arith.constant 0 : index
      %303 = vector.load %arg4[%c19_242, %c0_243, %c0_244] : memref<25x128x128xf32, #tpu.memory_space<vmem>>, vector<1x128x128xf32>
      %304 = vector.shape_cast %303 : vector<1x128x128xf32> to vector<128x128xf32>
      %cst_245 = arith.constant dense<0.000000e+00> : vector<128x128xf32>
      %305 = tpu.matmul %302, %304, %cst_245 {dimension_numbers = #tpu.dot_dimension_numbers<[1], [0], [0], [1], [0, 0, 1, 1], [], []>} : vector<128x128xf32>, vector<128x128xf32>, vector<128x128xf32> -> vector<128x128xf32>
      %306 = arith.addf %299, %305 : vector<128x128xf32>
      %c256_i32 = arith.constant 256 : i32
      %307 = arith.addi %165, %c256_i32 : i32
      %308 = arith.index_cast %307 : i32 to index
      %c0_246 = arith.constant 0 : index
      %309 = vector.load %arg14[%308, %c0_246] : memref<912x128xf32, #tpu.memory_space<vmem>>, vector<128x128xf32>
      %c20_247 = arith.constant 20 : index
      %c0_248 = arith.constant 0 : index
      %c0_249 = arith.constant 0 : index
      %310 = vector.load %arg4[%c20_247, %c0_248, %c0_249] : memref<25x128x128xf32, #tpu.memory_space<vmem>>, vector<1x128x128xf32>
      %311 = vector.shape_cast %310 : vector<1x128x128xf32> to vector<128x128xf32>
      %cst_250 = arith.constant dense<0.000000e+00> : vector<128x128xf32>
      %312 = tpu.matmul %309, %311, %cst_250 {dimension_numbers = #tpu.dot_dimension_numbers<[1], [0], [0], [1], [0, 0, 1, 1], [], []>} : vector<128x128xf32>, vector<128x128xf32>, vector<128x128xf32> -> vector<128x128xf32>
      %313 = arith.addf %306, %312 : vector<128x128xf32>
      %c258_i32 = arith.constant 258 : i32
      %314 = arith.addi %165, %c258_i32 : i32
      %315 = arith.index_cast %314 : i32 to index
      %c0_251 = arith.constant 0 : index
      %316 = vector.load %arg14[%315, %c0_251] : memref<912x128xf32, #tpu.memory_space<vmem>>, vector<128x128xf32>
      %c21_252 = arith.constant 21 : index
      %c0_253 = arith.constant 0 : index
      %c0_254 = arith.constant 0 : index
      %317 = vector.load %arg4[%c21_252, %c0_253, %c0_254] : memref<25x128x128xf32, #tpu.memory_space<vmem>>, vector<1x128x128xf32>
      %318 = vector.shape_cast %317 : vector<1x128x128xf32> to vector<128x128xf32>
      %cst_255 = arith.constant dense<0.000000e+00> : vector<128x128xf32>
      %319 = tpu.matmul %316, %318, %cst_255 {dimension_numbers = #tpu.dot_dimension_numbers<[1], [0], [0], [1], [0, 0, 1, 1], [], []>} : vector<128x128xf32>, vector<128x128xf32>, vector<128x128xf32> -> vector<128x128xf32>
      %320 = arith.addf %313, %319 : vector<128x128xf32>
      %c260_i32 = arith.constant 260 : i32
      %321 = arith.addi %165, %c260_i32 : i32
      %322 = arith.index_cast %321 : i32 to index
      %c0_256 = arith.constant 0 : index
      %323 = vector.load %arg14[%322, %c0_256] : memref<912x128xf32, #tpu.memory_space<vmem>>, vector<128x128xf32>
      %c22_257 = arith.constant 22 : index
      %c0_258 = arith.constant 0 : index
      %c0_259 = arith.constant 0 : index
      %324 = vector.load %arg4[%c22_257, %c0_258, %c0_259] : memref<25x128x128xf32, #tpu.memory_space<vmem>>, vector<1x128x128xf32>
      %325 = vector.shape_cast %324 : vector<1x128x128xf32> to vector<128x128xf32>
      %cst_260 = arith.constant dense<0.000000e+00> : vector<128x128xf32>
      %326 = tpu.matmul %323, %325, %cst_260 {dimension_numbers = #tpu.dot_dimension_numbers<[1], [0], [0], [1], [0, 0, 1, 1], [], []>} : vector<128x128xf32>, vector<128x128xf32>, vector<128x128xf32> -> vector<128x128xf32>
      %327 = arith.addf %320, %326 : vector<128x128xf32>
      %c262_i32 = arith.constant 262 : i32
      %328 = arith.addi %165, %c262_i32 : i32
      %329 = arith.index_cast %328 : i32 to index
      %c0_261 = arith.constant 0 : index
      %330 = vector.load %arg14[%329, %c0_261] : memref<912x128xf32, #tpu.memory_space<vmem>>, vector<128x128xf32>
      %c23_262 = arith.constant 23 : index
      %c0_263 = arith.constant 0 : index
      %c0_264 = arith.constant 0 : index
      %331 = vector.load %arg4[%c23_262, %c0_263, %c0_264] : memref<25x128x128xf32, #tpu.memory_space<vmem>>, vector<1x128x128xf32>
      %332 = vector.shape_cast %331 : vector<1x128x128xf32> to vector<128x128xf32>
      %cst_265 = arith.constant dense<0.000000e+00> : vector<128x128xf32>
      %333 = tpu.matmul %330, %332, %cst_265 {dimension_numbers = #tpu.dot_dimension_numbers<[1], [0], [0], [1], [0, 0, 1, 1], [], []>} : vector<128x128xf32>, vector<128x128xf32>, vector<128x128xf32> -> vector<128x128xf32>
      %334 = arith.addf %327, %333 : vector<128x128xf32>
      %c264_i32 = arith.constant 264 : i32
      %335 = arith.addi %165, %c264_i32 : i32
      %336 = arith.index_cast %335 : i32 to index
      %c0_266 = arith.constant 0 : index
      %337 = vector.load %arg14[%336, %c0_266] : memref<912x128xf32, #tpu.memory_space<vmem>>, vector<128x128xf32>
      %c24_267 = arith.constant 24 : index
      %c0_268 = arith.constant 0 : index
      %c0_269 = arith.constant 0 : index
      %338 = vector.load %arg4[%c24_267, %c0_268, %c0_269] : memref<25x128x128xf32, #tpu.memory_space<vmem>>, vector<1x128x128xf32>
      %339 = vector.shape_cast %338 : vector<1x128x128xf32> to vector<128x128xf32>
      %cst_270 = arith.constant dense<0.000000e+00> : vector<128x128xf32>
      %340 = tpu.matmul %337, %339, %cst_270 {dimension_numbers = #tpu.dot_dimension_numbers<[1], [0], [0], [1], [0, 0, 1, 1], [], []>} : vector<128x128xf32>, vector<128x128xf32>, vector<128x128xf32> -> vector<128x128xf32>
      %341 = arith.addf %334, %340 : vector<128x128xf32>
      %c0_271 = arith.constant 0 : index
      %c0_272 = arith.constant 0 : index
      %342 = vector.load %arg5[%c0_271, %c0_272] : memref<1x128xf32, #tpu.memory_space<vmem>>, vector<1x128xf32>
      %343 = vector.broadcast %342 : vector<1x128xf32> to vector<128x128xf32>
      %344 = arith.addf %341, %343 : vector<128x128xf32>
      %cst_273 = arith.constant 0.000000e+00 : f32
      %345 = vector.broadcast %cst_273 : f32 to vector<128x128xf32>
      %346 = arith.maximumf %344, %345 : vector<128x128xf32>
      %347 = arith.index_cast %165 : i32 to index
      %c0_274 = arith.constant 0 : index
      %348 = vector.load %arg15[%347, %c0_274] : memref<640x128xf32, #tpu.memory_space<vmem>>, vector<128x128xf32>
      tpu.vector_store %arg15[%347, %c0_274], %346 {strides = array<i32>} : memref<640x128xf32, #tpu.memory_space<vmem>>, vector<128x128xf32>,
    }
    %c5_i32_9 = arith.constant 5 : i32
    %c0_10 = arith.constant 0 : index
    %c0_11 = arith.constant 0 : index
    %10 = vector.load %arg15[%c0_10, %c0_11] : memref<640x128xf32, #tpu.memory_space<vmem>>, vector<536x128xf32>
    %c2 = arith.constant 2 : index
    %c0_12 = arith.constant 0 : index
    %11 = vector.load %arg15[%c2, %c0_12] : memref<640x128xf32, #tpu.memory_space<vmem>>, vector<536x128xf32>
    %12 = arith.maximumf %10, %11 : vector<536x128xf32>
    %c64 = arith.constant 64 : index
    %c0_13 = arith.constant 0 : index
    %13 = vector.load %arg15[%c64, %c0_13] : memref<640x128xf32, #tpu.memory_space<vmem>>, vector<536x128xf32>
    %c66 = arith.constant 66 : index
    %c0_14 = arith.constant 0 : index
    %14 = vector.load %arg15[%c66, %c0_14] : memref<640x128xf32, #tpu.memory_space<vmem>>, vector<536x128xf32>
    %15 = arith.maximumf %13, %14 : vector<536x128xf32>
    %16 = arith.maximumf %12, %15 : vector<536x128xf32>
    %c0_15 = arith.constant 0 : index
    %c0_16 = arith.constant 0 : index
    %17 = vector.load %arg16[%c0_15, %c0_16] : memref<536x128xf32, #tpu.memory_space<vmem>>, vector<536x128xf32>
    tpu.vector_store %arg16[%c0_15, %c0_16], %16 {strides = array<i32>} : memref<536x128xf32, #tpu.memory_space<vmem>>, vector<536x128xf32>,
    %cst = arith.constant 0.000000e+00 : f32
    %18 = vector.broadcast %cst : f32 to vector<8x128xf32>
    %c0_17 = arith.constant 0 : index
    %c0_18 = arith.constant 0 : index
    %19 = vector.load %arg16[%c0_17, %c0_18] : memref<536x128xf32, #tpu.memory_space<vmem>>, vector<8x128xf32>
    %c0_19 = arith.constant 0 : index
    %c0_20 = arith.constant 0 : index
    %c0_21 = arith.constant 0 : index
    %20 = vector.load %arg6[%c0_19, %c0_20, %c0_21] : memref<25x128x128xf32, #tpu.memory_space<vmem>>, vector<1x128x128xf32>
    %21 = vector.shape_cast %20 : vector<1x128x128xf32> to vector<128x128xf32>
    %cst_22 = arith.constant dense<0.000000e+00> : vector<8x128xf32>
    %22 = tpu.matmul %19, %21, %cst_22 {dimension_numbers = #tpu.dot_dimension_numbers<[1], [0], [0], [1], [0, 0, 1, 1], [], []>} : vector<8x128xf32>, vector<128x128xf32>, vector<8x128xf32> -> vector<8x128xf32>
    %23 = arith.addf %18, %22 : vector<8x128xf32>
    %c4 = arith.constant 4 : index
    %c0_23 = arith.constant 0 : index
    %24 = vector.load %arg16[%c4, %c0_23] : memref<536x128xf32, #tpu.memory_space<vmem>>, vector<8x128xf32>
    %c1_24 = arith.constant 1 : index
    %c0_25 = arith.constant 0 : index
    %c0_26 = arith.constant 0 : index
    %25 = vector.load %arg6[%c1_24, %c0_25, %c0_26] : memref<25x128x128xf32, #tpu.memory_space<vmem>>, vector<1x128x128xf32>
    %26 = vector.shape_cast %25 : vector<1x128x128xf32> to vector<128x128xf32>
    %cst_27 = arith.constant dense<0.000000e+00> : vector<8x128xf32>
    %27 = tpu.matmul %24, %26, %cst_27 {dimension_numbers = #tpu.dot_dimension_numbers<[1], [0], [0], [1], [0, 0, 1, 1], [], []>} : vector<8x128xf32>, vector<128x128xf32>, vector<8x128xf32> -> vector<8x128xf32>
    %28 = arith.addf %23, %27 : vector<8x128xf32>
    %c8 = arith.constant 8 : index
    %c0_28 = arith.constant 0 : index
    %29 = vector.load %arg16[%c8, %c0_28] : memref<536x128xf32, #tpu.memory_space<vmem>>, vector<8x128xf32>
    %c2_29 = arith.constant 2 : index
    %c0_30 = arith.constant 0 : index
    %c0_31 = arith.constant 0 : index
    %30 = vector.load %arg6[%c2_29, %c0_30, %c0_31] : memref<25x128x128xf32, #tpu.memory_space<vmem>>, vector<1x128x128xf32>
    %31 = vector.shape_cast %30 : vector<1x128x128xf32> to vector<128x128xf32>
    %cst_32 = arith.constant dense<0.000000e+00> : vector<8x128xf32>
    %32 = tpu.matmul %29, %31, %cst_32 {dimension_numbers = #tpu.dot_dimension_numbers<[1], [0], [0], [1], [0, 0, 1, 1], [], []>} : vector<8x128xf32>, vector<128x128xf32>, vector<8x128xf32> -> vector<8x128xf32>
    %33 = arith.addf %28, %32 : vector<8x128xf32>
    %c12 = arith.constant 12 : index
    %c0_33 = arith.constant 0 : index
    %34 = vector.load %arg16[%c12, %c0_33] : memref<536x128xf32, #tpu.memory_space<vmem>>, vector<8x128xf32>
    %c3 = arith.constant 3 : index
    %c0_34 = arith.constant 0 : index
    %c0_35 = arith.constant 0 : index
    %35 = vector.load %arg6[%c3, %c0_34, %c0_35] : memref<25x128x128xf32, #tpu.memory_space<vmem>>, vector<1x128x128xf32>
    %36 = vector.shape_cast %35 : vector<1x128x128xf32> to vector<128x128xf32>
    %cst_36 = arith.constant dense<0.000000e+00> : vector<8x128xf32>
    %37 = tpu.matmul %34, %36, %cst_36 {dimension_numbers = #tpu.dot_dimension_numbers<[1], [0], [0], [1], [0, 0, 1, 1], [], []>} : vector<8x128xf32>, vector<128x128xf32>, vector<8x128xf32> -> vector<8x128xf32>
    %38 = arith.addf %33, %37 : vector<8x128xf32>
    %c16 = arith.constant 16 : index
    %c0_37 = arith.constant 0 : index
    %39 = vector.load %arg16[%c16, %c0_37] : memref<536x128xf32, #tpu.memory_space<vmem>>, vector<8x128xf32>
    %c4_38 = arith.constant 4 : index
    %c0_39 = arith.constant 0 : index
    %c0_40 = arith.constant 0 : index
    %40 = vector.load %arg6[%c4_38, %c0_39, %c0_40] : memref<25x128x128xf32, #tpu.memory_space<vmem>>, vector<1x128x128xf32>
    %41 = vector.shape_cast %40 : vector<1x128x128xf32> to vector<128x128xf32>
    %cst_41 = arith.constant dense<0.000000e+00> : vector<8x128xf32>
    %42 = tpu.matmul %39, %41, %cst_41 {dimension_numbers = #tpu.dot_dimension_numbers<[1], [0], [0], [1], [0, 0, 1, 1], [], []>} : vector<8x128xf32>, vector<128x128xf32>, vector<8x128xf32> -> vector<8x128xf32>
    %43 = arith.addf %38, %42 : vector<8x128xf32>
    %c128 = arith.constant 128 : index
    %c0_42 = arith.constant 0 : index
    %44 = vector.load %arg16[%c128, %c0_42] : memref<536x128xf32, #tpu.memory_space<vmem>>, vector<8x128xf32>
    %c5 = arith.constant 5 : index
    %c0_43 = arith.constant 0 : index
    %c0_44 = arith.constant 0 : index
    %45 = vector.load %arg6[%c5, %c0_43, %c0_44] : memref<25x128x128xf32, #tpu.memory_space<vmem>>, vector<1x128x128xf32>
    %46 = vector.shape_cast %45 : vector<1x128x128xf32> to vector<128x128xf32>
    %cst_45 = arith.constant dense<0.000000e+00> : vector<8x128xf32>
    %47 = tpu.matmul %44, %46, %cst_45 {dimension_numbers = #tpu.dot_dimension_numbers<[1], [0], [0], [1], [0, 0, 1, 1], [], []>} : vector<8x128xf32>, vector<128x128xf32>, vector<8x128xf32> -> vector<8x128xf32>
    %48 = arith.addf %43, %47 : vector<8x128xf32>
    %c132 = arith.constant 132 : index
    %c0_46 = arith.constant 0 : index
    %49 = vector.load %arg16[%c132, %c0_46] : memref<536x128xf32, #tpu.memory_space<vmem>>, vector<8x128xf32>
    %c6 = arith.constant 6 : index
    %c0_47 = arith.constant 0 : index
    %c0_48 = arith.constant 0 : index
    %50 = vector.load %arg6[%c6, %c0_47, %c0_48] : memref<25x128x128xf32, #tpu.memory_space<vmem>>, vector<1x128x128xf32>
    %51 = vector.shape_cast %50 : vector<1x128x128xf32> to vector<128x128xf32>
    %cst_49 = arith.constant dense<0.000000e+00> : vector<8x128xf32>
    %52 = tpu.matmul %49, %51, %cst_49 {dimension_numbers = #tpu.dot_dimension_numbers<[1], [0], [0], [1], [0, 0, 1, 1], [], []>} : vector<8x128xf32>, vector<128x128xf32>, vector<8x128xf32> -> vector<8x128xf32>
    %53 = arith.addf %48, %52 : vector<8x128xf32>
    %c136 = arith.constant 136 : index
    %c0_50 = arith.constant 0 : index
    %54 = vector.load %arg16[%c136, %c0_50] : memref<536x128xf32, #tpu.memory_space<vmem>>, vector<8x128xf32>
    %c7 = arith.constant 7 : index
    %c0_51 = arith.constant 0 : index
    %c0_52 = arith.constant 0 : index
    %55 = vector.load %arg6[%c7, %c0_51, %c0_52] : memref<25x128x128xf32, #tpu.memory_space<vmem>>, vector<1x128x128xf32>
    %56 = vector.shape_cast %55 : vector<1x128x128xf32> to vector<128x128xf32>
    %cst_53 = arith.constant dense<0.000000e+00> : vector<8x128xf32>
    %57 = tpu.matmul %54, %56, %cst_53 {dimension_numbers = #tpu.dot_dimension_numbers<[1], [0], [0], [1], [0, 0, 1, 1], [], []>} : vector<8x128xf32>, vector<128x128xf32>, vector<8x128xf32> -> vector<8x128xf32>
    %58 = arith.addf %53, %57 : vector<8x128xf32>
    %c140 = arith.constant 140 : index
    %c0_54 = arith.constant 0 : index
    %59 = vector.load %arg16[%c140, %c0_54] : memref<536x128xf32, #tpu.memory_space<vmem>>, vector<8x128xf32>
    %c8_55 = arith.constant 8 : index
    %c0_56 = arith.constant 0 : index
    %c0_57 = arith.constant 0 : index
    %60 = vector.load %arg6[%c8_55, %c0_56, %c0_57] : memref<25x128x128xf32, #tpu.memory_space<vmem>>, vector<1x128x128xf32>
    %61 = vector.shape_cast %60 : vector<1x128x128xf32> to vector<128x128xf32>
    %cst_58 = arith.constant dense<0.000000e+00> : vector<8x128xf32>
    %62 = tpu.matmul %59, %61, %cst_58 {dimension_numbers = #tpu.dot_dimension_numbers<[1], [0], [0], [1], [0, 0, 1, 1], [], []>} : vector<8x128xf32>, vector<128x128xf32>, vector<8x128xf32> -> vector<8x128xf32>
    %63 = arith.addf %58, %62 : vector<8x128xf32>
    %c144 = arith.constant 144 : index
    %c0_59 = arith.constant 0 : index
    %64 = vector.load %arg16[%c144, %c0_59] : memref<536x128xf32, #tpu.memory_space<vmem>>, vector<8x128xf32>
    %c9 = arith.constant 9 : index
    %c0_60 = arith.constant 0 : index
    %c0_61 = arith.constant 0 : index
    %65 = vector.load %arg6[%c9, %c0_60, %c0_61] : memref<25x128x128xf32, #tpu.memory_space<vmem>>, vector<1x128x128xf32>
    %66 = vector.shape_cast %65 : vector<1x128x128xf32> to vector<128x128xf32>
    %cst_62 = arith.constant dense<0.000000e+00> : vector<8x128xf32>
    %67 = tpu.matmul %64, %66, %cst_62 {dimension_numbers = #tpu.dot_dimension_numbers<[1], [0], [0], [1], [0, 0, 1, 1], [], []>} : vector<8x128xf32>, vector<128x128xf32>, vector<8x128xf32> -> vector<8x128xf32>
    %68 = arith.addf %63, %67 : vector<8x128xf32>
    %c256 = arith.constant 256 : index
    %c0_63 = arith.constant 0 : index
    %69 = vector.load %arg16[%c256, %c0_63] : memref<536x128xf32, #tpu.memory_space<vmem>>, vector<8x128xf32>
    %c10 = arith.constant 10 : index
    %c0_64 = arith.constant 0 : index
    %c0_65 = arith.constant 0 : index
    %70 = vector.load %arg6[%c10, %c0_64, %c0_65] : memref<25x128x128xf32, #tpu.memory_space<vmem>>, vector<1x128x128xf32>
    %71 = vector.shape_cast %70 : vector<1x128x128xf32> to vector<128x128xf32>
    %cst_66 = arith.constant dense<0.000000e+00> : vector<8x128xf32>
    %72 = tpu.matmul %69, %71, %cst_66 {dimension_numbers = #tpu.dot_dimension_numbers<[1], [0], [0], [1], [0, 0, 1, 1], [], []>} : vector<8x128xf32>, vector<128x128xf32>, vector<8x128xf32> -> vector<8x128xf32>
    %73 = arith.addf %68, %72 : vector<8x128xf32>
    %c260 = arith.constant 260 : index
    %c0_67 = arith.constant 0 : index
    %74 = vector.load %arg16[%c260, %c0_67] : memref<536x128xf32, #tpu.memory_space<vmem>>, vector<8x128xf32>
    %c11 = arith.constant 11 : index
    %c0_68 = arith.constant 0 : index
    %c0_69 = arith.constant 0 : index
    %75 = vector.load %arg6[%c11, %c0_68, %c0_69] : memref<25x128x128xf32, #tpu.memory_space<vmem>>, vector<1x128x128xf32>
    %76 = vector.shape_cast %75 : vector<1x128x128xf32> to vector<128x128xf32>
    %cst_70 = arith.constant dense<0.000000e+00> : vector<8x128xf32>
    %77 = tpu.matmul %74, %76, %cst_70 {dimension_numbers = #tpu.dot_dimension_numbers<[1], [0], [0], [1], [0, 0, 1, 1], [], []>} : vector<8x128xf32>, vector<128x128xf32>, vector<8x128xf32> -> vector<8x128xf32>
    %78 = arith.addf %73, %77 : vector<8x128xf32>
    %c264 = arith.constant 264 : index
    %c0_71 = arith.constant 0 : index
    %79 = vector.load %arg16[%c264, %c0_71] : memref<536x128xf32, #tpu.memory_space<vmem>>, vector<8x128xf32>
    %c12_72 = arith.constant 12 : index
    %c0_73 = arith.constant 0 : index
    %c0_74 = arith.constant 0 : index
    %80 = vector.load %arg6[%c12_72, %c0_73, %c0_74] : memref<25x128x128xf32, #tpu.memory_space<vmem>>, vector<1x128x128xf32>
    %81 = vector.shape_cast %80 : vector<1x128x128xf32> to vector<128x128xf32>
    %cst_75 = arith.constant dense<0.000000e+00> : vector<8x128xf32>
    %82 = tpu.matmul %79, %81, %cst_75 {dimension_numbers = #tpu.dot_dimension_numbers<[1], [0], [0], [1], [0, 0, 1, 1], [], []>} : vector<8x128xf32>, vector<128x128xf32>, vector<8x128xf32> -> vector<8x128xf32>
    %83 = arith.addf %78, %82 : vector<8x128xf32>
    %c268 = arith.constant 268 : index
    %c0_76 = arith.constant 0 : index
    %84 = vector.load %arg16[%c268, %c0_76] : memref<536x128xf32, #tpu.memory_space<vmem>>, vector<8x128xf32>
    %c13 = arith.constant 13 : index
    %c0_77 = arith.constant 0 : index
    %c0_78 = arith.constant 0 : index
    %85 = vector.load %arg6[%c13, %c0_77, %c0_78] : memref<25x128x128xf32, #tpu.memory_space<vmem>>, vector<1x128x128xf32>
    %86 = vector.shape_cast %85 : vector<1x128x128xf32> to vector<128x128xf32>
    %cst_79 = arith.constant dense<0.000000e+00> : vector<8x128xf32>
    %87 = tpu.matmul %84, %86, %cst_79 {dimension_numbers = #tpu.dot_dimension_numbers<[1], [0], [0], [1], [0, 0, 1, 1], [], []>} : vector<8x128xf32>, vector<128x128xf32>, vector<8x128xf32> -> vector<8x128xf32>
    %88 = arith.addf %83, %87 : vector<8x128xf32>
    %c272 = arith.constant 272 : index
    %c0_80 = arith.constant 0 : index
    %89 = vector.load %arg16[%c272, %c0_80] : memref<536x128xf32, #tpu.memory_space<vmem>>, vector<8x128xf32>
    %c14 = arith.constant 14 : index
    %c0_81 = arith.constant 0 : index
    %c0_82 = arith.constant 0 : index
    %90 = vector.load %arg6[%c14, %c0_81, %c0_82] : memref<25x128x128xf32, #tpu.memory_space<vmem>>, vector<1x128x128xf32>
    %91 = vector.shape_cast %90 : vector<1x128x128xf32> to vector<128x128xf32>
    %cst_83 = arith.constant dense<0.000000e+00> : vector<8x128xf32>
    %92 = tpu.matmul %89, %91, %cst_83 {dimension_numbers = #tpu.dot_dimension_numbers<[1], [0], [0], [1], [0, 0, 1, 1], [], []>} : vector<8x128xf32>, vector<128x128xf32>, vector<8x128xf32> -> vector<8x128xf32>
    %93 = arith.addf %88, %92 : vector<8x128xf32>
    %c384 = arith.constant 384 : index
    %c0_84 = arith.constant 0 : index
    %94 = vector.load %arg16[%c384, %c0_84] : memref<536x128xf32, #tpu.memory_space<vmem>>, vector<8x128xf32>
    %c15 = arith.constant 15 : index
    %c0_85 = arith.constant 0 : index
    %c0_86 = arith.constant 0 : index
    %95 = vector.load %arg6[%c15, %c0_85, %c0_86] : memref<25x128x128xf32, #tpu.memory_space<vmem>>, vector<1x128x128xf32>
    %96 = vector.shape_cast %95 : vector<1x128x128xf32> to vector<128x128xf32>
    %cst_87 = arith.constant dense<0.000000e+00> : vector<8x128xf32>
    %97 = tpu.matmul %94, %96, %cst_87 {dimension_numbers = #tpu.dot_dimension_numbers<[1], [0], [0], [1], [0, 0, 1, 1], [], []>} : vector<8x128xf32>, vector<128x128xf32>, vector<8x128xf32> -> vector<8x128xf32>
    %98 = arith.addf %93, %97 : vector<8x128xf32>
    %c388 = arith.constant 388 : index
    %c0_88 = arith.constant 0 : index
    %99 = vector.load %arg16[%c388, %c0_88] : memref<536x128xf32, #tpu.memory_space<vmem>>, vector<8x128xf32>
    %c16_89 = arith.constant 16 : index
    %c0_90 = arith.constant 0 : index
    %c0_91 = arith.constant 0 : index
    %100 = vector.load %arg6[%c16_89, %c0_90, %c0_91] : memref<25x128x128xf32, #tpu.memory_space<vmem>>, vector<1x128x128xf32>
    %101 = vector.shape_cast %100 : vector<1x128x128xf32> to vector<128x128xf32>
    %cst_92 = arith.constant dense<0.000000e+00> : vector<8x128xf32>
    %102 = tpu.matmul %99, %101, %cst_92 {dimension_numbers = #tpu.dot_dimension_numbers<[1], [0], [0], [1], [0, 0, 1, 1], [], []>} : vector<8x128xf32>, vector<128x128xf32>, vector<8x128xf32> -> vector<8x128xf32>
    %103 = arith.addf %98, %102 : vector<8x128xf32>
    %c392 = arith.constant 392 : index
    %c0_93 = arith.constant 0 : index
    %104 = vector.load %arg16[%c392, %c0_93] : memref<536x128xf32, #tpu.memory_space<vmem>>, vector<8x128xf32>
    %c17 = arith.constant 17 : index
    %c0_94 = arith.constant 0 : index
    %c0_95 = arith.constant 0 : index
    %105 = vector.load %arg6[%c17, %c0_94, %c0_95] : memref<25x128x128xf32, #tpu.memory_space<vmem>>, vector<1x128x128xf32>
    %106 = vector.shape_cast %105 : vector<1x128x128xf32> to vector<128x128xf32>
    %cst_96 = arith.constant dense<0.000000e+00> : vector<8x128xf32>
    %107 = tpu.matmul %104, %106, %cst_96 {dimension_numbers = #tpu.dot_dimension_numbers<[1], [0], [0], [1], [0, 0, 1, 1], [], []>} : vector<8x128xf32>, vector<128x128xf32>, vector<8x128xf32> -> vector<8x128xf32>
    %108 = arith.addf %103, %107 : vector<8x128xf32>
    %c396 = arith.constant 396 : index
    %c0_97 = arith.constant 0 : index
    %109 = vector.load %arg16[%c396, %c0_97] : memref<536x128xf32, #tpu.memory_space<vmem>>, vector<8x128xf32>
    %c18 = arith.constant 18 : index
    %c0_98 = arith.constant 0 : index
    %c0_99 = arith.constant 0 : index
    %110 = vector.load %arg6[%c18, %c0_98, %c0_99] : memref<25x128x128xf32, #tpu.memory_space<vmem>>, vector<1x128x128xf32>
    %111 = vector.shape_cast %110 : vector<1x128x128xf32> to vector<128x128xf32>
    %cst_100 = arith.constant dense<0.000000e+00> : vector<8x128xf32>
    %112 = tpu.matmul %109, %111, %cst_100 {dimension_numbers = #tpu.dot_dimension_numbers<[1], [0], [0], [1], [0, 0, 1, 1], [], []>} : vector<8x128xf32>, vector<128x128xf32>, vector<8x128xf32> -> vector<8x128xf32>
    %113 = arith.addf %108, %112 : vector<8x128xf32>
    %c400 = arith.constant 400 : index
    %c0_101 = arith.constant 0 : index
    %114 = vector.load %arg16[%c400, %c0_101] : memref<536x128xf32, #tpu.memory_space<vmem>>, vector<8x128xf32>
    %c19 = arith.constant 19 : index
    %c0_102 = arith.constant 0 : index
    %c0_103 = arith.constant 0 : index
    %115 = vector.load %arg6[%c19, %c0_102, %c0_103] : memref<25x128x128xf32, #tpu.memory_space<vmem>>, vector<1x128x128xf32>
    %116 = vector.shape_cast %115 : vector<1x128x128xf32> to vector<128x128xf32>
    %cst_104 = arith.constant dense<0.000000e+00> : vector<8x128xf32>
    %117 = tpu.matmul %114, %116, %cst_104 {dimension_numbers = #tpu.dot_dimension_numbers<[1], [0], [0], [1], [0, 0, 1, 1], [], []>} : vector<8x128xf32>, vector<128x128xf32>, vector<8x128xf32> -> vector<8x128xf32>
    %118 = arith.addf %113, %117 : vector<8x128xf32>
    %c512 = arith.constant 512 : index
    %c0_105 = arith.constant 0 : index
    %119 = vector.load %arg16[%c512, %c0_105] : memref<536x128xf32, #tpu.memory_space<vmem>>, vector<8x128xf32>
    %c20 = arith.constant 20 : index
    %c0_106 = arith.constant 0 : index
    %c0_107 = arith.constant 0 : index
    %120 = vector.load %arg6[%c20, %c0_106, %c0_107] : memref<25x128x128xf32, #tpu.memory_space<vmem>>, vector<1x128x128xf32>
    %121 = vector.shape_cast %120 : vector<1x128x128xf32> to vector<128x128xf32>
    %cst_108 = arith.constant dense<0.000000e+00> : vector<8x128xf32>
    %122 = tpu.matmul %119, %121, %cst_108 {dimension_numbers = #tpu.dot_dimension_numbers<[1], [0], [0], [1], [0, 0, 1, 1], [], []>} : vector<8x128xf32>, vector<128x128xf32>, vector<8x128xf32> -> vector<8x128xf32>
    %123 = arith.addf %118, %122 : vector<8x128xf32>
    %c516 = arith.constant 516 : index
    %c0_109 = arith.constant 0 : index
    %124 = vector.load %arg16[%c516, %c0_109] : memref<536x128xf32, #tpu.memory_space<vmem>>, vector<8x128xf32>
    %c21 = arith.constant 21 : index
    %c0_110 = arith.constant 0 : index
    %c0_111 = arith.constant 0 : index
    %125 = vector.load %arg6[%c21, %c0_110, %c0_111] : memref<25x128x128xf32, #tpu.memory_space<vmem>>, vector<1x128x128xf32>
    %126 = vector.shape_cast %125 : vector<1x128x128xf32> to vector<128x128xf32>
    %cst_112 = arith.constant dense<0.000000e+00> : vector<8x128xf32>
    %127 = tpu.matmul %124, %126, %cst_112 {dimension_numbers = #tpu.dot_dimension_numbers<[1], [0], [0], [1], [0, 0, 1, 1], [], []>} : vector<8x128xf32>, vector<128x128xf32>, vector<8x128xf32> -> vector<8x128xf32>
    %128 = arith.addf %123, %127 : vector<8x128xf32>
    %c520 = arith.constant 520 : index
    %c0_113 = arith.constant 0 : index
    %129 = vector.load %arg16[%c520, %c0_113] : memref<536x128xf32, #tpu.memory_space<vmem>>, vector<8x128xf32>
    %c22 = arith.constant 22 : index
    %c0_114 = arith.constant 0 : index
    %c0_115 = arith.constant 0 : index
    %130 = vector.load %arg6[%c22, %c0_114, %c0_115] : memref<25x128x128xf32, #tpu.memory_space<vmem>>, vector<1x128x128xf32>
    %131 = vector.shape_cast %130 : vector<1x128x128xf32> to vector<128x128xf32>
    %cst_116 = arith.constant dense<0.000000e+00> : vector<8x128xf32>
    %132 = tpu.matmul %129, %131, %cst_116 {dimension_numbers = #tpu.dot_dimension_numbers<[1], [0], [0], [1], [0, 0, 1, 1], [], []>} : vector<8x128xf32>, vector<128x128xf32>, vector<8x128xf32> -> vector<8x128xf32>
    %133 = arith.addf %128, %132 : vector<8x128xf32>
    %c524 = arith.constant 524 : index
    %c0_117 = arith.constant 0 : index
    %134 = vector.load %arg16[%c524, %c0_117] : memref<536x128xf32, #tpu.memory_space<vmem>>, vector<8x128xf32>
    %c23 = arith.constant 23 : index
    %c0_118 = arith.constant 0 : index
    %c0_119 = arith.constant 0 : index
    %135 = vector.load %arg6[%c23, %c0_118, %c0_119] : memref<25x128x128xf32, #tpu.memory_space<vmem>>, vector<1x128x128xf32>
    %136 = vector.shape_cast %135 : vector<1x128x128xf32> to vector<128x128xf32>
    %cst_120 = arith.constant dense<0.000000e+00> : vector<8x128xf32>
    %137 = tpu.matmul %134, %136, %cst_120 {dimension_numbers = #tpu.dot_dimension_numbers<[1], [0], [0], [1], [0, 0, 1, 1], [], []>} : vector<8x128xf32>, vector<128x128xf32>, vector<8x128xf32> -> vector<8x128xf32>
    %138 = arith.addf %133, %137 : vector<8x128xf32>
    %c528 = arith.constant 528 : index
    %c0_121 = arith.constant 0 : index
    %139 = vector.load %arg16[%c528, %c0_121] : memref<536x128xf32, #tpu.memory_space<vmem>>, vector<8x128xf32>
    %c24 = arith.constant 24 : index
    %c0_122 = arith.constant 0 : index
    %c0_123 = arith.constant 0 : index
    %140 = vector.load %arg6[%c24, %c0_122, %c0_123] : memref<25x128x128xf32, #tpu.memory_space<vmem>>, vector<1x128x128xf32>
    %141 = vector.shape_cast %140 : vector<1x128x128xf32> to vector<128x128xf32>
    %cst_124 = arith.constant dense<0.000000e+00> : vector<8x128xf32>
    %142 = tpu.matmul %139, %141, %cst_124 {dimension_numbers = #tpu.dot_dimension_numbers<[1], [0], [0], [1], [0, 0, 1, 1], [], []>} : vector<8x128xf32>, vector<128x128xf32>, vector<8x128xf32> -> vector<8x128xf32>
    %143 = arith.addf %138, %142 : vector<8x128xf32>
    %c0_125 = arith.constant 0 : index
    %c0_126 = arith.constant 0 : index
    %144 = vector.load %arg7[%c0_125, %c0_126] : memref<1x128xf32, #tpu.memory_space<vmem>>, vector<1x128xf32>
    %145 = vector.broadcast %144 : vector<1x128xf32> to vector<8x128xf32>
    %146 = arith.addf %143, %145 : vector<8x128xf32>
    %cst_127 = arith.constant 0.000000e+00 : f32
    %147 = vector.broadcast %cst_127 : f32 to vector<8x128xf32>
    %148 = arith.maximumf %146, %147 : vector<8x128xf32>
    %c0_128 = arith.constant 0 : index
    %c0_129 = arith.constant 0 : index
    %149 = vector.load %arg8[%c0_128, %c0_129] : memref<128x128xf32, #tpu.memory_space<vmem>>, vector<128x128xf32>
    %cst_130 = arith.constant dense<0.000000e+00> : vector<8x128xf32>
    %150 = tpu.matmul %148, %149, %cst_130 {dimension_numbers = #tpu.dot_dimension_numbers<[1], [0], [0], [1], [0, 0, 1, 1], [], []>} : vector<8x128xf32>, vector<128x128xf32>, vector<8x128xf32> -> vector<8x128xf32>
    %c0_131 = arith.constant 0 : index
    %c0_132 = arith.constant 0 : index
    %151 = vector.load %arg9[%c0_131, %c0_132] : memref<1x128xf32, #tpu.memory_space<vmem>>, vector<1x128xf32>
    %152 = vector.broadcast %151 : vector<1x128xf32> to vector<8x128xf32>
    %153 = arith.addf %150, %152 : vector<8x128xf32>
    %cst_133 = arith.constant 0.000000e+00 : f32
    %154 = vector.broadcast %cst_133 : f32 to vector<8x128xf32>
    %155 = arith.maximumf %153, %154 : vector<8x128xf32>
    %c0_134 = arith.constant 0 : index
    %c0_135 = arith.constant 0 : index
    %156 = vector.load %arg10[%c0_134, %c0_135] : memref<128x128xf32, #tpu.memory_space<vmem>>, vector<128x128xf32>
    %cst_136 = arith.constant dense<0.000000e+00> : vector<8x128xf32>
    %157 = tpu.matmul %155, %156, %cst_136 {dimension_numbers = #tpu.dot_dimension_numbers<[1], [0], [0], [1], [0, 0, 1, 1], [], []>} : vector<8x128xf32>, vector<128x128xf32>, vector<8x128xf32> -> vector<8x128xf32>
    %c0_137 = arith.constant 0 : index
    %c0_138 = arith.constant 0 : index
    %158 = vector.load %arg11[%c0_137, %c0_138] : memref<1x128xf32, #tpu.memory_space<vmem>>, vector<1x128xf32>
    %159 = vector.broadcast %158 : vector<1x128xf32> to vector<8x128xf32>
    %160 = arith.addf %157, %159 : vector<8x128xf32>
    %c0_139 = arith.constant 0 : index
    %c0_140 = arith.constant 0 : index
    %c0_141 = arith.constant 0 : index
    %161 = vector.load %arg12[%c0_139, %c0_140, %c0_141] : memref<1x8x128xf32, #tpu.memory_space<vmem>>, vector<1x8x128xf32>
    %162 = vector.shape_cast %161 : vector<1x8x128xf32> to vector<8x128xf32>
    %163 = vector.shape_cast %160 : vector<8x128xf32> to vector<1x8x128xf32>
    tpu.vector_store %arg12[%c0_139, %c0_140, %c0_141], %163 {strides = array<i32>} : memref<1x8x128xf32, #tpu.memory_space<vmem>>, vector<1x8x128xf32>,
    return
  }
  func.func @transform_0(%arg0: i32) -> (i32, i32, i32) {
    %c0_i32 = arith.constant 0 : i32
    %c0_i32_0 = arith.constant 0 : i32
    %c0_i32_1 = arith.constant 0 : i32
    return %arg0, %c0_i32, %c0_i32_0 : i32, i32, i32
  }
  func.func @transform_1(%arg0: i32) -> (i32, i32, i32) {
    %c0_i32 = arith.constant 0 : i32
    %c0_i32_0 = arith.constant 0 : i32
    %c0_i32_1 = arith.constant 0 : i32
    %c0_i32_2 = arith.constant 0 : i32
    return %c0_i32, %c0_i32_0, %c0_i32_1 : i32, i32, i32
  }
  func.func @transform_2(%arg0: i32) -> (i32, i32) {
    %c0_i32 = arith.constant 0 : i32
    %c0_i32_0 = arith.constant 0 : i32
    %c0_i32_1 = arith.constant 0 : i32
    return %c0_i32, %c0_i32_0 : i32, i32
  }
  func.func @transform_3(%arg0: i32) -> (i32, i32, i32) {
    %c0_i32 = arith.constant 0 : i32
    %c0_i32_0 = arith.constant 0 : i32
    %c0_i32_1 = arith.constant 0 : i32
    %c0_i32_2 = arith.constant 0 : i32
    return %c0_i32, %c0_i32_0, %c0_i32_1 : i32, i32, i32
  }
  func.func @transform_4(%arg0: i32) -> (i32, i32) {
    %c0_i32 = arith.constant 0 : i32
    %c0_i32_0 = arith.constant 0 : i32
    %c0_i32_1 = arith.constant 0 : i32
    return %c0_i32, %c0_i32_0 : i32, i32
  }
  func.func @transform_5(%arg0: i32) -> (i32, i32, i32) {
    %c0_i32 = arith.constant 0 : i32
    %c0_i32_0 = arith.constant 0 : i32
    %c0_i32_1 = arith.constant 0 : i32
    %c0_i32_2 = arith.constant 0 : i32
    return %c0_i32, %c0_i32_0, %c0_i32_1 : i32, i32, i32
  }
  func.func @transform_6(%arg0: i32) -> (i32, i32) {
    %c0_i32 = arith.constant 0 : i32
    %c0_i32_0 = arith.constant 0 : i32
    %c0_i32_1 = arith.constant 0 : i32
    return %c0_i32, %c0_i32_0 : i32, i32
  }
  func.func @transform_7(%arg0: i32) -> (i32, i32) {
    %c0_i32 = arith.constant 0 : i32
    %c0_i32_0 = arith.constant 0 : i32
    %c0_i32_1 = arith.constant 0 : i32
    return %c0_i32, %c0_i32_0 : i32, i32
  }
  func.func @transform_8(%arg0: i32) -> (i32, i32) {
    %c0_i32 = arith.constant 0 : i32
    %c0_i32_0 = arith.constant 0 : i32
    %c0_i32_1 = arith.constant 0 : i32
    return %c0_i32, %c0_i32_0 : i32, i32
  }
  func.func @transform_9(%arg0: i32) -> (i32, i32) {
    %c0_i32 = arith.constant 0 : i32
    %c0_i32_0 = arith.constant 0 : i32
    %c0_i32_1 = arith.constant 0 : i32
    return %c0_i32, %c0_i32_0 : i32, i32
  }
  func.func @transform_10(%arg0: i32) -> (i32, i32) {
    %c0_i32 = arith.constant 0 : i32
    %c0_i32_0 = arith.constant 0 : i32
    %c0_i32_1 = arith.constant 0 : i32
    return %c0_i32, %c0_i32_0 : i32, i32
  }
  func.func @transform_11(%arg0: i32) -> (i32, i32, i32) {
    %c0_i32 = arith.constant 0 : i32
    %c0_i32_0 = arith.constant 0 : i32
    %c0_i32_1 = arith.constant 0 : i32
    return %arg0, %c0_i32, %c0_i32_0 : i32, i32, i32
  }
}

</mosaic_0001>

<bundles_post_ra>
// kernel: net_forward.1
= control target key start
LH: loop header
LB: loop body
LE: loop exit
PB: predicated region body
PF: predicated region fallthrough
CT: control target
= control target key end

     0   :  { %16 = vsyncpa [#allocation7], 0  ;;  %s28800_s0 = inlined_call_operand.vmem [shape: f32[2,1160,128], index: 0, kind: input, shape index: {}]   ;;  %s28801_s1 = inlined_call_operand.vmem [shape: f32[25,128,128], index: 1, kind: input, shape index: {}]   ;;  %s28802_s2 = inlined_call_operand.vmem [shape: f32[1,128], index: 2, kind: input, shape index: {}]   ;;  %s28803_s3 = inlined_call_operand.vmem [shape: f32[25,128,128], index: 3, kind: input, shape index: {}]   ;;  %s28804_s4 = inlined_call_operand.vmem [shape: f32[1,128], index: 4, kind: input, shape index: {}]   ;;  %s28805_s5 = inlined_call_operand.hbm [shape: f32[25,128,128], index: 5, kind: input, shape index: {}]   ;;  %s28806_s6 = inlined_call_operand.vmem [shape: f32[1,128], index: 6, kind: input, shape index: {}]   ;;  %s28807_s7 = inlined_call_operand.vmem [shape: f32[128,128], index: 7, kind: input, shape index: {}]   ;;  %s28808_s8 = inlined_call_operand.vmem [shape: f32[1,128], index: 8, kind: input, shape index: {}]   ;;  %s28809_s9 = inlined_call_operand.hbm [shape: f32[128,128], index: 9, kind: input, shape index: {}]   ;;  %s28810_s10 = inlined_call_operand.vmem [shape: f32[1,128], index: 10, kind: input, shape index: {}]   ;;  %s28811_s11 = inlined_call_operand.vmem [shape: f32[2,8,128], index: 11, kind: output, shape index: {}]  }
   0x1   :  { %17 = vsyncpa [#allocation9], 0  ;;  %s24532_s17 = smov 0  }
   0x2 LB: > { %s24538_s18 = sadd.s32 4294967295, %s24455_s17   ;;  %p13872_p0 = scmp.ge.s32.totalorder %s24455_s17, 1  ;;  %s24455_s17 = sphi %s24532_s17, %s23_s17  }
   0x3   : > { %p290_p1 = scmp.lt.s32.totalorder %s24455_s17, 3  ;;  %s24465_s19 = smov [#allocation6]  }
   0x4   : > { %s314_s20 = sshll.u32 %s24465_s19, 4  ;;  %p28812_p3 = scmp.eq.s32.totalorder %s24538_s18, 0  ;;  %s315_s20 = int_to_ptr.vmem [resolvable:$true] %s314_s20 }
   0x5   : > { %p24542_p2 = pnand %p13872_p0, %p290_p1  ;;  %s24466_s22 = smov [#allocation8]  }
   0x6   : > { %s336_s23 = sshll.u32 %s24466_s22, 4  ;;  %s24377_s27 = scalar_lea.hbm %s28805_s5, 51200  ;;  %s24555_s23 = int_to_ptr.vmem [resolvable:$true] %s336_s23 }
   0x7   : > { %s28814_s21 = scalar_select %p24542_p2, 1, 0 }
   0x8   : > { %p24335_p4 = pneg %p24542_p2  ;;  %p24378_p6 = scmp.ne.s32.totalorder %s28805_s5, %s24377_s27 }
   0x9   : > { %p24384_p10 = scmp.lt.u32.totalorder %s24377_s27, %s28805_s5 }
   0xa   : > { %p24551_p5 = pnand %p28812_p3, %p24335_p4 }
   0xc   : > { %p24379_p7 = pneg %p24551_p5 }
   0xe   : > { %p24380_p8 = pnand %p24379_p7, %p24378_p6 }
  0x10   : > { %p24381_p9 = pneg %p24380_p8 }
  0x12   : > { %p24386_p11 = pnand %p24384_p10, %p24381_p9 }
  0x14   : > { %24389 = shalt.err (!%p24386_p11)
}
  0x15   : > { %s24390_s13 = scalar_lea.vmem %s315_s20, 51200  ;;  %p24398_p1 = scmp.lt.s32.totalorder %s315_s20, %s315_s20 }
  0x16   : > { %p24391_p12 = scmp.ne.s32.totalorder %s315_s20, %s24390_s13  ;;  %p24399_p4 = scmp.lt.s32.totalorder %s24390_s13, %s24390_s13 }
  0x18   : > { %p24393_p13 = pnand %p24391_p12, %p24379_p7  ;;  %p24400_p3 = por %p24399_p4, %p24398_p1 }
  0x1a   : > { %p24394_p0 = pneg %p24393_p13 }
  0x1c   : > { %p24401_p2 = pnand %p24400_p3, %p24394_p0 }
  0x1e   : > { %24404 = shalt.err (!%p24401_p2)
}
  0x1f   : > { %s24467_s14 = smov 128   ;;  %s24468_s15 = smov 8  }
  0x20   : > { %24338 = dma.hbm_to_vmem [thread:$0]  (!%p24551_p5), %s28805_s5, 51200, %s315_s20, [#allocation7], %s24467_s14, %s24467_s14, %s24468_s15  }
  0x21   : > { %s24405_s26 = scalar_lea.hbm %s28809_s9, 2048 }
  0x22   : > { %p24406_p6 = scmp.ne.s32.totalorder %s28809_s9, %s24405_s26  ;;  %p24412_p8 = scmp.lt.u32.totalorder %s24405_s26, %s28809_s9 }
  0x24   : > { %p24408_p2 = pnand %p24406_p6, %p24379_p7 }
  0x26   : > { %p24409_p3 = pneg %p24408_p2 }
  0x28   : > { %p24414_p9 = pnand %p24412_p8, %p24409_p3 }
  0x2a   : > { %24417 = shalt.err (!%p24414_p9)
}
  0x2b   : > { %s24418_s20 = scalar_lea.vmem %s24555_s23, 2048  ;;  %p24426_p13 = scmp.lt.s32.totalorder %s24555_s23, %s24555_s23 }
  0x2c   : > { %p24419_p10 = scmp.ne.s32.totalorder %s24555_s23, %s24418_s20  ;;  %p24427_p0 = scmp.lt.s32.totalorder %s24418_s20, %s24418_s20 }
  0x2e   : > { %p24421_p11 = pnand %p24419_p10, %p24379_p7  ;;  %p24428_p1 = por %p24427_p0, %p24426_p13 }
  0x30   : > { %p24422_p12 = pneg %p24421_p11 }
  0x32   : > { %p24429_p4 = pnand %p24428_p1, %p24422_p12 }
  0x34   : > { %24432 = shalt.err (!%p24429_p4)
}
  0x35   : > { %24341 = dma.hbm_to_vmem [thread:$0]  (!%p24551_p5), %s28809_s9, 2048, %s24555_s23, [#allocation9], %s24467_s14, %s24467_s14, %s24468_s15  }
  0x36   : > { %p28816_p6 = scmp.ne.s32.totalorder %s28814_s21, 0 }
  0x37   : > { %p28817_p2 = scmp.eq.s32.totalorder (!%p28816_p6), %s24538_s18, 0 }
  0x38   : > { %363 = sbr.rel (%p28816_p6) target bundleno = 2537 (0x9e9), region = 64 }
  0x3f   : > { %24446 = dma.done.wait (%p28817_p2), [#allocation7], 51200   ;;  %p28818_p7 = pmov %p28817_p2 }
  0x40   : > { %p28819_p3 = pmov %p28817_p2 }
  0x41   : > { %24448 = vsyncadd (%p28818_p7), [#allocation7], 4294916096 }
  0x42   : > { %24450 = dma.done.wait (%p28819_p3), [#allocation9], 2048   ;;  %p28820_p8 = pmov %p28817_p2 }
  0x43   : > { %p406_p9 = scmp.lt.s32.totalorder %s24538_s18, 1  ;;  %s24626_s25 = smov 0  }
  0x44   : > { %24452 = vsyncadd (%p28820_p8), [#allocation9], 4294965248 }
  0x45   : > { %s28822_s18 = smov (!%p406_p9, %s24538_s18), 1 }
  0x46   : > { %s24326_s23 = smul.u32 1160, %s28822_s18  ;;  %s13880_s24 = sshll.u32 %s28822_s18, 3 }
  0x47   : > { %s24619_s15 = scalar_lea.vmem %s28811_s11, %s13880_s24 }
  0x48   : > { %s24624_s22 = scalar_lea.vmem %s28800_s0, %s24326_s23 }
  0x49 LB: >> { %v13899_v0 = vld [vmem:[%s28801_s1 + $0x80] sm:$0xff]  ;;  %v13900_v1 = vld [vmem:[%s28801_s1 + $0x88] sm:$0xff]  ;;  %v13901_v5 = vld [vmem:[%s28801_s1 + $0x90] sm:$0xff]  ;;  %s13881_s23 = sshll.u32 %s24459_s25, 7  ;;  %s420_s25 = sadd.s32 1, %s24459_s25   ;;  %s24459_s25 = sphi %s24626_s25, %s420_s25  }
  0x4a   : >> { %v14262_v2 = vld [vmem:[%s28801_s1 + $0x600] sm:$0xff]  ;;  %v21278_v3 = vpack.c.bf16 %v13900_v1, %v13899_v0  ;;  %v14263_v4 = vld [vmem:[%s28801_s1 + $0x608] sm:$0xff]  ;;  %v13902_v6 = vld [vmem:[%s28801_s1 + $0x98] sm:$0xff]  ;;  %s24683_s28 = scalar_lea.vmem %s24624_s22, %s13881_s23  ;;  %s26498_s20 = scalar_lea.vmem [#allocation2], %s13881_s23 }
  0x4b   : >> { %v21662_v7 = vpack.c.bf16 %v14263_v4, %v14262_v2  ;;  %v21282_v8 = vpack.c.bf16 %v13902_v6, %v13901_v5  ;;  %v14264_v9 = vld [vmem:[%s28801_s1 + $0x610] sm:$0xff]  ;;  %v14265_v10 = vld [vmem:[%s28801_s1 + $0x618] sm:$0xff]  ;;  %v13903_v11 = vld [vmem:[%s28801_s1 + $0xa0] sm:$0xff]  ;;  %p417_p5 = scmp.ge.s32.totalorder %s420_s25, 8  }
  0x4c   : >> { %21279 = vmatprep.subr.bf16.mxu1 %v21278_v3  ;;  %v21666_v12 = vpack.c.bf16 %v14265_v10, %v14264_v9  ;;  %v13904_v13 = vld [vmem:[%s28801_s1 + $0xa8] sm:$0xff]  ;;  %v14266_v14 = vld [vmem:[%s28801_s1 + $0x620] sm:$0xff]  ;;  %v13905_v18 = vld [vmem:[%s28801_s1 + $0xb0] sm:$0xff]  ;;  %s26536_s22 = smov (%p417_p5), 0  }
  0x4d   : >> { %v14267_v15 = vld [vmem:[%s28801_s1 + $0x628] sm:$0xff]  ;;  %21663 = vmatprep.subr.bf16.mxu0 %v21662_v7  ;;  %21281 = vmatpush3.bf16.msra.mxu1 %v21278_v3  ;;  %v21286_v16 = vpack.c.bf16 %v13904_v13, %v13903_v11  ;;  %v13906_v19 = vld [vmem:[%s28801_s1 + $0xb8] sm:$0xff]  ;;  %v14268_v20 = vld [vmem:[%s28801_s1 + $0x630] sm:$0xff] }
  0x4e   : >> { %21665 = vmatpush3.bf16.msra.mxu0 %v21662_v7  ;;  %21283 = vmatprep.subr.bf16.mxu1 %v21282_v8  ;;  %v21670_v17 = vpack.c.bf16 %v14267_v15, %v14266_v14  ;;  %v14269_v21 = vld [vmem:[%s28801_s1 + $0x638] sm:$0xff]  ;;  %v21290_v22 = vpack.c.bf16 %v13906_v19, %v13905_v18  ;;  %v13907_v24 = vld [vmem:[%s28801_s1 + $0xc0] sm:$0xff]  ;;  %v13908_v25 = vld [vmem:[%s28801_s1 + $0xc8] sm:$0xff] }
  0x4f   : >> { %21667 = vmatprep.subr.bf16.mxu0 %v21666_v12  ;;  %v21674_v23 = vpack.c.bf16 %v14269_v21, %v14268_v20  ;;  %v13883_v26 = vld [vmem:[%s24683_s28 + $0x1] sm:$0xff]  ;;  %v21294_v30 = vpack.c.bf16 %v13908_v25, %v13907_v24  ;;  %v13909_v32 = vld [vmem:[%s28801_s1 + $0xd0] sm:$0xff]  ;;  %v13910_v33 = vld [vmem:[%s28801_s1 + $0xd8] sm:$0xff] }
  0x50   : >> { %v14270_v27 = vld [vmem:[%s28801_s1 + $0x640] sm:$0xff]  ;;  %v14271_v28 = vld [vmem:[%s28801_s1 + $0x648] sm:$0xff]  ;;  %17565 = vmatprep.mubr.f32.mxu1 %v13883_v26  ;;  %v14272_v34 = vld [vmem:[%s28801_s1 + $0x650] sm:$0xff]  ;;  %v21298_v36 = vpack.c.bf16 %v13910_v33, %v13909_v32 }
  0x51   : >> { %21285 = vmatpush3.bf16.msra.mxu1 %v21282_v8  ;;  %v24699_v29 = vld [vmem:[%s24683_s28 + $0x42] sm:$0xff]  ;;  %v21678_v31 = vpack.c.bf16 %v14271_v28, %v14270_v27  ;;  %v14273_v35 = vld [vmem:[%s28801_s1 + $0x658] sm:$0xff]  ;;  %v13913_v44 = vld [vmem:[%s28801_s1 + $0xf0] sm:$0xff] }
  0x52   : >> { %21669 = vmatpush3.bf16.msra.mxu0 %v21666_v12  ;;  %21287 = vmatprep.subr.bf16.mxu1 %v21286_v16  ;;  %v21682_v37 = vpack.c.bf16 %v14273_v35, %v14272_v34  ;;  %v13911_v38 = vld [vmem:[%s28801_s1 + $0xe0] sm:$0xff]  ;;  %v13912_v39 = vld [vmem:[%s28801_s1 + $0xe8] sm:$0xff]  ;;  %v13914_v45 = vld [vmem:[%s28801_s1 + $0xf8] sm:$0xff] }
  0x53   : >> { %21671 = vmatprep.subr.bf16.mxu0 %v21670_v17  ;;  %18237 = vmatprep.mubr.f32.mxu0 %v24699_v29  ;;  %v14274_v40 = vld [vmem:[%s28801_s1 + $0x660] sm:$0xff]  ;;  %v14275_v41 = vld [vmem:[%s28801_s1 + $0x668] sm:$0xff]  ;;  %v21302_v42 = vpack.c.bf16 %v13912_v39, %v13911_v38  ;;  %v14276_v46 = vld [vmem:[%s28801_s1 + $0x670] sm:$0xff]  ;;  %v21306_v48 = vpack.c.bf16 %v13914_v45, %v13913_v44 }
  0x54   : >> { %v21686_v43 = vpack.c.bf16 %v14275_v41, %v14274_v40  ;;  %v14277_v47 = vld [vmem:[%s28801_s1 + $0x678] sm:$0xff]  ;;  %v439_v50 = vld [vmem:[%s28801_s1] sm:$0xff]  ;;  %v440_v51 = vld [vmem:[%s28801_s1 + $0x8] sm:$0xff] }
  0x55   : >> { %21289 = vmatpush3.bf16.msra.mxu1 %v21286_v16  ;;  %v21690_v49 = vpack.c.bf16 %v14277_v47, %v14276_v46  ;;  %v14295_v52 = vld [vmem:[%s28801_s1 + $0x680] sm:$0xff]  ;;  %v14296_v53 = vld [vmem:[%s28801_s1 + $0x688] sm:$0xff]  ;;  %v21310_v54 = vpack.c.bf16 %v440_v51, %v439_v50  ;;  %v441_v56 = vld [vmem:[%s28801_s1 + $0x10] sm:$0xff] }
  0x56   : >> { %21673 = vmatpush3.bf16.msra.mxu0 %v21670_v17  ;;  %21291 = vmatprep.subr.bf16.mxu1 %v21290_v22  ;;  %v21694_v55 = vpack.c.bf16 %v14296_v53, %v14295_v52  ;;  %v442_v57 = vld [vmem:[%s28801_s1 + $0x18] sm:$0xff]  ;;  %v13884_v58 = vld [vmem:[%s24683_s28 + $0x9] sm:$0xff]  ;;  %v443_v2 = vld [vmem:[%s28801_s1 + $0x20] sm:$0xff] }
  0x57   : >> { %21675 = vmatprep.subr.bf16.mxu0 %v21674_v23  ;;  %v14297_v59 = vld [vmem:[%s28801_s1 + $0x690] sm:$0xff]  ;;  %v14298_v60 = vld [vmem:[%s28801_s1 + $0x698] sm:$0xff]  ;;  %v21314_v63 = vpack.c.bf16 %v442_v57, %v441_v56  ;;  %v444_v3 = vld [vmem:[%s28801_s1 + $0x28] sm:$0xff] }
  0x58   : >> { %v24764_v61 = vld [vmem:[%s24683_s28 + $0x4a] sm:$0xff]  ;;  %v24768_v0 = vld [vmem:[%s24683_s28 + $0x52] sm:$0xff]  ;;  %v21698_v1 = vpack.c.bf16 %v14298_v60, %v14297_v59  ;;  %v14299_v5 = vld [vmem:[%s28801_s1 + $0x6a0] sm:$0xff]  ;;  %v21318_v9 = vpack.c.bf16 %v444_v3, %v443_v2 }
  0x59   : >> { %21293 = vmatpush3.bf16.msra.mxu1 %v21290_v22  ;;  %v13885_v62 = vld [vmem:[%s24683_s28 + $0x11] sm:$0xff]  ;;  %v13886_v4 = vld [vmem:[%s24683_s28 + $0x19] sm:$0xff]  ;;  %v14300_v6 = vld [vmem:[%s28801_s1 + $0x6a8] sm:$0xff] }
  0x5a   : >> { %21677 = vmatpush3.bf16.msra.mxu0 %v21674_v23  ;;  %21295 = vmatprep.subr.bf16.mxu1 %v21294_v30  ;;  %v24785_v7 = vld [vmem:[%s24683_s28 + $0x5a] sm:$0xff]  ;;  %v24790_v10 = vld [vmem:[%s24683_s28 + $0x62] sm:$0xff]  ;;  %v21702_v11 = vpack.c.bf16 %v14300_v6, %v14299_v5  ;;  %v445_v12 = vld [vmem:[%s28801_s1 + $0x30] sm:$0xff] }
  0x5b   : >> { %21679 = vmatprep.subr.bf16.mxu0 %v21678_v31  ;;  %v13887_v8 = vld [vmem:[%s24683_s28 + $0x21] sm:$0xff]  ;;  %v446_v13 = vld [vmem:[%s28801_s1 + $0x38] sm:$0xff]  ;;  %v13888_v14 = vld [vmem:[%s24683_s28 + $0x29] sm:$0xff] }
  0x5c   : >> { %v14301_v15 = vld [vmem:[%s28801_s1 + $0x6b0] sm:$0xff]  ;;  %v14302_v16 = vld [vmem:[%s28801_s1 + $0x6b8] sm:$0xff]  ;;  %v21322_v19 = vpack.c.bf16 %v446_v13, %v445_v12  ;;  %v447_v22 = vld [vmem:[%s28801_s1 + $0x40] sm:$0xff] }
  0x5d   : >> { %21297 = vmatpush3.bf16.msra.mxu1 %v21294_v30  ;;  %v24807_v17 = vld [vmem:[%s24683_s28 + $0x6a] sm:$0xff]  ;;  %v24812_v20 = vld [vmem:[%s24683_s28 + $0x72] sm:$0xff]  ;;  %v21706_v21 = vpack.c.bf16 %v14302_v16, %v14301_v15  ;;  %v14303_v25 = vld [vmem:[%s28801_s1 + $0x6c0] sm:$0xff] }
  0x5e   : >> { %21681 = vmatpush3.bf16.msra.mxu0 %v21678_v31  ;;  %21299 = vmatprep.subr.bf16.mxu1 %v21298_v36  ;;  %v13889_v18 = vld [vmem:[%s24683_s28 + $0x31] sm:$0xff]  ;;  %v448_v23 = vld [vmem:[%s28801_s1 + $0x48] sm:$0xff]  ;;  %v13890_v24 = vld [vmem:[%s24683_s28 + $0x39] sm:$0xff] }
  0x5f   : >> { %21683 = vmatprep.subr.bf16.mxu0 %v21682_v37  ;;  %v14304_v26 = vld [vmem:[%s28801_s1 + $0x6c8] sm:$0xff]  ;;  %v24829_v27 = vld [vmem:[%s24683_s28 + $0x7a] sm:$0xff]  ;;  %v21326_v30 = vpack.c.bf16 %v448_v23, %v447_v22  ;;  %v449_v33 = vld [vmem:[%s28801_s1 + $0x50] sm:$0xff] }
  0x60   : >> { %v13891_v28 = vld [vmem:[%s24683_s28 + $0x41] sm:$0xff]  ;;  %v21710_v32 = vpack.c.bf16 %v14304_v26, %v14303_v25  ;;  %v450_v34 = vld [vmem:[%s28801_s1 + $0x58] sm:$0xff]  ;;  %v13892_v35 = vld [vmem:[%s24683_s28 + $0x49] sm:$0xff] }
  0x61   : >> { %21301 = vmatpush3.bf16.msra.mxu1 %v21298_v36  ;;  %v14254_v31 = vld [vmem:[%s24683_s28 + $0x82] sm:$0xff]  ;;  %v14305_v36 = vld [vmem:[%s28801_s1 + $0x6d0] sm:$0xff]  ;;  %v21330_v40 = vpack.c.bf16 %v450_v34, %v449_v33  ;;  %v13894_v45 = vld [vmem:[%s24683_s28 + $0x59] sm:$0xff] }
  0x62   : >> { %21685 = vmatpush3.bf16.msra.mxu0 %v21682_v37  ;;  %21303 = vmatprep.subr.bf16.mxu1 %v21302_v42  ;;  %v14306_v37 = vld [vmem:[%s28801_s1 + $0x6d8] sm:$0xff]  ;;  %v14255_v38 = vld [vmem:[%s24683_s28 + $0x8a] sm:$0xff]  ;;  %v14307_v46 = vld [vmem:[%s28801_s1 + $0x6e0] sm:$0xff] }
  0x63   : >> { %21687 = vmatprep.subr.bf16.mxu0 %v21686_v43  ;;  %v13893_v39 = vld [vmem:[%s24683_s28 + $0x51] sm:$0xff]  ;;  %v452_v44 = vld [vmem:[%s28801_s1 + $0x68] sm:$0xff]  ;;  %v24898_v3 = vld [vmem:[%s24683_s28 + $0x79] sm:$0xff] }
  0x64   : >> { %v14256_v41 = vld [vmem:[%s24683_s28 + $0x92] sm:$0xff]  ;;  %v14308_v47 = vld [vmem:[%s28801_s1 + $0x6e8] sm:$0xff]  ;;  %v14261_v6 = vld [vmem:[%s24683_s28 + $0xba] sm:$0xff] }
  0x65   : >> { %21305 = vmatpush3.bf16.msra.mxu1 %v21302_v42  ;;  %v21714_v42 = vpack.c.bf16 %v14306_v37, %v14305_v36  ;;  %v14258_v51 = vld [vmem:[%s24683_s28 + $0xa2] sm:$0xff]  ;;  %v21718_v52 = vpack.c.bf16 %v14308_v47, %v14307_v46  ;;  %v453_v53 = vld [vmem:[%s28801_s1 + $0x70] sm:$0xff]  ;;  %v14310_v57 = vld [vmem:[%s28801_s1 + $0x6f8] sm:$0xff] }
  0x66   : >> { %21689 = vmatpush3.bf16.msra.mxu0 %v21686_v43  ;;  %21307 = vmatprep.subr.bf16.mxu1 %v21306_v48  ;;  %v451_v43 = vld [vmem:[%s28801_s1 + $0x60] sm:$0xff]  ;;  %v14309_v56 = vld [vmem:[%s28801_s1 + $0x6f0] sm:$0xff]  ;;  %v13933_v2 = vld [vmem:[%s28801_s1 + $0x108] sm:$0xff] }
  0x67   : >> { %21691 = vmatprep.subr.bf16.mxu0 %v21690_v49  ;;  %v21334_v50 = vpack.c.bf16 %v452_v44, %v451_v43  ;;  %v24887_v59 = vld [vmem:[%s24683_s28 + $0x71] sm:$0xff]  ;;  %v14329_v5 = vld [vmem:[%s28801_s1 + $0x708] sm:$0xff]  ;;  %v13936_v25 = vld [vmem:[%s28801_s1 + $0x120] sm:$0xff] }
  0x68   : >> { %v13934_v13 = vld [vmem:[%s28801_s1 + $0x110] sm:$0xff]  ;;  %v424_v15 = vld [vmem:[%s24683_s28 + $0x8] sm:$0xff]  ;;  %v427_v33 = vld [vmem:[%s24683_s28 + $0x20] sm:$0xff] }
  0x69   : >> { %21309 = vmatpush3.bf16.msra.mxu1 %v21306_v48  ;;  %v14257_v48 = vld [vmem:[%s24683_s28 + $0x9a] sm:$0xff]  ;;  %v14330_v16 = vld [vmem:[%s28801_s1 + $0x710] sm:$0xff]  ;;  %v13937_v26 = vld [vmem:[%s28801_s1 + $0x128] sm:$0xff] }
  0x6a   : >> { %21693 = vmatpush3.bf16.msra.mxu0 %v21690_v49  ;;  %21311 = vmatprep.subr.bf16.mxu1 %v21310_v54  ;;  %v24866_v49 = vld [vmem:[%s24683_s28 + $0x61] sm:$0xff]  ;;  %v24932_v23 = vld [vmem:[%s24683_s28 + $0x53] sm:$0xff]  ;;  %v21350_v34 = vpack.c.bf16 %v13937_v26, %v13936_v25 }
  0x6b   : >> { %21695 = vmatprep.subr.bf16.mxu0 %v21694_v55  ;;  %v13938_v37 = vld [vmem:[%s28801_s1 + $0x130] sm:$0xff]  ;;  %v13940_v47 = vld [vmem:[%s28801_s1 + $0x140] sm:$0xff] }
  0x6c   : >> { %17566 = vmatmul.mubr.f32.vlgmr.msra.gmra.mrb[0].mxu1 %v13884_v58  ;;  %v14259_v58 = vld [vmem:[%s24683_s28 + $0xaa] sm:$0xff] }
  0x6d   : >> { %18238 = vmatmul.mubr.f32.vlgmr.msra.gmra.mrb[0].mxu0 %v24764_v61  ;;  %21313 = vmatpush3.bf16.msra.mxu1 %v21310_v54  ;;  %v454_v54 = vld [vmem:[%s28801_s1 + $0x78] sm:$0xff]  ;;  %v429_v43 = vld [vmem:[%s24683_s28 + $0x30] sm:$0xff] }
  0x6e   : >> { %21697 = vmatpush3.bf16.msra.mxu0 %v21694_v55  ;;  %17568 = vmatprep.mubr.f32.mxu1 %v13885_v62  ;;  %v24876_v55 = vld [vmem:[%s24683_s28 + $0x69] sm:$0xff]  ;;  %v21338_v60 = vpack.c.bf16 %v454_v54, %v453_v53  ;;  %v14260_v62 = vld [vmem:[%s24683_s28 + $0xb2] sm:$0xff]  ;;  %v24993_v53 = vld [vmem:[%s24683_s28 + $0x7b] sm:$0xff] }
  0x6f   : >> { %18240 = vmatprep.mubr.f32.mxu0 %v24768_v0  ;;  %21315 = vmatprep.subr.bf16.mxu1 %v21314_v63  ;;  %v431_v54 = vld [vmem:[%s24683_s28 + $0x40] sm:$0xff]  ;;  %v13946_v26 = vld [vmem:[%s28801_s1 + $0x170] sm:$0xff] }
  0x70   : >> { %17569 = vmatmul.mubr.f32.gmra.mrb[2].mxu1 %v13886_v4  ;;  %21699 = vmatprep.subr.bf16.mxu0 %v21698_v1  ;;  %v14328_v4 = vld [vmem:[%s28801_s1 + $0x700] sm:$0xff] }
  0x71   : >> { %18241 = vmatmul.mubr.f32.gmra.mrb[2].mxu0 %v24785_v7  ;;  %21317 = vmatpush3.bf16.msra.mxu1 %v21314_v63  ;;  %v21722_v63 = vpack.c.bf16 %v14310_v57, %v14309_v56  ;;  %v21726_v12 = vpack.c.bf16 %v14329_v5, %v14328_v4  ;;  %v14287_v57 = vld [vmem:[%s24683_s28 + $0x83] sm:$0xff]  ;;  %v14288_v4 = vld [vmem:[%s24683_s28 + $0x8b] sm:$0xff] }
  0x72   : >> { %21701 = vmatpush3.bf16.msra.mxu0 %v21698_v1  ;;  %17571 = vmatprep.mubr.f32.mxu1 %v13887_v8  ;;  %v13932_v1 = vld [vmem:[%s28801_s1 + $0x100] sm:$0xff]  ;;  %v433_v5 = vld [vmem:[%s24683_s28 + $0x50] sm:$0xff] }
  0x73   : >> { %18243 = vmatprep.mubr.f32.mxu0 %v24790_v10  ;;  %21319 = vmatprep.subr.bf16.mxu1 %v21318_v9  ;;  %v423_v8 = vld [vmem:[%s24683_s28] sm:$0xff] }
  0x74   : >> { %17572 = vmatmul.mubr.f32.gmra.mrb[4].mxu1 %v13888_v14  ;;  %21703 = vmatprep.subr.bf16.mxu0 %v21702_v11  ;;  %v13935_v14 = vld [vmem:[%s28801_s1 + $0x118] sm:$0xff] }
  0x75   : >> { %18244 = vmatmul.mubr.f32.gmra.mrb[4].mxu0 %v24807_v17  ;;  %21321 = vmatpush3.bf16.msra.mxu1 %v21318_v9  ;;  %v21342_v9 = vpack.c.bf16 %v13933_v2, %v13932_v1  ;;  %v21346_v22 = vpack.c.bf16 %v13935_v14, %v13934_v13  ;;  %v14338_v1 = vld [vmem:[%s28801_s1 + $0x750] sm:$0xff]  ;;  %v14339_v2 = vld [vmem:[%s28801_s1 + $0x758] sm:$0xff]  ;;  %v13945_v13 = vld [vmem:[%s28801_s1 + $0x168] sm:$0xff] }
  0x76   : >> { %21705 = vmatpush3.bf16.msra.mxu0 %v21702_v11  ;;  %17574 = vmatprep.mubr.f32.mxu1 %v13889_v18  ;;  %v24911_v11 = vld [vmem:[%s24683_s28 + $0x43] sm:$0xff]  ;;  %v14331_v18 = vld [vmem:[%s28801_s1 + $0x718] sm:$0xff] }
  0x77   : >> { %18246 = vmatprep.mubr.f32.mxu0 %v24812_v20  ;;  %21323 = vmatprep.subr.bf16.mxu1 %v21322_v19  ;;  %v434_v14 = vld [vmem:[%s24683_s28 + $0x58] sm:$0xff] }
  0x78   : >> { %17575 = vmatmul.mubr.f32.gmra.mrb[6].mxu1 %v13890_v24  ;;  %21707 = vmatprep.subr.bf16.mxu0 %v21706_v21  ;;  %v21730_v24 = vpack.c.bf16 %v14331_v18, %v14330_v16  ;;  %v14341_v16 = vld [vmem:[%s28801_s1 + $0x768] sm:$0xff]  ;;  %v14290_v18 = vld [vmem:[%s24683_s28 + $0x9b] sm:$0xff] }
  0x79   : >> { %18247 = vmatmul.mubr.f32.gmra.mrb[6].mxu0 %v24829_v27  ;;  %21325 = vmatpush3.bf16.msra.mxu1 %v21322_v19  ;;  %v24927_v19 = vld [vmem:[%s24683_s28 + $0x4b] sm:$0xff] }
  0x7a   : >> { %21709 = vmatpush3.bf16.msra.mxu0 %v21706_v21  ;;  %17577 = vmatprep.mubr.f32.mxu1 %v13891_v28  ;;  %v425_v21 = vld [vmem:[%s24683_s28 + $0x10] sm:$0xff]  ;;  %v426_v28 = vld [vmem:[%s24683_s28 + $0x18] sm:$0xff] }
  0x7b   : >> { %18249 = vmatprep.mubr.f32.mxu0 %v14254_v31  ;;  %21327 = vmatprep.subr.bf16.mxu1 %v21326_v30  ;;  %v14333_v31 = vld [vmem:[%s28801_s1 + $0x728] sm:$0xff] }
  0x7c   : >> { %17578 = vmatmul.mubr.f32.gmra.mrb[8].mxu1 %v13892_v35  ;;  %21711 = vmatprep.subr.bf16.mxu0 %v21710_v32  ;;  %v24954_v35 = vld [vmem:[%s24683_s28 + $0x63] sm:$0xff] }
  0x7d   : >> { %18250 = vmatmul.mubr.f32.gmra.mrb[8].mxu0 %v14255_v38  ;;  %21329 = vmatpush3.bf16.msra.mxu1 %v21326_v30  ;;  %v14332_v30 = vld [vmem:[%s28801_s1 + $0x720] sm:$0xff]  ;;  %v13939_v38 = vld [vmem:[%s28801_s1 + $0x138] sm:$0xff] }
  0x7e   : >> { %21713 = vmatpush3.bf16.msra.mxu0 %v21710_v32  ;;  %17580 = vmatprep.mubr.f32.mxu1 %v13893_v39  ;;  %v24949_v32 = vld [vmem:[%s24683_s28 + $0x5b] sm:$0xff]  ;;  %v21734_v36 = vpack.c.bf16 %v14333_v31, %v14332_v30  ;;  %v428_v39 = vld [vmem:[%s24683_s28 + $0x28] sm:$0xff]  ;;  %v21354_v44 = vpack.c.bf16 %v13939_v38, %v13938_v37  ;;  %v14342_v31 = vld [vmem:[%s28801_s1 + $0x770] sm:$0xff] }
  0x7f   : >> { %18252 = vmatprep.mubr.f32.mxu0 %v14256_v41  ;;  %21331 = vmatprep.subr.bf16.mxu1 %v21330_v40  ;;  %v14335_v41 = vld [vmem:[%s28801_s1 + $0x738] sm:$0xff]  ;;  %v25040_v30 = vld [vmem:[%s24683_s28 + $0x68] sm:$0xff] }
  0x80   : >> { %17581 = vmatmul.mubr.f32.gmra.mrb[10].mxu1 %v13894_v45  ;;  %21715 = vmatprep.subr.bf16.mxu0 %v21714_v42  ;;  %v24976_v45 = vld [vmem:[%s24683_s28 + $0x73] sm:$0xff] }
  0x81   : >> { %18253 = vmatmul.mubr.f32.gmra.mrb[10].mxu0 %v14257_v48  ;;  %21333 = vmatpush3.bf16.msra.mxu1 %v21330_v40  ;;  %v14334_v40 = vld [vmem:[%s28801_s1 + $0x730] sm:$0xff]  ;;  %v13941_v48 = vld [vmem:[%s28801_s1 + $0x148] sm:$0xff] }
  0x82   : >> { %21717 = vmatpush3.bf16.msra.mxu0 %v21714_v42  ;;  %17583 = vmatprep.mubr.f32.mxu1 %v24866_v49  ;;  %v24971_v42 = vld [vmem:[%s24683_s28 + $0x6b] sm:$0xff]  ;;  %v21738_v46 = vpack.c.bf16 %v14335_v41, %v14334_v40  ;;  %v21358_v56 = vpack.c.bf16 %v13941_v48, %v13940_v47  ;;  %v14293_v38 = vld [vmem:[%s24683_s28 + $0xb3] sm:$0xff]  ;;  %v13965_v40 = vld [vmem:[%s28801_s1 + $0x180] sm:$0xff] }
  0x83   : >> { %18255 = vmatprep.mubr.f32.mxu0 %v14258_v51  ;;  %21335 = vmatprep.subr.bf16.mxu1 %v21334_v50  ;;  %v14336_v51 = vld [vmem:[%s28801_s1 + $0x740] sm:$0xff]  ;;  %v13966_v41 = vld [vmem:[%s28801_s1 + $0x188] sm:$0xff] }
  0x84   : >> { %17584 = vmatmul.mubr.f32.gmra.mrb[12].mxu1 %v24876_v55  ;;  %21719 = vmatprep.subr.bf16.mxu0 %v21718_v52  ;;  %v14294_v47 = vld [vmem:[%s24683_s28 + $0xbb] sm:$0xff] }
  0x85   : >> { %18256 = vmatmul.mubr.f32.gmra.mrb[12].mxu0 %v14259_v58  ;;  %21337 = vmatpush3.bf16.msra.mxu1 %v21334_v50  ;;  %v430_v50 = vld [vmem:[%s24683_s28 + $0x38] sm:$0xff]  ;;  %v13916_v48 = vld [vmem:[%s24683_s28 + $0x2] sm:$0xff] }
  0x86   : >> { %21721 = vmatpush3.bf16.msra.mxu0 %v21718_v52  ;;  %17586 = vmatprep.mubr.f32.mxu1 %v24887_v59  ;;  %v14337_v52 = vld [vmem:[%s28801_s1 + $0x748] sm:$0xff] }
  0x87   : >> { %18258 = vmatprep.mubr.f32.mxu0 %v14260_v62  ;;  %21339 = vmatprep.subr.bf16.mxu1 %v21338_v60  ;;  %v21742_v58 = vpack.c.bf16 %v14337_v52, %v14336_v51  ;;  %v13943_v62 = vld [vmem:[%s28801_s1 + $0x158] sm:$0xff]  ;;  %v25075_v51 = vld [vmem:[%s24683_s28 + $0x44] sm:$0xff] }
  0x88   : >> { %17587 = vmatmul.mubr.f32.gmra.mrb[14].mxu1 %v24898_v3  ;;  %21723 = vmatprep.subr.bf16.mxu0 %v21722_v63 }
  0x89   : >> { %18259 = vmatmul.mubr.f32.gmra.mrb[14].mxu0 %v14261_v6  ;;  %21341 = vmatpush3.bf16.msra.mxu1 %v21338_v60  ;;  %v13942_v60 = vld [vmem:[%s28801_s1 + $0x150] sm:$0xff] }
  0x8a   : >> { %21725 = vmatpush3.bf16.msra.mxu0 %v21722_v63  ;;  %17621 = vmatprep.mubr.f32.mxu1 %v423_v8  ;;  %v432_v63 = vld [vmem:[%s24683_s28 + $0x48] sm:$0xff]  ;;  %v21362_v6 = vpack.c.bf16 %v13943_v62, %v13942_v60  ;;  %v14289_v8 = vld [vmem:[%s24683_s28 + $0x93] sm:$0xff] }
  0x8b   : >> { %18293 = vmatprep.mubr.f32.mxu0 %v24911_v11  ;;  %21343 = vmatprep.subr.bf16.mxu1 %v21342_v9  ;;  %v14364_v60 = vld [vmem:[%s28801_s1 + $0x798] sm:$0xff]  ;;  %v25091_v62 = vld [vmem:[%s24683_s28 + $0x4c] sm:$0xff] }
  0x8c   : >> { %17622 = vmatmul.mubr.f32.vlgmr.msra.gmra.mrb[0].mxu1 %v424_v15  ;;  %21727 = vmatprep.subr.bf16.mxu0 %v21726_v12  ;;  %v14340_v15 = vld [vmem:[%s28801_s1 + $0x760] sm:$0xff] }
  0x8d   : >> { %18294 = vmatmul.mubr.f32.vlgmr.msra.gmra.mrb[0].mxu0 %v24927_v19  ;;  %21345 = vmatpush3.bf16.msra.mxu1 %v21342_v9  ;;  %v21746_v9 = vpack.c.bf16 %v14339_v2, %v14338_v1  ;;  %v21750_v25 = vpack.c.bf16 %v14341_v16, %v14340_v15  ;;  %v25096_v2 = vld [vmem:[%s24683_s28 + $0x54] sm:$0xff]  ;;  %v25118_v16 = vld [vmem:[%s24683_s28 + $0x64] sm:$0xff] }
  0x8e   : >> { %21729 = vmatpush3.bf16.msra.mxu0 %v21726_v12  ;;  %17624 = vmatprep.mubr.f32.mxu1 %v425_v21  ;;  %v13944_v12 = vld [vmem:[%s28801_s1 + $0x160] sm:$0xff] }
  0x8f   : >> { %18296 = vmatprep.mubr.f32.mxu0 %v24932_v23  ;;  %21347 = vmatprep.subr.bf16.mxu1 %v21346_v22  ;;  %v25030_v21 = vld [vmem:[%s24683_s28 + $0x60] sm:$0xff] }
  0x90   : >> { %17625 = vmatmul.mubr.f32.gmra.mrb[2].mxu1 %v426_v28  ;;  %21731 = vmatprep.subr.bf16.mxu0 %v21730_v24  ;;  %v13947_v28 = vld [vmem:[%s28801_s1 + $0x178] sm:$0xff] }
  0x91   : >> { %18297 = vmatmul.mubr.f32.gmra.mrb[2].mxu0 %v24949_v32  ;;  %21349 = vmatpush3.bf16.msra.mxu1 %v21346_v22  ;;  %v21366_v22 = vpack.c.bf16 %v13945_v13, %v13944_v12  ;;  %v21370_v37 = vpack.c.bf16 %v13947_v28, %v13946_v26  ;;  %v14366_v12 = vld [vmem:[%s28801_s1 + $0x7a8] sm:$0xff]  ;;  %v25113_v13 = vld [vmem:[%s24683_s28 + $0x5c] sm:$0xff]  ;;  %v14367_v26 = vld [vmem:[%s28801_s1 + $0x7b0] sm:$0xff] }
  0x92   : >> { %21733 = vmatpush3.bf16.msra.mxu0 %v21730_v24  ;;  %17627 = vmatprep.mubr.f32.mxu1 %v427_v33  ;;  %v14291_v24 = vld [vmem:[%s24683_s28 + $0xa3] sm:$0xff]  ;;  %v14343_v33 = vld [vmem:[%s28801_s1 + $0x778] sm:$0xff] }
  0x93   : >> { %18299 = vmatprep.mubr.f32.mxu0 %v24954_v35  ;;  %21351 = vmatprep.subr.bf16.mxu1 %v21350_v34  ;;  %v14368_v28 = vld [vmem:[%s28801_s1 + $0x7b8] sm:$0xff] }
  0x94   : >> { %17628 = vmatmul.mubr.f32.gmra.mrb[4].mxu1 %v428_v39  ;;  %21735 = vmatprep.subr.bf16.mxu0 %v21734_v36  ;;  %v21754_v39 = vpack.c.bf16 %v14343_v33, %v14342_v31  ;;  %v25135_v31 = vld [vmem:[%s24683_s28 + $0x6c] sm:$0xff] }
  0x95   : >> { %18300 = vmatmul.mubr.f32.gmra.mrb[4].mxu0 %v24971_v42  ;;  %21353 = vmatpush3.bf16.msra.mxu1 %v21350_v34  ;;  %v14292_v34 = vld [vmem:[%s24683_s28 + $0xab] sm:$0xff] }
  0x96   : >> { %21737 = vmatpush3.bf16.msra.mxu0 %v21734_v36  ;;  %17630 = vmatprep.mubr.f32.mxu1 %v429_v43  ;;  %v25051_v36 = vld [vmem:[%s24683_s28 + $0x70] sm:$0xff]  ;;  %v25062_v43 = vld [vmem:[%s24683_s28 + $0x78] sm:$0xff] }
  0x97   : >> { %18302 = vmatprep.mubr.f32.mxu0 %v24976_v45  ;;  %21355 = vmatprep.subr.bf16.mxu1 %v21354_v44  ;;  %v13922_v33 = vld [vmem:[%s24683_s28 + $0x32] sm:$0xff] }
  0x98   : >> { %17631 = vmatmul.mubr.f32.gmra.mrb[6].mxu1 %v430_v50  ;;  %21739 = vmatprep.subr.bf16.mxu0 %v21738_v46  ;;  %v21374_v50 = vpack.c.bf16 %v13966_v41, %v13965_v40  ;;  %v13974_v40 = vld [vmem:[%s28801_s1 + $0x1c8] sm:$0xff]  ;;  %v13923_v41 = vld [vmem:[%s24683_s28 + $0x3a] sm:$0xff] }
  0x99   : >> { %18303 = vmatmul.mubr.f32.gmra.mrb[6].mxu0 %v24993_v53  ;;  %21357 = vmatpush3.bf16.msra.mxu1 %v21354_v44  ;;  %v14361_v44 = vld [vmem:[%s28801_s1 + $0x780] sm:$0xff] }
  0x9a   : >> { %21741 = vmatpush3.bf16.msra.mxu0 %v21738_v46  ;;  %17633 = vmatprep.mubr.f32.mxu1 %v431_v54  ;;  %v14362_v46 = vld [vmem:[%s28801_s1 + $0x788] sm:$0xff]  ;;  %v13967_v54 = vld [vmem:[%s28801_s1 + $0x190] sm:$0xff] }
  0x9b   : >> { %18305 = vmatprep.mubr.f32.mxu0 %v14287_v57  ;;  %21359 = vmatprep.subr.bf16.mxu1 %v21358_v56  ;;  %v21758_v52 = vpack.c.bf16 %v14362_v46, %v14361_v44  ;;  %v13917_v57 = vld [vmem:[%s24683_s28 + $0xa] sm:$0xff]  ;;  %v14369_v44 = vld [vmem:[%s28801_s1 + $0x7c0] sm:$0xff] }
  0x9c   : >> { %17634 = vmatmul.mubr.f32.gmra.mrb[8].mxu1 %v432_v63  ;;  %21743 = vmatprep.subr.bf16.mxu0 %v21742_v58  ;;  %v13918_v63 = vld [vmem:[%s24683_s28 + $0x12] sm:$0xff]  ;;  %v14370_v46 = vld [vmem:[%s28801_s1 + $0x7c8] sm:$0xff] }
  0x9d   : >> { %18306 = vmatmul.mubr.f32.gmra.mrb[8].mxu0 %v14288_v4  ;;  %21361 = vmatpush3.bf16.msra.mxu1 %v21358_v56  ;;  %v13968_v56 = vld [vmem:[%s28801_s1 + $0x198] sm:$0xff] }
  0x9e   : >> { %21745 = vmatpush3.bf16.msra.mxu0 %v21742_v58  ;;  %17636 = vmatprep.mubr.f32.mxu1 %v433_v5  ;;  %v14363_v58 = vld [vmem:[%s28801_s1 + $0x790] sm:$0xff]  ;;  %v21378_v1 = vpack.c.bf16 %v13968_v56, %v13967_v54  ;;  %v13969_v5 = vld [vmem:[%s28801_s1 + $0x1a0] sm:$0xff]  ;;  %v13976_v56 = vld [vmem:[%s28801_s1 + $0x1d8] sm:$0xff] }
  0x9f   : >> { %18308 = vmatprep.mubr.f32.mxu0 %v14289_v8  ;;  %21363 = vmatprep.subr.bf16.mxu1 %v21362_v6  ;;  %v21762_v4 = vpack.c.bf16 %v14364_v60, %v14363_v58  ;;  %v13919_v8 = vld [vmem:[%s24683_s28 + $0x1a] sm:$0xff]  ;;  %v13975_v54 = vld [vmem:[%s28801_s1 + $0x1d0] sm:$0xff] }
  0xa0   : >> { %17637 = vmatmul.mubr.f32.gmra.mrb[10].mxu1 %v434_v14  ;;  %21747 = vmatprep.subr.bf16.mxu0 %v21746_v9  ;;  %v13920_v14 = vld [vmem:[%s24683_s28 + $0x22] sm:$0xff]  ;;  %v14372_v58 = vld [vmem:[%s28801_s1 + $0x7d8] sm:$0xff]  ;;  %v14321_v60 = vld [vmem:[%s24683_s28 + $0x8c] sm:$0xff] }
  0xa1   : >> { %18309 = vmatmul.mubr.f32.gmra.mrb[10].mxu0 %v14290_v18  ;;  %21365 = vmatpush3.bf16.msra.mxu1 %v21362_v6  ;;  %v13970_v6 = vld [vmem:[%s28801_s1 + $0x1a8] sm:$0xff] }
  0xa2   : >> { %21749 = vmatpush3.bf16.msra.mxu0 %v21746_v9  ;;  %17639 = vmatprep.mubr.f32.mxu1 %v25030_v21  ;;  %v14365_v9 = vld [vmem:[%s28801_s1 + $0x7a0] sm:$0xff]  ;;  %v21382_v15 = vpack.c.bf16 %v13970_v6, %v13969_v5  ;;  %v13978_v6 = vld [vmem:[%s28801_s1 + $0x1e8] sm:$0xff] }
  0xa3   : >> { %18311 = vmatprep.mubr.f32.mxu0 %v14291_v24  ;;  %21367 = vmatprep.subr.bf16.mxu1 %v21366_v22  ;;  %v21766_v18 = vpack.c.bf16 %v14366_v12, %v14365_v9  ;;  %v13972_v24 = vld [vmem:[%s28801_s1 + $0x1b8] sm:$0xff]  ;;  %v13977_v5 = vld [vmem:[%s28801_s1 + $0x1e0] sm:$0xff] }
  0xa4   : >> { %17640 = vmatmul.mubr.f32.gmra.mrb[12].mxu1 %v25040_v30  ;;  %21751 = vmatprep.subr.bf16.mxu0 %v21750_v25  ;;  %v21398_v9 = vpack.c.bf16 %v13978_v6, %v13977_v5  ;;  %v14324_v12 = vld [vmem:[%s24683_s28 + $0xa4] sm:$0xff]  ;;  %v14005_v5 = vld [vmem:[%s28801_s1 + $0x238] sm:$0xff]  ;;  %v14400_v6 = vld [vmem:[%s28801_s1 + $0x830] sm:$0xff] }
  0xa5   : >> { %18312 = vmatmul.mubr.f32.gmra.mrb[12].mxu0 %v14292_v34  ;;  %21369 = vmatpush3.bf16.msra.mxu1 %v21366_v22  ;;  %v13971_v22 = vld [vmem:[%s28801_s1 + $0x1b0] sm:$0xff] }
  0xa6   : >> { %21753 = vmatpush3.bf16.msra.mxu0 %v21750_v25  ;;  %17642 = vmatprep.mubr.f32.mxu1 %v25051_v36  ;;  %v13921_v25 = vld [vmem:[%s24683_s28 + $0x2a] sm:$0xff]  ;;  %v21386_v34 = vpack.c.bf16 %v13972_v24, %v13971_v22 }
  0xa7   : >> { %18314 = vmatprep.mubr.f32.mxu0 %v14293_v38  ;;  %21371 = vmatprep.subr.bf16.mxu1 %v21370_v37  ;;  %v21770_v38 = vpack.c.bf16 %v14368_v28, %v14367_v26  ;;  %v14325_v22 = vld [vmem:[%s24683_s28 + $0xac] sm:$0xff]  ;;  %v13998_v28 = vld [vmem:[%s28801_s1 + $0x200] sm:$0xff] }
  0xa8   : >> { %17643 = vmatmul.mubr.f32.gmra.mrb[14].mxu1 %v25062_v43  ;;  %21755 = vmatprep.subr.bf16.mxu0 %v21754_v39 }
  0xa9   : >> { %18315 = vmatmul.mubr.f32.gmra.mrb[14].mxu0 %v14294_v47  ;;  %21373 = vmatpush3.bf16.msra.mxu1 %v21370_v37  ;;  %v25140_v37 = vld [vmem:[%s24683_s28 + $0x74] sm:$0xff]  ;;  %v25157_v47 = vld [vmem:[%s24683_s28 + $0x7c] sm:$0xff] }
  0xaa   : >> { %21757 = vmatpush3.bf16.msra.mxu0 %v21754_v39  ;;  %17677 = vmatprep.mubr.f32.mxu1 %v13916_v48  ;;  %v13973_v39 = vld [vmem:[%s28801_s1 + $0x1c0] sm:$0xff] }
  0xab   : >> { %18349 = vmatprep.mubr.f32.mxu0 %v25075_v51  ;;  %21375 = vmatprep.subr.bf16.mxu1 %v21374_v50  ;;  %v21390_v48 = vpack.c.bf16 %v13974_v40, %v13973_v39 }
  0xac   : >> { %17678 = vmatmul.mubr.f32.vlgmr.msra.gmra.mrb[0].mxu1 %v13917_v57  ;;  %21759 = vmatprep.subr.bf16.mxu0 %v21758_v52  ;;  %v14371_v57 = vld [vmem:[%s28801_s1 + $0x7d0] sm:$0xff] }
  0xad   : >> { %18350 = vmatmul.mubr.f32.vlgmr.msra.gmra.mrb[0].mxu0 %v25091_v62  ;;  %21377 = vmatpush3.bf16.msra.mxu1 %v21374_v50  ;;  %v14320_v50 = vld [vmem:[%s24683_s28 + $0x84] sm:$0xff] }
  0xae   : >> { %21761 = vmatpush3.bf16.msra.mxu0 %v21758_v52  ;;  %17680 = vmatprep.mubr.f32.mxu1 %v13918_v63  ;;  %v21774_v52 = vpack.c.bf16 %v14370_v46, %v14369_v44  ;;  %v21394_v63 = vpack.c.bf16 %v13976_v56, %v13975_v54  ;;  %v14001_v44 = vld [vmem:[%s28801_s1 + $0x218] sm:$0xff]  ;;  %v14396_v46 = vld [vmem:[%s28801_s1 + $0x810] sm:$0xff]  ;;  %v14002_v54 = vld [vmem:[%s28801_s1 + $0x220] sm:$0xff] }
  0xaf   : >> { %18352 = vmatprep.mubr.f32.mxu0 %v25096_v2  ;;  %21379 = vmatprep.subr.bf16.mxu1 %v21378_v1  ;;  %v14003_v56 = vld [vmem:[%s28801_s1 + $0x228] sm:$0xff] }
  0xb0   : >> { %17681 = vmatmul.mubr.f32.gmra.mrb[2].mxu1 %v13919_v8  ;;  %21763 = vmatprep.subr.bf16.mxu0 %v21762_v4  ;;  %v14323_v8 = vld [vmem:[%s24683_s28 + $0x9c] sm:$0xff] }
  0xb1   : >> { %18353 = vmatmul.mubr.f32.gmra.mrb[2].mxu0 %v25113_v13  ;;  %21381 = vmatpush3.bf16.msra.mxu1 %v21378_v1  ;;  %v14322_v1 = vld [vmem:[%s24683_s28 + $0x94] sm:$0xff] }
  0xb2   : >> { %21765 = vmatpush3.bf16.msra.mxu0 %v21762_v4  ;;  %17683 = vmatprep.mubr.f32.mxu1 %v13920_v14  ;;  %v21778_v4 = vpack.c.bf16 %v14372_v58, %v14371_v57  ;;  %v14398_v57 = vld [vmem:[%s28801_s1 + $0x820] sm:$0xff]  ;;  %v14399_v58 = vld [vmem:[%s28801_s1 + $0x828] sm:$0xff] }
  0xb3   : >> { %18355 = vmatprep.mubr.f32.mxu0 %v25118_v16  ;;  %21383 = vmatprep.subr.bf16.mxu1 %v21382_v15 }
  0xb4   : >> { %17684 = vmatmul.mubr.f32.gmra.mrb[4].mxu1 %v13921_v25  ;;  %21767 = vmatprep.subr.bf16.mxu0 %v21766_v18  ;;  %v14326_v25 = vld [vmem:[%s24683_s28 + $0xb4] sm:$0xff] }
  0xb5   : >> { %18356 = vmatmul.mubr.f32.gmra.mrb[4].mxu0 %v25135_v31  ;;  %21385 = vmatpush3.bf16.msra.mxu1 %v21382_v15  ;;  %v13979_v15 = vld [vmem:[%s28801_s1 + $0x1f0] sm:$0xff] }
  0xb6   : >> { %21769 = vmatpush3.bf16.msra.mxu0 %v21766_v18  ;;  %17686 = vmatprep.mubr.f32.mxu1 %v13922_v33  ;;  %v13980_v18 = vld [vmem:[%s28801_s1 + $0x1f8] sm:$0xff]  ;;  %v13999_v33 = vld [vmem:[%s28801_s1 + $0x208] sm:$0xff] }
  0xb7   : >> { %18358 = vmatprep.mubr.f32.mxu0 %v25140_v37  ;;  %21387 = vmatprep.subr.bf16.mxu1 %v21386_v34  ;;  %v21402_v24 = vpack.c.bf16 %v13980_v18, %v13979_v15  ;;  %v21406_v39 = vpack.c.bf16 %v13999_v33, %v13998_v28  ;;  %v14007_v15 = vld [vmem:[%s28801_s1 + $0x248] sm:$0xff]  ;;  %v13956_v18 = vld [vmem:[%s24683_s28 + $0x3b] sm:$0xff]  ;;  %v14008_v28 = vld [vmem:[%s28801_s1 + $0x250] sm:$0xff] }
  0xb8   : >> { %17687 = vmatmul.mubr.f32.gmra.mrb[6].mxu1 %v13923_v41  ;;  %21771 = vmatprep.subr.bf16.mxu0 %v21770_v38  ;;  %v14000_v41 = vld [vmem:[%s28801_s1 + $0x210] sm:$0xff]  ;;  %v14009_v33 = vld [vmem:[%s28801_s1 + $0x258] sm:$0xff] }
  0xb9   : >> { %18359 = vmatmul.mubr.f32.gmra.mrb[6].mxu0 %v25157_v47  ;;  %21389 = vmatpush3.bf16.msra.mxu1 %v21386_v34  ;;  %v14327_v34 = vld [vmem:[%s24683_s28 + $0xbc] sm:$0xff] }
  0xba   : >> { %21773 = vmatpush3.bf16.msra.mxu0 %v21770_v38  ;;  %17689 = vmatprep.mubr.f32.mxu1 %v24699_v29  ;;  %v14373_v29 = vld [vmem:[%s28801_s1 + $0x7e0] sm:$0xff] }
  0xbb   : >> { %18361 = vmatprep.mubr.f32.mxu0 %v14320_v50  ;;  %21391 = vmatprep.subr.bf16.mxu1 %v21390_v48  ;;  %v13949_v38 = vld [vmem:[%s24683_s28 + $0x3] sm:$0xff]  ;;  %v21410_v50 = vpack.c.bf16 %v14001_v44, %v14000_v41 }
  0xbc   : >> { %17690 = vmatmul.mubr.f32.gmra.mrb[8].mxu1 %v24764_v61  ;;  %21775 = vmatprep.subr.bf16.mxu0 %v21774_v52  ;;  %v14374_v61 = vld [vmem:[%s28801_s1 + $0x7e8] sm:$0xff]  ;;  %v14010_v41 = vld [vmem:[%s28801_s1 + $0x260] sm:$0xff] }
  0xbd   : >> { %18362 = vmatmul.mubr.f32.gmra.mrb[8].mxu0 %v14321_v60  ;;  %21393 = vmatpush3.bf16.msra.mxu1 %v21390_v48  ;;  %v21782_v14 = vpack.c.bf16 %v14374_v61, %v14373_v29  ;;  %v13951_v48 = vld [vmem:[%s24683_s28 + $0x13] sm:$0xff]  ;;  %v13953_v60 = vld [vmem:[%s24683_s28 + $0x23] sm:$0xff] }
  0xbe   : >> { %21777 = vmatpush3.bf16.msra.mxu0 %v21774_v52  ;;  %17692 = vmatprep.mubr.f32.mxu1 %v24768_v0  ;;  %v14375_v0 = vld [vmem:[%s28801_s1 + $0x7f0] sm:$0xff]  ;;  %v14401_v29 = vld [vmem:[%s28801_s1 + $0x838] sm:$0xff]  ;;  %v25275_v61 = vld [vmem:[%s24683_s28 + $0x88] sm:$0xff] }
  0xbf   : >> { %18364 = vmatprep.mubr.f32.mxu0 %v14322_v1  ;;  %21395 = vmatprep.subr.bf16.mxu1 %v21394_v63  ;;  %v21798_v1 = vpack.c.bf16 %v14399_v58, %v14398_v57  ;;  %v14011_v44 = vld [vmem:[%s28801_s1 + $0x268] sm:$0xff]  ;;  %v14031_v58 = vld [vmem:[%s28801_s1 + $0x280] sm:$0xff] }
  0xc0   : >> { %17693 = vmatmul.mubr.f32.gmra.mrb[10].mxu1 %v24785_v7  ;;  %21779 = vmatprep.subr.bf16.mxu0 %v21778_v4  ;;  %v14376_v7 = vld [vmem:[%s28801_s1 + $0x7f8] sm:$0xff] }
  0xc1   : >> { %18365 = vmatmul.mubr.f32.gmra.mrb[10].mxu0 %v14323_v8  ;;  %21397 = vmatpush3.bf16.msra.mxu1 %v21394_v63  ;;  %v21786_v26 = vpack.c.bf16 %v14376_v7, %v14375_v0  ;;  %v21414_v63 = vpack.c.bf16 %v14003_v56, %v14002_v54  ;;  %v14402_v0 = vld [vmem:[%s28801_s1 + $0x840] sm:$0xff]  ;;  %v14403_v7 = vld [vmem:[%s28801_s1 + $0x848] sm:$0xff] }
  0xc2   : >> { %21781 = vmatpush3.bf16.msra.mxu0 %v21778_v4  ;;  %17695 = vmatprep.mubr.f32.mxu1 %v24790_v10  ;;  %v14394_v10 = vld [vmem:[%s28801_s1 + $0x800] sm:$0xff]  ;;  %v14004_v4 = vld [vmem:[%s28801_s1 + $0x230] sm:$0xff]  ;;  %v14358_v54 = vld [vmem:[%s24683_s28 + $0xc8] sm:$0xff] }
  0xc3   : >> { %18367 = vmatprep.mubr.f32.mxu0 %v14324_v12  ;;  %21399 = vmatprep.subr.bf16.mxu1 %v21398_v9  ;;  %v21418_v8 = vpack.c.bf16 %v14005_v5, %v14004_v4  ;;  %v21802_v12 = vpack.c.bf16 %v14401_v29, %v14400_v6  ;;  %v14034_v6 = vld [vmem:[%s28801_s1 + $0x298] sm:$0xff]  ;;  %v14429_v29 = vld [vmem:[%s28801_s1 + $0x890] sm:$0xff] }
  0xc4   : >> { %17696 = vmatmul.mubr.f32.gmra.mrb[12].mxu1 %v24807_v17  ;;  %21783 = vmatprep.subr.bf16.mxu0 %v21782_v14  ;;  %v14395_v17 = vld [vmem:[%s28801_s1 + $0x808] sm:$0xff] }
  0xc5   : >> { %18368 = vmatmul.mubr.f32.gmra.mrb[12].mxu0 %v14325_v22  ;;  %21401 = vmatpush3.bf16.msra.mxu1 %v21398_v9  ;;  %v21790_v40 = vpack.c.bf16 %v14395_v17, %v14394_v10  ;;  %v25280_v9 = vld [vmem:[%s24683_s28 + $0x90] sm:$0xff]  ;;  %v25297_v22 = vld [vmem:[%s24683_s28 + $0x98] sm:$0xff] }
  0xc6   : >> { %21785 = vmatpush3.bf16.msra.mxu0 %v21782_v14  ;;  %17698 = vmatprep.mubr.f32.mxu1 %v24812_v20  ;;  %v13950_v20 = vld [vmem:[%s24683_s28 + $0xb] sm:$0xff]  ;;  %v14006_v14 = vld [vmem:[%s28801_s1 + $0x240] sm:$0xff]  ;;  %v14405_v17 = vld [vmem:[%s28801_s1 + $0x858] sm:$0xff] }
  0xc7   : >> { %18370 = vmatprep.mubr.f32.mxu0 %v14326_v25  ;;  %21403 = vmatprep.subr.bf16.mxu1 %v21402_v24  ;;  %v14353_v25 = vld [vmem:[%s24683_s28 + $0xa0] sm:$0xff]  ;;  %v14404_v10 = vld [vmem:[%s28801_s1 + $0x850] sm:$0xff] }
  0xc8   : >> { %17699 = vmatmul.mubr.f32.gmra.mrb[14].mxu1 %v24829_v27  ;;  %21787 = vmatprep.subr.bf16.mxu0 %v21786_v26  ;;  %v14397_v27 = vld [vmem:[%s28801_s1 + $0x818] sm:$0xff] }
  0xc9   : >> { %18371 = vmatmul.mubr.f32.gmra.mrb[14].mxu0 %v14327_v34  ;;  %21405 = vmatpush3.bf16.msra.mxu1 %v21402_v24  ;;  %v21794_v52 = vpack.c.bf16 %v14397_v27, %v14396_v46  ;;  %v21422_v24 = vpack.c.bf16 %v14007_v15, %v14006_v14  ;;  %v14354_v34 = vld [vmem:[%s24683_s28 + $0xa8] sm:$0xff]  ;;  %v21430_v46 = vpack.c.bf16 %v14011_v44, %v14010_v41  ;;  %v14357_v27 = vld [vmem:[%s24683_s28 + $0xc0] sm:$0xff] }
  0xca   : >> { %21789 = vmatpush3.bf16.msra.mxu0 %v21786_v26  ;;  %17733 = vmatprep.mubr.f32.mxu1 %v13949_v38  ;;  %v21806_v26 = vpack.c.bf16 %v14403_v7, %v14402_v0  ;;  %v21426_v38 = vpack.c.bf16 %v14009_v33, %v14008_v28  ;;  %v14035_v14 = vld [vmem:[%s28801_s1 + $0x2a0] sm:$0xff]  ;;  %v14036_v15 = vld [vmem:[%s28801_s1 + $0x2a8] sm:$0xff]  ;;  %v14038_v28 = vld [vmem:[%s28801_s1 + $0x2b8] sm:$0xff] }
  0xcb   : >> { %18405 = vmatprep.mubr.f32.mxu0 %v25030_v21  ;;  %21407 = vmatprep.subr.bf16.mxu1 %v21406_v39  ;;  %v13952_v21 = vld [vmem:[%s24683_s28 + $0x1b] sm:$0xff]  ;;  %v14432_v0 = vld [vmem:[%s28801_s1 + $0x8a8] sm:$0xff]  ;;  %v14433_v33 = vld [vmem:[%s28801_s1 + $0x8b0] sm:$0xff] }
  0xcc   : >> { %17734 = vmatmul.mubr.f32.vlgmr.msra.gmra.mrb[0].mxu1 %v13950_v20  ;;  %21791 = vmatprep.subr.bf16.mxu0 %v21790_v40  ;;  %v14356_v20 = vld [vmem:[%s24683_s28 + $0xb8] sm:$0xff]  ;;  %v13986_v7 = vld [vmem:[%s24683_s28 + $0x24] sm:$0xff] }
  0xcd   : >> { %18406 = vmatmul.mubr.f32.vlgmr.msra.gmra.mrb[0].mxu0 %v25040_v30  ;;  %21409 = vmatpush3.bf16.msra.mxu1 %v21406_v39  ;;  %v25258_v30 = vld [vmem:[%s24683_s28 + $0x80] sm:$0xff]  ;;  %v14355_v39 = vld [vmem:[%s24683_s28 + $0xb0] sm:$0xff]  ;;  %v14040_v41 = vld [vmem:[%s28801_s1 + $0x2c8] sm:$0xff] }
  0xce   : >> { %21793 = vmatpush3.bf16.msra.mxu0 %v21790_v40  ;;  %17736 = vmatprep.mubr.f32.mxu1 %v13951_v48  ;;  %v21810_v40 = vpack.c.bf16 %v14405_v17, %v14404_v10  ;;  %v14434_v10 = vld [vmem:[%s28801_s1 + $0x8b8] sm:$0xff]  ;;  %v25415_v17 = vld [vmem:[%s24683_s28 + $0x89] sm:$0xff] }
  0xcf   : >> { %18408 = vmatprep.mubr.f32.mxu0 %v25051_v36  ;;  %21411 = vmatprep.subr.bf16.mxu1 %v21410_v50  ;;  %v13954_v36 = vld [vmem:[%s24683_s28 + $0x2b] sm:$0xff]  ;;  %v13989_v44 = vld [vmem:[%s24683_s28 + $0x3c] sm:$0xff] }
  0xd0   : >> { %17737 = vmatmul.mubr.f32.gmra.mrb[2].mxu1 %v13952_v21  ;;  %21795 = vmatprep.subr.bf16.mxu0 %v21794_v52  ;;  %v14359_v21 = vld [vmem:[%s24683_s28 + $0xd0] sm:$0xff] }
  0xd1   : >> { %18409 = vmatmul.mubr.f32.gmra.mrb[2].mxu0 %v25062_v43  ;;  %21413 = vmatpush3.bf16.msra.mxu1 %v21410_v50  ;;  %v13955_v43 = vld [vmem:[%s24683_s28 + $0x33] sm:$0xff] }
  0xd2   : >> { %21797 = vmatpush3.bf16.msra.mxu0 %v21794_v52  ;;  %17739 = vmatprep.mubr.f32.mxu1 %v13953_v60  ;;  %v14012_v50 = vld [vmem:[%s28801_s1 + $0x270] sm:$0xff]  ;;  %v14013_v52 = vld [vmem:[%s28801_s1 + $0x278] sm:$0xff]  ;;  %v14032_v60 = vld [vmem:[%s28801_s1 + $0x288] sm:$0xff] }
  0xd3   : >> { %18411 = vmatprep.mubr.f32.mxu0 %v25258_v30  ;;  %21415 = vmatprep.subr.bf16.mxu1 %v21414_v63  ;;  %v21434_v56 = vpack.c.bf16 %v14013_v52, %v14012_v50  ;;  %v21438_v4 = vpack.c.bf16 %v14032_v60, %v14031_v58  ;;  %v14041_v50 = vld [vmem:[%s28801_s1 + $0x2d0] sm:$0xff]  ;;  %v14042_v52 = vld [vmem:[%s28801_s1 + $0x2d8] sm:$0xff]  ;;  %v14043_v58 = vld [vmem:[%s28801_s1 + $0x2e0] sm:$0xff] }
  0xd4   : >> { %17740 = vmatmul.mubr.f32.gmra.mrb[4].mxu1 %v13954_v36  ;;  %21799 = vmatprep.subr.bf16.mxu0 %v21798_v1  ;;  %v14033_v36 = vld [vmem:[%s28801_s1 + $0x290] sm:$0xff]  ;;  %v14044_v60 = vld [vmem:[%s28801_s1 + $0x2e8] sm:$0xff] }
  0xd5   : >> { %18412 = vmatmul.mubr.f32.gmra.mrb[4].mxu0 %v25275_v61  ;;  %21417 = vmatpush3.bf16.msra.mxu1 %v21414_v63  ;;  %v14360_v63 = vld [vmem:[%s24683_s28 + $0xd8] sm:$0xff] }
  0xd6   : >> { %21801 = vmatpush3.bf16.msra.mxu0 %v21798_v1  ;;  %17742 = vmatprep.mubr.f32.mxu1 %v13955_v43  ;;  %v13982_v1 = vld [vmem:[%s24683_s28 + $0x4] sm:$0xff]  ;;  %v13984_v43 = vld [vmem:[%s24683_s28 + $0x14] sm:$0xff] }
  0xd7   : >> { %18414 = vmatprep.mubr.f32.mxu0 %v25280_v9  ;;  %21419 = vmatprep.subr.bf16.mxu1 %v21418_v8 }
  0xd8   : >> { %17743 = vmatmul.mubr.f32.gmra.mrb[6].mxu1 %v13956_v18  ;;  %21803 = vmatprep.subr.bf16.mxu0 %v21802_v12  ;;  %v14431_v18 = vld [vmem:[%s28801_s1 + $0x8a0] sm:$0xff] }
  0xd9   : >> { %18415 = vmatmul.mubr.f32.gmra.mrb[6].mxu0 %v25297_v22  ;;  %21421 = vmatpush3.bf16.msra.mxu1 %v21418_v8  ;;  %v21442_v8 = vpack.c.bf16 %v14034_v6, %v14033_v36  ;;  %v14391_v36 = vld [vmem:[%s24683_s28 + $0xc9] sm:$0xff] }
  0xda   : >> { %21805 = vmatpush3.bf16.msra.mxu0 %v21802_v12  ;;  %17745 = vmatprep.mubr.f32.mxu1 %v24911_v11  ;;  %v14406_v11 = vld [vmem:[%s28801_s1 + $0x860] sm:$0xff] }
  0xdb   : >> { %18417 = vmatprep.mubr.f32.mxu0 %v14353_v25  ;;  %21423 = vmatprep.subr.bf16.mxu1 %v21422_v24  ;;  %v21830_v25 = vpack.c.bf16 %v14432_v0, %v14431_v18  ;;  %v14066_v18 = vld [vmem:[%s28801_s1 + $0x310] sm:$0xff]  ;;  %v14016_v0 = vld [vmem:[%s24683_s28 + $0x28] sm:$0xff] }
  0xdc   : >> { %17746 = vmatmul.mubr.f32.gmra.mrb[8].mxu1 %v24927_v19  ;;  %21807 = vmatprep.subr.bf16.mxu0 %v21806_v26  ;;  %v14407_v19 = vld [vmem:[%s28801_s1 + $0x868] sm:$0xff] }
  0xdd   : >> { %18418 = vmatmul.mubr.f32.gmra.mrb[8].mxu0 %v14354_v34  ;;  %21425 = vmatpush3.bf16.msra.mxu1 %v21422_v24  ;;  %v21814_v48 = vpack.c.bf16 %v14407_v19, %v14406_v11  ;;  %v21446_v24 = vpack.c.bf16 %v14036_v15, %v14035_v14  ;;  %v14435_v11 = vld [vmem:[%s28801_s1 + $0x8c0] sm:$0xff]  ;;  %v14436_v19 = vld [vmem:[%s28801_s1 + $0x8c8] sm:$0xff] }
  0xde   : >> { %21809 = vmatpush3.bf16.msra.mxu0 %v21806_v26  ;;  %17748 = vmatprep.mubr.f32.mxu1 %v24932_v23  ;;  %v14408_v23 = vld [vmem:[%s28801_s1 + $0x870] sm:$0xff]  ;;  %v25507_v15 = vld [vmem:[%s24683_s28 + $0x62] sm:$0xff] }
  0xdf   : >> { %18420 = vmatprep.mubr.f32.mxu0 %v14355_v39  ;;  %21427 = vmatprep.subr.bf16.mxu1 %v21426_v38  ;;  %v14037_v26 = vld [vmem:[%s28801_s1 + $0x2b0] sm:$0xff]  ;;  %v21834_v39 = vpack.c.bf16 %v14434_v10, %v14433_v33  ;;  %v14068_v33 = vld [vmem:[%s28801_s1 + $0x320] sm:$0xff]  ;;  %v14069_v10 = vld [vmem:[%s28801_s1 + $0x328] sm:$0xff] }
  0xe0   : >> { %17749 = vmatmul.mubr.f32.gmra.mrb[10].mxu1 %v24949_v32  ;;  %21811 = vmatprep.subr.bf16.mxu0 %v21810_v40  ;;  %v14409_v32 = vld [vmem:[%s28801_s1 + $0x878] sm:$0xff]  ;;  %v21450_v34 = vpack.c.bf16 %v14038_v28, %v14037_v26 }
  0xe1   : >> { %18421 = vmatmul.mubr.f32.gmra.mrb[10].mxu0 %v14356_v20  ;;  %21429 = vmatpush3.bf16.msra.mxu1 %v21426_v38  ;;  %v21818_v57 = vpack.c.bf16 %v14409_v32, %v14408_v23  ;;  %v25420_v38 = vld [vmem:[%s24683_s28 + $0x91] sm:$0xff]  ;;  %v25437_v20 = vld [vmem:[%s24683_s28 + $0x99] sm:$0xff] }
  0xe2   : >> { %21813 = vmatpush3.bf16.msra.mxu0 %v21810_v40  ;;  %17751 = vmatprep.mubr.f32.mxu1 %v24954_v35  ;;  %v14427_v35 = vld [vmem:[%s28801_s1 + $0x880] sm:$0xff]  ;;  %v14437_v23 = vld [vmem:[%s28801_s1 + $0x8d0] sm:$0xff]  ;;  %v14438_v32 = vld [vmem:[%s28801_s1 + $0x8d8] sm:$0xff] }
  0xe3   : >> { %18423 = vmatprep.mubr.f32.mxu0 %v14357_v27  ;;  %21431 = vmatprep.subr.bf16.mxu1 %v21430_v46  ;;  %v14039_v40 = vld [vmem:[%s28801_s1 + $0x2c0] sm:$0xff]  ;;  %v25528_v28 = vld [vmem:[%s24683_s28 + $0x72] sm:$0xff] }
  0xe4   : >> { %17752 = vmatmul.mubr.f32.gmra.mrb[12].mxu1 %v24971_v42  ;;  %21815 = vmatprep.subr.bf16.mxu0 %v21814_v48  ;;  %v14428_v42 = vld [vmem:[%s28801_s1 + $0x888] sm:$0xff] }
  0xe5   : >> { %18424 = vmatmul.mubr.f32.gmra.mrb[12].mxu0 %v14358_v54  ;;  %21433 = vmatpush3.bf16.msra.mxu1 %v21430_v46  ;;  %v21822_v5 = vpack.c.bf16 %v14428_v42, %v14427_v35  ;;  %v21454_v46 = vpack.c.bf16 %v14040_v41, %v14039_v40  ;;  %v14386_v27 = vld [vmem:[%s24683_s28 + $0xa1] sm:$0xff]  ;;  %v14387_v54 = vld [vmem:[%s24683_s28 + $0xa9] sm:$0xff]  ;;  %v14389_v35 = vld [vmem:[%s24683_s28 + $0xb9] sm:$0xff]  ;;  %v21462_v42 = vpack.c.bf16 %v14044_v60, %v14043_v58 }
  0xe6   : >> { %21817 = vmatpush3.bf16.msra.mxu0 %v21814_v48  ;;  %17754 = vmatprep.mubr.f32.mxu1 %v24976_v45  ;;  %v13983_v45 = vld [vmem:[%s24683_s28 + $0xc] sm:$0xff]  ;;  %v21838_v48 = vpack.c.bf16 %v14436_v19, %v14435_v11  ;;  %v25545_v40 = vld [vmem:[%s24683_s28 + $0x7a] sm:$0xff]  ;;  %v25550_v11 = vld [vmem:[%s24683_s28 + $0x82] sm:$0xff] }
  0xe7   : >> { %18426 = vmatprep.mubr.f32.mxu0 %v14359_v21  ;;  %21435 = vmatprep.subr.bf16.mxu1 %v21434_v56  ;;  %v14388_v21 = vld [vmem:[%s24683_s28 + $0xb1] sm:$0xff]  ;;  %v14019_v41 = vld [vmem:[%s24683_s28 + $0x40] sm:$0xff]  ;;  %v14073_v58 = vld [vmem:[%s28801_s1 + $0x348] sm:$0xff] }
  0xe8   : >> { %17755 = vmatmul.mubr.f32.gmra.mrb[14].mxu1 %v24993_v53  ;;  %21819 = vmatprep.subr.bf16.mxu0 %v21818_v57  ;;  %v14430_v53 = vld [vmem:[%s28801_s1 + $0x898] sm:$0xff] }
  0xe9   : >> { %18427 = vmatmul.mubr.f32.gmra.mrb[14].mxu0 %v14360_v63  ;;  %21437 = vmatpush3.bf16.msra.mxu1 %v21434_v56  ;;  %v21826_v12 = vpack.c.bf16 %v14430_v53, %v14429_v29  ;;  %v21458_v56 = vpack.c.bf16 %v14042_v52, %v14041_v50  ;;  %v14390_v63 = vld [vmem:[%s24683_s28 + $0xc1] sm:$0xff]  ;;  %v14466_v50 = vld [vmem:[%s28801_s1 + $0x930] sm:$0xff]  ;;  %v14467_v52 = vld [vmem:[%s28801_s1 + $0x938] sm:$0xff] }
  0xea   : >> { %21821 = vmatpush3.bf16.msra.mxu0 %v21818_v57  ;;  %17789 = vmatprep.mubr.f32.mxu1 %v13982_v1  ;;  %v21842_v57 = vpack.c.bf16 %v14438_v32, %v14437_v23  ;;  %v14064_v53 = vld [vmem:[%s28801_s1 + $0x300] sm:$0xff]  ;;  %v25567_v23 = vld [vmem:[%s24683_s28 + $0x8a] sm:$0xff]  ;;  %v14022_v60 = vld [vmem:[%s24683_s28 + $0x58] sm:$0xff] }
  0xeb   : >> { %18461 = vmatprep.mubr.f32.mxu0 %v24866_v49  ;;  %21439 = vmatprep.subr.bf16.mxu1 %v21438_v4  ;;  %v13985_v49 = vld [vmem:[%s24683_s28 + $0x1c] sm:$0xff]  ;;  %v14021_v32 = vld [vmem:[%s24683_s28 + $0x50] sm:$0xff] }
  0xec   : >> { %17790 = vmatmul.mubr.f32.vlgmr.msra.gmra.mrb[0].mxu1 %v13983_v45  ;;  %21823 = vmatprep.subr.bf16.mxu0 %v21822_v5  ;;  %v14392_v45 = vld [vmem:[%s24683_s28 + $0xd1] sm:$0xff] }
  0xed   : >> { %18462 = vmatmul.mubr.f32.vlgmr.msra.gmra.mrb[0].mxu0 %v24876_v55  ;;  %21441 = vmatpush3.bf16.msra.mxu1 %v21438_v4  ;;  %v25398_v55 = vld [vmem:[%s24683_s28 + $0x81] sm:$0xff]  ;;  %v14045_v4 = vld [vmem:[%s28801_s1 + $0x2f0] sm:$0xff] }
  0xee   : >> { %21825 = vmatpush3.bf16.msra.mxu0 %v21822_v5  ;;  %17792 = vmatprep.mubr.f32.mxu1 %v13984_v43  ;;  %v14046_v5 = vld [vmem:[%s28801_s1 + $0x2f8] sm:$0xff]  ;;  %v14460_v43 = vld [vmem:[%s28801_s1 + $0x900] sm:$0xff] }
  0xef   : >> { %18464 = vmatprep.mubr.f32.mxu0 %v24887_v59  ;;  %21443 = vmatprep.subr.bf16.mxu1 %v21442_v8  ;;  %v13987_v59 = vld [vmem:[%s24683_s28 + $0x2c] sm:$0xff]  ;;  %v21466_v6 = vpack.c.bf16 %v14046_v5, %v14045_v4 }
  0xf0   : >> { %17793 = vmatmul.mubr.f32.gmra.mrb[2].mxu1 %v13985_v49  ;;  %21827 = vmatprep.subr.bf16.mxu0 %v21826_v12  ;;  %v14074_v5 = vld [vmem:[%s28801_s1 + $0x350] sm:$0xff] }
  0xf1   : >> { %18465 = vmatmul.mubr.f32.gmra.mrb[2].mxu0 %v24898_v3  ;;  %21445 = vmatpush3.bf16.msra.mxu1 %v21442_v8  ;;  %v13988_v3 = vld [vmem:[%s24683_s28 + $0x34] sm:$0xff] }
  0xf2   : >> { %21829 = vmatpush3.bf16.msra.mxu0 %v21826_v12  ;;  %17795 = vmatprep.mubr.f32.mxu1 %v13986_v7  ;;  %v14393_v8 = vld [vmem:[%s24683_s28 + $0xd9] sm:$0xff] }
  0xf3   : >> { %18467 = vmatprep.mubr.f32.mxu0 %v25398_v55  ;;  %21447 = vmatprep.subr.bf16.mxu1 %v21446_v24  ;;  %v14015_v12 = vld [vmem:[%s24683_s28 + $0x20] sm:$0xff]  ;;  %v14463_v7 = vld [vmem:[%s28801_s1 + $0x918] sm:$0xff] }
  0xf4   : >> { %17796 = vmatmul.mubr.f32.gmra.mrb[4].mxu1 %v13987_v59  ;;  %21831 = vmatprep.subr.bf16.mxu0 %v21830_v25 }
  0xf5   : >> { %18468 = vmatmul.mubr.f32.gmra.mrb[4].mxu0 %v25415_v17  ;;  %21449 = vmatpush3.bf16.msra.mxu1 %v21446_v24  ;;  %v25523_v24 = vld [vmem:[%s24683_s28 + $0x6a] sm:$0xff] }
  0xf6   : >> { %21833 = vmatpush3.bf16.msra.mxu0 %v21830_v25  ;;  %17798 = vmatprep.mubr.f32.mxu1 %v13988_v3  ;;  %v14017_v25 = vld [vmem:[%s24683_s28 + $0x30] sm:$0xff]  ;;  %v14018_v3 = vld [vmem:[%s24683_s28 + $0x38] sm:$0xff] }
  0xf7   : >> { %18470 = vmatprep.mubr.f32.mxu0 %v25420_v38  ;;  %21451 = vmatprep.subr.bf16.mxu1 %v21450_v34 }
  0xf8   : >> { %17799 = vmatmul.mubr.f32.gmra.mrb[6].mxu1 %v13989_v44  ;;  %21835 = vmatprep.subr.bf16.mxu0 %v21834_v39  ;;  %v21478_v44 = vpack.c.bf16 %v14069_v10, %v14068_v33  ;;  %v14424_v33 = vld [vmem:[%s24683_s28 + $0xca] sm:$0xff] }
  0xf9   : >> { %18471 = vmatmul.mubr.f32.gmra.mrb[6].mxu0 %v25437_v20  ;;  %21453 = vmatpush3.bf16.msra.mxu1 %v21450_v34  ;;  %v14464_v34 = vld [vmem:[%s28801_s1 + $0x920] sm:$0xff] }
  0xfa   : >> { %21837 = vmatpush3.bf16.msra.mxu0 %v21834_v39  ;;  %17801 = vmatprep.mubr.f32.mxu1 %v25075_v51  ;;  %v14439_v51 = vld [vmem:[%s28801_s1 + $0x8e0] sm:$0xff]  ;;  %v14465_v39 = vld [vmem:[%s28801_s1 + $0x928] sm:$0xff] }
  0xfb   : >> { %18473 = vmatprep.mubr.f32.mxu0 %v14386_v27  ;;  %21455 = vmatprep.subr.bf16.mxu1 %v21454_v46  ;;  %v21862_v19 = vpack.c.bf16 %v14465_v39, %v14464_v34  ;;  %v14071_v27 = vld [vmem:[%s28801_s1 + $0x338] sm:$0xff]  ;;  %v14097_v39 = vld [vmem:[%s28801_s1 + $0x380] sm:$0xff] }
  0xfc   : >> { %17802 = vmatmul.mubr.f32.gmra.mrb[8].mxu1 %v25091_v62  ;;  %21839 = vmatprep.subr.bf16.mxu0 %v21838_v48  ;;  %v14440_v62 = vld [vmem:[%s28801_s1 + $0x8e8] sm:$0xff] }
  0xfd   : >> { %18474 = vmatmul.mubr.f32.gmra.mrb[8].mxu0 %v14387_v54  ;;  %21457 = vmatpush3.bf16.msra.mxu1 %v21454_v46  ;;  %v21846_v1 = vpack.c.bf16 %v14440_v62, %v14439_v51  ;;  %v14070_v46 = vld [vmem:[%s28801_s1 + $0x330] sm:$0xff]  ;;  %v14468_v51 = vld [vmem:[%s28801_s1 + $0x940] sm:$0xff]  ;;  %v14469_v62 = vld [vmem:[%s28801_s1 + $0x948] sm:$0xff] }
  0xfe   : >> { %21841 = vmatpush3.bf16.msra.mxu0 %v21838_v48  ;;  %17804 = vmatprep.mubr.f32.mxu1 %v25096_v2  ;;  %v14441_v2 = vld [vmem:[%s28801_s1 + $0x8f0] sm:$0xff]  ;;  %v14020_v48 = vld [vmem:[%s24683_s28 + $0x48] sm:$0xff]  ;;  %v21482_v54 = vpack.c.bf16 %v14071_v27, %v14070_v46  ;;  %v21870_v4 = vpack.c.bf16 %v14469_v62, %v14468_v51  ;;  %v14101_v51 = vld [vmem:[%s28801_s1 + $0x3a0] sm:$0xff] }
  0xff   : >> { %18476 = vmatprep.mubr.f32.mxu0 %v14388_v21  ;;  %21459 = vmatprep.subr.bf16.mxu1 %v21458_v56  ;;  %v21866_v21 = vpack.c.bf16 %v14467_v52, %v14466_v50  ;;  %v25659_v27 = vld [vmem:[%s24683_s28 + $0x63] sm:$0xff]  ;;  %v14099_v50 = vld [vmem:[%s28801_s1 + $0x390] sm:$0xff] }
 0x100   : >> { %17805 = vmatmul.mubr.f32.gmra.mrb[10].mxu1 %v25113_v13  ;;  %21843 = vmatprep.subr.bf16.mxu0 %v21842_v57  ;;  %v14442_v13 = vld [vmem:[%s28801_s1 + $0x8f8] sm:$0xff]  ;;  %v14049_v52 = vld [vmem:[%s24683_s28 + $0x29] sm:$0xff] }
 0x101   : >> { %18477 = vmatmul.mubr.f32.gmra.mrb[10].mxu0 %v14389_v35  ;;  %21461 = vmatpush3.bf16.msra.mxu1 %v21458_v56  ;;  %v21850_v29 = vpack.c.bf16 %v14442_v13, %v14441_v2  ;;  %v25572_v56 = vld [vmem:[%s24683_s28 + $0x92] sm:$0xff]  ;;  %v25589_v35 = vld [vmem:[%s24683_s28 + $0x9a] sm:$0xff]  ;;  %v14024_v13 = vld [vmem:[%s24683_s28 + $0x68] sm:$0xff] }
 0x102   : >> { %21845 = vmatpush3.bf16.msra.mxu0 %v21842_v57  ;;  %17807 = vmatprep.mubr.f32.mxu1 %v25118_v16  ;;  %v14065_v16 = vld [vmem:[%s28801_s1 + $0x308] sm:$0xff]  ;;  %v14072_v57 = vld [vmem:[%s28801_s1 + $0x340] sm:$0xff]  ;;  %v14075_v2 = vld [vmem:[%s28801_s1 + $0x358] sm:$0xff] }
 0x103   : >> { %18479 = vmatprep.mubr.f32.mxu0 %v14390_v63  ;;  %21463 = vmatprep.subr.bf16.mxu1 %v21462_v42  ;;  %v21470_v14 = vpack.c.bf16 %v14065_v16, %v14064_v53  ;;  %v21486_v63 = vpack.c.bf16 %v14073_v58, %v14072_v57  ;;  %v21490_v53 = vpack.c.bf16 %v14075_v2, %v14074_v5  ;;  %v14421_v16 = vld [vmem:[%s24683_s28 + $0xb2] sm:$0xff]  ;;  %v14102_v62 = vld [vmem:[%s28801_s1 + $0x3a8] sm:$0xff] }
 0x104   : >> { %17808 = vmatmul.mubr.f32.gmra.mrb[12].mxu1 %v25135_v31  ;;  %21847 = vmatprep.subr.bf16.mxu0 %v21846_v1  ;;  %v14461_v31 = vld [vmem:[%s28801_s1 + $0x908] sm:$0xff]  ;;  %v25680_v58 = vld [vmem:[%s24683_s28 + $0x73] sm:$0xff]  ;;  %v21510_v2 = vpack.c.bf16 %v14102_v62, %v14101_v51 }
 0x105   : >> { %18480 = vmatmul.mubr.f32.gmra.mrb[12].mxu0 %v14391_v36  ;;  %21465 = vmatpush3.bf16.msra.mxu1 %v21462_v42  ;;  %v21854_v49 = vpack.c.bf16 %v14461_v31, %v14460_v43  ;;  %v14023_v42 = vld [vmem:[%s24683_s28 + $0x60] sm:$0xff]  ;;  %v14470_v36 = vld [vmem:[%s28801_s1 + $0x950] sm:$0xff]  ;;  %v14112_v62 = vld [vmem:[%s28801_s1 + $0x3f8] sm:$0xff] }
 0x106   : >> { %21849 = vmatpush3.bf16.msra.mxu0 %v21846_v1  ;;  %17810 = vmatprep.mubr.f32.mxu1 %v25140_v37  ;;  %v14067_v37 = vld [vmem:[%s28801_s1 + $0x318] sm:$0xff]  ;;  %v14419_v1 = vld [vmem:[%s24683_s28 + $0xa2] sm:$0xff]  ;;  %v14111_v51 = vld [vmem:[%s28801_s1 + $0x3f0] sm:$0xff] }
 0x107   : >> { %18482 = vmatprep.mubr.f32.mxu0 %v14392_v45  ;;  %21467 = vmatprep.subr.bf16.mxu1 %v21466_v6  ;;  %v21474_v26 = vpack.c.bf16 %v14067_v37, %v14066_v18  ;;  %v14420_v45 = vld [vmem:[%s24683_s28 + $0xaa] sm:$0xff]  ;;  %v14076_v31 = vld [vmem:[%s28801_s1 + $0x360] sm:$0xff] }
 0x108   : >> { %17811 = vmatmul.mubr.f32.gmra.mrb[14].mxu1 %v25157_v47  ;;  %21851 = vmatprep.subr.bf16.mxu0 %v21850_v29  ;;  %v14462_v47 = vld [vmem:[%s28801_s1 + $0x910] sm:$0xff]  ;;  %v14422_v18 = vld [vmem:[%s24683_s28 + $0xba] sm:$0xff] }
 0x109   : >> { %18483 = vmatmul.mubr.f32.gmra.mrb[14].mxu0 %v14393_v8  ;;  %21469 = vmatpush3.bf16.msra.mxu1 %v21466_v6  ;;  %v21858_v59 = vpack.c.bf16 %v14463_v7, %v14462_v47  ;;  %v14471_v6 = vld [vmem:[%s28801_s1 + $0x958] sm:$0xff]  ;;  %v14077_v8 = vld [vmem:[%s28801_s1 + $0x368] sm:$0xff]  ;;  %v14078_v7 = vld [vmem:[%s28801_s1 + $0x370] sm:$0xff] }
 0x10a   : >> { %21853 = vmatpush3.bf16.msra.mxu0 %v21850_v29  ;;  %17845 = vmatprep.mubr.f32.mxu1 %v14015_v12  ;;  %v14025_v29 = vld [vmem:[%s24683_s28 + $0x70] sm:$0xff]  ;;  %v21874_v43 = vpack.c.bf16 %v14471_v6, %v14470_v36  ;;  %v14026_v12 = vld [vmem:[%s24683_s28 + $0x78] sm:$0xff]  ;;  %v21494_v37 = vpack.c.bf16 %v14077_v8, %v14076_v31  ;;  %v14052_v5 = vld [vmem:[%s24683_s28 + $0x41] sm:$0xff] }
 0x10b   : >> { %18517 = vmatprep.mubr.f32.mxu0 %v25507_v15  ;;  %21471 = vmatprep.subr.bf16.mxu1 %v21470_v14  ;;  %v14103_v6 = vld [vmem:[%s28801_s1 + $0x3b0] sm:$0xff] }
 0x10c   : >> { %17846 = vmatmul.mubr.f32.vlgmr.msra.gmra.mrb[0].mxu1 %v14016_v0  ;;  %21855 = vmatprep.subr.bf16.mxu0 %v21854_v49  ;;  %v14423_v0 = vld [vmem:[%s24683_s28 + $0xc2] sm:$0xff]  ;;  %v14054_v31 = vld [vmem:[%s24683_s28 + $0x51] sm:$0xff] }
 0x10d   : >> { %18518 = vmatmul.mubr.f32.vlgmr.msra.gmra.mrb[0].mxu0 %v25523_v24  ;;  %21473 = vmatpush3.bf16.msra.mxu1 %v21470_v14  ;;  %v14472_v14 = vld [vmem:[%s28801_s1 + $0x960] sm:$0xff] }
 0x10e   : >> { %21857 = vmatpush3.bf16.msra.mxu0 %v21854_v49  ;;  %17848 = vmatprep.mubr.f32.mxu1 %v14017_v25  ;;  %v14473_v49 = vld [vmem:[%s28801_s1 + $0x968] sm:$0xff]  ;;  %v14079_v25 = vld [vmem:[%s28801_s1 + $0x378] sm:$0xff] }
 0x10f   : >> { %18520 = vmatprep.mubr.f32.mxu0 %v25528_v28  ;;  %21475 = vmatprep.subr.bf16.mxu1 %v21474_v26  ;;  %v21878_v47 = vpack.c.bf16 %v14473_v49, %v14472_v14  ;;  %v21498_v10 = vpack.c.bf16 %v14079_v25, %v14078_v7  ;;  %v14105_v49 = vld [vmem:[%s28801_s1 + $0x3c0] sm:$0xff] }
 0x110   : >> { %17849 = vmatmul.mubr.f32.gmra.mrb[2].mxu1 %v14018_v3  ;;  %21859 = vmatprep.subr.bf16.mxu0 %v21858_v59  ;;  %v14425_v3 = vld [vmem:[%s24683_s28 + $0xd2] sm:$0xff]  ;;  %v25741_v7 = vld [vmem:[%s24683_s28 + $0x9b] sm:$0xff] }
 0x111   : >> { %18521 = vmatmul.mubr.f32.gmra.mrb[2].mxu0 %v25545_v40  ;;  %21477 = vmatpush3.bf16.msra.mxu1 %v21474_v26  ;;  %v14474_v26 = vld [vmem:[%s28801_s1 + $0x970] sm:$0xff]  ;;  %v14056_v25 = vld [vmem:[%s24683_s28 + $0x61] sm:$0xff] }
 0x112   : >> { %21861 = vmatpush3.bf16.msra.mxu0 %v21858_v59  ;;  %17851 = vmatprep.mubr.f32.mxu1 %v14019_v41  ;;  %v14475_v59 = vld [vmem:[%s28801_s1 + $0x978] sm:$0xff]  ;;  %v14493_v41 = vld [vmem:[%s28801_s1 + $0x980] sm:$0xff] }
 0x113   : >> { %18523 = vmatprep.mubr.f32.mxu0 %v25550_v11  ;;  %21479 = vmatprep.subr.bf16.mxu1 %v21478_v44  ;;  %v21882_v34 = vpack.c.bf16 %v14475_v59, %v14474_v26  ;;  %v14452_v59 = vld [vmem:[%s24683_s28 + $0xa3] sm:$0xff] }
 0x114   : >> { %17852 = vmatmul.mubr.f32.gmra.mrb[4].mxu1 %v14020_v48  ;;  %21863 = vmatprep.subr.bf16.mxu0 %v21862_v19 }
 0x115   : >> { %18524 = vmatmul.mubr.f32.gmra.mrb[4].mxu0 %v25567_v23  ;;  %21481 = vmatpush3.bf16.msra.mxu1 %v21478_v44  ;;  %v14426_v44 = vld [vmem:[%s24683_s28 + $0xda] sm:$0xff] }
 0x116   : >> { %21865 = vmatpush3.bf16.msra.mxu0 %v21862_v19  ;;  %17854 = vmatprep.mubr.f32.mxu1 %v14021_v32  ;;  %v14048_v19 = vld [vmem:[%s24683_s28 + $0x21] sm:$0xff]  ;;  %v14496_v32 = vld [vmem:[%s28801_s1 + $0x998] sm:$0xff] }
 0x117   : >> { %18526 = vmatprep.mubr.f32.mxu0 %v25572_v56  ;;  %21483 = vmatprep.subr.bf16.mxu1 %v21482_v54 }
 0x118   : >> { %17855 = vmatmul.mubr.f32.gmra.mrb[6].mxu1 %v14022_v60  ;;  %21867 = vmatprep.subr.bf16.mxu0 %v21866_v21 }
 0x119   : >> { %18527 = vmatmul.mubr.f32.gmra.mrb[6].mxu0 %v25589_v35  ;;  %21485 = vmatpush3.bf16.msra.mxu1 %v21482_v54  ;;  %v25675_v54 = vld [vmem:[%s24683_s28 + $0x6b] sm:$0xff] }
 0x11a   : >> { %21869 = vmatpush3.bf16.msra.mxu0 %v21866_v21  ;;  %17857 = vmatprep.mubr.f32.mxu1 %v14023_v42  ;;  %v14050_v21 = vld [vmem:[%s24683_s28 + $0x31] sm:$0xff]  ;;  %v14051_v42 = vld [vmem:[%s24683_s28 + $0x39] sm:$0xff] }
 0x11b   : >> { %18529 = vmatprep.mubr.f32.mxu0 %v14419_v1  ;;  %21487 = vmatprep.subr.bf16.mxu1 %v21486_v63  ;;  %v14498_v1 = vld [vmem:[%s28801_s1 + $0x9a8] sm:$0xff] }
 0x11c   : >> { %17858 = vmatmul.mubr.f32.gmra.mrb[8].mxu1 %v14024_v13  ;;  %21871 = vmatprep.subr.bf16.mxu0 %v21870_v4  ;;  %v25702_v13 = vld [vmem:[%s24683_s28 + $0x83] sm:$0xff] }
 0x11d   : >> { %18530 = vmatmul.mubr.f32.gmra.mrb[8].mxu0 %v14420_v45  ;;  %21489 = vmatpush3.bf16.msra.mxu1 %v21486_v63  ;;  %v14497_v63 = vld [vmem:[%s28801_s1 + $0x9a0] sm:$0xff]  ;;  %v14104_v45 = vld [vmem:[%s28801_s1 + $0x3b8] sm:$0xff] }
 0x11e   : >> { %21873 = vmatpush3.bf16.msra.mxu0 %v21870_v4  ;;  %17860 = vmatprep.mubr.f32.mxu1 %v14025_v29  ;;  %v25697_v4 = vld [vmem:[%s24683_s28 + $0x7b] sm:$0xff]  ;;  %v21894_v36 = vpack.c.bf16 %v14498_v1, %v14497_v63  ;;  %v14053_v29 = vld [vmem:[%s24683_s28 + $0x49] sm:$0xff]  ;;  %v21514_v8 = vpack.c.bf16 %v14104_v45, %v14103_v6 }
 0x11f   : >> { %18532 = vmatprep.mubr.f32.mxu0 %v14421_v16  ;;  %21491 = vmatprep.subr.bf16.mxu1 %v21490_v53  ;;  %v14500_v16 = vld [vmem:[%s28801_s1 + $0x9b8] sm:$0xff]  ;;  %v14457_v1 = vld [vmem:[%s24683_s28 + $0xcb] sm:$0xff]  ;;  %v14130_v6 = vld [vmem:[%s28801_s1 + $0x400] sm:$0xff] }
 0x120   : >> { %17861 = vmatmul.mubr.f32.gmra.mrb[10].mxu1 %v14026_v12  ;;  %21875 = vmatprep.subr.bf16.mxu0 %v21874_v43  ;;  %v25724_v12 = vld [vmem:[%s24683_s28 + $0x93] sm:$0xff]  ;;  %v14526_v45 = vld [vmem:[%s28801_s1 + $0xa00] sm:$0xff] }
 0x121   : >> { %18533 = vmatmul.mubr.f32.gmra.mrb[10].mxu0 %v14422_v18  ;;  %21493 = vmatpush3.bf16.msra.mxu1 %v21490_v53  ;;  %v14499_v53 = vld [vmem:[%s28801_s1 + $0x9b0] sm:$0xff]  ;;  %v14106_v18 = vld [vmem:[%s28801_s1 + $0x3c8] sm:$0xff]  ;;  %v14508_v63 = vld [vmem:[%s28801_s1 + $0x9f8] sm:$0xff] }
 0x122   : >> { %21877 = vmatpush3.bf16.msra.mxu0 %v21874_v43  ;;  %17863 = vmatprep.mubr.f32.mxu1 %v25258_v30  ;;  %v14098_v30 = vld [vmem:[%s28801_s1 + $0x388] sm:$0xff]  ;;  %v21898_v14 = vpack.c.bf16 %v14500_v16, %v14499_v53  ;;  %v21518_v26 = vpack.c.bf16 %v14106_v18, %v14105_v49  ;;  %v14529_v18 = vld [vmem:[%s28801_s1 + $0xa18] sm:$0xff] }
 0x123   : >> { %18535 = vmatprep.mubr.f32.mxu0 %v14423_v0  ;;  %21495 = vmatprep.subr.bf16.mxu1 %v21494_v37  ;;  %v21502_v46 = vpack.c.bf16 %v14098_v30, %v14097_v39  ;;  %v25719_v43 = vld [vmem:[%s24683_s28 + $0x8b] sm:$0xff]  ;;  %v14501_v0 = vld [vmem:[%s28801_s1 + $0x9c0] sm:$0xff]  ;;  %v14504_v30 = vld [vmem:[%s28801_s1 + $0x9d8] sm:$0xff] }
 0x124   : >> { %17864 = vmatmul.mubr.f32.gmra.mrb[12].mxu1 %v25275_v61  ;;  %21879 = vmatprep.subr.bf16.mxu0 %v21878_v47  ;;  %v14494_v61 = vld [vmem:[%s28801_s1 + $0x988] sm:$0xff]  ;;  %v14503_v39 = vld [vmem:[%s28801_s1 + $0x9d0] sm:$0xff] }
 0x125   : >> { %18536 = vmatmul.mubr.f32.gmra.mrb[12].mxu0 %v14424_v33  ;;  %21497 = vmatpush3.bf16.msra.mxu1 %v21494_v37  ;;  %v21886_v48 = vpack.c.bf16 %v14494_v61, %v14493_v41  ;;  %v14055_v37 = vld [vmem:[%s24683_s28 + $0x59] sm:$0xff]  ;;  %v14453_v41 = vld [vmem:[%s24683_s28 + $0xab] sm:$0xff]  ;;  %v14081_v53 = vld [vmem:[%s24683_s28 + $0x22] sm:$0xff] }
 0x126   : >> { %21881 = vmatpush3.bf16.msra.mxu0 %v21878_v47  ;;  %17866 = vmatprep.mubr.f32.mxu1 %v25280_v9  ;;  %v14100_v9 = vld [vmem:[%s28801_s1 + $0x398] sm:$0xff]  ;;  %v14502_v47 = vld [vmem:[%s28801_s1 + $0x9c8] sm:$0xff] }
 0x127   : >> { %18538 = vmatprep.mubr.f32.mxu0 %v14425_v3  ;;  %21499 = vmatprep.subr.bf16.mxu1 %v21498_v10  ;;  %v21506_v57 = vpack.c.bf16 %v14100_v9, %v14099_v50  ;;  %v21902_v33 = vpack.c.bf16 %v14502_v47, %v14501_v0  ;;  %v14108_v3 = vld [vmem:[%s28801_s1 + $0x3d8] sm:$0xff]  ;;  %v14110_v50 = vld [vmem:[%s28801_s1 + $0x3e8] sm:$0xff] }
 0x128   : >> { %17867 = vmatmul.mubr.f32.gmra.mrb[14].mxu1 %v25297_v22  ;;  %21883 = vmatprep.subr.bf16.mxu0 %v21882_v34  ;;  %v14495_v22 = vld [vmem:[%s28801_s1 + $0x990] sm:$0xff]  ;;  %v14059_v9 = vld [vmem:[%s24683_s28 + $0x79] sm:$0xff] }
 0x129   : >> { %18539 = vmatmul.mubr.f32.gmra.mrb[14].mxu0 %v14426_v44  ;;  %21501 = vmatpush3.bf16.msra.mxu1 %v21498_v10  ;;  %v21890_v60 = vpack.c.bf16 %v14496_v32, %v14495_v22  ;;  %v14107_v10 = vld [vmem:[%s28801_s1 + $0x3d0] sm:$0xff]  ;;  %v14506_v22 = vld [vmem:[%s28801_s1 + $0x9e8] sm:$0xff]  ;;  %v14455_v32 = vld [vmem:[%s24683_s28 + $0xbb] sm:$0xff] }
 0x12a   : >> { %21885 = vmatpush3.bf16.msra.mxu0 %v21882_v34  ;;  %17901 = vmatprep.mubr.f32.mxu1 %v14048_v19  ;;  %v14057_v34 = vld [vmem:[%s24683_s28 + $0x69] sm:$0xff]  ;;  %v14058_v61 = vld [vmem:[%s24683_s28 + $0x71] sm:$0xff]  ;;  %v21522_v44 = vpack.c.bf16 %v14108_v3, %v14107_v10  ;;  %v14084_v10 = vld [vmem:[%s24683_s28 + $0x3a] sm:$0xff] }
 0x12b   : >> { %18573 = vmatprep.mubr.f32.mxu0 %v25659_v27  ;;  %21503 = vmatprep.subr.bf16.mxu1 %v21502_v46  ;;  %v14454_v19 = vld [vmem:[%s24683_s28 + $0xb3] sm:$0xff]  ;;  %v14082_v49 = vld [vmem:[%s24683_s28 + $0x2a] sm:$0xff]  ;;  %v14530_v3 = vld [vmem:[%s28801_s1 + $0xa20] sm:$0xff] }
 0x12c   : >> { %17902 = vmatmul.mubr.f32.vlgmr.msra.gmra.mrb[0].mxu1 %v14049_v52  ;;  %21887 = vmatprep.subr.bf16.mxu0 %v21886_v48  ;;  %v14505_v52 = vld [vmem:[%s28801_s1 + $0x9e0] sm:$0xff]  ;;  %v14083_v0 = vld [vmem:[%s24683_s28 + $0x32] sm:$0xff] }
 0x12d   : >> { %18574 = vmatmul.mubr.f32.vlgmr.msra.gmra.mrb[0].mxu0 %v25675_v54  ;;  %21505 = vmatpush3.bf16.msra.mxu1 %v21502_v46  ;;  %v21906_v46 = vpack.c.bf16 %v14504_v30, %v14503_v39  ;;  %v25849_v39 = vld [vmem:[%s24683_s28 + $0x7c] sm:$0xff] }
 0x12e   : >> { %21889 = vmatpush3.bf16.msra.mxu0 %v21886_v48  ;;  %17904 = vmatprep.mubr.f32.mxu1 %v14050_v21  ;;  %v14109_v48 = vld [vmem:[%s28801_s1 + $0x3e0] sm:$0xff] }
 0x12f   : >> { %18576 = vmatprep.mubr.f32.mxu0 %v25680_v58  ;;  %21507 = vmatprep.subr.bf16.mxu1 %v21506_v57  ;;  %v21526_v21 = vpack.c.bf16 %v14110_v50, %v14109_v48  ;;  %v14085_v30 = vld [vmem:[%s24683_s28 + $0x42] sm:$0xff]  ;;  %v14086_v48 = vld [vmem:[%s24683_s28 + $0x4a] sm:$0xff] }
 0x130   : >> { %17905 = vmatmul.mubr.f32.gmra.mrb[2].mxu1 %v14051_v42  ;;  %21891 = vmatprep.subr.bf16.mxu0 %v21890_v60  ;;  %v14507_v42 = vld [vmem:[%s28801_s1 + $0x9f0] sm:$0xff] }
 0x131   : >> { %18577 = vmatmul.mubr.f32.gmra.mrb[2].mxu0 %v25697_v4  ;;  %21509 = vmatpush3.bf16.msra.mxu1 %v21506_v57  ;;  %v14456_v57 = vld [vmem:[%s24683_s28 + $0xc3] sm:$0xff]  ;;  %v14532_v50 = vld [vmem:[%s28801_s1 + $0xa30] sm:$0xff] }
 0x132   : >> { %21893 = vmatpush3.bf16.msra.mxu0 %v21890_v60  ;;  %17907 = vmatprep.mubr.f32.mxu1 %v14052_v5  ;;  %v21910_v60 = vpack.c.bf16 %v14506_v22, %v14505_v52  ;;  %v21530_v5 = vpack.c.bf16 %v14112_v62, %v14111_v51  ;;  %v25871_v52 = vld [vmem:[%s24683_s28 + $0x8c] sm:$0xff]  ;;  %v14088_v62 = vld [vmem:[%s24683_s28 + $0x5a] sm:$0xff] }
 0x133   : >> { %18579 = vmatprep.mubr.f32.mxu0 %v25702_v13  ;;  %21511 = vmatprep.subr.bf16.mxu1 %v21510_v2  ;;  %v14087_v22 = vld [vmem:[%s24683_s28 + $0x52] sm:$0xff]  ;;  %v14139_v51 = vld [vmem:[%s28801_s1 + $0x448] sm:$0xff] }
 0x134   : >> { %17908 = vmatmul.mubr.f32.gmra.mrb[4].mxu1 %v14053_v29  ;;  %21895 = vmatprep.subr.bf16.mxu0 %v21894_v36  ;;  %v14459_v29 = vld [vmem:[%s24683_s28 + $0xdb] sm:$0xff] }
 0x135   : >> { %18580 = vmatmul.mubr.f32.gmra.mrb[4].mxu0 %v25719_v43  ;;  %21513 = vmatpush3.bf16.msra.mxu1 %v21510_v2  ;;  %v14458_v2 = vld [vmem:[%s24683_s28 + $0xd3] sm:$0xff] }
 0x136   : >> { %21897 = vmatpush3.bf16.msra.mxu0 %v21894_v36  ;;  %17910 = vmatprep.mubr.f32.mxu1 %v14054_v31  ;;  %v21914_v36 = vpack.c.bf16 %v14508_v63, %v14507_v42  ;;  %v25811_v31 = vld [vmem:[%s24683_s28 + $0x64] sm:$0xff] }
 0x137   : >> { %18582 = vmatprep.mubr.f32.mxu0 %v25724_v12  ;;  %21515 = vmatprep.subr.bf16.mxu1 %v21514_v8  ;;  %v14534_v42 = vld [vmem:[%s28801_s1 + $0xa40] sm:$0xff]  ;;  %v14535_v63 = vld [vmem:[%s28801_s1 + $0xa48] sm:$0xff] }
 0x138   : >> { %17911 = vmatmul.mubr.f32.gmra.mrb[6].mxu1 %v14055_v37  ;;  %21899 = vmatprep.subr.bf16.mxu0 %v21898_v14  ;;  %v25827_v37 = vld [vmem:[%s24683_s28 + $0x6c] sm:$0xff] }
 0x139   : >> { %18583 = vmatmul.mubr.f32.gmra.mrb[6].mxu0 %v25741_v7  ;;  %21517 = vmatpush3.bf16.msra.mxu1 %v21514_v8 }
 0x13a   : >> { %21901 = vmatpush3.bf16.msra.mxu0 %v21898_v14  ;;  %17913 = vmatprep.mubr.f32.mxu1 %v14056_v25  ;;  %v14132_v14 = vld [vmem:[%s28801_s1 + $0x410] sm:$0xff] }
 0x13b   : >> { %18585 = vmatprep.mubr.f32.mxu0 %v14452_v59  ;;  %21519 = vmatprep.subr.bf16.mxu1 %v21518_v26  ;;  %v25832_v25 = vld [vmem:[%s24683_s28 + $0x74] sm:$0xff]  ;;  %v14134_v59 = vld [vmem:[%s28801_s1 + $0x420] sm:$0xff] }
 0x13c   : >> { %17914 = vmatmul.mubr.f32.gmra.mrb[8].mxu1 %v14057_v34  ;;  %21903 = vmatprep.subr.bf16.mxu0 %v21902_v33  ;;  %v14531_v34 = vld [vmem:[%s28801_s1 + $0xa28] sm:$0xff] }
 0x13d   : >> { %18586 = vmatmul.mubr.f32.gmra.mrb[8].mxu0 %v14453_v41  ;;  %21521 = vmatpush3.bf16.msra.mxu1 %v21518_v26 }
 0x13e   : >> { %21905 = vmatpush3.bf16.msra.mxu0 %v21902_v33  ;;  %17916 = vmatprep.mubr.f32.mxu1 %v14058_v61  ;;  %v14135_v33 = vld [vmem:[%s28801_s1 + $0x428] sm:$0xff] }
 0x13f   : >> { %18588 = vmatprep.mubr.f32.mxu0 %v14454_v19  ;;  %21523 = vmatprep.subr.bf16.mxu1 %v21522_v44  ;;  %v21542_v41 = vpack.c.bf16 %v14135_v33, %v14134_v59  ;;  %v25854_v61 = vld [vmem:[%s24683_s28 + $0x84] sm:$0xff]  ;;  %v14136_v19 = vld [vmem:[%s28801_s1 + $0x430] sm:$0xff] }
 0x140   : >> { %17917 = vmatmul.mubr.f32.gmra.mrb[10].mxu1 %v14059_v9  ;;  %21907 = vmatprep.subr.bf16.mxu0 %v21906_v46  ;;  %v14533_v9 = vld [vmem:[%s28801_s1 + $0xa38] sm:$0xff]  ;;  %v14490_v59 = vld [vmem:[%s24683_s28 + $0xcc] sm:$0xff] }
 0x141   : >> { %18589 = vmatmul.mubr.f32.gmra.mrb[10].mxu0 %v14455_v32  ;;  %21525 = vmatpush3.bf16.msra.mxu1 %v21522_v44  ;;  %v21926_v44 = vpack.c.bf16 %v14531_v34, %v14530_v3  ;;  %v14163_v34 = vld [vmem:[%s28801_s1 + $0x480] sm:$0xff] }
 0x142   : >> { %21909 = vmatpush3.bf16.msra.mxu0 %v21906_v46  ;;  %17919 = vmatprep.mubr.f32.mxu1 %v25398_v55  ;;  %v14131_v55 = vld [vmem:[%s28801_s1 + $0x408] sm:$0xff]  ;;  %v14137_v46 = vld [vmem:[%s28801_s1 + $0x438] sm:$0xff] }
 0x143   : >> { %18591 = vmatprep.mubr.f32.mxu0 %v14456_v57  ;;  %21527 = vmatprep.subr.bf16.mxu1 %v21526_v21  ;;  %v21534_v16 = vpack.c.bf16 %v14131_v55, %v14130_v6  ;;  %v21546_v32 = vpack.c.bf16 %v14137_v46, %v14136_v19  ;;  %v21930_v57 = vpack.c.bf16 %v14533_v9, %v14532_v50  ;;  %v14140_v6 = vld [vmem:[%s28801_s1 + $0x450] sm:$0xff]  ;;  %v14141_v55 = vld [vmem:[%s28801_s1 + $0x458] sm:$0xff]  ;;  %v25963_v46 = vld [vmem:[%s24683_s28 + $0x80] sm:$0xff] }
 0x144   : >> { %17920 = vmatmul.mubr.f32.gmra.mrb[12].mxu1 %v25415_v17  ;;  %21911 = vmatprep.subr.bf16.mxu0 %v21910_v60  ;;  %v14527_v17 = vld [vmem:[%s28801_s1 + $0xa08] sm:$0xff]  ;;  %v14165_v50 = vld [vmem:[%s28801_s1 + $0x490] sm:$0xff] }
 0x145   : >> { %18592 = vmatmul.mubr.f32.gmra.mrb[12].mxu0 %v14457_v1  ;;  %21529 = vmatpush3.bf16.msra.mxu1 %v21526_v21  ;;  %v21918_v8 = vpack.c.bf16 %v14527_v17, %v14526_v45  ;;  %v25876_v21 = vld [vmem:[%s24683_s28 + $0x94] sm:$0xff]  ;;  %v25893_v1 = vld [vmem:[%s24683_s28 + $0x9c] sm:$0xff]  ;;  %v14115_v9 = vld [vmem:[%s24683_s28 + $0x2b] sm:$0xff] }
 0x146   : >> { %21913 = vmatpush3.bf16.msra.mxu0 %v21910_v60  ;;  %17922 = vmatprep.mubr.f32.mxu1 %v25420_v38  ;;  %v14133_v38 = vld [vmem:[%s28801_s1 + $0x418] sm:$0xff]  ;;  %v14138_v60 = vld [vmem:[%s28801_s1 + $0x440] sm:$0xff]  ;;  %v14536_v45 = vld [vmem:[%s28801_s1 + $0xa50] sm:$0xff] }
 0x147   : >> { %18594 = vmatprep.mubr.f32.mxu0 %v14458_v2  ;;  %21531 = vmatprep.subr.bf16.mxu1 %v21530_v5  ;;  %v21538_v47 = vpack.c.bf16 %v14133_v38, %v14132_v14  ;;  %v14485_v2 = vld [vmem:[%s24683_s28 + $0xa4] sm:$0xff]  ;;  %v14537_v17 = vld [vmem:[%s28801_s1 + $0xa58] sm:$0xff] }
 0x148   : >> { %17923 = vmatmul.mubr.f32.gmra.mrb[14].mxu1 %v25437_v20  ;;  %21915 = vmatprep.subr.bf16.mxu0 %v21914_v36  ;;  %v14528_v20 = vld [vmem:[%s28801_s1 + $0xa10] sm:$0xff]  ;;  %v14142_v14 = vld [vmem:[%s28801_s1 + $0x460] sm:$0xff]  ;;  %v14143_v38 = vld [vmem:[%s28801_s1 + $0x468] sm:$0xff] }
 0x149   : >> { %18595 = vmatmul.mubr.f32.gmra.mrb[14].mxu0 %v14459_v29  ;;  %21533 = vmatpush3.bf16.msra.mxu1 %v21530_v5  ;;  %v21922_v26 = vpack.c.bf16 %v14529_v18, %v14528_v20  ;;  %v21550_v5 = vpack.c.bf16 %v14139_v51, %v14138_v60  ;;  %v14486_v29 = vld [vmem:[%s24683_s28 + $0xac] sm:$0xff]  ;;  %v21558_v20 = vpack.c.bf16 %v14143_v38, %v14142_v14  ;;  %v14489_v18 = vld [vmem:[%s24683_s28 + $0xc4] sm:$0xff]  ;;  %v14566_v38 = vld [vmem:[%s28801_s1 + $0xab8] sm:$0xff] }
 0x14a   : >> { %21917 = vmatpush3.bf16.msra.mxu0 %v21914_v36  ;;  %17957 = vmatprep.mubr.f32.mxu1 %v14081_v53  ;;  %v21934_v36 = vpack.c.bf16 %v14535_v63, %v14534_v42  ;;  %v21554_v53 = vpack.c.bf16 %v14141_v55, %v14140_v6  ;;  %v25984_v51 = vld [vmem:[%s24683_s28 + $0x90] sm:$0xff]  ;;  %v14167_v42 = vld [vmem:[%s28801_s1 + $0x4a0] sm:$0xff]  ;;  %v14168_v63 = vld [vmem:[%s28801_s1 + $0x4a8] sm:$0xff] }
 0x14b   : >> { %18629 = vmatprep.mubr.f32.mxu0 %v25811_v31  ;;  %21535 = vmatprep.subr.bf16.mxu1 %v21534_v16  ;;  %v26001_v6 = vld [vmem:[%s24683_s28 + $0x98] sm:$0xff]  ;;  %v14118_v55 = vld [vmem:[%s24683_s28 + $0x43] sm:$0xff]  ;;  %v14565_v14 = vld [vmem:[%s28801_s1 + $0xab0] sm:$0xff] }
 0x14c   : >> { %17958 = vmatmul.mubr.f32.vlgmr.msra.gmra.mrb[0].mxu1 %v14082_v49  ;;  %21919 = vmatprep.subr.bf16.mxu0 %v21918_v8  ;;  %v14488_v49 = vld [vmem:[%s24683_s28 + $0xbc] sm:$0xff] }
 0x14d   : >> { %18630 = vmatmul.mubr.f32.vlgmr.msra.gmra.mrb[0].mxu0 %v25827_v37  ;;  %21537 = vmatpush3.bf16.msra.mxu1 %v21534_v16  ;;  %v14487_v16 = vld [vmem:[%s24683_s28 + $0xb4] sm:$0xff] }
 0x14e   : >> { %21921 = vmatpush3.bf16.msra.mxu0 %v21918_v8  ;;  %17960 = vmatprep.mubr.f32.mxu1 %v14083_v0  ;;  %v21938_v8 = vpack.c.bf16 %v14537_v17, %v14536_v45  ;;  %v21574_v45 = vpack.c.bf16 %v14168_v63, %v14167_v42  ;;  %v26006_v17 = vld [vmem:[%s24683_s28 + $0xa0] sm:$0xff]  ;;  %v14523_v42 = vld [vmem:[%s24683_s28 + $0xe8] sm:$0xff] }
 0x14f   : >> { %18632 = vmatprep.mubr.f32.mxu0 %v25832_v25  ;;  %21539 = vmatprep.subr.bf16.mxu1 %v21538_v47 }
 0x150   : >> { %17961 = vmatmul.mubr.f32.gmra.mrb[2].mxu1 %v14084_v10  ;;  %21923 = vmatprep.subr.bf16.mxu0 %v21922_v26  ;;  %v14491_v10 = vld [vmem:[%s24683_s28 + $0xd4] sm:$0xff] }
 0x151   : >> { %18633 = vmatmul.mubr.f32.gmra.mrb[2].mxu0 %v25849_v39  ;;  %21541 = vmatpush3.bf16.msra.mxu1 %v21538_v47  ;;  %v14144_v47 = vld [vmem:[%s28801_s1 + $0x470] sm:$0xff] }
 0x152   : >> { %21925 = vmatpush3.bf16.msra.mxu0 %v21922_v26  ;;  %17963 = vmatprep.mubr.f32.mxu1 %v14085_v30  ;;  %v14145_v26 = vld [vmem:[%s28801_s1 + $0x478] sm:$0xff]  ;;  %v14559_v30 = vld [vmem:[%s28801_s1 + $0xa80] sm:$0xff] }
 0x153   : >> { %18635 = vmatprep.mubr.f32.mxu0 %v25854_v61  ;;  %21543 = vmatprep.subr.bf16.mxu1 %v21542_v41  ;;  %v21562_v33 = vpack.c.bf16 %v14145_v26, %v14144_v47  ;;  %v14172_v47 = vld [vmem:[%s28801_s1 + $0x4c8] sm:$0xff]  ;;  %v14121_v26 = vld [vmem:[%s24683_s28 + $0x5b] sm:$0xff] }
 0x154   : >> { %17964 = vmatmul.mubr.f32.gmra.mrb[4].mxu1 %v14086_v48  ;;  %21927 = vmatprep.subr.bf16.mxu0 %v21926_v44 }
 0x155   : >> { %18636 = vmatmul.mubr.f32.gmra.mrb[4].mxu0 %v25871_v52  ;;  %21545 = vmatpush3.bf16.msra.mxu1 %v21542_v41  ;;  %v14492_v41 = vld [vmem:[%s24683_s28 + $0xdc] sm:$0xff] }
 0x156   : >> { %21929 = vmatpush3.bf16.msra.mxu0 %v21926_v44  ;;  %17966 = vmatprep.mubr.f32.mxu1 %v14087_v22  ;;  %v14114_v44 = vld [vmem:[%s24683_s28 + $0x23] sm:$0xff]  ;;  %v14562_v22 = vld [vmem:[%s28801_s1 + $0xa98] sm:$0xff] }
 0x157   : >> { %18638 = vmatprep.mubr.f32.mxu0 %v25876_v21  ;;  %21547 = vmatprep.subr.bf16.mxu1 %v21546_v32 }
 0x158   : >> { %17967 = vmatmul.mubr.f32.gmra.mrb[6].mxu1 %v14088_v62  ;;  %21931 = vmatprep.subr.bf16.mxu0 %v21930_v57 }
 0x159   : >> { %18639 = vmatmul.mubr.f32.gmra.mrb[6].mxu0 %v25893_v1  ;;  %21549 = vmatpush3.bf16.msra.mxu1 %v21546_v32  ;;  %v25979_v32 = vld [vmem:[%s24683_s28 + $0x88] sm:$0xff] }
 0x15a   : >> { %21933 = vmatpush3.bf16.msra.mxu0 %v21930_v57  ;;  %17969 = vmatprep.mubr.f32.mxu1 %v25507_v15  ;;  %v14538_v15 = vld [vmem:[%s28801_s1 + $0xa60] sm:$0xff]  ;;  %v14116_v57 = vld [vmem:[%s24683_s28 + $0x33] sm:$0xff] }
 0x15b   : >> { %18641 = vmatprep.mubr.f32.mxu0 %v14485_v2  ;;  %21551 = vmatprep.subr.bf16.mxu1 %v21550_v5  ;;  %v14563_v2 = vld [vmem:[%s28801_s1 + $0xaa0] sm:$0xff] }
 0x15c   : >> { %17970 = vmatmul.mubr.f32.gmra.mrb[8].mxu1 %v25523_v24  ;;  %21935 = vmatprep.subr.bf16.mxu0 %v21934_v36  ;;  %v14539_v24 = vld [vmem:[%s28801_s1 + $0xa68] sm:$0xff] }
 0x15d   : >> { %18642 = vmatmul.mubr.f32.gmra.mrb[8].mxu0 %v14486_v29  ;;  %21553 = vmatpush3.bf16.msra.mxu1 %v21550_v5  ;;  %v21942_v0 = vpack.c.bf16 %v14539_v24, %v14538_v15  ;;  %v14117_v5 = vld [vmem:[%s24683_s28 + $0x3b] sm:$0xff]  ;;  %v26023_v15 = vld [vmem:[%s24683_s28 + $0xa8] sm:$0xff]  ;;  %v14120_v24 = vld [vmem:[%s24683_s28 + $0x53] sm:$0xff] }
 0x15e   : >> { %21937 = vmatpush3.bf16.msra.mxu0 %v21934_v36  ;;  %17972 = vmatprep.mubr.f32.mxu1 %v25528_v28  ;;  %v14540_v28 = vld [vmem:[%s28801_s1 + $0xa70] sm:$0xff]  ;;  %v14564_v36 = vld [vmem:[%s28801_s1 + $0xaa8] sm:$0xff] }
 0x15f   : >> { %18644 = vmatprep.mubr.f32.mxu0 %v14487_v16  ;;  %21555 = vmatprep.subr.bf16.mxu1 %v21554_v53  ;;  %v21958_v29 = vpack.c.bf16 %v14564_v36, %v14563_v2  ;;  %v14170_v16 = vld [vmem:[%s28801_s1 + $0x4b8] sm:$0xff]  ;;  %v14196_v36 = vld [vmem:[%s28801_s1 + $0x500] sm:$0xff] }
 0x160   : >> { %17973 = vmatmul.mubr.f32.gmra.mrb[10].mxu1 %v25545_v40  ;;  %21939 = vmatprep.subr.bf16.mxu0 %v21938_v8  ;;  %v14541_v40 = vld [vmem:[%s28801_s1 + $0xa78] sm:$0xff] }
 0x161   : >> { %18645 = vmatmul.mubr.f32.gmra.mrb[10].mxu0 %v14488_v49  ;;  %21557 = vmatpush3.bf16.msra.mxu1 %v21554_v53  ;;  %v21946_v3 = vpack.c.bf16 %v14541_v40, %v14540_v28  ;;  %v14169_v53 = vld [vmem:[%s28801_s1 + $0x4b0] sm:$0xff]  ;;  %v14567_v28 = vld [vmem:[%s28801_s1 + $0xac0] sm:$0xff]  ;;  %v14568_v40 = vld [vmem:[%s28801_s1 + $0xac8] sm:$0xff] }
 0x162   : >> { %21941 = vmatpush3.bf16.msra.mxu0 %v21938_v8  ;;  %17975 = vmatprep.mubr.f32.mxu1 %v25550_v11  ;;  %v14164_v11 = vld [vmem:[%s28801_s1 + $0x488] sm:$0xff]  ;;  %v21578_v49 = vpack.c.bf16 %v14170_v16, %v14169_v53 }
 0x163   : >> { %18647 = vmatprep.mubr.f32.mxu0 %v14489_v18  ;;  %21559 = vmatprep.subr.bf16.mxu1 %v21558_v20  ;;  %v21566_v19 = vpack.c.bf16 %v14164_v11, %v14163_v34  ;;  %v14119_v8 = vld [vmem:[%s24683_s28 + $0x4b] sm:$0xff]  ;;  %v21962_v18 = vpack.c.bf16 %v14566_v38, %v14565_v14  ;;  %v14174_v11 = vld [vmem:[%s28801_s1 + $0x4d8] sm:$0xff]  ;;  %v26115_v16 = vld [vmem:[%s24683_s28 + $0x81] sm:$0xff] }
 0x164   : >> { %17976 = vmatmul.mubr.f32.gmra.mrb[12].mxu1 %v25567_v23  ;;  %21943 = vmatprep.subr.bf16.mxu0 %v21942_v0  ;;  %v14560_v23 = vld [vmem:[%s28801_s1 + $0xa88] sm:$0xff]  ;;  %v14173_v34 = vld [vmem:[%s28801_s1 + $0x4d0] sm:$0xff] }
 0x165   : >> { %18648 = vmatmul.mubr.f32.gmra.mrb[12].mxu0 %v14490_v59  ;;  %21561 = vmatpush3.bf16.msra.mxu1 %v21558_v20  ;;  %v21950_v48 = vpack.c.bf16 %v14560_v23, %v14559_v30  ;;  %v26028_v20 = vld [vmem:[%s24683_s28 + $0xb0] sm:$0xff]  ;;  %v26045_v59 = vld [vmem:[%s24683_s28 + $0xb8] sm:$0xff] }
 0x166   : >> { %21945 = vmatpush3.bf16.msra.mxu0 %v21942_v0  ;;  %17978 = vmatprep.mubr.f32.mxu1 %v25572_v56  ;;  %v14166_v56 = vld [vmem:[%s28801_s1 + $0x498] sm:$0xff]  ;;  %v14171_v0 = vld [vmem:[%s28801_s1 + $0x4c0] sm:$0xff]  ;;  %v14569_v30 = vld [vmem:[%s28801_s1 + $0xad0] sm:$0xff] }
 0x167   : >> { %18650 = vmatprep.mubr.f32.mxu0 %v14491_v10  ;;  %21563 = vmatprep.subr.bf16.mxu1 %v21562_v33  ;;  %v21570_v60 = vpack.c.bf16 %v14166_v56, %v14165_v50  ;;  %v14518_v10 = vld [vmem:[%s24683_s28 + $0xc0] sm:$0xff]  ;;  %v14570_v23 = vld [vmem:[%s28801_s1 + $0xad8] sm:$0xff]  ;;  %v14176_v56 = vld [vmem:[%s28801_s1 + $0x4e8] sm:$0xff] }
 0x168   : >> { %17979 = vmatmul.mubr.f32.gmra.mrb[14].mxu1 %v25589_v35  ;;  %21947 = vmatprep.subr.bf16.mxu0 %v21946_v3  ;;  %v14561_v35 = vld [vmem:[%s28801_s1 + $0xa90] sm:$0xff]  ;;  %v14175_v50 = vld [vmem:[%s28801_s1 + $0x4e0] sm:$0xff] }
 0x169   : >> { %18651 = vmatmul.mubr.f32.gmra.mrb[14].mxu0 %v14492_v41  ;;  %21565 = vmatpush3.bf16.msra.mxu1 %v21562_v33  ;;  %v21954_v62 = vpack.c.bf16 %v14562_v22, %v14561_v35  ;;  %v21582_v33 = vpack.c.bf16 %v14172_v47, %v14171_v0  ;;  %v14519_v41 = vld [vmem:[%s24683_s28 + $0xc8] sm:$0xff]  ;;  %v21590_v35 = vpack.c.bf16 %v14176_v56, %v14175_v50  ;;  %v14522_v22 = vld [vmem:[%s24683_s28 + $0xe0] sm:$0xff]  ;;  %v14198_v14 = vld [vmem:[%s28801_s1 + $0x510] sm:$0xff] }
 0x16a   : >> { %21949 = vmatpush3.bf16.msra.mxu0 %v21946_v3  ;;  %18013 = vmatprep.mubr.f32.mxu1 %v14114_v44  ;;  %v21966_v3 = vpack.c.bf16 %v14568_v40, %v14567_v28  ;;  %v21586_v44 = vpack.c.bf16 %v14174_v11, %v14173_v34  ;;  %v14148_v38 = vld [vmem:[%s24683_s28 + $0x2c] sm:$0xff]  ;;  %v14200_v28 = vld [vmem:[%s28801_s1 + $0x520] sm:$0xff]  ;;  %v14599_v56 = vld [vmem:[%s28801_s1 + $0xb38] sm:$0xff] }
 0x16b   : >> { %18685 = vmatprep.mubr.f32.mxu0 %v25963_v46  ;;  %21567 = vmatprep.subr.bf16.mxu1 %v21566_v19  ;;  %v26136_v47 = vld [vmem:[%s24683_s28 + $0x91] sm:$0xff]  ;;  %v14201_v40 = vld [vmem:[%s28801_s1 + $0x528] sm:$0xff]  ;;  %v26153_v34 = vld [vmem:[%s24683_s28 + $0x99] sm:$0xff] }
 0x16c   : >> { %18014 = vmatmul.mubr.f32.vlgmr.msra.gmra.mrb[0].mxu1 %v14115_v9  ;;  %21951 = vmatprep.subr.bf16.mxu0 %v21950_v48  ;;  %v14521_v9 = vld [vmem:[%s24683_s28 + $0xd8] sm:$0xff]  ;;  %v14151_v11 = vld [vmem:[%s24683_s28 + $0x44] sm:$0xff]  ;;  %v14598_v50 = vld [vmem:[%s28801_s1 + $0xb30] sm:$0xff] }
 0x16d   : >> { %18686 = vmatmul.mubr.f32.vlgmr.msra.gmra.mrb[0].mxu0 %v25979_v32  ;;  %21569 = vmatpush3.bf16.msra.mxu1 %v21566_v19  ;;  %v14520_v19 = vld [vmem:[%s24683_s28 + $0xd0] sm:$0xff] }
 0x16e   : >> { %21953 = vmatpush3.bf16.msra.mxu0 %v21950_v48  ;;  %18016 = vmatprep.mubr.f32.mxu1 %v14116_v57  ;;  %v21970_v48 = vpack.c.bf16 %v14570_v23, %v14569_v30  ;;  %v21606_v30 = vpack.c.bf16 %v14201_v40, %v14200_v28  ;;  %v26158_v23 = vld [vmem:[%s24683_s28 + $0xa1] sm:$0xff]  ;;  %v14556_v28 = vld [vmem:[%s24683_s28 + $0xe9] sm:$0xff] }
 0x16f   : >> { %18688 = vmatprep.mubr.f32.mxu0 %v25984_v51  ;;  %21571 = vmatprep.subr.bf16.mxu1 %v21570_v60 }
 0x170   : >> { %18017 = vmatmul.mubr.f32.gmra.mrb[2].mxu1 %v14117_v5  ;;  %21955 = vmatprep.subr.bf16.mxu0 %v21954_v62  ;;  %v14524_v5 = vld [vmem:[%s24683_s28 + $0xf0] sm:$0xff] }
 0x171   : >> { %18689 = vmatmul.mubr.f32.gmra.mrb[2].mxu0 %v26001_v6  ;;  %21573 = vmatpush3.bf16.msra.mxu1 %v21570_v60  ;;  %v14177_v60 = vld [vmem:[%s28801_s1 + $0x4f0] sm:$0xff] }
 0x172   : >> { %21957 = vmatpush3.bf16.msra.mxu0 %v21954_v62  ;;  %18019 = vmatprep.mubr.f32.mxu1 %v14118_v55  ;;  %v14178_v62 = vld [vmem:[%s28801_s1 + $0x4f8] sm:$0xff]  ;;  %v14592_v55 = vld [vmem:[%s28801_s1 + $0xb00] sm:$0xff] }
 0x173   : >> { %18691 = vmatprep.mubr.f32.mxu0 %v26006_v17  ;;  %21575 = vmatprep.subr.bf16.mxu1 %v21574_v45  ;;  %v21594_v63 = vpack.c.bf16 %v14178_v62, %v14177_v60  ;;  %v14205_v60 = vld [vmem:[%s28801_s1 + $0x548] sm:$0xff]  ;;  %v14154_v62 = vld [vmem:[%s24683_s28 + $0x5c] sm:$0xff] }
 0x174   : >> { %18020 = vmatmul.mubr.f32.gmra.mrb[4].mxu1 %v14119_v8  ;;  %21959 = vmatprep.subr.bf16.mxu0 %v21958_v29 }
 0x175   : >> { %18692 = vmatmul.mubr.f32.gmra.mrb[4].mxu0 %v26023_v15  ;;  %21577 = vmatpush3.bf16.msra.mxu1 %v21574_v45  ;;  %v14525_v45 = vld [vmem:[%s24683_s28 + $0xf8] sm:$0xff] }
 0x176   : >> { %21961 = vmatpush3.bf16.msra.mxu0 %v21958_v29  ;;  %18022 = vmatprep.mubr.f32.mxu1 %v14120_v24  ;;  %v14147_v29 = vld [vmem:[%s24683_s28 + $0x24] sm:$0xff]  ;;  %v14595_v24 = vld [vmem:[%s28801_s1 + $0xb18] sm:$0xff] }
 0x177   : >> { %18694 = vmatprep.mubr.f32.mxu0 %v26028_v20  ;;  %21579 = vmatprep.subr.bf16.mxu1 %v21578_v49 }
 0x178   : >> { %18023 = vmatmul.mubr.f32.gmra.mrb[6].mxu1 %v14121_v26  ;;  %21963 = vmatprep.subr.bf16.mxu0 %v21962_v18 }
 0x179   : >> { %18695 = vmatmul.mubr.f32.gmra.mrb[6].mxu0 %v26045_v59  ;;  %21581 = vmatpush3.bf16.msra.mxu1 %v21578_v49  ;;  %v26131_v49 = vld [vmem:[%s24683_s28 + $0x89] sm:$0xff] }
 0x17a   : >> { %21965 = vmatpush3.bf16.msra.mxu0 %v21962_v18  ;;  %18025 = vmatprep.mubr.f32.mxu1 %v25659_v27  ;;  %v14571_v27 = vld [vmem:[%s28801_s1 + $0xae0] sm:$0xff]  ;;  %v14149_v18 = vld [vmem:[%s24683_s28 + $0x34] sm:$0xff] }
 0x17b   : >> { %18697 = vmatprep.mubr.f32.mxu0 %v14518_v10  ;;  %21583 = vmatprep.subr.bf16.mxu1 %v21582_v33  ;;  %v14596_v10 = vld [vmem:[%s28801_s1 + $0xb20] sm:$0xff] }
 0x17c   : >> { %18026 = vmatmul.mubr.f32.gmra.mrb[8].mxu1 %v25675_v54  ;;  %21967 = vmatprep.subr.bf16.mxu0 %v21966_v3  ;;  %v14572_v54 = vld [vmem:[%s28801_s1 + $0xae8] sm:$0xff] }
 0x17d   : >> { %18698 = vmatmul.mubr.f32.gmra.mrb[8].mxu0 %v14519_v41  ;;  %21585 = vmatpush3.bf16.msra.mxu1 %v21582_v33  ;;  %v21974_v57 = vpack.c.bf16 %v14572_v54, %v14571_v27  ;;  %v14150_v33 = vld [vmem:[%s24683_s28 + $0x3c] sm:$0xff]  ;;  %v26175_v27 = vld [vmem:[%s24683_s28 + $0xa9] sm:$0xff]  ;;  %v14153_v54 = vld [vmem:[%s24683_s28 + $0x54] sm:$0xff] }
 0x17e   : >> { %21969 = vmatpush3.bf16.msra.mxu0 %v21966_v3  ;;  %18028 = vmatprep.mubr.f32.mxu1 %v25680_v58  ;;  %v14573_v58 = vld [vmem:[%s28801_s1 + $0xaf0] sm:$0xff]  ;;  %v14597_v3 = vld [vmem:[%s28801_s1 + $0xb28] sm:$0xff] }
 0x17f   : >> { %18700 = vmatprep.mubr.f32.mxu0 %v14520_v19  ;;  %21587 = vmatprep.subr.bf16.mxu1 %v21586_v44  ;;  %v21990_v41 = vpack.c.bf16 %v14597_v3, %v14596_v10  ;;  %v14203_v19 = vld [vmem:[%s28801_s1 + $0x538] sm:$0xff]  ;;  %v14229_v3 = vld [vmem:[%s28801_s1 + $0x580] sm:$0xff] }
 0x180   : >> { %18029 = vmatmul.mubr.f32.gmra.mrb[10].mxu1 %v25697_v4  ;;  %21971 = vmatprep.subr.bf16.mxu0 %v21970_v48  ;;  %v14574_v4 = vld [vmem:[%s28801_s1 + $0xaf8] sm:$0xff] }
 0x181   : >> { %18701 = vmatmul.mubr.f32.gmra.mrb[10].mxu0 %v14521_v9  ;;  %21589 = vmatpush3.bf16.msra.mxu1 %v21586_v44  ;;  %v21978_v2 = vpack.c.bf16 %v14574_v4, %v14573_v58  ;;  %v14202_v44 = vld [vmem:[%s28801_s1 + $0x530] sm:$0xff]  ;;  %v14600_v58 = vld [vmem:[%s28801_s1 + $0xb40] sm:$0xff]  ;;  %v14601_v4 = vld [vmem:[%s28801_s1 + $0xb48] sm:$0xff] }
 0x182   : >> { %21973 = vmatpush3.bf16.msra.mxu0 %v21970_v48  ;;  %18031 = vmatprep.mubr.f32.mxu1 %v25702_v13  ;;  %v14197_v13 = vld [vmem:[%s28801_s1 + $0x508] sm:$0xff]  ;;  %v21610_v9 = vpack.c.bf16 %v14203_v19, %v14202_v44 }
 0x183   : >> { %18703 = vmatprep.mubr.f32.mxu0 %v14522_v22  ;;  %21591 = vmatprep.subr.bf16.mxu1 %v21590_v35  ;;  %v21598_v53 = vpack.c.bf16 %v14197_v13, %v14196_v36  ;;  %v14152_v48 = vld [vmem:[%s24683_s28 + $0x4c] sm:$0xff]  ;;  %v21994_v22 = vpack.c.bf16 %v14599_v56, %v14598_v50  ;;  %v14207_v13 = vld [vmem:[%s28801_s1 + $0x558] sm:$0xff]  ;;  %v14576_v19 = vld [vmem:[%s24683_s28 + $0x82] sm:$0xff] }
 0x184   : >> { %18032 = vmatmul.mubr.f32.gmra.mrb[12].mxu1 %v25719_v43  ;;  %21975 = vmatprep.subr.bf16.mxu0 %v21974_v57  ;;  %v14593_v43 = vld [vmem:[%s28801_s1 + $0xb08] sm:$0xff]  ;;  %v14206_v36 = vld [vmem:[%s28801_s1 + $0x550] sm:$0xff] }
 0x185   : >> { %18704 = vmatmul.mubr.f32.gmra.mrb[12].mxu0 %v14523_v42  ;;  %21593 = vmatpush3.bf16.msra.mxu1 %v21590_v35  ;;  %v21982_v8 = vpack.c.bf16 %v14593_v43, %v14592_v55  ;;  %v26180_v35 = vld [vmem:[%s24683_s28 + $0xb1] sm:$0xff]  ;;  %v26197_v42 = vld [vmem:[%s24683_s28 + $0xb9] sm:$0xff]  ;;  %v14181_v56 = vld [vmem:[%s24683_s28 + $0x48] sm:$0xff] }
 0x186   : >> { %21977 = vmatpush3.bf16.msra.mxu0 %v21974_v57  ;;  %18034 = vmatprep.mubr.f32.mxu1 %v25724_v12  ;;  %v14199_v12 = vld [vmem:[%s28801_s1 + $0x518] sm:$0xff]  ;;  %v14204_v57 = vld [vmem:[%s28801_s1 + $0x540] sm:$0xff]  ;;  %v14602_v55 = vld [vmem:[%s28801_s1 + $0xb50] sm:$0xff] }
 0x187   : >> { %18706 = vmatprep.mubr.f32.mxu0 %v14524_v5  ;;  %21595 = vmatprep.subr.bf16.mxu1 %v21594_v63  ;;  %v21602_v0 = vpack.c.bf16 %v14199_v12, %v14198_v14  ;;  %v14551_v5 = vld [vmem:[%s24683_s28 + $0xc1] sm:$0xff]  ;;  %v14603_v43 = vld [vmem:[%s28801_s1 + $0xb58] sm:$0xff]  ;;  %v14231_v50 = vld [vmem:[%s28801_s1 + $0x590] sm:$0xff] }
 0x188   : >> { %18035 = vmatmul.mubr.f32.gmra.mrb[14].mxu1 %v25741_v7  ;;  %21979 = vmatprep.subr.bf16.mxu0 %v21978_v2  ;;  %v14594_v7 = vld [vmem:[%s28801_s1 + $0xb10] sm:$0xff]  ;;  %v14208_v14 = vld [vmem:[%s28801_s1 + $0x560] sm:$0xff]  ;;  %v14209_v12 = vld [vmem:[%s28801_s1 + $0x568] sm:$0xff] }
 0x189   : >> { %18707 = vmatmul.mubr.f32.gmra.mrb[14].mxu0 %v14525_v45  ;;  %21597 = vmatpush3.bf16.msra.mxu1 %v21594_v63  ;;  %v21986_v26 = vpack.c.bf16 %v14595_v24, %v14594_v7  ;;  %v21614_v63 = vpack.c.bf16 %v14205_v60, %v14204_v57  ;;  %v14552_v45 = vld [vmem:[%s24683_s28 + $0xc9] sm:$0xff]  ;;  %v21622_v7 = vpack.c.bf16 %v14209_v12, %v14208_v14  ;;  %v14555_v24 = vld [vmem:[%s24683_s28 + $0xe1] sm:$0xff]  ;;  %v14578_v60 = vld [vmem:[%s24683_s28 + $0x92] sm:$0xff] }
 0x18a   : >> { %21981 = vmatpush3.bf16.msra.mxu0 %v21978_v2  ;;  %18069 = vmatprep.mubr.f32.mxu1 %v14147_v29  ;;  %v21998_v2 = vpack.c.bf16 %v14601_v4, %v14600_v58  ;;  %v21618_v29 = vpack.c.bf16 %v14207_v13, %v14206_v36  ;;  %v14233_v58 = vld [vmem:[%s28801_s1 + $0x5a0] sm:$0xff]  ;;  %v14234_v4 = vld [vmem:[%s28801_s1 + $0x5a8] sm:$0xff]  ;;  %v14631_v14 = vld [vmem:[%s28801_s1 + $0xbb0] sm:$0xff] }
 0x18b   : >> { %18741 = vmatprep.mubr.f32.mxu0 %v26115_v16  ;;  %21599 = vmatprep.subr.bf16.mxu1 %v21598_v53  ;;  %v14579_v36 = vld [vmem:[%s24683_s28 + $0x9a] sm:$0xff] }
 0x18c   : >> { %18070 = vmatmul.mubr.f32.vlgmr.msra.gmra.mrb[0].mxu1 %v14148_v38  ;;  %21983 = vmatprep.subr.bf16.mxu0 %v21982_v8  ;;  %v14554_v38 = vld [vmem:[%s24683_s28 + $0xd9] sm:$0xff] }
 0x18d   : >> { %18742 = vmatmul.mubr.f32.vlgmr.msra.gmra.mrb[0].mxu0 %v26131_v49  ;;  %21601 = vmatpush3.bf16.msra.mxu1 %v21598_v53  ;;  %v14553_v53 = vld [vmem:[%s24683_s28 + $0xd1] sm:$0xff]  ;;  %v14184_v13 = vld [vmem:[%s24683_s28 + $0x60] sm:$0xff] }
 0x18e   : >> { %21985 = vmatpush3.bf16.msra.mxu0 %v21982_v8  ;;  %18072 = vmatprep.mubr.f32.mxu1 %v14149_v18  ;;  %v22002_v8 = vpack.c.bf16 %v14603_v43, %v14602_v55  ;;  %v21638_v55 = vpack.c.bf16 %v14234_v4, %v14233_v58  ;;  %v14580_v43 = vld [vmem:[%s24683_s28 + $0xa2] sm:$0xff]  ;;  %v14632_v12 = vld [vmem:[%s28801_s1 + $0xbb8] sm:$0xff] }
 0x18f   : >> { %18744 = vmatprep.mubr.f32.mxu0 %v26136_v47  ;;  %21603 = vmatprep.subr.bf16.mxu1 %v21602_v0  ;;  %v14658_v4 = vld [vmem:[%s28801_s1 + $0xc00] sm:$0xff] }
 0x190   : >> { %18073 = vmatmul.mubr.f32.gmra.mrb[2].mxu1 %v14150_v33  ;;  %21987 = vmatprep.subr.bf16.mxu0 %v21986_v26  ;;  %v14557_v33 = vld [vmem:[%s24683_s28 + $0xf1] sm:$0xff] }
 0x191   : >> { %18745 = vmatmul.mubr.f32.gmra.mrb[2].mxu0 %v26153_v34  ;;  %21605 = vmatpush3.bf16.msra.mxu1 %v21602_v0  ;;  %v14210_v0 = vld [vmem:[%s28801_s1 + $0x570] sm:$0xff] }
 0x192   : >> { %21989 = vmatpush3.bf16.msra.mxu0 %v21986_v26  ;;  %18075 = vmatprep.mubr.f32.mxu1 %v14151_v11  ;;  %v14211_v26 = vld [vmem:[%s28801_s1 + $0x578] sm:$0xff]  ;;  %v14625_v11 = vld [vmem:[%s28801_s1 + $0xb80] sm:$0xff] }
 0x193   : >> { %18747 = vmatprep.mubr.f32.mxu0 %v26158_v23  ;;  %21607 = vmatprep.subr.bf16.mxu1 %v21606_v30  ;;  %v21626_v40 = vpack.c.bf16 %v14211_v26, %v14210_v0  ;;  %v14238_v0 = vld [vmem:[%s28801_s1 + $0x5c8] sm:$0xff]  ;;  %v14187_v26 = vld [vmem:[%s24683_s28 + $0x78] sm:$0xff] }
 0x194   : >> { %18076 = vmatmul.mubr.f32.gmra.mrb[4].mxu1 %v14152_v48  ;;  %21991 = vmatprep.subr.bf16.mxu0 %v21990_v41 }
 0x195   : >> { %18748 = vmatmul.mubr.f32.gmra.mrb[4].mxu0 %v26175_v27  ;;  %21609 = vmatpush3.bf16.msra.mxu1 %v21606_v30  ;;  %v14558_v30 = vld [vmem:[%s24683_s28 + $0xf9] sm:$0xff] }
 0x196   : >> { %21993 = vmatpush3.bf16.msra.mxu0 %v21990_v41  ;;  %18078 = vmatprep.mubr.f32.mxu1 %v14153_v54  ;;  %v14180_v41 = vld [vmem:[%s24683_s28 + $0x40] sm:$0xff]  ;;  %v14628_v54 = vld [vmem:[%s28801_s1 + $0xb98] sm:$0xff] }
 0x197   : >> { %18750 = vmatprep.mubr.f32.mxu0 %v26180_v35  ;;  %21611 = vmatprep.subr.bf16.mxu1 %v21610_v9 }
 0x198   : >> { %18079 = vmatmul.mubr.f32.gmra.mrb[6].mxu1 %v14154_v62  ;;  %21995 = vmatprep.subr.bf16.mxu0 %v21994_v22 }
 0x199   : >> { %18751 = vmatmul.mubr.f32.gmra.mrb[6].mxu0 %v26197_v42  ;;  %21613 = vmatpush3.bf16.msra.mxu1 %v21610_v9  ;;  %v14577_v9 = vld [vmem:[%s24683_s28 + $0x8a] sm:$0xff] }
 0x19a   : >> { %21997 = vmatpush3.bf16.msra.mxu0 %v21994_v22  ;;  %18081 = vmatprep.mubr.f32.mxu1 %v25811_v31  ;;  %v14604_v31 = vld [vmem:[%s28801_s1 + $0xb60] sm:$0xff]  ;;  %v14182_v22 = vld [vmem:[%s24683_s28 + $0x50] sm:$0xff] }
 0x19b   : >> { %18753 = vmatprep.mubr.f32.mxu0 %v14551_v5  ;;  %21615 = vmatprep.subr.bf16.mxu1 %v21614_v63  ;;  %v14629_v5 = vld [vmem:[%s28801_s1 + $0xba0] sm:$0xff] }
 0x19c   : >> { %18082 = vmatmul.mubr.f32.gmra.mrb[8].mxu1 %v25827_v37  ;;  %21999 = vmatprep.subr.bf16.mxu0 %v21998_v2  ;;  %v14605_v37 = vld [vmem:[%s28801_s1 + $0xb68] sm:$0xff] }
 0x19d   : >> { %18754 = vmatmul.mubr.f32.gmra.mrb[8].mxu0 %v14552_v45  ;;  %21617 = vmatpush3.bf16.msra.mxu1 %v21614_v63  ;;  %v22006_v18 = vpack.c.bf16 %v14605_v37, %v14604_v31  ;;  %v14183_v63 = vld [vmem:[%s24683_s28 + $0x58] sm:$0xff]  ;;  %v14581_v31 = vld [vmem:[%s24683_s28 + $0xaa] sm:$0xff] }
 0x19e   : >> { %22001 = vmatpush3.bf16.msra.mxu0 %v21998_v2  ;;  %18084 = vmatprep.mubr.f32.mxu1 %v25832_v25  ;;  %v14606_v25 = vld [vmem:[%s28801_s1 + $0xb70] sm:$0xff]  ;;  %v14630_v2 = vld [vmem:[%s28801_s1 + $0xba8] sm:$0xff] }
 0x19f   : >> { %18756 = vmatprep.mubr.f32.mxu0 %v14553_v53  ;;  %21619 = vmatprep.subr.bf16.mxu1 %v21618_v29  ;;  %v22022_v45 = vpack.c.bf16 %v14630_v2, %v14629_v5  ;;  %v14236_v53 = vld [vmem:[%s28801_s1 + $0x5b8] sm:$0xff]  ;;  %v14186_v37 = vld [vmem:[%s24683_s28 + $0x70] sm:$0xff]  ;;  %v14609_v2 = vld [vmem:[%s24683_s28 + $0x83] sm:$0xff] }
 0x1a0   : >> { %18085 = vmatmul.mubr.f32.gmra.mrb[10].mxu1 %v25849_v39  ;;  %22003 = vmatprep.subr.bf16.mxu0 %v22002_v8  ;;  %v14607_v39 = vld [vmem:[%s28801_s1 + $0xb78] sm:$0xff] }
 0x1a1   : >> { %18757 = vmatmul.mubr.f32.gmra.mrb[10].mxu0 %v14554_v38  ;;  %21621 = vmatpush3.bf16.msra.mxu1 %v21618_v29  ;;  %v22010_v10 = vpack.c.bf16 %v14607_v39, %v14606_v25  ;;  %v14235_v29 = vld [vmem:[%s28801_s1 + $0x5b0] sm:$0xff]  ;;  %v14633_v25 = vld [vmem:[%s28801_s1 + $0xbc0] sm:$0xff]  ;;  %v14634_v39 = vld [vmem:[%s28801_s1 + $0xbc8] sm:$0xff] }
 0x1a2   : >> { %22005 = vmatpush3.bf16.msra.mxu0 %v22002_v8  ;;  %18087 = vmatprep.mubr.f32.mxu1 %v25854_v61  ;;  %v14230_v61 = vld [vmem:[%s28801_s1 + $0x588] sm:$0xff]  ;;  %v21642_v38 = vpack.c.bf16 %v14236_v53, %v14235_v29  ;;  %v14662_v29 = vld [vmem:[%s28801_s1 + $0xc20] sm:$0xff] }
 0x1a3   : >> { %18759 = vmatprep.mubr.f32.mxu0 %v14555_v24  ;;  %21623 = vmatprep.subr.bf16.mxu1 %v21622_v7  ;;  %v21630_v44 = vpack.c.bf16 %v14230_v61, %v14229_v3  ;;  %v14185_v8 = vld [vmem:[%s24683_s28 + $0x68] sm:$0xff]  ;;  %v22026_v24 = vpack.c.bf16 %v14632_v12, %v14631_v14  ;;  %v14239_v3 = vld [vmem:[%s28801_s1 + $0x5d0] sm:$0xff]  ;;  %v14240_v61 = vld [vmem:[%s28801_s1 + $0x5d8] sm:$0xff] }
 0x1a4   : >> { %18088 = vmatmul.mubr.f32.gmra.mrb[12].mxu1 %v25871_v52  ;;  %22007 = vmatprep.subr.bf16.mxu0 %v22006_v18  ;;  %v14626_v52 = vld [vmem:[%s28801_s1 + $0xb88] sm:$0xff]  ;;  %v14612_v14 = vld [vmem:[%s24683_s28 + $0x9b] sm:$0xff] }
 0x1a5   : >> { %18760 = vmatmul.mubr.f32.gmra.mrb[12].mxu0 %v14556_v28  ;;  %21625 = vmatpush3.bf16.msra.mxu1 %v21622_v7  ;;  %v22014_v48 = vpack.c.bf16 %v14626_v52, %v14625_v11  ;;  %v14582_v7 = vld [vmem:[%s24683_s28 + $0xb2] sm:$0xff]  ;;  %v14583_v28 = vld [vmem:[%s24683_s28 + $0xba] sm:$0xff]  ;;  %v14663_v53 = vld [vmem:[%s28801_s1 + $0xc28] sm:$0xff] }
 0x1a6   : >> { %22009 = vmatpush3.bf16.msra.mxu0 %v22006_v18  ;;  %18090 = vmatprep.mubr.f32.mxu1 %v25876_v21  ;;  %v14232_v21 = vld [vmem:[%s28801_s1 + $0x598] sm:$0xff]  ;;  %v14237_v18 = vld [vmem:[%s28801_s1 + $0x5c0] sm:$0xff]  ;;  %v14635_v11 = vld [vmem:[%s28801_s1 + $0xbd0] sm:$0xff] }
 0x1a7   : >> { %18762 = vmatprep.mubr.f32.mxu0 %v14557_v33  ;;  %21627 = vmatprep.subr.bf16.mxu1 %v21626_v40  ;;  %v21634_v57 = vpack.c.bf16 %v14232_v21, %v14231_v50  ;;  %v14584_v33 = vld [vmem:[%s24683_s28 + $0xc2] sm:$0xff]  ;;  %v14636_v52 = vld [vmem:[%s28801_s1 + $0xbd8] sm:$0xff] }
 0x1a8   : >> { %18091 = vmatmul.mubr.f32.gmra.mrb[14].mxu1 %v25893_v1  ;;  %22011 = vmatprep.subr.bf16.mxu0 %v22010_v10  ;;  %v14627_v1 = vld [vmem:[%s28801_s1 + $0xb90] sm:$0xff]  ;;  %v14242_v50 = vld [vmem:[%s28801_s1 + $0x5e8] sm:$0xff]  ;;  %v14587_v21 = vld [vmem:[%s24683_s28 + $0xda] sm:$0xff] }
 0x1a9   : >> { %18763 = vmatmul.mubr.f32.gmra.mrb[14].mxu0 %v14558_v30  ;;  %21629 = vmatpush3.bf16.msra.mxu1 %v21626_v40  ;;  %v22018_v62 = vpack.c.bf16 %v14628_v54, %v14627_v1  ;;  %v21646_v40 = vpack.c.bf16 %v14238_v0, %v14237_v18  ;;  %v14585_v30 = vld [vmem:[%s24683_s28 + $0xca] sm:$0xff]  ;;  %v14588_v1 = vld [vmem:[%s24683_s28 + $0xe2] sm:$0xff] }
 0x1aa   : >> { %22013 = vmatpush3.bf16.msra.mxu0 %v22010_v10  ;;  %18125 = vmatprep.mubr.f32.mxu1 %v14180_v41  ;;  %v22030_v10 = vpack.c.bf16 %v14634_v39, %v14633_v25  ;;  %v21650_v41 = vpack.c.bf16 %v14240_v61, %v14239_v3  ;;  %v14217_v12 = vld [vmem:[%s24683_s28 + $0x61] sm:$0xff]  ;;  %v14614_v18 = vld [vmem:[%s24683_s28 + $0xab] sm:$0xff]  ;;  %v14615_v25 = vld [vmem:[%s24683_s28 + $0xb3] sm:$0xff] }
 0x1ab   : >> { %18797 = vmatprep.mubr.f32.mxu0 %v14576_v19  ;;  %21631 = vmatprep.subr.bf16.mxu1 %v21630_v44  ;;  %v22034_v19 = vpack.c.bf16 %v14636_v52, %v14635_v11  ;;  %v14219_v0 = vld [vmem:[%s24683_s28 + $0x71] sm:$0xff]  ;;  %v14666_v39 = vld [vmem:[%s28801_s1 + $0xc40] sm:$0xff] }
 0x1ac   : >> { %18126 = vmatmul.mubr.f32.vlgmr.msra.gmra.mrb[0].mxu1 %v14181_v56  ;;  %22015 = vmatprep.subr.bf16.mxu0 %v22014_v48  ;;  %v14617_v3 = vld [vmem:[%s24683_s28 + $0xc3] sm:$0xff]  ;;  %v14668_v61 = vld [vmem:[%s28801_s1 + $0xc50] sm:$0xff]  ;;  %v14669_v11 = vld [vmem:[%s28801_s1 + $0xc58] sm:$0xff] }
 0x1ad   : >> { %18798 = vmatmul.mubr.f32.vlgmr.msra.gmra.mrb[0].mxu0 %v14577_v9  ;;  %21633 = vmatpush3.bf16.msra.mxu1 %v21630_v44  ;;  %v14586_v44 = vld [vmem:[%s24683_s28 + $0xd2] sm:$0xff] }
 0x1ae   : >> { %22017 = vmatpush3.bf16.msra.mxu0 %v22014_v48  ;;  %18128 = vmatprep.mubr.f32.mxu1 %v14182_v22  ;;  %v14241_v48 = vld [vmem:[%s28801_s1 + $0x5e0] sm:$0xff]  ;;  %v14243_v9 = vld [vmem:[%s28801_s1 + $0x5f0] sm:$0xff]  ;;  %v14244_v22 = vld [vmem:[%s28801_s1 + $0x5f8] sm:$0xff] }
 0x1af   : >> { %18800 = vmatprep.mubr.f32.mxu0 %v14578_v60  ;;  %21635 = vmatprep.subr.bf16.mxu1 %v21634_v57  ;;  %v21654_v56 = vpack.c.bf16 %v14242_v50, %v14241_v48  ;;  %v21658_v60 = vpack.c.bf16 %v14244_v22, %v14243_v9  ;;  %v14618_v52 = vld [vmem:[%s24683_s28 + $0xcb] sm:$0xff]  ;;  %v14621_v48 = vld [vmem:[%s24683_s28 + $0xe3] sm:$0xff] }
 0x1b0   : >> { %18129 = vmatmul.mubr.f32.gmra.mrb[2].mxu1 %v14183_v63  ;;  %22019 = vmatprep.subr.bf16.mxu0 %v22018_v62  ;;  %v14659_v63 = vld [vmem:[%s28801_s1 + $0xc08] sm:$0xff]  ;;  %v14672_v50 = vld [vmem:[%s28801_s1 + $0xc70] sm:$0xff]  ;;  %v14645_v9 = vld [vmem:[%s24683_s28 + $0x9c] sm:$0xff] }
 0x1b1   : >> { %18801 = vmatmul.mubr.f32.gmra.mrb[2].mxu0 %v14579_v36  ;;  %21637 = vmatpush3.bf16.msra.mxu1 %v21634_v57  ;;  %v14589_v57 = vld [vmem:[%s24683_s28 + $0xea] sm:$0xff]  ;;  %v22046_v5 = vpack.c.bf16 %v14659_v63, %v14658_v4  ;;  %v14649_v4 = vld [vmem:[%s24683_s28 + $0xbc] sm:$0xff] }
 0x1b2   : >> { %22021 = vmatpush3.bf16.msra.mxu0 %v22018_v62  ;;  %18131 = vmatprep.mubr.f32.mxu1 %v14184_v13  ;;  %v14590_v62 = vld [vmem:[%s24683_s28 + $0xf2] sm:$0xff]  ;;  %v14214_v13 = vld [vmem:[%s24683_s28 + $0x49] sm:$0xff] }
 0x1b3   : >> { %18803 = vmatprep.mubr.f32.mxu0 %v14580_v43  ;;  %21639 = vmatprep.subr.bf16.mxu1 %v21638_v55  ;;  %v14660_v36 = vld [vmem:[%s28801_s1 + $0xc10] sm:$0xff]  ;;  %v14654_v22 = vld [vmem:[%s24683_s28 + $0xe4] sm:$0xff] }
 0x1b4   : >> { %18132 = vmatmul.mubr.f32.gmra.mrb[4].mxu1 %v14185_v8  ;;  %22023 = vmatprep.subr.bf16.mxu0 %v22022_v45  ;;  %v14216_v8 = vld [vmem:[%s24683_s28 + $0x59] sm:$0xff] }
 0x1b5   : >> { %18804 = vmatmul.mubr.f32.gmra.mrb[4].mxu0 %v14581_v31  ;;  %21641 = vmatpush3.bf16.msra.mxu1 %v21638_v55  ;;  %v14610_v55 = vld [vmem:[%s24683_s28 + $0x8b] sm:$0xff]  ;;  %v22054_v31 = vpack.c.bf16 %v14663_v53, %v14662_v29 }
 0x1b6   : >> { %22025 = vmatpush3.bf16.msra.mxu0 %v22022_v45  ;;  %18134 = vmatprep.mubr.f32.mxu1 %v14186_v37  ;;  %v14611_v45 = vld [vmem:[%s24683_s28 + $0x93] sm:$0xff]  ;;  %v14613_v37 = vld [vmem:[%s24683_s28 + $0xa3] sm:$0xff] }
 0x1b7   : >> { %18806 = vmatprep.mubr.f32.mxu0 %v14582_v7  ;;  %21643 = vmatprep.subr.bf16.mxu1 %v21642_v38  ;;  %v14665_v7 = vld [vmem:[%s28801_s1 + $0xc38] sm:$0xff] }
 0x1b8   : >> { %18135 = vmatmul.mubr.f32.gmra.mrb[6].mxu1 %v14187_v26  ;;  %22027 = vmatprep.subr.bf16.mxu0 %v22026_v24 }
 0x1b9   : >> { %18807 = vmatmul.mubr.f32.gmra.mrb[6].mxu0 %v14583_v28  ;;  %21645 = vmatpush3.bf16.msra.mxu1 %v21642_v38  ;;  %v14664_v38 = vld [vmem:[%s28801_s1 + $0xc30] sm:$0xff]  ;;  %v14667_v28 = vld [vmem:[%s28801_s1 + $0xc48] sm:$0xff] }
 0x1ba   : >> { %22029 = vmatpush3.bf16.msra.mxu0 %v22026_v24  ;;  %18137 = vmatprep.mubr.f32.mxu1 %v25963_v46  ;;  %v14637_v46 = vld [vmem:[%s28801_s1 + $0xbe0] sm:$0xff]  ;;  %v14218_v24 = vld [vmem:[%s24683_s28 + $0x69] sm:$0xff]  ;;  %v22058_v26 = vpack.c.bf16 %v14665_v7, %v14664_v38 }
 0x1bb   : >> { %18809 = vmatprep.mubr.f32.mxu0 %v14584_v33  ;;  %21647 = vmatprep.subr.bf16.mxu1 %v21646_v40  ;;  %v14616_v33 = vld [vmem:[%s24683_s28 + $0xbb] sm:$0xff] }
 0x1bc   : >> { %18138 = vmatmul.mubr.f32.gmra.mrb[8].mxu1 %v25979_v32  ;;  %22031 = vmatprep.subr.bf16.mxu0 %v22030_v10  ;;  %v14638_v32 = vld [vmem:[%s28801_s1 + $0xbe8] sm:$0xff] }
 0x1bd   : >> { %18810 = vmatmul.mubr.f32.gmra.mrb[8].mxu0 %v14585_v30  ;;  %21649 = vmatpush3.bf16.msra.mxu1 %v21646_v40  ;;  %v22038_v54 = vpack.c.bf16 %v14638_v32, %v14637_v46  ;;  %v14220_v40 = vld [vmem:[%s24683_s28 + $0x79] sm:$0xff]  ;;  %v22066_v30 = vpack.c.bf16 %v14669_v11, %v14668_v61 }
 0x1be   : >> { %22033 = vmatpush3.bf16.msra.mxu0 %v22030_v10  ;;  %18140 = vmatprep.mubr.f32.mxu1 %v25984_v51  ;;  %v14639_v51 = vld [vmem:[%s28801_s1 + $0xbf0] sm:$0xff]  ;;  %v22062_v10 = vpack.c.bf16 %v14667_v28, %v14666_v39  ;;  %v14673_v46 = vld [vmem:[%s28801_s1 + $0xc78] sm:$0xff]  ;;  %v26490_v61 = vld [vmem:[%s28802_s2] ss:$0 sm:$0xff] }
 0x1bf   : >> { %18812 = vmatprep.mubr.f32.mxu0 %v14586_v44  ;;  %21651 = vmatprep.subr.bf16.mxu1 %v21650_v41  ;;  %v14670_v44 = vld [vmem:[%s28801_s1 + $0xc60] sm:$0xff]  ;;  %v14623_v32 = vld [vmem:[%s24683_s28 + $0xf3] sm:$0xff] }
 0x1c0   : >> { %18141 = vmatmul.mubr.f32.gmra.mrb[10].mxu1 %v26001_v6  ;;  %22035 = vmatprep.subr.bf16.mxu0 %v22034_v19  ;;  %v14640_v6 = vld [vmem:[%s28801_s1 + $0xbf8] sm:$0xff] }
 0x1c1   : >> { %18813 = vmatmul.mubr.f32.gmra.mrb[10].mxu0 %v14587_v21  ;;  %21653 = vmatpush3.bf16.msra.mxu1 %v21650_v41  ;;  %v22042_v58 = vpack.c.bf16 %v14640_v6, %v14639_v51  ;;  %v14619_v41 = vld [vmem:[%s24683_s28 + $0xd3] sm:$0xff]  ;;  %v14624_v21 = vld [vmem:[%s24683_s28 + $0xfb] sm:$0xff]  ;;  %v14646_v51 = vld [vmem:[%s24683_s28 + $0xa4] sm:$0xff] }
 0x1c2   : >> { %22037 = vmatpush3.bf16.msra.mxu0 %v22034_v19  ;;  %18143 = vmatprep.mubr.f32.mxu1 %v26006_v17  ;;  %v14591_v17 = vld [vmem:[%s24683_s28 + $0xfa] sm:$0xff]  ;;  %v14671_v19 = vld [vmem:[%s28801_s1 + $0xc68] sm:$0xff] }
 0x1c3   : >> { %18815 = vmatprep.mubr.f32.mxu0 %v14588_v1  ;;  %21655 = vmatprep.subr.bf16.mxu1 %v21654_v56  ;;  %v14652_v1 = vld [vmem:[%s24683_s28 + $0xd4] sm:$0xff]  ;;  %v14655_v6 = vld [vmem:[%s24683_s28 + $0xec] sm:$0xff] }
 0x1c4   : >> { %18144 = vmatmul.mubr.f32.gmra.mrb[12].mxu1 %v26023_v15  ;;  %22039 = vmatprep.subr.bf16.mxu0 %v22038_v54  ;;  %v14213_v15 = vld [vmem:[%s24683_s28 + $0x41] sm:$0xff] }
 0x1c5   : >> { %18816 = vmatmul.mubr.f32.gmra.mrb[12].mxu0 %v14589_v57  ;;  %21657 = vmatpush3.bf16.msra.mxu1 %v21654_v56  ;;  %v14651_v56 = vld [vmem:[%s24683_s28 + $0xcc] sm:$0xff] }
 0x1c6   : >> { %22041 = vmatpush3.bf16.msra.mxu0 %v22038_v54  ;;  %18146 = vmatprep.mubr.f32.mxu1 %v26028_v20  ;;  %v14661_v20 = vld [vmem:[%s28801_s1 + $0xc18] sm:$0xff]  ;;  %v14647_v57 = vld [vmem:[%s24683_s28 + $0xac] sm:$0xff] }
 0x1c7   : >> { %18818 = vmatprep.mubr.f32.mxu0 %v14590_v62  ;;  %21659 = vmatprep.subr.bf16.mxu1 %v21658_v60  ;;  %v22050_v43 = vpack.c.bf16 %v14661_v20, %v14660_v36  ;;  %v14644_v54 = vld [vmem:[%s24683_s28 + $0x94] sm:$0xff] }
 0x1c8   : >> { %18147 = vmatmul.mubr.f32.gmra.mrb[14].mxu1 %v26045_v59  ;;  %22043 = vmatprep.subr.bf16.mxu0 %v22042_v58  ;;  %v14215_v59 = vld [vmem:[%s24683_s28 + $0x51] sm:$0xff] }
 0x1c9   : >> { %18819 = vmatmul.mubr.f32.gmra.mrb[14].mxu0 %v14591_v17  ;;  %21661 = vmatpush3.bf16.msra.mxu1 %v21658_v60  ;;  %v14656_v60 = vld [vmem:[%s24683_s28 + $0xf4] sm:$0xff] }
 0x1ca   : >> { %22045 = vmatpush3.bf16.msra.mxu0 %v22042_v58  ;;  %18181 = vmatprep.mubr.f32.mxu1 %v14213_v15  ;;  %v14648_v62 = vld [vmem:[%s24683_s28 + $0xb4] sm:$0xff]  ;;  %v14657_v58 = vld [vmem:[%s24683_s28 + $0xfc] sm:$0xff] }
 0x1cb   : >> { %18853 = vmatprep.mubr.f32.mxu0 %v14609_v2  ;;  %22047 = vmatprep.subr.bf16.mxu0 %v22046_v5 }
 0x1cc   : >> { %18182 = vmatmul.mubr.f32.vlgmr.msra.gmra.mrb[0].mxu1 %v14214_v13  ;;  %23526 = vmatprep.subr.bf16.mxu1 %v22046_v5 }
 0x1cd   : >> { %18854 = vmatmul.mubr.f32.vlgmr.msra.gmra.mrb[0].mxu0 %v14610_v55  ;;  %23534 = vmatpush3.bf16.msra.mxu1 %v22046_v5 }
 0x1ce   : >> { %22049 = vmatpush3.bf16.msra.mxu0 %v22046_v5  ;;  %18184 = vmatprep.mubr.f32.mxu1 %v14215_v59 }
 0x1cf   : >> { %18856 = vmatprep.mubr.f32.mxu0 %v14611_v45  ;;  %22051 = vmatprep.subr.bf16.mxu0 %v22050_v43 }
 0x1d0   : >> { %18185 = vmatmul.mubr.f32.gmra.mrb[2].mxu1 %v14216_v8  ;;  %23527 = vmatprep.subr.bf16.mxu1 %v22050_v43 }
 0x1d1   : >> { %18857 = vmatmul.mubr.f32.gmra.mrb[2].mxu0 %v14612_v14  ;;  %23535 = vmatpush3.bf16.msra.mxu1 %v22050_v43 }
 0x1d2   : >> { %22053 = vmatpush3.bf16.msra.mxu0 %v22050_v43  ;;  %18187 = vmatprep.mubr.f32.mxu1 %v14217_v12 }
 0x1d3   : >> { %18859 = vmatprep.mubr.f32.mxu0 %v14613_v37  ;;  %22055 = vmatprep.subr.bf16.mxu0 %v22054_v31 }
 0x1d4   : >> { %18188 = vmatmul.mubr.f32.gmra.mrb[4].mxu1 %v14218_v24  ;;  %23528 = vmatprep.subr.bf16.mxu1 %v22054_v31 }
 0x1d5   : >> { %18860 = vmatmul.mubr.f32.gmra.mrb[4].mxu0 %v14614_v18  ;;  %23536 = vmatpush3.bf16.msra.mxu1 %v22054_v31 }
 0x1d6   : >> { %22057 = vmatpush3.bf16.msra.mxu0 %v22054_v31  ;;  %18190 = vmatprep.mubr.f32.mxu1 %v14219_v0 }
 0x1d7   : >> { %18862 = vmatprep.mubr.f32.mxu0 %v14615_v25  ;;  %22059 = vmatprep.subr.bf16.mxu0 %v22058_v26 }
 0x1d8   : >> { %18191 = vmatmul.mubr.f32.gmra.mrb[6].mxu1 %v14220_v40  ;;  %23529 = vmatprep.subr.bf16.mxu1 %v22058_v26 }
 0x1d9   : >> { %18863 = vmatmul.mubr.f32.gmra.mrb[6].mxu0 %v14616_v33  ;;  %23537 = vmatpush3.bf16.msra.mxu1 %v22058_v26 }
 0x1da   : >> { %22061 = vmatpush3.bf16.msra.mxu0 %v22058_v26  ;;  %18193 = vmatprep.mubr.f32.mxu1 %v26115_v16  ;;  %v14620_v16 = vld [vmem:[%s24683_s28 + $0xdb] sm:$0xff] }
 0x1db   : >> { %18865 = vmatprep.mubr.f32.mxu0 %v14617_v3  ;;  %22063 = vmatprep.subr.bf16.mxu0 %v22062_v10 }
 0x1dc   : >> { %18194 = vmatmul.mubr.f32.gmra.mrb[8].mxu1 %v26131_v49  ;;  %23530 = vmatprep.subr.bf16.mxu1 %v22062_v10  ;;  %v22070_v49 = vpack.c.bf16 %v14671_v19, %v14670_v44 }
 0x1dd   : >> { %18866 = vmatmul.mubr.f32.gmra.mrb[8].mxu0 %v14618_v52  ;;  %23538 = vmatpush3.bf16.msra.mxu1 %v22062_v10 }
 0x1de   : >> { %22065 = vmatpush3.bf16.msra.mxu0 %v22062_v10  ;;  %18196 = vmatprep.mubr.f32.mxu1 %v26136_v47  ;;  %v14622_v47 = vld [vmem:[%s24683_s28 + $0xeb] sm:$0xff] }
 0x1df   : >> { %18868 = vmatprep.mubr.f32.mxu0 %v14619_v41  ;;  %22067 = vmatprep.subr.bf16.mxu0 %v22066_v30 }
 0x1e0   : >> { %18197 = vmatmul.mubr.f32.gmra.mrb[10].mxu1 %v26153_v34  ;;  %23531 = vmatprep.subr.bf16.mxu1 %v22066_v30  ;;  %v22074_v34 = vpack.c.bf16 %v14673_v46, %v14672_v50 }
 0x1e1   : >> { %18869 = vmatmul.mubr.f32.gmra.mrb[10].mxu0 %v14620_v16  ;;  %23539 = vmatpush3.bf16.msra.mxu1 %v22066_v30 }
 0x1e2   : >> { %22069 = vmatpush3.bf16.msra.mxu0 %v22066_v30  ;;  %18199 = vmatprep.mubr.f32.mxu1 %v26158_v23  ;;  %v14642_v23 = vld [vmem:[%s24683_s28 + $0x84] sm:$0xff] }
 0x1e3   : >> { %18871 = vmatprep.mubr.f32.mxu0 %v14621_v48  ;;  %22071 = vmatprep.subr.bf16.mxu0 %v22070_v49 }
 0x1e4   : >> { %18200 = vmatmul.mubr.f32.gmra.mrb[12].mxu1 %v26175_v27  ;;  %23532 = vmatprep.subr.bf16.mxu1 %v22070_v49  ;;  %v14650_v27 = vld [vmem:[%s24683_s28 + $0xc4] sm:$0xff] }
 0x1e5   : >> { %18872 = vmatmul.mubr.f32.gmra.mrb[12].mxu0 %v14622_v47  ;;  %23540 = vmatpush3.bf16.msra.mxu1 %v22070_v49 }
 0x1e6   : >> { %22073 = vmatpush3.bf16.msra.mxu0 %v22070_v49  ;;  %18202 = vmatprep.mubr.f32.mxu1 %v26180_v35  ;;  %v14643_v35 = vld [vmem:[%s24683_s28 + $0x8c] sm:$0xff] }
 0x1e7   : >> { %18874 = vmatprep.mubr.f32.mxu0 %v14623_v32  ;;  %22075 = vmatprep.subr.bf16.mxu0 %v22074_v34 }
 0x1e8   : >> { %18203 = vmatmul.mubr.f32.gmra.mrb[14].mxu1 %v26197_v42  ;;  %23533 = vmatprep.subr.bf16.mxu1 %v22074_v34  ;;  %v14653_v42 = vld [vmem:[%s24683_s28 + $0xdc] sm:$0xff] }
 0x1e9   : >> { %18875 = vmatmul.mubr.f32.gmra.mrb[14].mxu0 %v14624_v21  ;;  %23541 = vmatpush3.bf16.msra.mxu1 %v22074_v34 }
 0x1ea   : >> { %22077 = vmatpush3.bf16.msra.mxu0 %v22074_v34  ;;  %18909 = vmatprep.mubr.f32.mxu0 %v14642_v23 }
 0x1eb   : >> { %18921 = vmatprep.mubr.f32.mxu1 %v14650_v27 }
 0x1ec   : >> { %18922 = vmatmul.mubr.f32.vlgmr.msra.gmra.mrb[16].mxu1 %v14651_v56 }
 0x1ed   : >> { %18910 = vmatmul.mubr.f32.vlgmr.msra.gmra.mrb[0].mxu0 %v14643_v35  ;;  %18924 = vmatprep.mubr.f32.mxu1 %v14652_v1 }
 0x1ee   : >> { %18912 = vmatprep.mubr.f32.mxu0 %v14644_v54 }
 0x1f0   : >> { %18925 = vmatmul.mubr.f32.gmra.mrb[18].mxu1 %v14653_v42 }
 0x1f1   : >> { %18913 = vmatmul.mubr.f32.gmra.mrb[2].mxu0 %v14645_v9  ;;  %18927 = vmatprep.mubr.f32.mxu1 %v14654_v22 }
 0x1f2   : >> { %18915 = vmatprep.mubr.f32.mxu0 %v14646_v51 }
 0x1f4   : >> { %18928 = vmatmul.mubr.f32.gmra.mrb[20].mxu1 %v14655_v6 }
 0x1f5   : >> { %18916 = vmatmul.mubr.f32.gmra.mrb[4].mxu0 %v14647_v57  ;;  %18930 = vmatprep.mubr.f32.mxu1 %v14656_v60 }
 0x1f6   : >> { %18918 = vmatprep.mubr.f32.mxu0 %v14648_v62 }
 0x1f8   : >> { %18931 = vmatmul.mubr.f32.gmra.mrb[22].mxu1 %v14657_v58 }
 0x1f9   : >> { %18919 = vmatmul.mubr.f32.gmra.mrb[6].mxu0 %v14649_v4 }
 0x29f   : >> { %v18183_v63 = vpop.f32.mrb[0].mxu1 }
 0x2a0   : >> { %v2645_v17 = vpop.f32.mrb[1].mxu1 }
 0x2a3   : >> { %v18186_v15 = vpop.f32.mrb[2].mxu1 }
 0x2a4   : >> { %v2655_v5 = vpop.f32.mrb[3].mxu1 }
 0x2a7   : >> { %v26477_v2 = vpop.f32.mrb[4].mxu1 }
 0x2a8   : >> { %v26479_v36 = vpop.f32.mrb[5].mxu1 }
 0x2ab   : >> { %v26481_v20 = vpop.f32.mrb[6].mxu1 }
 0x2ac   : >> { %v26483_v13 = vpop.f32.mrb[7].mxu1 }
 0x2af   : >> { %v18195_v55 = vpop.f32.mrb[8].mxu1 }
 0x2b0   : >> { %v18867_v59 = vpop.f32.mrb[8].mxu0  ;;  %v2685_v43 = vpop.f32.mrb[9].mxu1 }
 0x2b1   : >> { %v23550_v45 = vadd.f32 %v18867_v59, %v18195_v55  ;;  %v5037_v29 = vpop.f32.mrb[9].mxu0 }
 0x2b2   : >> { %v23552_v53 = vadd.f32 %v5037_v29, %v2685_v43 }
 0x2b3   : >> { %v18198_v8 = vpop.f32.mrb[10].mxu1 }
 0x2b4   : >> { %v18870_v14 = vpop.f32.mrb[10].mxu0  ;;  %v2695_v12 = vpop.f32.mrb[11].mxu1 }
 0x2b5   : >> { %v23554_v31 = vadd.f32 %v18870_v14, %v18198_v8  ;;  %v5047_v37 = vpop.f32.mrb[11].mxu0 }
 0x2b6   : >> { %v23556_v38 = vadd.f32 %v5047_v37, %v2695_v12 }
 0x2b7   : >> { %v18201_v7 = vpop.f32.mrb[12].mxu1 }
 0x2b8   : >> { %v18873_v24 = vpop.f32.mrb[12].mxu0  ;;  %v2705_v18 = vpop.f32.mrb[13].mxu1 }
 0x2b9   : >> { %v23558_v0 = vadd.f32 %v18873_v24, %v18201_v7  ;;  %v5057_v26 = vpop.f32.mrb[13].mxu0 }
 0x2ba   : >> { %v23560_v25 = vadd.f32 %v5057_v26, %v2705_v18 }
 0x2bb   : >> { %v18204_v39 = vpop.f32.mrb[14].mxu1 }
 0x2bc   : >> { %v18876_v28 = vpop.f32.mrb[14].mxu0  ;;  %v2715_v40 = vpop.f32.mrb[15].mxu1 }
 0x2bd   : >> { %v23562_v33 = vadd.f32 %v18876_v28, %v18204_v39  ;;  %v5067_v10 = vpop.f32.mrb[15].mxu0 }
 0x2be   : >> { %v26485_v3 = vadd.f32 %v5067_v10, %v2715_v40 }
 0x2bf   : >> { %v18923_v11 = vpop.f32.mrb[16].mxu1 }
 0x2c0   : >> { %v18911_v52 = vpop.f32.mrb[0].mxu0  ;;  %v23551_v30 = vadd.f32 %v23550_v45, %v18923_v11  ;;  %v5233_v41 = vpop.f32.mrb[17].mxu1 }
 0x2c1   : >> { %v23542_v44 = vadd.f32 %v18911_v52, %v18183_v63  ;;  %v5193_v19 = vpop.f32.mrb[1].mxu0  ;;  %v23553_v16 = vadd.f32 %v23552_v53, %v5233_v41 }
 0x2c2   : >> { %v5304_v49 = vadd.f32 %v23551_v30, %v26490_v61  ;;  %v23543_v48 = vadd.f32 %v5193_v19, %v2645_v17 }
 0x2c3   : >> { %v5296_v50 = vadd.f32 %v23542_v44, %v26490_v61  ;;  %v5303_v46 = vadd.f32 %v23553_v16, %v26490_v61  ;;  %v18926_v47 = vpop.f32.mrb[18].mxu1 }
 0x2c4   : >> { %v5320_v34 = vmax.f32 %v5304_v49, 0.0  ;;  %v5295_v32 = vadd.f32 %v23543_v48, %v26490_v61  ;;  %v18914_v21 = vpop.f32.mrb[2].mxu0  ;;  %v23555_v23 = vadd.f32 %v23554_v31, %v18926_v47  ;;  %v5243_v27 = vpop.f32.mrb[19].mxu1 }
 0x2c5   : >> { %v5312_v56 = vmax.f32 %v5296_v50, 0.0  ;;  %v5319_v35 = vmax.f32 %v5303_v46, 0.0  ;;  %v23544_v1 = vadd.f32 %v18914_v21, %v18186_v15  ;;  %v5203_v54 = vpop.f32.mrb[3].mxu0  ;;  %v23557_v42 = vadd.f32 %v23556_v38, %v5243_v27 }
 0x2c6   : >> { %5337 = vst [vmem:[%s26498_s20 + $0x48] sm:$0xff] %v5320_v34  ;;  %v5311_v9 = vmax.f32 %v5295_v32, 0.0  ;;  %v5306_v22 = vadd.f32 %v23555_v23, %v26490_v61  ;;  %v23545_v51 = vadd.f32 %v5203_v54, %v2655_v5 }
 0x2c7   : >> { %5329 = vst [vmem:[%s26498_s20 + $0x8] sm:$0xff] %v5312_v56  ;;  %5336 = vst [vmem:[%s26498_s20 + $0x40] sm:$0xff] %v5319_v35  ;;  %v5298_v6 = vadd.f32 %v23544_v1, %v26490_v61  ;;  %v5305_v57 = vadd.f32 %v23557_v42, %v26490_v61  ;;  %v18929_v60 = vpop.f32.mrb[20].mxu1 }
 0x2c8   : >> { %5328 = vst [vmem:[%s26498_s20] sm:$0xff] %v5311_v9  ;;  %v5322_v62 = vmax.f32 %v5306_v22, 0.0  ;;  %v5297_v58 = vadd.f32 %v23545_v51, %v26490_v61  ;;  %v18917_v4 = vpop.f32.mrb[4].mxu0  ;;  %v23559_v63 = vadd.f32 %v23558_v0, %v18929_v60  ;;  %v5253_v17 = vpop.f32.mrb[21].mxu1 }
 0x2c9   : >> { %v5314_v15 = vmax.f32 %v5298_v6, 0.0  ;;  %v5321_v5 = vmax.f32 %v5305_v57, 0.0  ;;  %v23546_v55 = vadd.f32 %v18917_v4, %v26477_v2  ;;  %v5213_v59 = vpop.f32.mrb[5].mxu0  ;;  %v23561_v43 = vadd.f32 %v23560_v25, %v5253_v17 }
 0x2ca   : >> { %5339 = vst [vmem:[%s26498_s20 + $0x58] sm:$0xff] %v5322_v62  ;;  %v5313_v45 = vmax.f32 %v5297_v58, 0.0  ;;  %v5308_v29 = vadd.f32 %v23559_v63, %v26490_v61  ;;  %v23547_v53 = vadd.f32 %v5213_v59, %v26479_v36 }
 0x2cb   : >> { %5331 = vst [vmem:[%s26498_s20 + $0x18] sm:$0xff] %v5314_v15  ;;  %5338 = vst [vmem:[%s26498_s20 + $0x50] sm:$0xff] %v5321_v5  ;;  %v5300_v8 = vadd.f32 %v23546_v55, %v26490_v61  ;;  %v5307_v14 = vadd.f32 %v23561_v43, %v26490_v61  ;;  %v18932_v12 = vpop.f32.mrb[22].mxu1 }
 0x2cc   : >> { %5330 = vst [vmem:[%s26498_s20 + $0x10] sm:$0xff] %v5313_v45  ;;  %v5324_v2 = vmax.f32 %v5308_v29, 0.0  ;;  %v5299_v31 = vadd.f32 %v23547_v53, %v26490_v61  ;;  %v18920_v37 = vpop.f32.mrb[6].mxu0  ;;  %v23563_v38 = vadd.f32 %v23562_v33, %v18932_v12  ;;  %v5263_v7 = vpop.f32.mrb[23].mxu1 }
 0x2cd   : >> { %v5316_v24 = vmax.f32 %v5300_v8, 0.0  ;;  %v5323_v36 = vmax.f32 %v5307_v14, 0.0  ;;  %v23548_v18 = vadd.f32 %v18920_v37, %v26481_v20  ;;  %v5223_v0 = vpop.f32.mrb[7].mxu0  ;;  %v23565_v26 = vadd.f32 %v26485_v3, %v5263_v7 }
 0x2ce   : >> { %5341 = vst [vmem:[%s26498_s20 + $0x68] sm:$0xff] %v5324_v2  ;;  %v5315_v25 = vmax.f32 %v5299_v31, 0.0  ;;  %v5310_v39 = vadd.f32 %v23563_v38, %v26490_v61  ;;  %v23549_v28 = vadd.f32 %v5223_v0, %v26483_v13  ;;  %419 = sbr.rel (!%p417_p5) target bundleno = 73 (0x49), region = 241 }
 0x2cf   : >> { %5333 = vst [vmem:[%s26498_s20 + $0x28] sm:$0xff] %v5316_v24  ;;  %5340 = vst [vmem:[%s26498_s20 + $0x60] sm:$0xff] %v5323_v36  ;;  %v5302_v40 = vadd.f32 %v23548_v18, %v26490_v61  ;;  %v5309_v33 = vadd.f32 %v23565_v26, %v26490_v61 }
 0x2d0   : >> { %5332 = vst [vmem:[%s26498_s20 + $0x20] sm:$0xff] %v5315_v25  ;;  %v5326_v20 = vmax.f32 %v5310_v39, 0.0  ;;  %v5301_v10 = vadd.f32 %v23549_v28, %v26490_v61 }
 0x2d1   : >> { %v5318_v3 = vmax.f32 %v5302_v40, 0.0  ;;  %v5325_v11 = vmax.f32 %v5309_v33, 0.0 }
 0x2d2   : >> { %5343 = vst [vmem:[%s26498_s20 + $0x78] sm:$0xff] %v5326_v20  ;;  %v5317_v52 = vmax.f32 %v5301_v10, 0.0 }
 0x2d3   : >> { %5335 = vst [vmem:[%s26498_s20 + $0x38] sm:$0xff] %v5318_v3  ;;  %5342 = vst [vmem:[%s26498_s20 + $0x70] sm:$0xff] %v5325_v11 }
 0x2d4   : >> { %5334 = vst [vmem:[%s26498_s20 + $0x30] sm:$0xff] %v5317_v52 }
 0x2db   : > { %v5344_v13 = vld [vmem:[#allocation2] sm:$0xff]  ;;  %v5345_v16 = vld [vmem:[#allocation2 + $0x8] sm:$0xff]  ;;  %v5346_v46 = vld [vmem:[#allocation2 + $0x10] sm:$0xff] }
 0x2dc   : > { %v5348_v30 = vld [vmem:[#allocation2 + $0x20] sm:$0xff]  ;;  %v5349_v61 = vld [vmem:[#allocation2 + $0x28] sm:$0xff]  ;;  %v5350_v32 = vld [vmem:[#allocation2 + $0x30] sm:$0xff] }
 0x2dd   : > { %v5458_v41 = vld [vmem:[#allocation2 + $0x1] sm:$0xff]  ;;  %v5459_v48 = vld [vmem:[#allocation2 + $0x9] sm:$0xff]  ;;  %v5460_v21 = vld [vmem:[#allocation2 + $0x11] sm:$0xff] }
 0x2de   : > { %v5462_v44 = vld [vmem:[#allocation2 + $0x21] sm:$0xff]  ;;  %v5572_v19 = vmax.f32 %v5344_v13, %v5458_v41  ;;  %v5463_v50 = vld [vmem:[#allocation2 + $0x29] sm:$0xff]  ;;  %v5573_v47 = vmax.f32 %v5345_v16, %v5459_v48  ;;  %v5464_v23 = vld [vmem:[#allocation2 + $0x31] sm:$0xff]  ;;  %v5574_v56 = vmax.f32 %v5346_v46, %v5460_v21 }
 0x2df   : > { %v5576_v49 = vmax.f32 %v5348_v30, %v5462_v44  ;;  %v5577_v34 = vmax.f32 %v5349_v61, %v5463_v50  ;;  %v5578_v35 = vmax.f32 %v5350_v32, %v5464_v23  ;;  %v5347_v1 = vld [vmem:[#allocation2 + $0x18] sm:$0xff]  ;;  %v5352_v6 = vld [vmem:[#allocation2 + $0x40] sm:$0xff]  ;;  %v5353_v4 = vld [vmem:[#allocation2 + $0x48] sm:$0xff] }
 0x2e0   : > { %v5351_v54 = vld [vmem:[#allocation2 + $0x38] sm:$0xff]  ;;  %v5466_v57 = vld [vmem:[#allocation2 + $0x41] sm:$0xff]  ;;  %v5467_v63 = vld [vmem:[#allocation2 + $0x49] sm:$0xff] }
 0x2e1   : > { %v5698_v27 = vmax.f32 %v5572_v19, %v5576_v49  ;;  %v5461_v42 = vld [vmem:[#allocation2 + $0x19] sm:$0xff]  ;;  %v5699_v9 = vmax.f32 %v5573_v47, %v5577_v34  ;;  %v5700_v60 = vmax.f32 %v5574_v56, %v5578_v35  ;;  %v5580_v58 = vmax.f32 %v5352_v6, %v5466_v57  ;;  %v5354_v17 = vld [vmem:[#allocation2 + $0x50] sm:$0xff]  ;;  %v5470_v14 = vld [vmem:[#allocation2 + $0x61] sm:$0xff] }
 0x2e2   : > { %v5465_v22 = vld [vmem:[#allocation2 + $0x39] sm:$0xff]  ;;  %v5575_v51 = vmax.f32 %v5347_v1, %v5461_v42  ;;  %v5581_v15 = vmax.f32 %v5353_v4, %v5467_v63  ;;  %v5468_v5 = vld [vmem:[#allocation2 + $0x51] sm:$0xff]  ;;  %v5357_v12 = vld [vmem:[#allocation2 + $0x68] sm:$0xff] }
 0x2e3   : > { %5812 = vst [vmem:[#allocation3] sm:$0xff] %v5698_v27  ;;  %v5579_v62 = vmax.f32 %v5351_v54, %v5465_v22  ;;  %5813 = vst [vmem:[#allocation3 + $0x8] sm:$0xff] %v5699_v9  ;;  %v5355_v55 = vld [vmem:[#allocation2 + $0x58] sm:$0xff]  ;;  %v5702_v45 = vmax.f32 %v5576_v49, %v5580_v58  ;;  %v5582_v29 = vmax.f32 %v5354_v17, %v5468_v5  ;;  %v5356_v8 = vld [vmem:[#allocation2 + $0x60] sm:$0xff] }
 0x2e4   : > { %v5469_v59 = vld [vmem:[#allocation2 + $0x59] sm:$0xff]  ;;  %5814 = vst [vmem:[#allocation3 + $0x10] sm:$0xff] %v5700_v60  ;;  %v5703_v2 = vmax.f32 %v5577_v34, %v5581_v15  ;;  %v5584_v31 = vmax.f32 %v5356_v8, %v5470_v14  ;;  %v5471_v37 = vld [vmem:[#allocation2 + $0x69] sm:$0xff]  ;;  %v5472_v7 = vld [vmem:[#allocation2 + $0x71] sm:$0xff] }
 0x2e5   : > { %v5701_v43 = vmax.f32 %v5575_v51, %v5579_v62  ;;  %v5583_v53 = vmax.f32 %v5355_v55, %v5469_v59  ;;  %v5358_v38 = vld [vmem:[#allocation2 + $0x70] sm:$0xff]  ;;  %5816 = vst [vmem:[#allocation3 + $0x20] sm:$0xff] %v5702_v45  ;;  %v5704_v24 = vmax.f32 %v5578_v35, %v5582_v29  ;;  %v5585_v18 = vmax.f32 %v5357_v12, %v5471_v37  ;;  %v5359_v26 = vld [vmem:[#allocation2 + $0x78] sm:$0xff]  ;;  %v5360_v39 = vld [vmem:[#allocation2 + $0x80] sm:$0xff] }
 0x2e6   : > { %v5586_v0 = vmax.f32 %v5358_v38, %v5472_v7  ;;  %v5473_v25 = vld [vmem:[#allocation2 + $0x79] sm:$0xff]  ;;  %5817 = vst [vmem:[#allocation3 + $0x28] sm:$0xff] %v5703_v2  ;;  %v5706_v28 = vmax.f32 %v5580_v58, %v5584_v31  ;;  %v5474_v33 = vld [vmem:[#allocation2 + $0x81] sm:$0xff]  ;;  %v5475_v10 = vld [vmem:[#allocation2 + $0x89] sm:$0xff] }
 0x2e7   : > { %5815 = vst [vmem:[#allocation3 + $0x18] sm:$0xff] %v5701_v43  ;;  %v5705_v36 = vmax.f32 %v5579_v62, %v5583_v53  ;;  %v5587_v40 = vmax.f32 %v5359_v26, %v5473_v25  ;;  %v5361_v20 = vld [vmem:[#allocation2 + $0x88] sm:$0xff]  ;;  %5818 = vst [vmem:[#allocation3 + $0x30] sm:$0xff] %v5704_v24  ;;  %v5707_v3 = vmax.f32 %v5581_v15, %v5585_v18  ;;  %v5362_v30 = vld [vmem:[#allocation2 + $0x90] sm:$0xff] }
 0x2e8   : > { %v5708_v11 = vmax.f32 %v5582_v29, %v5586_v0  ;;  %v5588_v52 = vmax.f32 %v5360_v39, %v5474_v33  ;;  %v5589_v13 = vmax.f32 %v5361_v20, %v5475_v10  ;;  %v5476_v41 = vld [vmem:[#allocation2 + $0x91] sm:$0xff]  ;;  %5820 = vst [vmem:[#allocation3 + $0x40] sm:$0xff] %v5706_v28  ;;  %v5477_v61 = vld [vmem:[#allocation2 + $0x99] sm:$0xff]  ;;  %v5478_v48 = vld [vmem:[#allocation2 + $0xa1] sm:$0xff] }
 0x2e9   : > { %5819 = vst [vmem:[#allocation3 + $0x38] sm:$0xff] %v5705_v36  ;;  %v5363_v44 = vld [vmem:[#allocation2 + $0x98] sm:$0xff]  ;;  %v5709_v19 = vmax.f32 %v5583_v53, %v5587_v40  ;;  %v5590_v16 = vmax.f32 %v5362_v30, %v5476_v41  ;;  %v5364_v49 = vld [vmem:[#allocation2 + $0xa0] sm:$0xff]  ;;  %5821 = vst [vmem:[#allocation3 + $0x48] sm:$0xff] %v5707_v3 }
 0x2ea   : > { %5822 = vst [vmem:[#allocation3 + $0x50] sm:$0xff] %v5708_v11  ;;  %v5710_v50 = vmax.f32 %v5584_v31, %v5588_v52  ;;  %v5711_v46 = vmax.f32 %v5585_v18, %v5589_v13  ;;  %v5591_v47 = vmax.f32 %v5363_v44, %v5477_v61  ;;  %v5592_v34 = vmax.f32 %v5364_v49, %v5478_v48  ;;  %v5365_v32 = vld [vmem:[#allocation2 + $0xa8] sm:$0xff]  ;;  %v5366_v23 = vld [vmem:[#allocation2 + $0xb0] sm:$0xff]  ;;  %v5367_v1 = vld [vmem:[#allocation2 + $0xb8] sm:$0xff] }
 0x2eb   : > { %v5479_v21 = vld [vmem:[#allocation2 + $0xa9] sm:$0xff]  ;;  %5823 = vst [vmem:[#allocation3 + $0x58] sm:$0xff] %v5709_v19  ;;  %v5712_v27 = vmax.f32 %v5586_v0, %v5590_v16  ;;  %v5480_v35 = vld [vmem:[#allocation2 + $0xb1] sm:$0xff]  ;;  %v5481_v54 = vld [vmem:[#allocation2 + $0xb9] sm:$0xff] }
 0x2ec   : > { %v5593_v56 = vmax.f32 %v5365_v32, %v5479_v21  ;;  %5824 = vst [vmem:[#allocation3 + $0x60] sm:$0xff] %v5710_v50  ;;  %5825 = vst [vmem:[#allocation3 + $0x68] sm:$0xff] %v5711_v46  ;;  %v5713_v42 = vmax.f32 %v5587_v40, %v5591_v47  ;;  %v5714_v9 = vmax.f32 %v5588_v52, %v5592_v34  ;;  %v5368_v6 = vld [vmem:[#allocation2 + $0xc0] sm:$0xff]  ;;  %v5369_v60 = vld [vmem:[#allocation2 + $0xc8] sm:$0xff] }
 0x2ed   : > { %v5594_v22 = vmax.f32 %v5366_v23, %v5480_v35  ;;  %v5595_v51 = vmax.f32 %v5367_v1, %v5481_v54  ;;  %v5482_v57 = vld [vmem:[#allocation2 + $0xc1] sm:$0xff]  ;;  %5826 = vst [vmem:[#allocation3 + $0x70] sm:$0xff] %v5712_v27  ;;  %v5483_v4 = vld [vmem:[#allocation2 + $0xc9] sm:$0xff]  ;;  %v5484_v17 = vld [vmem:[#allocation2 + $0xd1] sm:$0xff] }
 0x2ee   : > { %v5715_v62 = vmax.f32 %v5589_v13, %v5593_v56  ;;  %v5596_v58 = vmax.f32 %v5368_v6, %v5482_v57  ;;  %v5370_v63 = vld [vmem:[#allocation2 + $0xd0] sm:$0xff]  ;;  %5827 = vst [vmem:[#allocation3 + $0x78] sm:$0xff] %v5713_v42  ;;  %5828 = vst [vmem:[#allocation3 + $0x80] sm:$0xff] %v5714_v9  ;;  %v5597_v55 = vmax.f32 %v5369_v60, %v5483_v4  ;;  %v5371_v43 = vld [vmem:[#allocation2 + $0xd8] sm:$0xff] }
 0x2ef   : > { %v5716_v15 = vmax.f32 %v5590_v16, %v5594_v22  ;;  %v5717_v5 = vmax.f32 %v5591_v47, %v5595_v51  ;;  %v5598_v59 = vmax.f32 %v5370_v63, %v5484_v17  ;;  %v5485_v45 = vld [vmem:[#allocation2 + $0xd9] sm:$0xff]  ;;  %v5486_v14 = vld [vmem:[#allocation2 + $0xe1] sm:$0xff]  ;;  %v5487_v2 = vld [vmem:[#allocation2 + $0xe9] sm:$0xff] }
 0x2f0   : > { %v5372_v29 = vld [vmem:[#allocation2 + $0xe0] sm:$0xff]  ;;  %5829 = vst [vmem:[#allocation3 + $0x88] sm:$0xff] %v5715_v62  ;;  %v5718_v53 = vmax.f32 %v5592_v34, %v5596_v58  ;;  %v5599_v8 = vmax.f32 %v5371_v43, %v5485_v45  ;;  %v5373_v12 = vld [vmem:[#allocation2 + $0xe8] sm:$0xff]  ;;  %v5719_v31 = vmax.f32 %v5593_v56, %v5597_v55  ;;  %v5374_v24 = vld [vmem:[#allocation2 + $0xf0] sm:$0xff] }
 0x2f1   : > { %5830 = vst [vmem:[#allocation3 + $0x90] sm:$0xff] %v5716_v15  ;;  %5831 = vst [vmem:[#allocation3 + $0x98] sm:$0xff] %v5717_v5  ;;  %v5720_v37 = vmax.f32 %v5594_v22, %v5598_v59  ;;  %v5600_v38 = vmax.f32 %v5372_v29, %v5486_v14  ;;  %v5601_v7 = vmax.f32 %v5373_v12, %v5487_v2  ;;  %v5488_v36 = vld [vmem:[#allocation2 + $0xf1] sm:$0xff]  ;;  %v5489_v25 = vld [vmem:[#allocation2 + $0xf9] sm:$0xff] }
 0x2f2   : > { %v5375_v18 = vld [vmem:[#allocation2 + $0xf8] sm:$0xff]  ;;  %5832 = vst [vmem:[#allocation3 + $0xa0] sm:$0xff] %v5718_v53  ;;  %v5721_v0 = vmax.f32 %v5595_v51, %v5599_v8  ;;  %v5602_v26 = vmax.f32 %v5374_v24, %v5488_v36  ;;  %v5376_v39 = vld [vmem:[#allocation2 + $0x100] sm:$0xff]  ;;  %5833 = vst [vmem:[#allocation3 + $0xa8] sm:$0xff] %v5719_v31 }
 0x2f3   : > { %v5490_v28 = vld [vmem:[#allocation2 + $0x101] sm:$0xff]  ;;  %5834 = vst [vmem:[#allocation3 + $0xb0] sm:$0xff] %v5720_v37  ;;  %v5722_v40 = vmax.f32 %v5596_v58, %v5600_v38  ;;  %v5723_v33 = vmax.f32 %v5597_v55, %v5601_v7  ;;  %v5603_v20 = vmax.f32 %v5375_v18, %v5489_v25  ;;  %v5491_v11 = vld [vmem:[#allocation2 + $0x109] sm:$0xff]  ;;  %v5492_v41 = vld [vmem:[#allocation2 + $0x111] sm:$0xff] }
 0x2f4   : > { %v5604_v10 = vmax.f32 %v5376_v39, %v5490_v28  ;;  %v5377_v3 = vld [vmem:[#allocation2 + $0x108] sm:$0xff]  ;;  %v5378_v52 = vld [vmem:[#allocation2 + $0x110] sm:$0xff]  ;;  %5835 = vst [vmem:[#allocation3 + $0xb8] sm:$0xff] %v5721_v0  ;;  %v5724_v13 = vmax.f32 %v5598_v59, %v5602_v26  ;;  %v5379_v44 = vld [vmem:[#allocation2 + $0x118] sm:$0xff] }
 0x2f5   : > { %v5605_v30 = vmax.f32 %v5377_v3, %v5491_v11  ;;  %v5493_v19 = vld [vmem:[#allocation2 + $0x119] sm:$0xff]  ;;  %5836 = vst [vmem:[#allocation3 + $0xc0] sm:$0xff] %v5722_v40  ;;  %5837 = vst [vmem:[#allocation3 + $0xc8] sm:$0xff] %v5723_v33  ;;  %v5725_v16 = vmax.f32 %v5599_v8, %v5603_v20  ;;  %v5606_v49 = vmax.f32 %v5378_v52, %v5492_v41  ;;  %v5494_v46 = vld [vmem:[#allocation2 + $0x121] sm:$0xff] }
 0x2f6   : > { %v5726_v61 = vmax.f32 %v5600_v38, %v5604_v10  ;;  %v5607_v48 = vmax.f32 %v5379_v44, %v5493_v19  ;;  %v5380_v50 = vld [vmem:[#allocation2 + $0x120] sm:$0xff]  ;;  %v5381_v47 = vld [vmem:[#allocation2 + $0x128] sm:$0xff]  ;;  %5838 = vst [vmem:[#allocation3 + $0xd0] sm:$0xff] %v5724_v13  ;;  %v5382_v23 = vld [vmem:[#allocation2 + $0x130] sm:$0xff] }
 0x2f7   : > { %v5727_v34 = vmax.f32 %v5601_v7, %v5605_v30  ;;  %v5608_v32 = vmax.f32 %v5380_v50, %v5494_v46  ;;  %v5495_v21 = vld [vmem:[#allocation2 + $0x129] sm:$0xff]  ;;  %v5496_v27 = vld [vmem:[#allocation2 + $0x131] sm:$0xff]  ;;  %5839 = vst [vmem:[#allocation3 + $0xd8] sm:$0xff] %v5725_v16  ;;  %v5728_v56 = vmax.f32 %v5602_v26, %v5606_v49  ;;  %v5497_v9 = vld [vmem:[#allocation2 + $0x139] sm:$0xff] }
 0x2f8   : > { %5840 = vst [vmem:[#allocation3 + $0xe0] sm:$0xff] %v5726_v61  ;;  %v5729_v35 = vmax.f32 %v5603_v20, %v5607_v48  ;;  %v5609_v1 = vmax.f32 %v5381_v47, %v5495_v21  ;;  %v5610_v54 = vmax.f32 %v5382_v23, %v5496_v27  ;;  %v5383_v42 = vld [vmem:[#allocation2 + $0x138] sm:$0xff]  ;;  %v5384_v22 = vld [vmem:[#allocation2 + $0x140] sm:$0xff]  ;;  %v5385_v60 = vld [vmem:[#allocation2 + $0x148] sm:$0xff] }
 0x2f9   : > { %5841 = vst [vmem:[#allocation3 + $0xe8] sm:$0xff] %v5727_v34  ;;  %v5730_v51 = vmax.f32 %v5604_v10, %v5608_v32  ;;  %v5611_v6 = vmax.f32 %v5383_v42, %v5497_v9  ;;  %v5498_v57 = vld [vmem:[#allocation2 + $0x141] sm:$0xff]  ;;  %v5499_v62 = vld [vmem:[#allocation2 + $0x149] sm:$0xff]  ;;  %5842 = vst [vmem:[#allocation3 + $0xf0] sm:$0xff] %v5728_v56 }
 0x2fa   : > { %5843 = vst [vmem:[#allocation3 + $0xf8] sm:$0xff] %v5729_v35  ;;  %v5731_v58 = vmax.f32 %v5605_v30, %v5609_v1  ;;  %v5732_v4 = vmax.f32 %v5606_v49, %v5610_v54  ;;  %v5612_v63 = vmax.f32 %v5384_v22, %v5498_v57  ;;  %v5613_v17 = vmax.f32 %v5385_v60, %v5499_v62  ;;  %v5386_v15 = vld [vmem:[#allocation2 + $0x150] sm:$0xff]  ;;  %v5387_v55 = vld [vmem:[#allocation2 + $0x158] sm:$0xff]  ;;  %v5388_v29 = vld [vmem:[#allocation2 + $0x160] sm:$0xff] }
 0x2fb   : > { %v5500_v5 = vld [vmem:[#allocation2 + $0x151] sm:$0xff]  ;;  %5844 = vst [vmem:[#allocation3 + $0x100] sm:$0xff] %v5730_v51  ;;  %v5733_v59 = vmax.f32 %v5607_v48, %v5611_v6  ;;  %v5501_v45 = vld [vmem:[#allocation2 + $0x159] sm:$0xff]  ;;  %v5502_v53 = vld [vmem:[#allocation2 + $0x161] sm:$0xff] }
 0x2fc   : > { %v5614_v43 = vmax.f32 %v5386_v15, %v5500_v5  ;;  %5845 = vst [vmem:[#allocation3 + $0x108] sm:$0xff] %v5731_v58  ;;  %5846 = vst [vmem:[#allocation3 + $0x110] sm:$0xff] %v5732_v4  ;;  %v5734_v8 = vmax.f32 %v5608_v32, %v5612_v63  ;;  %v5735_v14 = vmax.f32 %v5609_v1, %v5613_v17  ;;  %v5389_v31 = vld [vmem:[#allocation2 + $0x168] sm:$0xff]  ;;  %v5390_v38 = vld [vmem:[#allocation2 + $0x170] sm:$0xff] }
 0x2fd   : > { %v5615_v12 = vmax.f32 %v5387_v55, %v5501_v45  ;;  %v5616_v2 = vmax.f32 %v5388_v29, %v5502_v53  ;;  %v5503_v37 = vld [vmem:[#allocation2 + $0x169] sm:$0xff]  ;;  %5847 = vst [vmem:[#allocation3 + $0x118] sm:$0xff] %v5733_v59  ;;  %v5504_v36 = vld [vmem:[#allocation2 + $0x171] sm:$0xff]  ;;  %v5505_v0 = vld [vmem:[#allocation2 + $0x179] sm:$0xff] }
 0x2fe   : > { %v5736_v7 = vmax.f32 %v5610_v54, %v5614_v43  ;;  %v5617_v24 = vmax.f32 %v5389_v31, %v5503_v37  ;;  %v5391_v18 = vld [vmem:[#allocation2 + $0x178] sm:$0xff]  ;;  %5848 = vst [vmem:[#allocation3 + $0x120] sm:$0xff] %v5734_v8  ;;  %5849 = vst [vmem:[#allocation3 + $0x128] sm:$0xff] %v5735_v14  ;;  %v5618_v39 = vmax.f32 %v5390_v38, %v5504_v36  ;;  %v5392_v40 = vld [vmem:[#allocation2 + $0x180] sm:$0xff] }
 0x2ff   : > { %v5737_v26 = vmax.f32 %v5611_v6, %v5615_v12  ;;  %v5738_v25 = vmax.f32 %v5612_v63, %v5616_v2  ;;  %v5619_v28 = vmax.f32 %v5391_v18, %v5505_v0  ;;  %v5506_v33 = vld [vmem:[#allocation2 + $0x181] sm:$0xff]  ;;  %v5507_v11 = vld [vmem:[#allocation2 + $0x189] sm:$0xff]  ;;  %v5508_v13 = vld [vmem:[#allocation2 + $0x191] sm:$0xff] }
 0x300   : > { %v5393_v20 = vld [vmem:[#allocation2 + $0x188] sm:$0xff]  ;;  %5850 = vst [vmem:[#allocation3 + $0x130] sm:$0xff] %v5736_v7  ;;  %v5739_v10 = vmax.f32 %v5613_v17, %v5617_v24  ;;  %v5620_v3 = vmax.f32 %v5392_v40, %v5506_v33  ;;  %v5394_v52 = vld [vmem:[#allocation2 + $0x190] sm:$0xff]  ;;  %v5740_v30 = vmax.f32 %v5614_v43, %v5618_v39  ;;  %v5395_v16 = vld [vmem:[#allocation2 + $0x198] sm:$0xff] }
 0x301   : > { %5851 = vst [vmem:[#allocation3 + $0x138] sm:$0xff] %v5737_v26  ;;  %5852 = vst [vmem:[#allocation3 + $0x140] sm:$0xff] %v5738_v25  ;;  %v5741_v41 = vmax.f32 %v5615_v12, %v5619_v28  ;;  %v5621_v44 = vmax.f32 %v5393_v20, %v5507_v11  ;;  %v5622_v19 = vmax.f32 %v5394_v52, %v5508_v13  ;;  %v5509_v61 = vld [vmem:[#allocation2 + $0x199] sm:$0xff]  ;;  %v5510_v46 = vld [vmem:[#allocation2 + $0x1a1] sm:$0xff] }
 0x302   : > { %v5396_v49 = vld [vmem:[#allocation2 + $0x1a0] sm:$0xff]  ;;  %5853 = vst [vmem:[#allocation3 + $0x148] sm:$0xff] %v5739_v10  ;;  %v5742_v48 = vmax.f32 %v5616_v2, %v5620_v3  ;;  %v5623_v50 = vmax.f32 %v5395_v16, %v5509_v61  ;;  %v5397_v47 = vld [vmem:[#allocation2 + $0x1a8] sm:$0xff]  ;;  %5854 = vst [vmem:[#allocation3 + $0x150] sm:$0xff] %v5740_v30 }
 0x303   : > { %v5511_v34 = vld [vmem:[#allocation2 + $0x1a9] sm:$0xff]  ;;  %5855 = vst [vmem:[#allocation3 + $0x158] sm:$0xff] %v5741_v41  ;;  %v5743_v32 = vmax.f32 %v5617_v24, %v5621_v44  ;;  %v5744_v21 = vmax.f32 %v5618_v39, %v5622_v19  ;;  %v5624_v23 = vmax.f32 %v5396_v49, %v5510_v46  ;;  %v5512_v35 = vld [vmem:[#allocation2 + $0x1b1] sm:$0xff]  ;;  %v5513_v9 = vld [vmem:[#allocation2 + $0x1b9] sm:$0xff] }
 0x304   : > { %v5625_v27 = vmax.f32 %v5397_v47, %v5511_v34  ;;  %v5398_v56 = vld [vmem:[#allocation2 + $0x1b0] sm:$0xff]  ;;  %v5399_v1 = vld [vmem:[#allocation2 + $0x1b8] sm:$0xff]  ;;  %5856 = vst [vmem:[#allocation3 + $0x160] sm:$0xff] %v5742_v48  ;;  %v5745_v54 = vmax.f32 %v5619_v28, %v5623_v50  ;;  %v5400_v22 = vld [vmem:[#allocation2 + $0x1c0] sm:$0xff] }
 0x305   : > { %v5626_v42 = vmax.f32 %v5398_v56, %v5512_v35  ;;  %v5514_v51 = vld [vmem:[#allocation2 + $0x1c1] sm:$0xff]  ;;  %5857 = vst [vmem:[#allocation3 + $0x168] sm:$0xff] %v5743_v32  ;;  %5858 = vst [vmem:[#allocation3 + $0x170] sm:$0xff] %v5744_v21  ;;  %v5746_v6 = vmax.f32 %v5620_v3, %v5624_v23  ;;  %v5627_v60 = vmax.f32 %v5399_v1, %v5513_v9  ;;  %v5515_v4 = vld [vmem:[#allocation2 + $0x1c9] sm:$0xff] }
 0x306   : > { %v5747_v57 = vmax.f32 %v5621_v44, %v5625_v27  ;;  %v5628_v62 = vmax.f32 %v5400_v22, %v5514_v51  ;;  %v5401_v58 = vld [vmem:[#allocation2 + $0x1c8] sm:$0xff]  ;;  %v5402_v63 = vld [vmem:[#allocation2 + $0x1d0] sm:$0xff]  ;;  %5859 = vst [vmem:[#allocation3 + $0x178] sm:$0xff] %v5745_v54  ;;  %v5403_v55 = vld [vmem:[#allocation2 + $0x1d8] sm:$0xff] }
 0x307   : > { %v5748_v17 = vmax.f32 %v5622_v19, %v5626_v42  ;;  %v5629_v15 = vmax.f32 %v5401_v58, %v5515_v4  ;;  %v5516_v5 = vld [vmem:[#allocation2 + $0x1d1] sm:$0xff]  ;;  %v5517_v59 = vld [vmem:[#allocation2 + $0x1d9] sm:$0xff]  ;;  %5860 = vst [vmem:[#allocation3 + $0x180] sm:$0xff] %v5746_v6  ;;  %v5749_v43 = vmax.f32 %v5623_v50, %v5627_v60  ;;  %v5518_v14 = vld [vmem:[#allocation2 + $0x1e1] sm:$0xff] }
 0x308   : > { %5861 = vst [vmem:[#allocation3 + $0x188] sm:$0xff] %v5747_v57  ;;  %v5750_v45 = vmax.f32 %v5624_v23, %v5628_v62  ;;  %v5630_v29 = vmax.f32 %v5402_v63, %v5516_v5  ;;  %v5631_v53 = vmax.f32 %v5403_v55, %v5517_v59  ;;  %v5404_v8 = vld [vmem:[#allocation2 + $0x1e0] sm:$0xff]  ;;  %v5405_v12 = vld [vmem:[#allocation2 + $0x1e8] sm:$0xff]  ;;  %v5406_v38 = vld [vmem:[#allocation2 + $0x1f0] sm:$0xff] }
 0x309   : > { %5862 = vst [vmem:[#allocation3 + $0x190] sm:$0xff] %v5748_v17  ;;  %v5751_v2 = vmax.f32 %v5625_v27, %v5629_v15  ;;  %v5632_v31 = vmax.f32 %v5404_v8, %v5518_v14  ;;  %v5519_v37 = vld [vmem:[#allocation2 + $0x1e9] sm:$0xff]  ;;  %v5520_v7 = vld [vmem:[#allocation2 + $0x1f1] sm:$0xff]  ;;  %5863 = vst [vmem:[#allocation3 + $0x198] sm:$0xff] %v5749_v43 }
 0x30a   : > { %5864 = vst [vmem:[#allocation3 + $0x1a0] sm:$0xff] %v5750_v45  ;;  %v5752_v24 = vmax.f32 %v5626_v42, %v5630_v29  ;;  %v5753_v36 = vmax.f32 %v5627_v60, %v5631_v53  ;;  %v5633_v18 = vmax.f32 %v5405_v12, %v5519_v37  ;;  %v5634_v0 = vmax.f32 %v5406_v38, %v5520_v7  ;;  %v5407_v26 = vld [vmem:[#allocation2 + $0x1f8] sm:$0xff]  ;;  %v5408_v39 = vld [vmem:[#allocation2 + $0x200] sm:$0xff]  ;;  %v5409_v20 = vld [vmem:[#allocation2 + $0x208] sm:$0xff] }
 0x30b   : > { %v5521_v25 = vld [vmem:[#allocation2 + $0x1f9] sm:$0xff]  ;;  %5865 = vst [vmem:[#allocation3 + $0x1a8] sm:$0xff] %v5751_v2  ;;  %v5754_v28 = vmax.f32 %v5628_v62, %v5632_v31  ;;  %v5522_v33 = vld [vmem:[#allocation2 + $0x201] sm:$0xff]  ;;  %v5523_v10 = vld [vmem:[#allocation2 + $0x209] sm:$0xff] }
 0x30c   : > { %v5635_v40 = vmax.f32 %v5407_v26, %v5521_v25  ;;  %5866 = vst [vmem:[#allocation3 + $0x1b0] sm:$0xff] %v5752_v24  ;;  %5867 = vst [vmem:[#allocation3 + $0x1b8] sm:$0xff] %v5753_v36  ;;  %v5755_v3 = vmax.f32 %v5629_v15, %v5633_v18  ;;  %v5756_v11 = vmax.f32 %v5630_v29, %v5634_v0  ;;  %v5410_v30 = vld [vmem:[#allocation2 + $0x210] sm:$0xff]  ;;  %v5411_v44 = vld [vmem:[#allocation2 + $0x218] sm:$0xff] }
 0x30d   : > { %v5636_v52 = vmax.f32 %v5408_v39, %v5522_v33  ;;  %v5637_v13 = vmax.f32 %v5409_v20, %v5523_v10  ;;  %v5524_v41 = vld [vmem:[#allocation2 + $0x211] sm:$0xff]  ;;  %5868 = vst [vmem:[#allocation3 + $0x1c0] sm:$0xff] %v5754_v28  ;;  %v5525_v61 = vld [vmem:[#allocation2 + $0x219] sm:$0xff]  ;;  %v5526_v48 = vld [vmem:[#allocation2 + $0x221] sm:$0xff] }
 0x30e   : > { %v5757_v19 = vmax.f32 %v5631_v53, %v5635_v40  ;;  %v5638_v16 = vmax.f32 %v5410_v30, %v5524_v41  ;;  %v5412_v49 = vld [vmem:[#allocation2 + $0x220] sm:$0xff]  ;;  %5869 = vst [vmem:[#allocation3 + $0x1c8] sm:$0xff] %v5755_v3  ;;  %5870 = vst [vmem:[#allocation3 + $0x1d0] sm:$0xff] %v5756_v11  ;;  %v5639_v47 = vmax.f32 %v5411_v44, %v5525_v61  ;;  %v5413_v32 = vld [vmem:[#allocation2 + $0x228] sm:$0xff] }
 0x30f   : > { %v5758_v50 = vmax.f32 %v5632_v31, %v5636_v52  ;;  %v5759_v46 = vmax.f32 %v5633_v18, %v5637_v13  ;;  %v5640_v34 = vmax.f32 %v5412_v49, %v5526_v48  ;;  %v5527_v21 = vld [vmem:[#allocation2 + $0x229] sm:$0xff]  ;;  %v5528_v35 = vld [vmem:[#allocation2 + $0x231] sm:$0xff]  ;;  %v5529_v54 = vld [vmem:[#allocation2 + $0x239] sm:$0xff] }
 0x310   : > { %v5414_v23 = vld [vmem:[#allocation2 + $0x230] sm:$0xff]  ;;  %5871 = vst [vmem:[#allocation3 + $0x1d8] sm:$0xff] %v5757_v19  ;;  %v5760_v27 = vmax.f32 %v5634_v0, %v5638_v16  ;;  %v5641_v56 = vmax.f32 %v5413_v32, %v5527_v21  ;;  %v5415_v1 = vld [vmem:[#allocation2 + $0x238] sm:$0xff]  ;;  %v5761_v42 = vmax.f32 %v5635_v40, %v5639_v47  ;;  %v5416_v6 = vld [vmem:[#allocation2 + $0x240] sm:$0xff] }
 0x311   : > { %5872 = vst [vmem:[#allocation3 + $0x1e0] sm:$0xff] %v5758_v50  ;;  %5873 = vst [vmem:[#allocation3 + $0x1e8] sm:$0xff] %v5759_v46  ;;  %v5762_v9 = vmax.f32 %v5636_v52, %v5640_v34  ;;  %v5642_v22 = vmax.f32 %v5414_v23, %v5528_v35  ;;  %v5643_v51 = vmax.f32 %v5415_v1, %v5529_v54  ;;  %v5530_v57 = vld [vmem:[#allocation2 + $0x241] sm:$0xff]  ;;  %v5531_v4 = vld [vmem:[#allocation2 + $0x249] sm:$0xff] }
 0x312   : > { %v5417_v60 = vld [vmem:[#allocation2 + $0x248] sm:$0xff]  ;;  %5874 = vst [vmem:[#allocation3 + $0x1f0] sm:$0xff] %v5760_v27  ;;  %v5763_v62 = vmax.f32 %v5637_v13, %v5641_v56  ;;  %v5644_v58 = vmax.f32 %v5416_v6, %v5530_v57  ;;  %v5418_v63 = vld [vmem:[#allocation2 + $0x250] sm:$0xff]  ;;  %5875 = vst [vmem:[#allocation3 + $0x1f8] sm:$0xff] %v5761_v42 }
 0x313   : > { %v5532_v17 = vld [vmem:[#allocation2 + $0x251] sm:$0xff]  ;;  %5876 = vst [vmem:[#allocation3 + $0x200] sm:$0xff] %v5762_v9  ;;  %v5764_v15 = vmax.f32 %v5638_v16, %v5642_v22  ;;  %v5765_v5 = vmax.f32 %v5639_v47, %v5643_v51  ;;  %v5645_v55 = vmax.f32 %v5417_v60, %v5531_v4  ;;  %v5533_v45 = vld [vmem:[#allocation2 + $0x259] sm:$0xff]  ;;  %v5534_v14 = vld [vmem:[#allocation2 + $0x261] sm:$0xff] }
 0x314   : > { %v5646_v59 = vmax.f32 %v5418_v63, %v5532_v17  ;;  %v5419_v43 = vld [vmem:[#allocation2 + $0x258] sm:$0xff]  ;;  %v5420_v29 = vld [vmem:[#allocation2 + $0x260] sm:$0xff]  ;;  %5877 = vst [vmem:[#allocation3 + $0x208] sm:$0xff] %v5763_v62  ;;  %v5766_v53 = vmax.f32 %v5640_v34, %v5644_v58  ;;  %v5421_v12 = vld [vmem:[#allocation2 + $0x268] sm:$0xff] }
 0x315   : > { %v5647_v8 = vmax.f32 %v5419_v43, %v5533_v45  ;;  %v5535_v2 = vld [vmem:[#allocation2 + $0x269] sm:$0xff]  ;;  %5878 = vst [vmem:[#allocation3 + $0x210] sm:$0xff] %v5764_v15  ;;  %5879 = vst [vmem:[#allocation3 + $0x218] sm:$0xff] %v5765_v5  ;;  %v5767_v31 = vmax.f32 %v5641_v56, %v5645_v55  ;;  %v5648_v38 = vmax.f32 %v5420_v29, %v5534_v14  ;;  %v5536_v36 = vld [vmem:[#allocation2 + $0x271] sm:$0xff] }
 0x316   : > { %v5768_v37 = vmax.f32 %v5642_v22, %v5646_v59  ;;  %v5649_v7 = vmax.f32 %v5421_v12, %v5535_v2  ;;  %v5422_v24 = vld [vmem:[#allocation2 + $0x270] sm:$0xff]  ;;  %v5423_v18 = vld [vmem:[#allocation2 + $0x278] sm:$0xff]  ;;  %5880 = vst [vmem:[#allocation3 + $0x220] sm:$0xff] %v5766_v53  ;;  %v5424_v39 = vld [vmem:[#allocation2 + $0x280] sm:$0xff] }
 0x317   : > { %v5769_v0 = vmax.f32 %v5643_v51, %v5647_v8  ;;  %v5650_v26 = vmax.f32 %v5422_v24, %v5536_v36  ;;  %v5537_v25 = vld [vmem:[#allocation2 + $0x279] sm:$0xff]  ;;  %v5538_v28 = vld [vmem:[#allocation2 + $0x281] sm:$0xff]  ;;  %5881 = vst [vmem:[#allocation3 + $0x228] sm:$0xff] %v5767_v31  ;;  %v5770_v40 = vmax.f32 %v5644_v58, %v5648_v38  ;;  %v5539_v11 = vld [vmem:[#allocation2 + $0x289] sm:$0xff] }
 0x318   : > { %5882 = vst [vmem:[#allocation3 + $0x230] sm:$0xff] %v5768_v37  ;;  %v5771_v33 = vmax.f32 %v5645_v55, %v5649_v7  ;;  %v5651_v20 = vmax.f32 %v5423_v18, %v5537_v25  ;;  %v5652_v10 = vmax.f32 %v5424_v39, %v5538_v28  ;;  %v5425_v3 = vld [vmem:[#allocation2 + $0x288] sm:$0xff]  ;;  %v5426_v52 = vld [vmem:[#allocation2 + $0x290] sm:$0xff]  ;;  %v5427_v44 = vld [vmem:[#allocation2 + $0x298] sm:$0xff] }
 0x319   : > { %5883 = vst [vmem:[#allocation3 + $0x238] sm:$0xff] %v5769_v0  ;;  %v5772_v13 = vmax.f32 %v5646_v59, %v5650_v26  ;;  %v5653_v30 = vmax.f32 %v5425_v3, %v5539_v11  ;;  %v5540_v41 = vld [vmem:[#allocation2 + $0x291] sm:$0xff]  ;;  %v5541_v19 = vld [vmem:[#allocation2 + $0x299] sm:$0xff]  ;;  %5884 = vst [vmem:[#allocation3 + $0x240] sm:$0xff] %v5770_v40 }
 0x31a   : > { %5885 = vst [vmem:[#allocation3 + $0x248] sm:$0xff] %v5771_v33  ;;  %v5773_v16 = vmax.f32 %v5647_v8, %v5651_v20  ;;  %v5774_v61 = vmax.f32 %v5648_v38, %v5652_v10  ;;  %v5654_v49 = vmax.f32 %v5426_v52, %v5540_v41  ;;  %v5655_v48 = vmax.f32 %v5427_v44, %v5541_v19  ;;  %v5428_v50 = vld [vmem:[#allocation2 + $0x2a0] sm:$0xff]  ;;  %v5429_v47 = vld [vmem:[#allocation2 + $0x2a8] sm:$0xff]  ;;  %v5430_v23 = vld [vmem:[#allocation2 + $0x2b0] sm:$0xff] }
 0x31b   : > { %v5542_v46 = vld [vmem:[#allocation2 + $0x2a1] sm:$0xff]  ;;  %5886 = vst [vmem:[#allocation3 + $0x250] sm:$0xff] %v5772_v13  ;;  %v5775_v34 = vmax.f32 %v5649_v7, %v5653_v30  ;;  %v5543_v21 = vld [vmem:[#allocation2 + $0x2a9] sm:$0xff]  ;;  %v5544_v27 = vld [vmem:[#allocation2 + $0x2b1] sm:$0xff] }
 0x31c   : > { %v5656_v32 = vmax.f32 %v5428_v50, %v5542_v46  ;;  %5887 = vst [vmem:[#allocation3 + $0x258] sm:$0xff] %v5773_v16  ;;  %5888 = vst [vmem:[#allocation3 + $0x260] sm:$0xff] %v5774_v61  ;;  %v5776_v56 = vmax.f32 %v5650_v26, %v5654_v49  ;;  %v5777_v35 = vmax.f32 %v5651_v20, %v5655_v48  ;;  %v5431_v42 = vld [vmem:[#allocation2 + $0x2b8] sm:$0xff]  ;;  %v5432_v22 = vld [vmem:[#allocation2 + $0x2c0] sm:$0xff] }
 0x31d   : > { %v5657_v1 = vmax.f32 %v5429_v47, %v5543_v21  ;;  %v5658_v54 = vmax.f32 %v5430_v23, %v5544_v27  ;;  %v5545_v9 = vld [vmem:[#allocation2 + $0x2b9] sm:$0xff]  ;;  %5889 = vst [vmem:[#allocation3 + $0x268] sm:$0xff] %v5775_v34  ;;  %v5546_v57 = vld [vmem:[#allocation2 + $0x2c1] sm:$0xff]  ;;  %v5547_v62 = vld [vmem:[#allocation2 + $0x2c9] sm:$0xff] }
 0x31e   : > { %v5778_v51 = vmax.f32 %v5652_v10, %v5656_v32  ;;  %v5659_v6 = vmax.f32 %v5431_v42, %v5545_v9  ;;  %v5433_v60 = vld [vmem:[#allocation2 + $0x2c8] sm:$0xff]  ;;  %5890 = vst [vmem:[#allocation3 + $0x270] sm:$0xff] %v5776_v56  ;;  %5891 = vst [vmem:[#allocation3 + $0x278] sm:$0xff] %v5777_v35  ;;  %v5660_v63 = vmax.f32 %v5432_v22, %v5546_v57  ;;  %v5434_v15 = vld [vmem:[#allocation2 + $0x2d0] sm:$0xff] }
 0x31f   : > { %v5779_v58 = vmax.f32 %v5653_v30, %v5657_v1  ;;  %v5780_v4 = vmax.f32 %v5654_v49, %v5658_v54  ;;  %v5661_v17 = vmax.f32 %v5433_v60, %v5547_v62  ;;  %v5548_v5 = vld [vmem:[#allocation2 + $0x2d1] sm:$0xff]  ;;  %v5549_v45 = vld [vmem:[#allocation2 + $0x2d9] sm:$0xff]  ;;  %v5550_v53 = vld [vmem:[#allocation2 + $0x2e1] sm:$0xff] }
 0x320   : > { %v5435_v55 = vld [vmem:[#allocation2 + $0x2d8] sm:$0xff]  ;;  %5892 = vst [vmem:[#allocation3 + $0x280] sm:$0xff] %v5778_v51  ;;  %v5781_v59 = vmax.f32 %v5655_v48, %v5659_v6  ;;  %v5662_v43 = vmax.f32 %v5434_v15, %v5548_v5  ;;  %v5436_v29 = vld [vmem:[#allocation2 + $0x2e0] sm:$0xff]  ;;  %v5782_v8 = vmax.f32 %v5656_v32, %v5660_v63  ;;  %v5437_v31 = vld [vmem:[#allocation2 + $0x2e8] sm:$0xff] }
 0x321   : > { %5893 = vst [vmem:[#allocation3 + $0x288] sm:$0xff] %v5779_v58  ;;  %5894 = vst [vmem:[#allocation3 + $0x290] sm:$0xff] %v5780_v4  ;;  %v5783_v14 = vmax.f32 %v5657_v1, %v5661_v17  ;;  %v5663_v12 = vmax.f32 %v5435_v55, %v5549_v45  ;;  %v5664_v2 = vmax.f32 %v5436_v29, %v5550_v53  ;;  %v5551_v37 = vld [vmem:[#allocation2 + $0x2e9] sm:$0xff]  ;;  %v5552_v36 = vld [vmem:[#allocation2 + $0x2f1] sm:$0xff] }
 0x322   : > { %v5438_v38 = vld [vmem:[#allocation2 + $0x2f0] sm:$0xff]  ;;  %5895 = vst [vmem:[#allocation3 + $0x298] sm:$0xff] %v5781_v59  ;;  %v5784_v7 = vmax.f32 %v5658_v54, %v5662_v43  ;;  %v5665_v24 = vmax.f32 %v5437_v31, %v5551_v37  ;;  %v5439_v18 = vld [vmem:[#allocation2 + $0x2f8] sm:$0xff]  ;;  %5896 = vst [vmem:[#allocation3 + $0x2a0] sm:$0xff] %v5782_v8 }
 0x323   : > { %v5553_v0 = vld [vmem:[#allocation2 + $0x2f9] sm:$0xff]  ;;  %5897 = vst [vmem:[#allocation3 + $0x2a8] sm:$0xff] %v5783_v14  ;;  %v5785_v26 = vmax.f32 %v5659_v6, %v5663_v12  ;;  %v5786_v25 = vmax.f32 %v5660_v63, %v5664_v2  ;;  %v5666_v39 = vmax.f32 %v5438_v38, %v5552_v36  ;;  %v5554_v33 = vld [vmem:[#allocation2 + $0x301] sm:$0xff]  ;;  %v5555_v11 = vld [vmem:[#allocation2 + $0x309] sm:$0xff] }
 0x324   : > { %v5667_v28 = vmax.f32 %v5439_v18, %v5553_v0  ;;  %v5440_v40 = vld [vmem:[#allocation2 + $0x300] sm:$0xff]  ;;  %v5441_v20 = vld [vmem:[#allocation2 + $0x308] sm:$0xff]  ;;  %5898 = vst [vmem:[#allocation3 + $0x2b0] sm:$0xff] %v5784_v7  ;;  %v5787_v10 = vmax.f32 %v5661_v17, %v5665_v24  ;;  %v5442_v52 = vld [vmem:[#allocation2 + $0x310] sm:$0xff] }
 0x325   : > { %v5668_v3 = vmax.f32 %v5440_v40, %v5554_v33  ;;  %v5556_v13 = vld [vmem:[#allocation2 + $0x311] sm:$0xff]  ;;  %5899 = vst [vmem:[#allocation3 + $0x2b8] sm:$0xff] %v5785_v26  ;;  %5900 = vst [vmem:[#allocation3 + $0x2c0] sm:$0xff] %v5786_v25  ;;  %v5788_v30 = vmax.f32 %v5662_v43, %v5666_v39  ;;  %v5669_v44 = vmax.f32 %v5441_v20, %v5555_v11  ;;  %v5557_v61 = vld [vmem:[#allocation2 + $0x319] sm:$0xff] }
 0x326   : > { %v5789_v41 = vmax.f32 %v5663_v12, %v5667_v28  ;;  %v5670_v19 = vmax.f32 %v5442_v52, %v5556_v13  ;;  %v5443_v16 = vld [vmem:[#allocation2 + $0x318] sm:$0xff]  ;;  %v5444_v49 = vld [vmem:[#allocation2 + $0x320] sm:$0xff]  ;;  %5901 = vst [vmem:[#allocation3 + $0x2c8] sm:$0xff] %v5787_v10  ;;  %v5445_v47 = vld [vmem:[#allocation2 + $0x328] sm:$0xff] }
 0x327   : > { %v5790_v48 = vmax.f32 %v5664_v2, %v5668_v3  ;;  %v5671_v50 = vmax.f32 %v5443_v16, %v5557_v61  ;;  %v5558_v46 = vld [vmem:[#allocation2 + $0x321] sm:$0xff]  ;;  %v5559_v34 = vld [vmem:[#allocation2 + $0x329] sm:$0xff]  ;;  %5902 = vst [vmem:[#allocation3 + $0x2d0] sm:$0xff] %v5788_v30  ;;  %v5791_v32 = vmax.f32 %v5665_v24, %v5669_v44  ;;  %v5560_v35 = vld [vmem:[#allocation2 + $0x331] sm:$0xff] }
 0x328   : > { %5903 = vst [vmem:[#allocation3 + $0x2d8] sm:$0xff] %v5789_v41  ;;  %v5792_v21 = vmax.f32 %v5666_v39, %v5670_v19  ;;  %v5672_v23 = vmax.f32 %v5444_v49, %v5558_v46  ;;  %v5673_v27 = vmax.f32 %v5445_v47, %v5559_v34  ;;  %v5446_v56 = vld [vmem:[#allocation2 + $0x330] sm:$0xff]  ;;  %v5447_v1 = vld [vmem:[#allocation2 + $0x338] sm:$0xff]  ;;  %v5448_v22 = vld [vmem:[#allocation2 + $0x340] sm:$0xff] }
 0x329   : > { %5904 = vst [vmem:[#allocation3 + $0x2e0] sm:$0xff] %v5790_v48  ;;  %v5793_v54 = vmax.f32 %v5667_v28, %v5671_v50  ;;  %v5674_v42 = vmax.f32 %v5446_v56, %v5560_v35  ;;  %v5561_v9 = vld [vmem:[#allocation2 + $0x339] sm:$0xff]  ;;  %v5562_v51 = vld [vmem:[#allocation2 + $0x341] sm:$0xff]  ;;  %5905 = vst [vmem:[#allocation3 + $0x2e8] sm:$0xff] %v5791_v32 }
 0x32a   : > { %5906 = vst [vmem:[#allocation3 + $0x2f0] sm:$0xff] %v5792_v21  ;;  %v5794_v6 = vmax.f32 %v5668_v3, %v5672_v23  ;;  %v5795_v57 = vmax.f32 %v5669_v44, %v5673_v27  ;;  %v5675_v60 = vmax.f32 %v5447_v1, %v5561_v9  ;;  %v5676_v62 = vmax.f32 %v5448_v22, %v5562_v51  ;;  %v5449_v58 = vld [vmem:[#allocation2 + $0x348] sm:$0xff]  ;;  %v5450_v63 = vld [vmem:[#allocation2 + $0x350] sm:$0xff]  ;;  %v5451_v55 = vld [vmem:[#allocation2 + $0x358] sm:$0xff] }
 0x32b   : > { %v5563_v4 = vld [vmem:[#allocation2 + $0x349] sm:$0xff]  ;;  %5907 = vst [vmem:[#allocation3 + $0x2f8] sm:$0xff] %v5793_v54  ;;  %v5796_v17 = vmax.f32 %v5670_v19, %v5674_v42  ;;  %v5564_v5 = vld [vmem:[#allocation2 + $0x351] sm:$0xff]  ;;  %v5565_v59 = vld [vmem:[#allocation2 + $0x359] sm:$0xff] }
 0x32c   : > { %v5677_v15 = vmax.f32 %v5449_v58, %v5563_v4  ;;  %5908 = vst [vmem:[#allocation3 + $0x300] sm:$0xff] %v5794_v6  ;;  %5909 = vst [vmem:[#allocation3 + $0x308] sm:$0xff] %v5795_v57  ;;  %v5797_v43 = vmax.f32 %v5671_v50, %v5675_v60  ;;  %v5798_v45 = vmax.f32 %v5672_v23, %v5676_v62  ;;  %v5452_v8 = vld [vmem:[#allocation2 + $0x360] sm:$0xff]  ;;  %v5453_v12 = vld [vmem:[#allocation2 + $0x368] sm:$0xff] }
 0x32d   : > { %v5678_v29 = vmax.f32 %v5450_v63, %v5564_v5  ;;  %v5679_v53 = vmax.f32 %v5451_v55, %v5565_v59  ;;  %v5566_v14 = vld [vmem:[#allocation2 + $0x361] sm:$0xff]  ;;  %5910 = vst [vmem:[#allocation3 + $0x310] sm:$0xff] %v5796_v17  ;;  %v5567_v37 = vld [vmem:[#allocation2 + $0x369] sm:$0xff]  ;;  %v5568_v7 = vld [vmem:[#allocation2 + $0x371] sm:$0xff] }
 0x32e   : > { %v5799_v2 = vmax.f32 %v5673_v27, %v5677_v15  ;;  %v5680_v31 = vmax.f32 %v5452_v8, %v5566_v14  ;;  %v5454_v38 = vld [vmem:[#allocation2 + $0x370] sm:$0xff]  ;;  %5911 = vst [vmem:[#allocation3 + $0x318] sm:$0xff] %v5797_v43  ;;  %5912 = vst [vmem:[#allocation3 + $0x320] sm:$0xff] %v5798_v45  ;;  %v5681_v18 = vmax.f32 %v5453_v12, %v5567_v37  ;;  %v5455_v26 = vld [vmem:[#allocation2 + $0x378] sm:$0xff] }
 0x32f   : > { %v5800_v24 = vmax.f32 %v5674_v42, %v5678_v29  ;;  %v5801_v36 = vmax.f32 %v5675_v60, %v5679_v53  ;;  %v5682_v0 = vmax.f32 %v5454_v38, %v5568_v7  ;;  %v5569_v25 = vld [vmem:[#allocation2 + $0x379] sm:$0xff]  ;;  %v5570_v33 = vld [vmem:[#allocation2 + $0x381] sm:$0xff]  ;;  %v5571_v10 = vld [vmem:[#allocation2 + $0x389] sm:$0xff] }
 0x330   : > { %v5456_v39 = vld [vmem:[#allocation2 + $0x380] sm:$0xff]  ;;  %5913 = vst [vmem:[#allocation3 + $0x328] sm:$0xff] %v5799_v2  ;;  %v5802_v28 = vmax.f32 %v5676_v62, %v5680_v31  ;;  %v5683_v40 = vmax.f32 %v5455_v26, %v5569_v25  ;;  %v5457_v20 = vld [vmem:[#allocation2 + $0x388] sm:$0xff]  ;;  %v5803_v3 = vmax.f32 %v5677_v15, %v5681_v18  ;;  %v5686_v30 = vld [vmem:[#allocation2 + $0x390] sm:$0xff] }
 0x331   : > { %5914 = vst [vmem:[#allocation3 + $0x330] sm:$0xff] %v5800_v24  ;;  %5915 = vst [vmem:[#allocation3 + $0x338] sm:$0xff] %v5801_v36  ;;  %v5804_v11 = vmax.f32 %v5678_v29, %v5682_v0  ;;  %v5684_v52 = vmax.f32 %v5456_v39, %v5570_v33  ;;  %v5685_v13 = vmax.f32 %v5457_v20, %v5571_v10  ;;  %v5690_v41 = vld [vmem:[#allocation2 + $0x391] sm:$0xff]  ;;  %v5691_v61 = vld [vmem:[#allocation2 + $0x399] sm:$0xff] }
 0x332   : > { %v5687_v44 = vld [vmem:[#allocation2 + $0x398] sm:$0xff]  ;;  %5916 = vst [vmem:[#allocation3 + $0x340] sm:$0xff] %v5802_v28  ;;  %v5805_v19 = vmax.f32 %v5679_v53, %v5683_v40  ;;  %v5694_v16 = vmax.f32 %v5686_v30, %v5690_v41  ;;  %v5688_v49 = vld [vmem:[#allocation2 + $0x3a0] sm:$0xff]  ;;  %5917 = vst [vmem:[#allocation3 + $0x348] sm:$0xff] %v5803_v3 }
 0x333   : > { %v5692_v48 = vld [vmem:[#allocation2 + $0x3a1] sm:$0xff]  ;;  %5918 = vst [vmem:[#allocation3 + $0x350] sm:$0xff] %v5804_v11  ;;  %v5806_v50 = vmax.f32 %v5680_v31, %v5684_v52  ;;  %v5807_v46 = vmax.f32 %v5681_v18, %v5685_v13  ;;  %v5695_v47 = vmax.f32 %v5687_v44, %v5691_v61  ;;  %v5693_v21 = vld [vmem:[#allocation2 + $0x3a9] sm:$0xff] }
 0x334   : > { %v5696_v34 = vmax.f32 %v5688_v49, %v5692_v48  ;;  %v5689_v32 = vld [vmem:[#allocation2 + $0x3a8] sm:$0xff]  ;;  %5919 = vst [vmem:[#allocation3 + $0x358] sm:$0xff] %v5805_v19  ;;  %v5808_v23 = vmax.f32 %v5682_v0, %v5694_v16 }
 0x335   : > { %v5697_v27 = vmax.f32 %v5689_v32, %v5693_v21  ;;  %5920 = vst [vmem:[#allocation3 + $0x360] sm:$0xff] %v5806_v50  ;;  %5921 = vst [vmem:[#allocation3 + $0x368] sm:$0xff] %v5807_v46  ;;  %v5809_v56 = vmax.f32 %v5683_v40, %v5695_v47 }
 0x336   : > { %v5810_v35 = vmax.f32 %v5684_v52, %v5696_v34  ;;  %5922 = vst [vmem:[#allocation3 + $0x370] sm:$0xff] %v5808_v23 }
 0x337   : > { %v5811_v1 = vmax.f32 %v5685_v13, %v5697_v27  ;;  %5923 = vst [vmem:[#allocation3 + $0x378] sm:$0xff] %v5809_v56 }
 0x338   : > { %5924 = vst [vmem:[#allocation3 + $0x380] sm:$0xff] %v5810_v35 }
 0x339   : > { %5925 = vst [vmem:[#allocation3 + $0x388] sm:$0xff] %v5811_v1 }
 0x33a LB: >> { %v14693_v54 = vld [vmem:[%s28803_s3 + $0x80] sm:$0xff]  ;;  %v14694_v42 = vld [vmem:[%s28803_s3 + $0x88] sm:$0xff]  ;;  %v14695_v6 = vld [vmem:[%s28803_s3 + $0x90] sm:$0xff]  ;;  %s14675_s19 = sshll.u32 %s24463_s22, 7  ;;  %s5931_s22 = sadd.s32 1, %s24463_s22   ;;  %s24463_s22 = sphi %s26536_s22, %s5931_s22  }
 0x33b   : >> { %v15056_v9 = vld [vmem:[%s28803_s3 + $0x600] sm:$0xff]  ;;  %v22078_v22 = vpack.c.bf16 %v14694_v42, %v14693_v54  ;;  %v15057_v51 = vld [vmem:[%s28803_s3 + $0x608] sm:$0xff]  ;;  %v14696_v57 = vld [vmem:[%s28803_s3 + $0x98] sm:$0xff]  ;;  %s26598_s21 = scalar_lea.vmem [#allocation3], %s14675_s19  ;;  %s28359_s25 = scalar_lea.vmem [#allocation4], %s14675_s19 }
 0x33c   : >> { %v22462_v60 = vpack.c.bf16 %v15057_v51, %v15056_v9  ;;  %v22082_v62 = vpack.c.bf16 %v14696_v57, %v14695_v6  ;;  %v15058_v58 = vld [vmem:[%s28803_s3 + $0x610] sm:$0xff]  ;;  %v15059_v4 = vld [vmem:[%s28803_s3 + $0x618] sm:$0xff]  ;;  %v14697_v63 = vld [vmem:[%s28803_s3 + $0xa0] sm:$0xff]  ;;  %p5928_p10 = scmp.ge.s32.totalorder %s5931_s22, 5  }
 0x33d   : >> { %22079 = vmatprep.subr.bf16.mxu1 %v22078_v22  ;;  %v22466_v17 = vpack.c.bf16 %v15059_v4, %v15058_v58  ;;  %v14698_v15 = vld [vmem:[%s28803_s3 + $0xa8] sm:$0xff]  ;;  %v15060_v5 = vld [vmem:[%s28803_s3 + $0x620] sm:$0xff]  ;;  %v14699_v45 = vld [vmem:[%s28803_s3 + $0xb0] sm:$0xff]  ;;  %vm24470_vm0 = vmmov (%p5928_p10), 0  }
 0x33e   : >> { %v15061_v55 = vld [vmem:[%s28803_s3 + $0x628] sm:$0xff]  ;;  %22463 = vmatprep.subr.bf16.mxu0 %v22462_v60  ;;  %22081 = vmatpush3.bf16.msra.mxu1 %v22078_v22  ;;  %v22086_v59 = vpack.c.bf16 %v14698_v15, %v14697_v63  ;;  %v14700_v29 = vld [vmem:[%s28803_s3 + $0xb8] sm:$0xff]  ;;  %v15062_v53 = vld [vmem:[%s28803_s3 + $0x630] sm:$0xff] }
 0x33f   : >> { %22465 = vmatpush3.bf16.msra.mxu0 %v22462_v60  ;;  %22083 = vmatprep.subr.bf16.mxu1 %v22082_v62  ;;  %v22470_v43 = vpack.c.bf16 %v15061_v55, %v15060_v5  ;;  %v15063_v8 = vld [vmem:[%s28803_s3 + $0x638] sm:$0xff]  ;;  %v22090_v14 = vpack.c.bf16 %v14700_v29, %v14699_v45  ;;  %v14701_v2 = vld [vmem:[%s28803_s3 + $0xc0] sm:$0xff]  ;;  %v14702_v31 = vld [vmem:[%s28803_s3 + $0xc8] sm:$0xff] }
 0x340   : >> { %22467 = vmatprep.subr.bf16.mxu0 %v22466_v17  ;;  %v22474_v12 = vpack.c.bf16 %v15063_v8, %v15062_v53  ;;  %v14677_v37 = vld [vmem:[%s26598_s21 + $0x2] sm:$0xff]  ;;  %v22094_v36 = vpack.c.bf16 %v14702_v31, %v14701_v2  ;;  %v14703_v0 = vld [vmem:[%s28803_s3 + $0xd0] sm:$0xff]  ;;  %v14704_v26 = vld [vmem:[%s28803_s3 + $0xd8] sm:$0xff] }
 0x341   : >> { %v15064_v38 = vld [vmem:[%s28803_s3 + $0x640] sm:$0xff]  ;;  %v15065_v7 = vld [vmem:[%s28803_s3 + $0x648] sm:$0xff]  ;;  %18965 = vmatprep.mubr.f32.mxu1 %v14677_v37  ;;  %v15066_v25 = vld [vmem:[%s28803_s3 + $0x650] sm:$0xff]  ;;  %v22098_v28 = vpack.c.bf16 %v14704_v26, %v14703_v0 }
 0x342   : >> { %22085 = vmatpush3.bf16.msra.mxu1 %v22082_v62  ;;  %v15040_v24 = vld [vmem:[%s26598_s21 + $0x84] sm:$0xff]  ;;  %v22478_v18 = vpack.c.bf16 %v15065_v7, %v15064_v38  ;;  %v15067_v39 = vld [vmem:[%s28803_s3 + $0x658] sm:$0xff]  ;;  %v14707_v13 = vld [vmem:[%s28803_s3 + $0xf0] sm:$0xff] }
 0x343   : >> { %22469 = vmatpush3.bf16.msra.mxu0 %v22466_v17  ;;  %22087 = vmatprep.subr.bf16.mxu1 %v22086_v59  ;;  %v22482_v40 = vpack.c.bf16 %v15067_v39, %v15066_v25  ;;  %v14705_v33 = vld [vmem:[%s28803_s3 + $0xe0] sm:$0xff]  ;;  %v14706_v20 = vld [vmem:[%s28803_s3 + $0xe8] sm:$0xff]  ;;  %v14708_v30 = vld [vmem:[%s28803_s3 + $0xf8] sm:$0xff] }
 0x344   : >> { %22471 = vmatprep.subr.bf16.mxu0 %v22470_v43  ;;  %19637 = vmatprep.mubr.f32.mxu0 %v15040_v24  ;;  %v15068_v10 = vld [vmem:[%s28803_s3 + $0x660] sm:$0xff]  ;;  %v15069_v3 = vld [vmem:[%s28803_s3 + $0x668] sm:$0xff]  ;;  %v22102_v11 = vpack.c.bf16 %v14706_v20, %v14705_v33  ;;  %v15070_v41 = vld [vmem:[%s28803_s3 + $0x670] sm:$0xff]  ;;  %v22106_v19 = vpack.c.bf16 %v14708_v30, %v14707_v13 }
 0x345   : >> { %v22486_v52 = vpack.c.bf16 %v15069_v3, %v15068_v10  ;;  %v15071_v44 = vld [vmem:[%s28803_s3 + $0x678] sm:$0xff]  ;;  %v5950_v61 = vld [vmem:[%s28803_s3] sm:$0xff]  ;;  %v5951_v49 = vld [vmem:[%s28803_s3 + $0x8] sm:$0xff] }
 0x346   : >> { %22089 = vmatpush3.bf16.msra.mxu1 %v22086_v59  ;;  %v22490_v16 = vpack.c.bf16 %v15071_v44, %v15070_v41  ;;  %v15089_v48 = vld [vmem:[%s28803_s3 + $0x680] sm:$0xff]  ;;  %v15090_v50 = vld [vmem:[%s28803_s3 + $0x688] sm:$0xff]  ;;  %v22110_v46 = vpack.c.bf16 %v5951_v49, %v5950_v61  ;;  %v5952_v34 = vld [vmem:[%s28803_s3 + $0x10] sm:$0xff] }
 0x347   : >> { %22473 = vmatpush3.bf16.msra.mxu0 %v22470_v43  ;;  %22091 = vmatprep.subr.bf16.mxu1 %v22090_v14  ;;  %v22494_v47 = vpack.c.bf16 %v15090_v50, %v15089_v48  ;;  %v5953_v32 = vld [vmem:[%s28803_s3 + $0x18] sm:$0xff]  ;;  %v14678_v21 = vld [vmem:[%s26598_s21 + $0xa] sm:$0xff]  ;;  %v5954_v9 = vld [vmem:[%s28803_s3 + $0x20] sm:$0xff] }
 0x348   : >> { %22475 = vmatprep.subr.bf16.mxu0 %v22474_v12  ;;  %v15091_v23 = vld [vmem:[%s28803_s3 + $0x690] sm:$0xff]  ;;  %v15092_v27 = vld [vmem:[%s28803_s3 + $0x698] sm:$0xff]  ;;  %v22114_v1 = vpack.c.bf16 %v5953_v32, %v5952_v34  ;;  %v5955_v22 = vld [vmem:[%s28803_s3 + $0x28] sm:$0xff] }
 0x349   : >> { %v15041_v56 = vld [vmem:[%s26598_s21 + $0x8c] sm:$0xff]  ;;  %v15042_v54 = vld [vmem:[%s26598_s21 + $0x94] sm:$0xff]  ;;  %v22498_v42 = vpack.c.bf16 %v15092_v27, %v15091_v23  ;;  %v15093_v6 = vld [vmem:[%s28803_s3 + $0x6a0] sm:$0xff]  ;;  %v22118_v58 = vpack.c.bf16 %v5955_v22, %v5954_v9 }
 0x34a   : >> { %22093 = vmatpush3.bf16.msra.mxu1 %v22090_v14  ;;  %v14679_v35 = vld [vmem:[%s26598_s21 + $0x12] sm:$0xff]  ;;  %v14680_v51 = vld [vmem:[%s26598_s21 + $0x1a] sm:$0xff]  ;;  %v15094_v57 = vld [vmem:[%s28803_s3 + $0x6a8] sm:$0xff] }
 0x34b   : >> { %22477 = vmatpush3.bf16.msra.mxu0 %v22474_v12  ;;  %22095 = vmatprep.subr.bf16.mxu1 %v22094_v36  ;;  %v15043_v60 = vld [vmem:[%s26598_s21 + $0x9c] sm:$0xff]  ;;  %v15044_v4 = vld [vmem:[%s26598_s21 + $0xa4] sm:$0xff]  ;;  %v22502_v63 = vpack.c.bf16 %v15094_v57, %v15093_v6  ;;  %v5956_v17 = vld [vmem:[%s28803_s3 + $0x30] sm:$0xff] }
 0x34c   : >> { %22479 = vmatprep.subr.bf16.mxu0 %v22478_v18  ;;  %v14681_v62 = vld [vmem:[%s26598_s21 + $0x22] sm:$0xff]  ;;  %v5957_v15 = vld [vmem:[%s28803_s3 + $0x38] sm:$0xff]  ;;  %v14682_v5 = vld [vmem:[%s26598_s21 + $0x2a] sm:$0xff] }
 0x34d   : >> { %v15095_v55 = vld [vmem:[%s28803_s3 + $0x6b0] sm:$0xff]  ;;  %v15096_v59 = vld [vmem:[%s28803_s3 + $0x6b8] sm:$0xff]  ;;  %v22122_v29 = vpack.c.bf16 %v5957_v15, %v5956_v17  ;;  %v5958_v14 = vld [vmem:[%s28803_s3 + $0x40] sm:$0xff] }
 0x34e   : >> { %22097 = vmatpush3.bf16.msra.mxu1 %v22094_v36  ;;  %v15045_v43 = vld [vmem:[%s26598_s21 + $0xac] sm:$0xff]  ;;  %v15046_v53 = vld [vmem:[%s26598_s21 + $0xb4] sm:$0xff]  ;;  %v22506_v8 = vpack.c.bf16 %v15096_v59, %v15095_v55  ;;  %v15097_v31 = vld [vmem:[%s28803_s3 + $0x6c0] sm:$0xff] }
 0x34f   : >> { %22481 = vmatpush3.bf16.msra.mxu0 %v22478_v18  ;;  %22099 = vmatprep.subr.bf16.mxu1 %v22098_v28  ;;  %v14683_v45 = vld [vmem:[%s26598_s21 + $0x32] sm:$0xff]  ;;  %v5959_v12 = vld [vmem:[%s28803_s3 + $0x48] sm:$0xff]  ;;  %v14684_v2 = vld [vmem:[%s26598_s21 + $0x3a] sm:$0xff] }
 0x350   : >> { %22483 = vmatprep.subr.bf16.mxu0 %v22482_v40  ;;  %v15098_v37 = vld [vmem:[%s28803_s3 + $0x6c8] sm:$0xff]  ;;  %v15047_v38 = vld [vmem:[%s26598_s21 + $0xbc] sm:$0xff]  ;;  %v22126_v24 = vpack.c.bf16 %v5959_v12, %v5958_v14  ;;  %v5960_v0 = vld [vmem:[%s28803_s3 + $0x50] sm:$0xff] }
 0x351   : >> { %v14685_v7 = vld [vmem:[%s26598_s21 + $0x42] sm:$0xff]  ;;  %v22510_v18 = vpack.c.bf16 %v15098_v37, %v15097_v31  ;;  %v5961_v26 = vld [vmem:[%s28803_s3 + $0x58] sm:$0xff]  ;;  %v14686_v25 = vld [vmem:[%s26598_s21 + $0x4a] sm:$0xff] }
 0x352   : >> { %22101 = vmatpush3.bf16.msra.mxu1 %v22098_v28  ;;  %v15048_v36 = vld [vmem:[%s26598_s21 + $0xc4] sm:$0xff]  ;;  %v15099_v39 = vld [vmem:[%s28803_s3 + $0x6d0] sm:$0xff]  ;;  %v15100_v28 = vld [vmem:[%s28803_s3 + $0x6d8] sm:$0xff]  ;;  %v22130_v20 = vpack.c.bf16 %v5961_v26, %v5960_v0 }
 0x353   : >> { %22485 = vmatpush3.bf16.msra.mxu0 %v22482_v40  ;;  %22103 = vmatprep.subr.bf16.mxu1 %v22102_v11  ;;  %v15049_v40 = vld [vmem:[%s26598_s21 + $0xcc] sm:$0xff]  ;;  %v15050_v10 = vld [vmem:[%s26598_s21 + $0xd4] sm:$0xff]  ;;  %v22514_v3 = vpack.c.bf16 %v15100_v28, %v15099_v39  ;;  %v15101_v30 = vld [vmem:[%s28803_s3 + $0x6e0] sm:$0xff] }
 0x354   : >> { %22487 = vmatprep.subr.bf16.mxu0 %v22486_v52  ;;  %v14687_v33 = vld [vmem:[%s26598_s21 + $0x52] sm:$0xff]  ;;  %v14688_v13 = vld [vmem:[%s26598_s21 + $0x5a] sm:$0xff]  ;;  %v15102_v41 = vld [vmem:[%s28803_s3 + $0x6e8] sm:$0xff] }
 0x355   : >> { %v15051_v44 = vld [vmem:[%s26598_s21 + $0xdc] sm:$0xff]  ;;  %v15052_v61 = vld [vmem:[%s26598_s21 + $0xe4] sm:$0xff]  ;;  %v22518_v49 = vpack.c.bf16 %v15102_v41, %v15101_v30  ;;  %v5964_v48 = vld [vmem:[%s28803_s3 + $0x70] sm:$0xff] }
 0x356   : >> { %22105 = vmatpush3.bf16.msra.mxu1 %v22102_v11  ;;  %v5962_v11 = vld [vmem:[%s28803_s3 + $0x60] sm:$0xff]  ;;  %v5965_v50 = vld [vmem:[%s28803_s3 + $0x78] sm:$0xff]  ;;  %v15053_v32 = vld [vmem:[%s26598_s21 + $0xec] sm:$0xff] }
 0x357   : >> { %22489 = vmatpush3.bf16.msra.mxu0 %v22486_v52  ;;  %22107 = vmatprep.subr.bf16.mxu1 %v22106_v19  ;;  %v5963_v52 = vld [vmem:[%s28803_s3 + $0x68] sm:$0xff]  ;;  %v15104_v34 = vld [vmem:[%s28803_s3 + $0x6f8] sm:$0xff]  ;;  %v22138_v23 = vpack.c.bf16 %v5965_v50, %v5964_v48 }
 0x358   : >> { %22491 = vmatprep.subr.bf16.mxu0 %v22490_v16  ;;  %v15054_v27 = vld [vmem:[%s26598_s21 + $0xf4] sm:$0xff]  ;;  %v15123_v9 = vld [vmem:[%s28803_s3 + $0x708] sm:$0xff]  ;;  %v15055_v22 = vld [vmem:[%s26598_s21 + $0xfc] sm:$0xff] }
 0x359   : >> { %v15073_v57 = vld [vmem:[%s26598_s21 + $0x86] sm:$0xff]  ;;  %v15125_v17 = vld [vmem:[%s28803_s3 + $0x718] sm:$0xff]  ;;  %v15074_v15 = vld [vmem:[%s26598_s21 + $0x8e] sm:$0xff] }
 0x35a   : >> { %22109 = vmatpush3.bf16.msra.mxu1 %v22106_v19  ;;  %v14689_v19 = vld [vmem:[%s26598_s21 + $0x62] sm:$0xff]  ;;  %v15075_v59 = vld [vmem:[%s26598_s21 + $0x96] sm:$0xff]  ;;  %v15078_v26 = vld [vmem:[%s26598_s21 + $0xae] sm:$0xff] }
 0x35b   : >> { %22493 = vmatpush3.bf16.msra.mxu0 %v22490_v16  ;;  %22111 = vmatprep.subr.bf16.mxu1 %v22110_v46  ;;  %v22134_v16 = vpack.c.bf16 %v5963_v52, %v5962_v11  ;;  %v15127_v14 = vld [vmem:[%s28803_s3 + $0x728] sm:$0xff]  ;;  %v15076_v12 = vld [vmem:[%s26598_s21 + $0x9e] sm:$0xff]  ;;  %v15079_v28 = vld [vmem:[%s26598_s21 + $0xb6] sm:$0xff] }
 0x35c   : >> { %22495 = vmatprep.subr.bf16.mxu0 %v22494_v47  ;;  %v15077_v37 = vld [vmem:[%s26598_s21 + $0xa6] sm:$0xff]  ;;  %v15129_v0 = vld [vmem:[%s28803_s3 + $0x738] sm:$0xff]  ;;  %v15082_v50 = vld [vmem:[%s26598_s21 + $0xce] sm:$0xff] }
 0x35d   : >> { %18966 = vmatmul.mubr.f32.vlgmr.msra.gmra.mrb[0].mxu1 %v14678_v21  ;;  %v14691_v21 = vld [vmem:[%s26598_s21 + $0x72] sm:$0xff]  ;;  %v15131_v11 = vld [vmem:[%s28803_s3 + $0x748] sm:$0xff]  ;;  %v15080_v52 = vld [vmem:[%s26598_s21 + $0xbe] sm:$0xff] }
 0x35e   : >> { %19638 = vmatmul.mubr.f32.vlgmr.msra.gmra.mrb[0].mxu0 %v15041_v56  ;;  %22113 = vmatpush3.bf16.msra.mxu1 %v22110_v46  ;;  %v14690_v46 = vld [vmem:[%s26598_s21 + $0x6a] sm:$0xff]  ;;  %v15133_v48 = vld [vmem:[%s28803_s3 + $0x758] sm:$0xff] }
 0x35f   : >> { %22497 = vmatpush3.bf16.msra.mxu0 %v22494_v47  ;;  %18968 = vmatprep.mubr.f32.mxu1 %v14679_v35  ;;  %v15103_v47 = vld [vmem:[%s28803_s3 + $0x6f0] sm:$0xff]  ;;  %v14726_v35 = vld [vmem:[%s28803_s3 + $0x100] sm:$0xff] }
 0x360   : >> { %19640 = vmatprep.mubr.f32.mxu0 %v15042_v54  ;;  %22115 = vmatprep.subr.bf16.mxu1 %v22114_v1  ;;  %v22522_v56 = vpack.c.bf16 %v15104_v34, %v15103_v47  ;;  %v14692_v54 = vld [vmem:[%s26598_s21 + $0x7a] sm:$0xff]  ;;  %v15081_v41 = vld [vmem:[%s26598_s21 + $0xc6] sm:$0xff] }
 0x361   : >> { %18969 = vmatmul.mubr.f32.gmra.mrb[2].mxu1 %v14680_v51  ;;  %22499 = vmatprep.subr.bf16.mxu0 %v22498_v42  ;;  %v5934_v51 = vld [vmem:[%s26598_s21] sm:$0xff]  ;;  %v15083_v34 = vld [vmem:[%s26598_s21 + $0xd6] sm:$0xff] }
 0x362   : >> { %19641 = vmatmul.mubr.f32.gmra.mrb[2].mxu0 %v15043_v60  ;;  %22117 = vmatpush3.bf16.msra.mxu1 %v22114_v1  ;;  %v14727_v1 = vld [vmem:[%s28803_s3 + $0x108] sm:$0xff] }
 0x363   : >> { %22501 = vmatpush3.bf16.msra.mxu0 %v22498_v42  ;;  %18971 = vmatprep.mubr.f32.mxu1 %v14681_v62  ;;  %v15122_v42 = vld [vmem:[%s28803_s3 + $0x700] sm:$0xff]  ;;  %v22142_v6 = vpack.c.bf16 %v14727_v1, %v14726_v35  ;;  %v14728_v62 = vld [vmem:[%s28803_s3 + $0x110] sm:$0xff]  ;;  %v15135_v35 = vld [vmem:[%s28803_s3 + $0x768] sm:$0xff] }
 0x364   : >> { %19643 = vmatprep.mubr.f32.mxu0 %v15044_v4  ;;  %22119 = vmatprep.subr.bf16.mxu1 %v22118_v58  ;;  %v22526_v60 = vpack.c.bf16 %v15123_v9, %v15122_v42  ;;  %v26791_v4 = vld [vmem:[%s26598_s21 + $0x8] sm:$0xff]  ;;  %v15084_v1 = vld [vmem:[%s26598_s21 + $0xde] sm:$0xff] }
 0x365   : >> { %18972 = vmatmul.mubr.f32.gmra.mrb[4].mxu1 %v14682_v5  ;;  %22503 = vmatprep.subr.bf16.mxu0 %v22502_v63  ;;  %v26801_v5 = vld [vmem:[%s26598_s21 + $0x10] sm:$0xff]  ;;  %v15085_v9 = vld [vmem:[%s26598_s21 + $0xe6] sm:$0xff] }
 0x366   : >> { %19644 = vmatmul.mubr.f32.gmra.mrb[4].mxu0 %v15045_v43  ;;  %22121 = vmatpush3.bf16.msra.mxu1 %v22118_v58  ;;  %v14729_v58 = vld [vmem:[%s28803_s3 + $0x118] sm:$0xff] }
 0x367   : >> { %22505 = vmatpush3.bf16.msra.mxu0 %v22502_v63  ;;  %18974 = vmatprep.mubr.f32.mxu1 %v14683_v45  ;;  %v15124_v63 = vld [vmem:[%s28803_s3 + $0x710] sm:$0xff]  ;;  %v22146_v55 = vpack.c.bf16 %v14729_v58, %v14728_v62  ;;  %v14730_v45 = vld [vmem:[%s28803_s3 + $0x120] sm:$0xff]  ;;  %v15137_v62 = vld [vmem:[%s28803_s3 + $0x778] sm:$0xff] }
 0x368   : >> { %19646 = vmatprep.mubr.f32.mxu0 %v15046_v53  ;;  %22123 = vmatprep.subr.bf16.mxu1 %v22122_v29  ;;  %v22530_v43 = vpack.c.bf16 %v15125_v17, %v15124_v63  ;;  %v26812_v53 = vld [vmem:[%s26598_s21 + $0x18] sm:$0xff]  ;;  %v15086_v58 = vld [vmem:[%s26598_s21 + $0xee] sm:$0xff] }
 0x369   : >> { %18975 = vmatmul.mubr.f32.gmra.mrb[6].mxu1 %v14684_v2  ;;  %22507 = vmatprep.subr.bf16.mxu0 %v22506_v8  ;;  %v26823_v2 = vld [vmem:[%s26598_s21 + $0x20] sm:$0xff]  ;;  %v26933_v63 = vld [vmem:[%s26598_s21 + $0x70] sm:$0xff] }
 0x36a   : >> { %19647 = vmatmul.mubr.f32.gmra.mrb[6].mxu0 %v15047_v38  ;;  %22125 = vmatpush3.bf16.msra.mxu1 %v22122_v29  ;;  %v14731_v29 = vld [vmem:[%s28803_s3 + $0x128] sm:$0xff] }
 0x36b   : >> { %22509 = vmatpush3.bf16.msra.mxu0 %v22506_v8  ;;  %18977 = vmatprep.mubr.f32.mxu1 %v14685_v7  ;;  %v15126_v8 = vld [vmem:[%s28803_s3 + $0x720] sm:$0xff]  ;;  %v22150_v31 = vpack.c.bf16 %v14731_v29, %v14730_v45  ;;  %v14732_v7 = vld [vmem:[%s28803_s3 + $0x130] sm:$0xff]  ;;  %v26944_v45 = vld [vmem:[%s26598_s21 + $0x78] sm:$0xff] }
 0x36c   : >> { %19649 = vmatprep.mubr.f32.mxu0 %v15048_v36  ;;  %22127 = vmatprep.subr.bf16.mxu1 %v22126_v24  ;;  %v22534_v38 = vpack.c.bf16 %v15127_v14, %v15126_v8  ;;  %v26834_v36 = vld [vmem:[%s26598_s21 + $0x28] sm:$0xff]  ;;  %v15155_v29 = vld [vmem:[%s28803_s3 + $0x780] sm:$0xff] }
 0x36d   : >> { %18978 = vmatmul.mubr.f32.gmra.mrb[8].mxu1 %v14686_v25  ;;  %22511 = vmatprep.subr.bf16.mxu0 %v22510_v18  ;;  %v26845_v25 = vld [vmem:[%s26598_s21 + $0x30] sm:$0xff]  ;;  %v15156_v8 = vld [vmem:[%s28803_s3 + $0x788] sm:$0xff]  ;;  %v15088_v14 = vld [vmem:[%s26598_s21 + $0xfe] sm:$0xff] }
 0x36e   : >> { %19650 = vmatmul.mubr.f32.gmra.mrb[8].mxu0 %v15049_v40  ;;  %22129 = vmatpush3.bf16.msra.mxu1 %v22126_v24  ;;  %v14733_v24 = vld [vmem:[%s28803_s3 + $0x138] sm:$0xff] }
 0x36f   : >> { %22513 = vmatpush3.bf16.msra.mxu0 %v22510_v18  ;;  %18980 = vmatprep.mubr.f32.mxu1 %v14687_v33  ;;  %v15128_v18 = vld [vmem:[%s28803_s3 + $0x730] sm:$0xff]  ;;  %v22154_v39 = vpack.c.bf16 %v14733_v24, %v14732_v7  ;;  %v14734_v33 = vld [vmem:[%s28803_s3 + $0x140] sm:$0xff]  ;;  %v14762_v24 = vld [vmem:[%s28803_s3 + $0x198] sm:$0xff] }
 0x370   : >> { %19652 = vmatprep.mubr.f32.mxu0 %v15050_v10  ;;  %22131 = vmatprep.subr.bf16.mxu1 %v22130_v20  ;;  %v22538_v40 = vpack.c.bf16 %v15129_v0, %v15128_v18  ;;  %v26856_v10 = vld [vmem:[%s26598_s21 + $0x38] sm:$0xff]  ;;  %v14761_v7 = vld [vmem:[%s28803_s3 + $0x190] sm:$0xff] }
 0x371   : >> { %18981 = vmatmul.mubr.f32.gmra.mrb[10].mxu1 %v14688_v13  ;;  %22515 = vmatprep.subr.bf16.mxu0 %v22514_v3  ;;  %v26867_v13 = vld [vmem:[%s26598_s21 + $0x40] sm:$0xff]  ;;  %v14711_v18 = vld [vmem:[%s26598_s21 + $0xc] sm:$0xff] }
 0x372   : >> { %19653 = vmatmul.mubr.f32.gmra.mrb[10].mxu0 %v15051_v44  ;;  %22133 = vmatpush3.bf16.msra.mxu1 %v22130_v20  ;;  %v14735_v20 = vld [vmem:[%s28803_s3 + $0x148] sm:$0xff]  ;;  %v15157_v0 = vld [vmem:[%s28803_s3 + $0x790] sm:$0xff] }
 0x373   : >> { %22517 = vmatpush3.bf16.msra.mxu0 %v22514_v3  ;;  %18983 = vmatprep.mubr.f32.mxu1 %v14689_v19  ;;  %v15130_v3 = vld [vmem:[%s28803_s3 + $0x740] sm:$0xff]  ;;  %v22158_v30 = vpack.c.bf16 %v14735_v20, %v14734_v33  ;;  %v14736_v19 = vld [vmem:[%s28803_s3 + $0x150] sm:$0xff]  ;;  %v26978_v33 = vld [vmem:[%s26598_s21 + $0x98] sm:$0xff] }
 0x374   : >> { %19655 = vmatprep.mubr.f32.mxu0 %v15052_v61  ;;  %22135 = vmatprep.subr.bf16.mxu1 %v22134_v16  ;;  %v22542_v44 = vpack.c.bf16 %v15131_v11, %v15130_v3  ;;  %v26878_v61 = vld [vmem:[%s26598_s21 + $0x48] sm:$0xff]  ;;  %v14763_v3 = vld [vmem:[%s28803_s3 + $0x1a0] sm:$0xff] }
 0x375   : >> { %18984 = vmatmul.mubr.f32.gmra.mrb[12].mxu1 %v14690_v46  ;;  %22519 = vmatprep.subr.bf16.mxu0 %v22518_v49  ;;  %v26889_v46 = vld [vmem:[%s26598_s21 + $0x50] sm:$0xff]  ;;  %v14764_v11 = vld [vmem:[%s28803_s3 + $0x1a8] sm:$0xff] }
 0x376   : >> { %19656 = vmatmul.mubr.f32.gmra.mrb[12].mxu0 %v15053_v32  ;;  %22137 = vmatpush3.bf16.msra.mxu1 %v22134_v16  ;;  %v14737_v16 = vld [vmem:[%s28803_s3 + $0x158] sm:$0xff] }
 0x377   : >> { %22521 = vmatpush3.bf16.msra.mxu0 %v22518_v49  ;;  %18986 = vmatprep.mubr.f32.mxu1 %v14691_v21  ;;  %v15132_v49 = vld [vmem:[%s28803_s3 + $0x750] sm:$0xff]  ;;  %v22162_v47 = vpack.c.bf16 %v14737_v16, %v14736_v19  ;;  %v14738_v21 = vld [vmem:[%s28803_s3 + $0x160] sm:$0xff]  ;;  %v22182_v16 = vpack.c.bf16 %v14764_v11, %v14763_v3 }
 0x378   : >> { %19658 = vmatprep.mubr.f32.mxu0 %v15054_v27  ;;  %22139 = vmatprep.subr.bf16.mxu1 %v22138_v23  ;;  %v22546_v32 = vpack.c.bf16 %v15133_v48, %v15132_v49  ;;  %v26900_v27 = vld [vmem:[%s26598_s21 + $0x58] sm:$0xff]  ;;  %v14714_v19 = vld [vmem:[%s26598_s21 + $0x24] sm:$0xff] }
 0x379   : >> { %18987 = vmatmul.mubr.f32.gmra.mrb[14].mxu1 %v14692_v54  ;;  %22523 = vmatprep.subr.bf16.mxu0 %v22522_v56  ;;  %v26911_v54 = vld [vmem:[%s26598_s21 + $0x60] sm:$0xff]  ;;  %v27000_v49 = vld [vmem:[%s26598_s21 + $0xa8] sm:$0xff] }
 0x37a   : >> { %19659 = vmatmul.mubr.f32.gmra.mrb[14].mxu0 %v15055_v22  ;;  %22141 = vmatpush3.bf16.msra.mxu1 %v22138_v23  ;;  %v14739_v23 = vld [vmem:[%s28803_s3 + $0x168] sm:$0xff] }
 0x37b   : >> { %22525 = vmatpush3.bf16.msra.mxu0 %v22522_v56  ;;  %19021 = vmatprep.mubr.f32.mxu1 %v5934_v51  ;;  %v15134_v56 = vld [vmem:[%s28803_s3 + $0x760] sm:$0xff]  ;;  %v22166_v42 = vpack.c.bf16 %v14739_v23, %v14738_v21  ;;  %v14740_v51 = vld [vmem:[%s28803_s3 + $0x170] sm:$0xff]  ;;  %v15162_v21 = vld [vmem:[%s28803_s3 + $0x7b8] sm:$0xff] }
 0x37c   : >> { %19693 = vmatprep.mubr.f32.mxu0 %v15073_v57  ;;  %22143 = vmatprep.subr.bf16.mxu1 %v22142_v6  ;;  %v22550_v22 = vpack.c.bf16 %v15135_v35, %v15134_v56  ;;  %v26922_v57 = vld [vmem:[%s26598_s21 + $0x68] sm:$0xff]  ;;  %v27017_v23 = vld [vmem:[%s26598_s21 + $0xb0] sm:$0xff] }
 0x37d   : >> { %19022 = vmatmul.mubr.f32.vlgmr.msra.gmra.mrb[0].mxu1 %v26791_v4  ;;  %22527 = vmatprep.subr.bf16.mxu0 %v22526_v60  ;;  %v14716_v56 = vld [vmem:[%s26598_s21 + $0x34] sm:$0xff]  ;;  %v14722_v3 = vld [vmem:[%s26598_s21 + $0x64] sm:$0xff] }
 0x37e   : >> { %19694 = vmatmul.mubr.f32.vlgmr.msra.gmra.mrb[0].mxu0 %v15074_v15  ;;  %22145 = vmatpush3.bf16.msra.mxu1 %v22142_v6  ;;  %v14741_v6 = vld [vmem:[%s28803_s3 + $0x178] sm:$0xff] }
 0x37f   : >> { %22529 = vmatpush3.bf16.msra.mxu0 %v22526_v60  ;;  %19024 = vmatprep.mubr.f32.mxu1 %v26801_v5  ;;  %v15136_v60 = vld [vmem:[%s28803_s3 + $0x770] sm:$0xff]  ;;  %v22170_v17 = vpack.c.bf16 %v14741_v6, %v14740_v51  ;;  %v14717_v51 = vld [vmem:[%s26598_s21 + $0x3c] sm:$0xff] }
 0x380   : >> { %19696 = vmatprep.mubr.f32.mxu0 %v15075_v59  ;;  %22147 = vmatprep.subr.bf16.mxu1 %v22146_v55  ;;  %v15087_v15 = vld [vmem:[%s26598_s21 + $0xf6] sm:$0xff]  ;;  %v14759_v59 = vld [vmem:[%s28803_s3 + $0x180] sm:$0xff] }
 0x381   : >> { %19025 = vmatmul.mubr.f32.gmra.mrb[2].mxu1 %v26812_v53  ;;  %22531 = vmatprep.subr.bf16.mxu0 %v22530_v43  ;;  %v15163_v6 = vld [vmem:[%s28803_s3 + $0x7c0] sm:$0xff] }
 0x382   : >> { %19697 = vmatmul.mubr.f32.gmra.mrb[2].mxu0 %v15076_v12  ;;  %22149 = vmatpush3.bf16.msra.mxu1 %v22146_v55  ;;  %v22554_v55 = vpack.c.bf16 %v15137_v62, %v15136_v60  ;;  %v14710_v12 = vld [vmem:[%s26598_s21 + $0x4] sm:$0xff] }
 0x383   : >> { %22533 = vmatpush3.bf16.msra.mxu0 %v22530_v43  ;;  %19027 = vmatprep.mubr.f32.mxu1 %v26823_v2  ;;  %v14760_v43 = vld [vmem:[%s28803_s3 + $0x188] sm:$0xff]  ;;  %v27039_v62 = vld [vmem:[%s26598_s21 + $0xc0] sm:$0xff] }
 0x384   : >> { %19699 = vmatprep.mubr.f32.mxu0 %v15077_v37  ;;  %22151 = vmatprep.subr.bf16.mxu1 %v22150_v31  ;;  %v26957_v37 = vld [vmem:[%s26598_s21 + $0x88] sm:$0xff] }
 0x385   : >> { %19028 = vmatmul.mubr.f32.gmra.mrb[4].mxu1 %v26834_v36  ;;  %22535 = vmatprep.subr.bf16.mxu0 %v22534_v38  ;;  %v15164_v60 = vld [vmem:[%s28803_s3 + $0x7c8] sm:$0xff] }
 0x386   : >> { %19700 = vmatmul.mubr.f32.gmra.mrb[4].mxu0 %v15078_v26  ;;  %22153 = vmatpush3.bf16.msra.mxu1 %v22150_v31  ;;  %v22174_v31 = vpack.c.bf16 %v14760_v43, %v14759_v59  ;;  %v15158_v26 = vld [vmem:[%s28803_s3 + $0x798] sm:$0xff]  ;;  %v14769_v59 = vld [vmem:[%s28803_s3 + $0x1d0] sm:$0xff] }
 0x387   : >> { %22537 = vmatpush3.bf16.msra.mxu0 %v22534_v38  ;;  %19030 = vmatprep.mubr.f32.mxu1 %v26845_v25  ;;  %v22558_v38 = vpack.c.bf16 %v15156_v8, %v15155_v29  ;;  %v22562_v20 = vpack.c.bf16 %v15158_v26, %v15157_v0  ;;  %v14770_v43 = vld [vmem:[%s28803_s3 + $0x1d8] sm:$0xff]  ;;  %v14719_v29 = vld [vmem:[%s26598_s21 + $0x4c] sm:$0xff] }
 0x388   : >> { %19702 = vmatprep.mubr.f32.mxu0 %v15079_v28  ;;  %22155 = vmatprep.subr.bf16.mxu1 %v22154_v39  ;;  %v14712_v28 = vld [vmem:[%s26598_s21 + $0x14] sm:$0xff]  ;;  %v14772_v0 = vld [vmem:[%s28803_s3 + $0x1e8] sm:$0xff]  ;;  %v14721_v26 = vld [vmem:[%s26598_s21 + $0x5c] sm:$0xff] }
 0x389   : >> { %19031 = vmatmul.mubr.f32.gmra.mrb[6].mxu1 %v26856_v10  ;;  %22539 = vmatprep.subr.bf16.mxu0 %v22538_v40  ;;  %v15165_v8 = vld [vmem:[%s28803_s3 + $0x7d0] sm:$0xff] }
 0x38a   : >> { %19703 = vmatmul.mubr.f32.gmra.mrb[6].mxu0 %v15080_v52  ;;  %22157 = vmatpush3.bf16.msra.mxu1 %v22154_v39  ;;  %v26973_v39 = vld [vmem:[%s26598_s21 + $0x90] sm:$0xff]  ;;  %v14713_v52 = vld [vmem:[%s26598_s21 + $0x1c] sm:$0xff] }
 0x38b   : >> { %22541 = vmatpush3.bf16.msra.mxu0 %v22538_v40  ;;  %19033 = vmatprep.mubr.f32.mxu1 %v26867_v13  ;;  %v22178_v40 = vpack.c.bf16 %v14762_v24, %v14761_v7  ;;  %v27066_v7 = vld [vmem:[%s26598_s21 + $0xd8] sm:$0xff] }
 0x38c   : >> { %19705 = vmatprep.mubr.f32.mxu0 %v15081_v41  ;;  %22159 = vmatprep.subr.bf16.mxu1 %v22158_v30  ;;  %v15160_v41 = vld [vmem:[%s28803_s3 + $0x7a8] sm:$0xff] }
 0x38d   : >> { %19034 = vmatmul.mubr.f32.gmra.mrb[8].mxu1 %v26878_v61  ;;  %22543 = vmatprep.subr.bf16.mxu0 %v22542_v44 }
 0x38e   : >> { %19706 = vmatmul.mubr.f32.gmra.mrb[8].mxu0 %v15082_v50  ;;  %22161 = vmatpush3.bf16.msra.mxu1 %v22158_v30  ;;  %v15159_v30 = vld [vmem:[%s28803_s3 + $0x7a0] sm:$0xff]  ;;  %v14765_v50 = vld [vmem:[%s28803_s3 + $0x1b0] sm:$0xff] }
 0x38f   : >> { %22545 = vmatpush3.bf16.msra.mxu0 %v22542_v44  ;;  %19036 = vmatprep.mubr.f32.mxu1 %v26889_v46  ;;  %v26995_v44 = vld [vmem:[%s26598_s21 + $0xa0] sm:$0xff]  ;;  %v22566_v48 = vpack.c.bf16 %v15160_v41, %v15159_v30  ;;  %v14773_v41 = vld [vmem:[%s28803_s3 + $0x1f0] sm:$0xff] }
 0x390   : >> { %19708 = vmatprep.mubr.f32.mxu0 %v15083_v34  ;;  %22163 = vmatprep.subr.bf16.mxu1 %v22162_v47  ;;  %v14715_v34 = vld [vmem:[%s26598_s21 + $0x2c] sm:$0xff] }
 0x391   : >> { %19037 = vmatmul.mubr.f32.gmra.mrb[10].mxu1 %v26900_v27  ;;  %22547 = vmatprep.subr.bf16.mxu0 %v22546_v32 }
 0x392   : >> { %19709 = vmatmul.mubr.f32.gmra.mrb[10].mxu0 %v15084_v1  ;;  %22165 = vmatpush3.bf16.msra.mxu1 %v22162_v47  ;;  %v14766_v47 = vld [vmem:[%s28803_s3 + $0x1b8] sm:$0xff] }
 0x393   : >> { %22549 = vmatpush3.bf16.msra.mxu0 %v22546_v32  ;;  %19039 = vmatprep.mubr.f32.mxu1 %v26911_v54  ;;  %v15161_v32 = vld [vmem:[%s28803_s3 + $0x7b0] sm:$0xff]  ;;  %v22186_v35 = vpack.c.bf16 %v14766_v47, %v14765_v50  ;;  %v27022_v1 = vld [vmem:[%s26598_s21 + $0xb8] sm:$0xff] }
 0x394   : >> { %19711 = vmatprep.mubr.f32.mxu0 %v15085_v9  ;;  %22167 = vmatprep.subr.bf16.mxu1 %v22166_v42  ;;  %v14767_v9 = vld [vmem:[%s28803_s3 + $0x1c0] sm:$0xff]  ;;  %v15170_v50 = vld [vmem:[%s28803_s3 + $0x7f8] sm:$0xff]  ;;  %v27105_v47 = vld [vmem:[%s26598_s21 + $0xf0] sm:$0xff] }
 0x395   : >> { %19040 = vmatmul.mubr.f32.gmra.mrb[12].mxu1 %v26922_v57  ;;  %22551 = vmatprep.subr.bf16.mxu0 %v22550_v22 }
 0x396   : >> { %19712 = vmatmul.mubr.f32.gmra.mrb[12].mxu0 %v15086_v58  ;;  %22169 = vmatpush3.bf16.msra.mxu1 %v22166_v42  ;;  %v22570_v42 = vpack.c.bf16 %v15162_v21, %v15161_v32  ;;  %v14718_v58 = vld [vmem:[%s26598_s21 + $0x44] sm:$0xff]  ;;  %v27110_v21 = vld [vmem:[%s26598_s21 + $0xf8] sm:$0xff] }
 0x397   : >> { %22553 = vmatpush3.bf16.msra.mxu0 %v22550_v22  ;;  %19042 = vmatprep.mubr.f32.mxu1 %v26933_v63  ;;  %v14768_v22 = vld [vmem:[%s28803_s3 + $0x1c8] sm:$0xff] }
 0x398   : >> { %19714 = vmatprep.mubr.f32.mxu0 %v15087_v15  ;;  %22171 = vmatprep.subr.bf16.mxu1 %v22170_v17  ;;  %v27044_v15 = vld [vmem:[%s26598_s21 + $0xc8] sm:$0xff] }
 0x399   : >> { %19043 = vmatmul.mubr.f32.gmra.mrb[14].mxu1 %v26944_v45  ;;  %22555 = vmatprep.subr.bf16.mxu0 %v22554_v55 }
 0x39a   : >> { %19715 = vmatmul.mubr.f32.gmra.mrb[14].mxu0 %v15088_v14  ;;  %22173 = vmatpush3.bf16.msra.mxu1 %v22170_v17  ;;  %v22190_v17 = vpack.c.bf16 %v14768_v22, %v14767_v9  ;;  %v15166_v14 = vld [vmem:[%s28803_s3 + $0x7d8] sm:$0xff]  ;;  %v15188_v22 = vld [vmem:[%s28803_s3 + $0x800] sm:$0xff] }
 0x39b   : >> { %22557 = vmatpush3.bf16.msra.mxu0 %v22554_v55  ;;  %19077 = vmatprep.mubr.f32.mxu1 %v14710_v12  ;;  %v22574_v55 = vpack.c.bf16 %v15164_v60, %v15163_v6  ;;  %v27061_v12 = vld [vmem:[%s26598_s21 + $0xd0] sm:$0xff]  ;;  %v22578_v24 = vpack.c.bf16 %v15166_v14, %v15165_v8  ;;  %v14725_v9 = vld [vmem:[%s26598_s21 + $0x7c] sm:$0xff]  ;;  %v14743_v60 = vld [vmem:[%s26598_s21 + $0x6] sm:$0xff] }
 0x39c   : >> { %19749 = vmatprep.mubr.f32.mxu0 %v26957_v37  ;;  %22175 = vmatprep.subr.bf16.mxu1 %v22174_v31  ;;  %v27127_v6 = vld [vmem:[%s26598_s21 + $0x100] sm:$0xff]  ;;  %v15191_v8 = vld [vmem:[%s28803_s3 + $0x818] sm:$0xff] }
 0x39d   : >> { %19078 = vmatmul.mubr.f32.vlgmr.msra.gmra.mrb[0].mxu1 %v14711_v18  ;;  %22559 = vmatprep.subr.bf16.mxu0 %v22558_v38  ;;  %v14771_v18 = vld [vmem:[%s28803_s3 + $0x1e0] sm:$0xff]  ;;  %v14745_v14 = vld [vmem:[%s26598_s21 + $0x16] sm:$0xff] }
 0x39e   : >> { %19750 = vmatmul.mubr.f32.vlgmr.msra.gmra.mrb[0].mxu0 %v26973_v39  ;;  %22177 = vmatpush3.bf16.msra.mxu1 %v22174_v31  ;;  %v14720_v31 = vld [vmem:[%s26598_s21 + $0x54] sm:$0xff]  ;;  %v22198_v11 = vpack.c.bf16 %v14772_v0, %v14771_v18  ;;  %v14797_v18 = vld [vmem:[%s28803_s3 + $0x228] sm:$0xff]  ;;  %v14746_v0 = vld [vmem:[%s26598_s21 + $0x1e] sm:$0xff] }
 0x39f   : >> { %22561 = vmatpush3.bf16.msra.mxu0 %v22558_v38  ;;  %19080 = vmatprep.mubr.f32.mxu1 %v14712_v28  ;;  %v22194_v38 = vpack.c.bf16 %v14770_v43, %v14769_v59  ;;  %v15167_v28 = vld [vmem:[%s28803_s3 + $0x7e0] sm:$0xff]  ;;  %v14795_v59 = vld [vmem:[%s28803_s3 + $0x218] sm:$0xff]  ;;  %v14744_v43 = vld [vmem:[%s26598_s21 + $0xe] sm:$0xff] }
 0x3a0   : >> { %19752 = vmatprep.mubr.f32.mxu0 %v26978_v33  ;;  %22179 = vmatprep.subr.bf16.mxu1 %v22178_v40 }
 0x3a1   : >> { %19081 = vmatmul.mubr.f32.gmra.mrb[2].mxu1 %v14713_v52  ;;  %22563 = vmatprep.subr.bf16.mxu0 %v22562_v20  ;;  %v27088_v52 = vld [vmem:[%s26598_s21 + $0xe8] sm:$0xff] }
 0x3a2   : >> { %19753 = vmatmul.mubr.f32.gmra.mrb[2].mxu0 %v26995_v44  ;;  %22181 = vmatpush3.bf16.msra.mxu1 %v22178_v40  ;;  %v15168_v40 = vld [vmem:[%s28803_s3 + $0x7e8] sm:$0xff] }
 0x3a3   : >> { %22565 = vmatpush3.bf16.msra.mxu0 %v22562_v20  ;;  %19083 = vmatprep.mubr.f32.mxu1 %v14714_v19  ;;  %v27083_v20 = vld [vmem:[%s26598_s21 + $0xe0] sm:$0xff]  ;;  %v22582_v30 = vpack.c.bf16 %v15168_v40, %v15167_v28  ;;  %v14774_v19 = vld [vmem:[%s28803_s3 + $0x1f8] sm:$0xff] }
 0x3a4   : >> { %19755 = vmatprep.mubr.f32.mxu0 %v27000_v49  ;;  %22183 = vmatprep.subr.bf16.mxu1 %v22182_v16  ;;  %v22202_v32 = vpack.c.bf16 %v14774_v19, %v14773_v41  ;;  %v14747_v28 = vld [vmem:[%s26598_s21 + $0x26] sm:$0xff]  ;;  %v15195_v41 = vld [vmem:[%s28803_s3 + $0x838] sm:$0xff] }
 0x3a5   : >> { %19084 = vmatmul.mubr.f32.gmra.mrb[4].mxu1 %v14715_v34  ;;  %22567 = vmatprep.subr.bf16.mxu0 %v22566_v48  ;;  %v14724_v34 = vld [vmem:[%s26598_s21 + $0x74] sm:$0xff] }
 0x3a6   : >> { %19756 = vmatmul.mubr.f32.gmra.mrb[4].mxu0 %v27017_v23  ;;  %22185 = vmatpush3.bf16.msra.mxu1 %v22182_v16  ;;  %v14723_v16 = vld [vmem:[%s26598_s21 + $0x6c] sm:$0xff]  ;;  %v14749_v19 = vld [vmem:[%s26598_s21 + $0x36] sm:$0xff] }
 0x3a7   : >> { %22569 = vmatpush3.bf16.msra.mxu0 %v22566_v48  ;;  %19086 = vmatprep.mubr.f32.mxu1 %v14716_v56  ;;  %v15169_v48 = vld [vmem:[%s28803_s3 + $0x7f0] sm:$0xff] }
 0x3a8   : >> { %19758 = vmatprep.mubr.f32.mxu0 %v27022_v1  ;;  %22187 = vmatprep.subr.bf16.mxu1 %v22186_v35  ;;  %v22586_v56 = vpack.c.bf16 %v15170_v50, %v15169_v48  ;;  %v14800_v48 = vld [vmem:[%s28803_s3 + $0x240] sm:$0xff]  ;;  %v14801_v50 = vld [vmem:[%s28803_s3 + $0x248] sm:$0xff] }
 0x3a9   : >> { %19087 = vmatmul.mubr.f32.gmra.mrb[6].mxu1 %v14717_v51  ;;  %22571 = vmatprep.subr.bf16.mxu0 %v22570_v42  ;;  %v15189_v51 = vld [vmem:[%s28803_s3 + $0x808] sm:$0xff] }
 0x3aa   : >> { %19759 = vmatmul.mubr.f32.gmra.mrb[6].mxu0 %v27039_v62  ;;  %22189 = vmatpush3.bf16.msra.mxu1 %v22186_v35  ;;  %v14792_v35 = vld [vmem:[%s28803_s3 + $0x200] sm:$0xff] }
 0x3ab   : >> { %22573 = vmatpush3.bf16.msra.mxu0 %v22570_v42  ;;  %19089 = vmatprep.mubr.f32.mxu1 %v14718_v58  ;;  %v14793_v42 = vld [vmem:[%s28803_s3 + $0x208] sm:$0xff] }
 0x3ac   : >> { %19761 = vmatprep.mubr.f32.mxu0 %v27044_v15  ;;  %22191 = vmatprep.subr.bf16.mxu1 %v22190_v17  ;;  %v22206_v58 = vpack.c.bf16 %v14793_v42, %v14792_v35  ;;  %v22222_v35 = vpack.c.bf16 %v14801_v50, %v14800_v48  ;;  %v14802_v42 = vld [vmem:[%s28803_s3 + $0x250] sm:$0xff]  ;;  %v15222_v48 = vld [vmem:[%s28803_s3 + $0x888] sm:$0xff]  ;;  %v15154_v50 = vld [vmem:[%s26598_s21 + $0x138] sm:$0xff] }
 0x3ad   : >> { %19090 = vmatmul.mubr.f32.gmra.mrb[8].mxu1 %v14719_v29  ;;  %22575 = vmatprep.subr.bf16.mxu0 %v22574_v55  ;;  %v15190_v29 = vld [vmem:[%s28803_s3 + $0x810] sm:$0xff] }
 0x3ae   : >> { %19762 = vmatmul.mubr.f32.gmra.mrb[8].mxu0 %v27061_v12  ;;  %22193 = vmatpush3.bf16.msra.mxu1 %v22190_v17  ;;  %v22590_v17 = vpack.c.bf16 %v15189_v51, %v15188_v22  ;;  %v15198_v22 = vld [vmem:[%s28803_s3 + $0x850] sm:$0xff]  ;;  %v15199_v51 = vld [vmem:[%s28803_s3 + $0x858] sm:$0xff] }
 0x3af   : >> { %22577 = vmatpush3.bf16.msra.mxu0 %v22574_v55  ;;  %19092 = vmatprep.mubr.f32.mxu1 %v14720_v31  ;;  %v14794_v55 = vld [vmem:[%s28803_s3 + $0x210] sm:$0xff] }
 0x3b0   : >> { %19764 = vmatprep.mubr.f32.mxu0 %v27066_v7  ;;  %22195 = vmatprep.subr.bf16.mxu1 %v22194_v38  ;;  %v22210_v31 = vpack.c.bf16 %v14795_v59, %v14794_v55  ;;  %v22610_v55 = vpack.c.bf16 %v15199_v51, %v15198_v22  ;;  %v14804_v59 = vld [vmem:[%s28803_s3 + $0x260] sm:$0xff]  ;;  %v15174_v22 = vld [vmem:[%s26598_s21 + $0xd2] sm:$0xff] }
 0x3b1   : >> { %19093 = vmatmul.mubr.f32.gmra.mrb[10].mxu1 %v14721_v26  ;;  %22579 = vmatprep.subr.bf16.mxu0 %v22578_v24  ;;  %v15193_v26 = vld [vmem:[%s28803_s3 + $0x828] sm:$0xff] }
 0x3b2   : >> { %19765 = vmatmul.mubr.f32.gmra.mrb[10].mxu0 %v27083_v20  ;;  %22197 = vmatpush3.bf16.msra.mxu1 %v22194_v38  ;;  %v22594_v38 = vpack.c.bf16 %v15191_v8, %v15190_v29  ;;  %v15200_v29 = vld [vmem:[%s28803_s3 + $0x860] sm:$0xff]  ;;  %v15201_v8 = vld [vmem:[%s28803_s3 + $0x868] sm:$0xff] }
 0x3b3   : >> { %22581 = vmatpush3.bf16.msra.mxu0 %v22578_v24  ;;  %19095 = vmatprep.mubr.f32.mxu1 %v14722_v3  ;;  %v14796_v24 = vld [vmem:[%s28803_s3 + $0x220] sm:$0xff]  ;;  %v14798_v3 = vld [vmem:[%s28803_s3 + $0x230] sm:$0xff] }
 0x3b4   : >> { %19767 = vmatprep.mubr.f32.mxu0 %v27088_v52  ;;  %22199 = vmatprep.subr.bf16.mxu1 %v22198_v11  ;;  %v22214_v40 = vpack.c.bf16 %v14797_v18, %v14796_v24  ;;  %v15151_v24 = vld [vmem:[%s26598_s21 + $0x120] sm:$0xff]  ;;  %v22614_v18 = vpack.c.bf16 %v15201_v8, %v15200_v29  ;;  %v15177_v29 = vld [vmem:[%s26598_s21 + $0xea] sm:$0xff] }
 0x3b5   : >> { %19096 = vmatmul.mubr.f32.gmra.mrb[12].mxu1 %v14723_v16  ;;  %22583 = vmatprep.subr.bf16.mxu0 %v22582_v30 }
 0x3b6   : >> { %19768 = vmatmul.mubr.f32.gmra.mrb[12].mxu0 %v27105_v47  ;;  %22201 = vmatpush3.bf16.msra.mxu1 %v22198_v11  ;;  %v14799_v11 = vld [vmem:[%s28803_s3 + $0x238] sm:$0xff] }
 0x3b7   : >> { %22585 = vmatpush3.bf16.msra.mxu0 %v22582_v30  ;;  %19098 = vmatprep.mubr.f32.mxu1 %v14724_v34  ;;  %v14748_v30 = vld [vmem:[%s26598_s21 + $0x2e] sm:$0xff]  ;;  %v22218_v16 = vpack.c.bf16 %v14799_v11, %v14798_v3  ;;  %v14750_v34 = vld [vmem:[%s26598_s21 + $0x3e] sm:$0xff]  ;;  %v14757_v3 = vld [vmem:[%s26598_s21 + $0x76] sm:$0xff] }
 0x3b8   : >> { %19770 = vmatprep.mubr.f32.mxu0 %v27110_v21  ;;  %22203 = vmatprep.subr.bf16.mxu1 %v22202_v32 }
 0x3b9   : >> { %19099 = vmatmul.mubr.f32.gmra.mrb[14].mxu1 %v14725_v9  ;;  %22587 = vmatprep.subr.bf16.mxu0 %v22586_v56  ;;  %v14803_v9 = vld [vmem:[%s28803_s3 + $0x258] sm:$0xff] }
 0x3ba   : >> { %19771 = vmatmul.mubr.f32.gmra.mrb[14].mxu0 %v27127_v6  ;;  %22205 = vmatpush3.bf16.msra.mxu1 %v22202_v32  ;;  %v15197_v32 = vld [vmem:[%s28803_s3 + $0x848] sm:$0xff] }
 0x3bb   : >> { %22589 = vmatpush3.bf16.msra.mxu0 %v22586_v56  ;;  %19133 = vmatprep.mubr.f32.mxu1 %v14743_v60  ;;  %v14751_v56 = vld [vmem:[%s26598_s21 + $0x46] sm:$0xff] }
 0x3bc   : >> { %19805 = vmatprep.mubr.f32.mxu0 %v27039_v62  ;;  %22207 = vmatprep.subr.bf16.mxu1 %v22206_v58  ;;  %v15192_v62 = vld [vmem:[%s28803_s3 + $0x820] sm:$0xff]  ;;  %v15148_v60 = vld [vmem:[%s26598_s21 + $0x108] sm:$0xff] }
 0x3bd   : >> { %19134 = vmatmul.mubr.f32.vlgmr.msra.gmra.mrb[0].mxu1 %v14744_v43  ;;  %22591 = vmatprep.subr.bf16.mxu0 %v22590_v17  ;;  %v14805_v43 = vld [vmem:[%s28803_s3 + $0x268] sm:$0xff] }
 0x3be   : >> { %19806 = vmatmul.mubr.f32.vlgmr.msra.gmra.mrb[0].mxu0 %v27044_v15  ;;  %22209 = vmatpush3.bf16.msra.mxu1 %v22206_v58  ;;  %v22598_v15 = vpack.c.bf16 %v15193_v26, %v15192_v62  ;;  %v14753_v58 = vld [vmem:[%s26598_s21 + $0x56] sm:$0xff]  ;;  %v14756_v26 = vld [vmem:[%s26598_s21 + $0x6e] sm:$0xff] }
 0x3bf   : >> { %22593 = vmatpush3.bf16.msra.mxu0 %v22590_v17  ;;  %19136 = vmatprep.mubr.f32.mxu1 %v14745_v14  ;;  %v15149_v17 = vld [vmem:[%s26598_s21 + $0x110] sm:$0xff]  ;;  %v15150_v14 = vld [vmem:[%s26598_s21 + $0x118] sm:$0xff] }
 0x3c0   : >> { %19808 = vmatprep.mubr.f32.mxu0 %v27061_v12  ;;  %22211 = vmatprep.subr.bf16.mxu1 %v22210_v31  ;;  %v15194_v12 = vld [vmem:[%s28803_s3 + $0x830] sm:$0xff]  ;;  %v14807_v62 = vld [vmem:[%s28803_s3 + $0x278] sm:$0xff] }
 0x3c1   : >> { %19137 = vmatmul.mubr.f32.gmra.mrb[2].mxu1 %v14746_v0  ;;  %22595 = vmatprep.subr.bf16.mxu0 %v22594_v38  ;;  %v14806_v0 = vld [vmem:[%s28803_s3 + $0x270] sm:$0xff] }
 0x3c2   : >> { %19809 = vmatmul.mubr.f32.gmra.mrb[2].mxu0 %v27066_v7  ;;  %22213 = vmatpush3.bf16.msra.mxu1 %v22210_v31  ;;  %v22602_v7 = vpack.c.bf16 %v15195_v41, %v15194_v12  ;;  %v14755_v31 = vld [vmem:[%s26598_s21 + $0x66] sm:$0xff]  ;;  %v22234_v11 = vpack.c.bf16 %v14807_v62, %v14806_v0 }
 0x3c3   : >> { %22597 = vmatpush3.bf16.msra.mxu0 %v22594_v38  ;;  %19139 = vmatprep.mubr.f32.mxu1 %v14747_v28  ;;  %v22230_v38 = vpack.c.bf16 %v14805_v43, %v14804_v59  ;;  %v15202_v28 = vld [vmem:[%s28803_s3 + $0x870] sm:$0xff]  ;;  %v14825_v41 = vld [vmem:[%s28803_s3 + $0x280] sm:$0xff] }
 0x3c4   : >> { %19811 = vmatprep.mubr.f32.mxu0 %v27083_v20  ;;  %22215 = vmatprep.subr.bf16.mxu1 %v22214_v40  ;;  %v15196_v20 = vld [vmem:[%s28803_s3 + $0x840] sm:$0xff]  ;;  %v14831_v43 = vld [vmem:[%s28803_s3 + $0x2b0] sm:$0xff] }
 0x3c5   : >> { %19140 = vmatmul.mubr.f32.gmra.mrb[4].mxu1 %v14748_v30  ;;  %22599 = vmatprep.subr.bf16.mxu0 %v22598_v15  ;;  %v15153_v30 = vld [vmem:[%s26598_s21 + $0x130] sm:$0xff]  ;;  %v15180_v62 = vld [vmem:[%s26598_s21 + $0x102] sm:$0xff] }
 0x3c6   : >> { %19812 = vmatmul.mubr.f32.gmra.mrb[4].mxu0 %v27088_v52  ;;  %22217 = vmatpush3.bf16.msra.mxu1 %v22214_v40  ;;  %v22606_v52 = vpack.c.bf16 %v15197_v32, %v15196_v20  ;;  %v15203_v40 = vld [vmem:[%s28803_s3 + $0x878] sm:$0xff]  ;;  %v15172_v20 = vld [vmem:[%s26598_s21 + $0xc2] sm:$0xff] }
 0x3c7   : >> { %22601 = vmatpush3.bf16.msra.mxu0 %v22598_v15  ;;  %19142 = vmatprep.mubr.f32.mxu1 %v14749_v19  ;;  %v15152_v15 = vld [vmem:[%s26598_s21 + $0x128] sm:$0xff]  ;;  %v22618_v12 = vpack.c.bf16 %v15203_v40, %v15202_v28  ;;  %v14835_v28 = vld [vmem:[%s28803_s3 + $0x2d0] sm:$0xff]  ;;  %v14836_v40 = vld [vmem:[%s28803_s3 + $0x2d8] sm:$0xff] }
 0x3c8   : >> { %19814 = vmatprep.mubr.f32.mxu0 %v27105_v47  ;;  %22219 = vmatprep.subr.bf16.mxu1 %v22218_v16  ;;  %v14752_v47 = vld [vmem:[%s26598_s21 + $0x4e] sm:$0xff] }
 0x3c9   : >> { %19143 = vmatmul.mubr.f32.gmra.mrb[6].mxu1 %v14750_v34  ;;  %22603 = vmatprep.subr.bf16.mxu0 %v22602_v7  ;;  %v14826_v19 = vld [vmem:[%s28803_s3 + $0x288] sm:$0xff] }
 0x3ca   : >> { %19815 = vmatmul.mubr.f32.gmra.mrb[6].mxu0 %v27110_v21  ;;  %22221 = vmatpush3.bf16.msra.mxu1 %v22218_v16  ;;  %v22226_v21 = vpack.c.bf16 %v14803_v9, %v14802_v42  ;;  %v14758_v16 = vld [vmem:[%s26598_s21 + $0x7e] sm:$0xff]  ;;  %v22238_v34 = vpack.c.bf16 %v14826_v19, %v14825_v41  ;;  %v15173_v9 = vld [vmem:[%s26598_s21 + $0xca] sm:$0xff] }
 0x3cb   : >> { %22605 = vmatpush3.bf16.msra.mxu0 %v22602_v7  ;;  %19145 = vmatprep.mubr.f32.mxu1 %v14751_v56  ;;  %v15221_v7 = vld [vmem:[%s28803_s3 + $0x880] sm:$0xff]  ;;  %v14827_v56 = vld [vmem:[%s28803_s3 + $0x290] sm:$0xff]  ;;  %v15224_v42 = vld [vmem:[%s28803_s3 + $0x898] sm:$0xff] }
 0x3cc   : >> { %19817 = vmatprep.mubr.f32.mxu0 %v27127_v6  ;;  %22223 = vmatprep.subr.bf16.mxu1 %v22222_v35  ;;  %v14754_v6 = vld [vmem:[%s26598_s21 + $0x5e] sm:$0xff]  ;;  %v22622_v32 = vpack.c.bf16 %v15222_v48, %v15221_v7  ;;  %v14838_v19 = vld [vmem:[%s28803_s3 + $0x2e8] sm:$0xff] }
 0x3cd   : >> { %19146 = vmatmul.mubr.f32.gmra.mrb[8].mxu1 %v14752_v47  ;;  %22607 = vmatprep.subr.bf16.mxu0 %v22606_v52  ;;  %v14837_v41 = vld [vmem:[%s28803_s3 + $0x2e0] sm:$0xff]  ;;  %v15234_v7 = vld [vmem:[%s28803_s3 + $0x8e8] sm:$0xff] }
 0x3ce   : >> { %19818 = vmatmul.mubr.f32.gmra.mrb[8].mxu0 %v15148_v60  ;;  %22225 = vmatpush3.bf16.msra.mxu1 %v22222_v35  ;;  %v14828_v35 = vld [vmem:[%s28803_s3 + $0x298] sm:$0xff]  ;;  %v14829_v60 = vld [vmem:[%s28803_s3 + $0x2a0] sm:$0xff] }
 0x3cf   : >> { %22609 = vmatpush3.bf16.msra.mxu0 %v22606_v52  ;;  %19148 = vmatprep.mubr.f32.mxu1 %v14753_v58  ;;  %v15223_v52 = vld [vmem:[%s28803_s3 + $0x890] sm:$0xff]  ;;  %v22242_v47 = vpack.c.bf16 %v14828_v35, %v14827_v56  ;;  %v14830_v58 = vld [vmem:[%s28803_s3 + $0x2a8] sm:$0xff]  ;;  %v15183_v48 = vld [vmem:[%s26598_s21 + $0x11a] sm:$0xff] }
 0x3d0   : >> { %19820 = vmatprep.mubr.f32.mxu0 %v15149_v17  ;;  %22227 = vmatprep.subr.bf16.mxu1 %v22226_v21  ;;  %v22626_v51 = vpack.c.bf16 %v15224_v42, %v15223_v52  ;;  %v22246_v17 = vpack.c.bf16 %v14830_v58, %v14829_v60  ;;  %v14840_v56 = vld [vmem:[%s28803_s3 + $0x2f8] sm:$0xff]  ;;  %v15235_v35 = vld [vmem:[%s28803_s3 + $0x8f0] sm:$0xff]  ;;  %v14859_v60 = vld [vmem:[%s28803_s3 + $0x308] sm:$0xff] }
 0x3d1   : >> { %19149 = vmatmul.mubr.f32.gmra.mrb[10].mxu1 %v14754_v6  ;;  %22611 = vmatprep.subr.bf16.mxu0 %v22610_v55  ;;  %v14832_v6 = vld [vmem:[%s28803_s3 + $0x2b8] sm:$0xff]  ;;  %v15185_v42 = vld [vmem:[%s26598_s21 + $0x12a] sm:$0xff]  ;;  %v27379_v58 = vld [vmem:[%s26598_s21 + $0x80] sm:$0xff] }
 0x3d2   : >> { %19821 = vmatmul.mubr.f32.gmra.mrb[10].mxu0 %v15150_v14  ;;  %22229 = vmatpush3.bf16.msra.mxu1 %v22226_v21  ;;  %v15175_v21 = vld [vmem:[%s26598_s21 + $0xda] sm:$0xff]  ;;  %v22250_v8 = vpack.c.bf16 %v14832_v6, %v14831_v43  ;;  %v15178_v14 = vld [vmem:[%s26598_s21 + $0xf2] sm:$0xff] }
 0x3d3   : >> { %22613 = vmatpush3.bf16.msra.mxu0 %v22610_v55  ;;  %19151 = vmatprep.mubr.f32.mxu1 %v14755_v31  ;;  %v15176_v55 = vld [vmem:[%s26598_s21 + $0xe2] sm:$0xff]  ;;  %v15236_v52 = vld [vmem:[%s28803_s3 + $0x8f8] sm:$0xff]  ;;  %v14860_v43 = vld [vmem:[%s28803_s3 + $0x310] sm:$0xff] }
 0x3d4   : >> { %19823 = vmatprep.mubr.f32.mxu0 %v15151_v24  ;;  %22231 = vmatprep.subr.bf16.mxu1 %v22230_v38  ;;  %v14834_v24 = vld [vmem:[%s28803_s3 + $0x2c8] sm:$0xff]  ;;  %v14861_v6 = vld [vmem:[%s28803_s3 + $0x318] sm:$0xff] }
 0x3d5   : >> { %19152 = vmatmul.mubr.f32.gmra.mrb[12].mxu1 %v14756_v26  ;;  %22615 = vmatprep.subr.bf16.mxu0 %v22614_v18 }
 0x3d6   : >> { %19824 = vmatmul.mubr.f32.gmra.mrb[12].mxu0 %v15152_v15  ;;  %22233 = vmatpush3.bf16.msra.mxu1 %v22230_v38  ;;  %v14833_v38 = vld [vmem:[%s28803_s3 + $0x2c0] sm:$0xff]  ;;  %v15232_v15 = vld [vmem:[%s28803_s3 + $0x8d8] sm:$0xff] }
 0x3d7   : >> { %22617 = vmatpush3.bf16.msra.mxu0 %v22614_v18  ;;  %19154 = vmatprep.mubr.f32.mxu1 %v14757_v3  ;;  %v15179_v18 = vld [vmem:[%s26598_s21 + $0xfa] sm:$0xff]  ;;  %v22254_v0 = vpack.c.bf16 %v14834_v24, %v14833_v38  ;;  %v15181_v3 = vld [vmem:[%s26598_s21 + $0x10a] sm:$0xff] }
 0x3d8   : >> { %19826 = vmatprep.mubr.f32.mxu0 %v15153_v30  ;;  %22235 = vmatprep.subr.bf16.mxu1 %v22234_v11  ;;  %v15182_v30 = vld [vmem:[%s26598_s21 + $0x112] sm:$0xff]  ;;  %v14862_v38 = vld [vmem:[%s28803_s3 + $0x320] sm:$0xff]  ;;  %v14863_v24 = vld [vmem:[%s28803_s3 + $0x328] sm:$0xff] }
 0x3d9   : >> { %19155 = vmatmul.mubr.f32.gmra.mrb[14].mxu1 %v14758_v16  ;;  %22619 = vmatprep.subr.bf16.mxu0 %v22618_v12  ;;  %v15233_v16 = vld [vmem:[%s28803_s3 + $0x8e0] sm:$0xff] }
 0x3da   : >> { %19827 = vmatmul.mubr.f32.gmra.mrb[14].mxu0 %v15154_v50  ;;  %22237 = vmatpush3.bf16.msra.mxu1 %v22234_v11  ;;  %v22258_v11 = vpack.c.bf16 %v14836_v40, %v14835_v28  ;;  %v22262_v50 = vpack.c.bf16 %v14838_v19, %v14837_v41  ;;  %v15210_v28 = vld [vmem:[%s26598_s21 + $0xec] sm:$0xff]  ;;  %v15213_v41 = vld [vmem:[%s26598_s21 + $0x104] sm:$0xff] }
 0x3db   : >> { %22621 = vmatpush3.bf16.msra.mxu0 %v22618_v12  ;;  %19189 = vmatprep.mubr.f32.mxu1 %v26791_v4  ;;  %v15225_v4 = vld [vmem:[%s28803_s3 + $0x8a0] sm:$0xff] }
 0x3dc   : >> { %19861 = vmatprep.mubr.f32.mxu0 %v15172_v20  ;;  %22239 = vmatprep.subr.bf16.mxu1 %v22238_v34  ;;  %v22646_v20 = vpack.c.bf16 %v15234_v7, %v15233_v16  ;;  %v14868_v16 = vld [vmem:[%s28803_s3 + $0x350] sm:$0xff]  ;;  %v14869_v7 = vld [vmem:[%s28803_s3 + $0x358] sm:$0xff] }
 0x3dd   : >> { %19190 = vmatmul.mubr.f32.vlgmr.msra.gmra.mrb[0].mxu1 %v26801_v5  ;;  %22623 = vmatprep.subr.bf16.mxu0 %v22622_v32  ;;  %v15226_v5 = vld [vmem:[%s28803_s3 + $0x8a8] sm:$0xff] }
 0x3de   : >> { %19862 = vmatmul.mubr.f32.vlgmr.msra.gmra.mrb[0].mxu0 %v15173_v9  ;;  %22241 = vmatpush3.bf16.msra.mxu1 %v22238_v34  ;;  %v22630_v59 = vpack.c.bf16 %v15226_v5, %v15225_v4  ;;  %v15184_v34 = vld [vmem:[%s26598_s21 + $0x122] sm:$0xff] }
 0x3df   : >> { %22625 = vmatpush3.bf16.msra.mxu0 %v22622_v32  ;;  %19192 = vmatprep.mubr.f32.mxu1 %v26812_v53  ;;  %v15227_v53 = vld [vmem:[%s28803_s3 + $0x8b0] sm:$0xff]  ;;  %v15254_v4 = vld [vmem:[%s28803_s3 + $0x900] sm:$0xff]  ;;  %v15255_v5 = vld [vmem:[%s28803_s3 + $0x908] sm:$0xff] }
 0x3e0   : >> { %19864 = vmatprep.mubr.f32.mxu0 %v15174_v22  ;;  %22243 = vmatprep.subr.bf16.mxu1 %v22242_v47  ;;  %v14839_v32 = vld [vmem:[%s28803_s3 + $0x2f0] sm:$0xff]  ;;  %v22650_v22 = vpack.c.bf16 %v15236_v52, %v15235_v35  ;;  %v15266_v35 = vld [vmem:[%s28803_s3 + $0x960] sm:$0xff] }
 0x3e1   : >> { %19193 = vmatmul.mubr.f32.gmra.mrb[2].mxu1 %v26823_v2  ;;  %22627 = vmatprep.subr.bf16.mxu0 %v22626_v51  ;;  %v15228_v2 = vld [vmem:[%s28803_s3 + $0x8b8] sm:$0xff]  ;;  %v22266_v9 = vpack.c.bf16 %v14840_v56, %v14839_v32  ;;  %v14870_v32 = vld [vmem:[%s28803_s3 + $0x360] sm:$0xff]  ;;  %v14871_v56 = vld [vmem:[%s28803_s3 + $0x368] sm:$0xff] }
 0x3e2   : >> { %19865 = vmatmul.mubr.f32.gmra.mrb[2].mxu0 %v15175_v21  ;;  %22245 = vmatpush3.bf16.msra.mxu1 %v22242_v47  ;;  %v22634_v31 = vpack.c.bf16 %v15228_v2, %v15227_v53  ;;  %v15186_v47 = vld [vmem:[%s26598_s21 + $0x132] sm:$0xff]  ;;  %v15187_v21 = vld [vmem:[%s26598_s21 + $0x13a] sm:$0xff] }
 0x3e3   : >> { %22629 = vmatpush3.bf16.msra.mxu0 %v22626_v51  ;;  %19195 = vmatprep.mubr.f32.mxu1 %v26834_v36  ;;  %v15229_v36 = vld [vmem:[%s28803_s3 + $0x8c0] sm:$0xff]  ;;  %v15256_v53 = vld [vmem:[%s28803_s3 + $0x910] sm:$0xff]  ;;  %v15257_v2 = vld [vmem:[%s28803_s3 + $0x918] sm:$0xff] }
 0x3e4   : >> { %19867 = vmatprep.mubr.f32.mxu0 %v15176_v55  ;;  %22247 = vmatprep.subr.bf16.mxu1 %v22246_v17  ;;  %v14858_v51 = vld [vmem:[%s28803_s3 + $0x300] sm:$0xff] }
 0x3e5   : >> { %19196 = vmatmul.mubr.f32.gmra.mrb[4].mxu1 %v26845_v25  ;;  %22631 = vmatprep.subr.bf16.mxu0 %v22630_v59  ;;  %v15230_v25 = vld [vmem:[%s28803_s3 + $0x8c8] sm:$0xff]  ;;  %v15216_v52 = vld [vmem:[%s26598_s21 + $0x11c] sm:$0xff] }
 0x3e6   : >> { %19868 = vmatmul.mubr.f32.gmra.mrb[4].mxu0 %v15177_v29  ;;  %22249 = vmatpush3.bf16.msra.mxu1 %v22246_v17  ;;  %v22638_v26 = vpack.c.bf16 %v15230_v25, %v15229_v36  ;;  %v22270_v17 = vpack.c.bf16 %v14859_v60, %v14858_v51  ;;  %v15205_v55 = vld [vmem:[%s26598_s21 + $0xc4] sm:$0xff]  ;;  %v15206_v29 = vld [vmem:[%s26598_s21 + $0xcc] sm:$0xff]  ;;  %v15208_v36 = vld [vmem:[%s26598_s21 + $0xdc] sm:$0xff]  ;;  %v22278_v25 = vpack.c.bf16 %v14863_v24, %v14862_v38 }
 0x3e7   : >> { %22633 = vmatpush3.bf16.msra.mxu0 %v22630_v59  ;;  %19198 = vmatprep.mubr.f32.mxu1 %v26856_v10  ;;  %v15231_v10 = vld [vmem:[%s28803_s3 + $0x8d0] sm:$0xff]  ;;  %v22654_v59 = vpack.c.bf16 %v15255_v5, %v15254_v4  ;;  %v14873_v51 = vld [vmem:[%s28803_s3 + $0x378] sm:$0xff] }
 0x3e8   : >> { %19870 = vmatprep.mubr.f32.mxu0 %v15178_v14  ;;  %22251 = vmatprep.subr.bf16.mxu1 %v22250_v8  ;;  %v22642_v12 = vpack.c.bf16 %v15232_v15, %v15231_v10  ;;  %v15207_v14 = vld [vmem:[%s26598_s21 + $0xd4] sm:$0xff]  ;;  %v15218_v60 = vld [vmem:[%s26598_s21 + $0x12c] sm:$0xff] }
 0x3e9   : >> { %19199 = vmatmul.mubr.f32.gmra.mrb[6].mxu1 %v26867_v13  ;;  %22635 = vmatprep.subr.bf16.mxu0 %v22634_v31  ;;  %v15211_v10 = vld [vmem:[%s26598_s21 + $0xf4] sm:$0xff] }
 0x3ea   : >> { %19871 = vmatmul.mubr.f32.gmra.mrb[6].mxu0 %v15179_v18  ;;  %22253 = vmatpush3.bf16.msra.mxu1 %v22250_v8  ;;  %v22274_v8 = vpack.c.bf16 %v14861_v6, %v14860_v43  ;;  %v15209_v18 = vld [vmem:[%s26598_s21 + $0xe4] sm:$0xff]  ;;  %v15219_v4 = vld [vmem:[%s26598_s21 + $0x134] sm:$0xff] }
 0x3eb   : >> { %22637 = vmatpush3.bf16.msra.mxu0 %v22634_v31  ;;  %19201 = vmatprep.mubr.f32.mxu1 %v26878_v61  ;;  %v22658_v31 = vpack.c.bf16 %v15257_v2, %v15256_v53  ;;  %v15238_v6 = vld [vmem:[%s26598_s21 + $0xc6] sm:$0xff]  ;;  %v14893_v2 = vld [vmem:[%s28803_s3 + $0x390] sm:$0xff] }
 0x3ec   : >> { %19873 = vmatprep.mubr.f32.mxu0 %v15180_v62  ;;  %22255 = vmatprep.subr.bf16.mxu1 %v22254_v0  ;;  %v14864_v62 = vld [vmem:[%s28803_s3 + $0x330] sm:$0xff] }
 0x3ed   : >> { %19202 = vmatmul.mubr.f32.gmra.mrb[8].mxu1 %v26889_v46  ;;  %22639 = vmatprep.subr.bf16.mxu0 %v22638_v26  ;;  %v15240_v24 = vld [vmem:[%s26598_s21 + $0xd6] sm:$0xff] }
 0x3ee   : >> { %19874 = vmatmul.mubr.f32.gmra.mrb[8].mxu0 %v15181_v3  ;;  %22257 = vmatpush3.bf16.msra.mxu1 %v22254_v0  ;;  %v14866_v3 = vld [vmem:[%s28803_s3 + $0x340] sm:$0xff] }
 0x3ef   : >> { %22641 = vmatpush3.bf16.msra.mxu0 %v22638_v26  ;;  %19204 = vmatprep.mubr.f32.mxu1 %v26900_v27  ;;  %v14865_v26 = vld [vmem:[%s28803_s3 + $0x338] sm:$0xff] }
 0x3f0   : >> { %19876 = vmatprep.mubr.f32.mxu0 %v15182_v30  ;;  %22259 = vmatprep.subr.bf16.mxu1 %v22258_v11  ;;  %v22282_v40 = vpack.c.bf16 %v14865_v26, %v14864_v62  ;;  %v15212_v30 = vld [vmem:[%s26598_s21 + $0xfc] sm:$0xff] }
 0x3f1   : >> { %19205 = vmatmul.mubr.f32.gmra.mrb[10].mxu1 %v26911_v54  ;;  %22643 = vmatprep.subr.bf16.mxu0 %v22642_v12  ;;  %v15241_v62 = vld [vmem:[%s26598_s21 + $0xde] sm:$0xff] }
 0x3f2   : >> { %19877 = vmatmul.mubr.f32.gmra.mrb[10].mxu0 %v15183_v48  ;;  %22261 = vmatpush3.bf16.msra.mxu1 %v22258_v11  ;;  %v14867_v11 = vld [vmem:[%s28803_s3 + $0x348] sm:$0xff] }
 0x3f3   : >> { %22645 = vmatpush3.bf16.msra.mxu0 %v22642_v12  ;;  %19207 = vmatprep.mubr.f32.mxu1 %v26922_v57  ;;  %v22286_v12 = vpack.c.bf16 %v14867_v11, %v14866_v3  ;;  %v15214_v48 = vld [vmem:[%s26598_s21 + $0x10c] sm:$0xff]  ;;  %v14846_v26 = vld [vmem:[%s26598_s21 + $0x62] sm:$0xff]  ;;  %v15294_v11 = vld [vmem:[%s28803_s3 + $0x9b8] sm:$0xff] }
 0x3f4   : >> { %19879 = vmatprep.mubr.f32.mxu0 %v15184_v34  ;;  %22263 = vmatprep.subr.bf16.mxu1 %v22262_v50  ;;  %v15215_v34 = vld [vmem:[%s26598_s21 + $0x114] sm:$0xff] }
 0x3f5   : >> { %19208 = vmatmul.mubr.f32.gmra.mrb[12].mxu1 %v26933_v63  ;;  %22647 = vmatprep.subr.bf16.mxu0 %v22646_v20  ;;  %v15293_v3 = vld [vmem:[%s28803_s3 + $0x9b0] sm:$0xff] }
 0x3f6   : >> { %19880 = vmatmul.mubr.f32.gmra.mrb[12].mxu0 %v15185_v42  ;;  %22265 = vmatpush3.bf16.msra.mxu1 %v22262_v50  ;;  %v22290_v50 = vpack.c.bf16 %v14869_v7, %v14868_v16  ;;  %v22294_v42 = vpack.c.bf16 %v14871_v56, %v14870_v32  ;;  %v14900_v16 = vld [vmem:[%s28803_s3 + $0x3c8] sm:$0xff]  ;;  %v14849_v7 = vld [vmem:[%s26598_s21 + $0x7a] sm:$0xff]  ;;  %v14901_v56 = vld [vmem:[%s28803_s3 + $0x3d0] sm:$0xff] }
 0x3f7   : >> { %22649 = vmatpush3.bf16.msra.mxu0 %v22646_v20  ;;  %19210 = vmatprep.mubr.f32.mxu1 %v26944_v45 }
 0x3f8   : >> { %19882 = vmatprep.mubr.f32.mxu0 %v15186_v47  ;;  %22267 = vmatprep.subr.bf16.mxu1 %v22266_v9 }
 0x3f9   : >> { %19211 = vmatmul.mubr.f32.gmra.mrb[14].mxu1 %v27379_v58  ;;  %22651 = vmatprep.subr.bf16.mxu0 %v22650_v22 }
 0x3fa   : >> { %19883 = vmatmul.mubr.f32.gmra.mrb[14].mxu0 %v15187_v21  ;;  %22269 = vmatpush3.bf16.msra.mxu1 %v22266_v9  ;;  %v15217_v9 = vld [vmem:[%s26598_s21 + $0x124] sm:$0xff] }
 0x3fb   : >> { %22653 = vmatpush3.bf16.msra.mxu0 %v22650_v22  ;;  %19245 = vmatprep.mubr.f32.mxu1 %v26867_v13  ;;  %v15258_v13 = vld [vmem:[%s28803_s3 + $0x920] sm:$0xff]  ;;  %v14872_v22 = vld [vmem:[%s28803_s3 + $0x370] sm:$0xff] }
 0x3fc   : >> { %19917 = vmatprep.mubr.f32.mxu0 %v15205_v55  ;;  %22271 = vmatprep.subr.bf16.mxu1 %v22270_v17  ;;  %v14891_v21 = vld [vmem:[%s28803_s3 + $0x380] sm:$0xff] }
 0x3fd   : >> { %19246 = vmatmul.mubr.f32.vlgmr.msra.gmra.mrb[0].mxu1 %v26878_v61  ;;  %22655 = vmatprep.subr.bf16.mxu0 %v22654_v59  ;;  %v15259_v61 = vld [vmem:[%s28803_s3 + $0x928] sm:$0xff]  ;;  %v15220_v55 = vld [vmem:[%s26598_s21 + $0x13c] sm:$0xff] }
 0x3fe   : >> { %19918 = vmatmul.mubr.f32.vlgmr.msra.gmra.mrb[0].mxu0 %v15206_v29  ;;  %22273 = vmatpush3.bf16.msra.mxu1 %v22270_v17  ;;  %v22662_v0 = vpack.c.bf16 %v15259_v61, %v15258_v13  ;;  %v15287_v17 = vld [vmem:[%s28803_s3 + $0x980] sm:$0xff]  ;;  %v14843_v29 = vld [vmem:[%s26598_s21 + $0x4a] sm:$0xff] }
 0x3ff   : >> { %22657 = vmatpush3.bf16.msra.mxu0 %v22654_v59  ;;  %19248 = vmatprep.mubr.f32.mxu1 %v26889_v46  ;;  %v15260_v46 = vld [vmem:[%s28803_s3 + $0x930] sm:$0xff]  ;;  %v14842_v59 = vld [vmem:[%s26598_s21 + $0x42] sm:$0xff] }
 0x400   : >> { %19920 = vmatprep.mubr.f32.mxu0 %v15207_v14  ;;  %22275 = vmatprep.subr.bf16.mxu1 %v22274_v8  ;;  %v15239_v14 = vld [vmem:[%s26598_s21 + $0xce] sm:$0xff]  ;;  %v14895_v61 = vld [vmem:[%s28803_s3 + $0x3a0] sm:$0xff] }
 0x401   : >> { %19249 = vmatmul.mubr.f32.gmra.mrb[2].mxu1 %v26900_v27  ;;  %22659 = vmatprep.subr.bf16.mxu0 %v22658_v31  ;;  %v15261_v27 = vld [vmem:[%s28803_s3 + $0x938] sm:$0xff] }
 0x402   : >> { %19921 = vmatmul.mubr.f32.gmra.mrb[2].mxu0 %v15208_v36  ;;  %22277 = vmatpush3.bf16.msra.mxu1 %v22274_v8  ;;  %v22666_v15 = vpack.c.bf16 %v15261_v27, %v15260_v46  ;;  %v15290_v8 = vld [vmem:[%s28803_s3 + $0x998] sm:$0xff]  ;;  %v14896_v36 = vld [vmem:[%s28803_s3 + $0x3a8] sm:$0xff] }
 0x403   : >> { %22661 = vmatpush3.bf16.msra.mxu0 %v22658_v31  ;;  %19251 = vmatprep.mubr.f32.mxu1 %v26911_v54  ;;  %v15262_v54 = vld [vmem:[%s28803_s3 + $0x940] sm:$0xff]  ;;  %v14844_v31 = vld [vmem:[%s26598_s21 + $0x52] sm:$0xff]  ;;  %v22310_v46 = vpack.c.bf16 %v14896_v36, %v14895_v61  ;;  %v15321_v61 = vld [vmem:[%s28803_s3 + $0xa08] sm:$0xff] }
 0x404   : >> { %19923 = vmatprep.mubr.f32.mxu0 %v15209_v18  ;;  %22279 = vmatprep.subr.bf16.mxu1 %v22278_v25  ;;  %v15291_v18 = vld [vmem:[%s28803_s3 + $0x9a0] sm:$0xff] }
 0x405   : >> { %19252 = vmatmul.mubr.f32.gmra.mrb[4].mxu1 %v26922_v57  ;;  %22663 = vmatprep.subr.bf16.mxu0 %v22662_v0  ;;  %v15263_v57 = vld [vmem:[%s28803_s3 + $0x948] sm:$0xff]  ;;  %v15253_v36 = vld [vmem:[%s26598_s21 + $0x13e] sm:$0xff] }
 0x406   : >> { %19924 = vmatmul.mubr.f32.gmra.mrb[4].mxu0 %v15210_v28  ;;  %22281 = vmatpush3.bf16.msra.mxu1 %v22278_v25  ;;  %v22670_v19 = vpack.c.bf16 %v15263_v57, %v15262_v54  ;;  %v14845_v25 = vld [vmem:[%s26598_s21 + $0x5a] sm:$0xff]  ;;  %v15242_v27 = vld [vmem:[%s26598_s21 + $0xe6] sm:$0xff]  ;;  %v15243_v54 = vld [vmem:[%s26598_s21 + $0xee] sm:$0xff] }
 0x407   : >> { %22665 = vmatpush3.bf16.msra.mxu0 %v22662_v0  ;;  %19254 = vmatprep.mubr.f32.mxu1 %v26933_v63  ;;  %v15264_v63 = vld [vmem:[%s28803_s3 + $0x950] sm:$0xff]  ;;  %v15292_v0 = vld [vmem:[%s28803_s3 + $0x9a8] sm:$0xff] }
 0x408   : >> { %19926 = vmatprep.mubr.f32.mxu0 %v15211_v10  ;;  %22283 = vmatprep.subr.bf16.mxu1 %v22282_v40  ;;  %v22694_v28 = vpack.c.bf16 %v15292_v0, %v15291_v18  ;;  %v14898_v10 = vld [vmem:[%s28803_s3 + $0x3b8] sm:$0xff]  ;;  %v27648_v0 = vld [vmem:[%s26598_s21 + $0xc8] sm:$0xff] }
 0x409   : >> { %19255 = vmatmul.mubr.f32.gmra.mrb[6].mxu1 %v26944_v45  ;;  %22667 = vmatprep.subr.bf16.mxu0 %v22666_v15  ;;  %v15265_v45 = vld [vmem:[%s28803_s3 + $0x958] sm:$0xff] }
 0x40a   : >> { %19927 = vmatmul.mubr.f32.gmra.mrb[6].mxu0 %v15212_v30  ;;  %22285 = vmatpush3.bf16.msra.mxu1 %v22282_v40  ;;  %v22674_v20 = vpack.c.bf16 %v15265_v45, %v15264_v63  ;;  %v14897_v40 = vld [vmem:[%s28803_s3 + $0x3b0] sm:$0xff]  ;;  %v15295_v63 = vld [vmem:[%s28803_s3 + $0x9c0] sm:$0xff]  ;;  %v15296_v45 = vld [vmem:[%s28803_s3 + $0x9c8] sm:$0xff] }
 0x40b   : >> { %22669 = vmatpush3.bf16.msra.mxu0 %v22666_v15  ;;  %19257 = vmatprep.mubr.f32.mxu1 %v27379_v58  ;;  %v22298_v58 = vpack.c.bf16 %v14873_v51, %v14872_v22  ;;  %v14847_v15 = vld [vmem:[%s26598_s21 + $0x6a] sm:$0xff]  ;;  %v14848_v57 = vld [vmem:[%s26598_s21 + $0x72] sm:$0xff]  ;;  %v22314_v30 = vpack.c.bf16 %v14898_v10, %v14897_v40  ;;  %v22702_v32 = vpack.c.bf16 %v15296_v45, %v15295_v63 }
 0x40c   : >> { %19929 = vmatprep.mubr.f32.mxu0 %v15213_v41  ;;  %22287 = vmatprep.subr.bf16.mxu1 %v22286_v12  ;;  %v22698_v41 = vpack.c.bf16 %v15294_v11, %v15293_v3  ;;  %v15248_v51 = vld [vmem:[%s26598_s21 + $0x116] sm:$0xff]  ;;  %v27691_v45 = vld [vmem:[%s26598_s21 + $0xe8] sm:$0xff] }
 0x40d   : >> { %19258 = vmatmul.mubr.f32.gmra.mrb[8].mxu1 %v26957_v37  ;;  %22671 = vmatprep.subr.bf16.mxu0 %v22670_v19  ;;  %v15267_v37 = vld [vmem:[%s28803_s3 + $0x968] sm:$0xff]  ;;  %v15323_v40 = vld [vmem:[%s28803_s3 + $0xa18] sm:$0xff]  ;;  %v27664_v10 = vld [vmem:[%s26598_s21 + $0xd0] sm:$0xff] }
 0x40e   : >> { %19930 = vmatmul.mubr.f32.gmra.mrb[8].mxu0 %v15214_v48  ;;  %22289 = vmatpush3.bf16.msra.mxu1 %v22286_v12  ;;  %v22678_v47 = vpack.c.bf16 %v15267_v37, %v15266_v35  ;;  %v15244_v12 = vld [vmem:[%s26598_s21 + $0xf6] sm:$0xff]  ;;  %v15245_v48 = vld [vmem:[%s26598_s21 + $0xfe] sm:$0xff]  ;;  %v14851_v37 = vld [vmem:[%s26598_s21 + $0x8a] sm:$0xff] }
 0x40f   : >> { %22673 = vmatpush3.bf16.msra.mxu0 %v22670_v19  ;;  %19260 = vmatprep.mubr.f32.mxu1 %v26973_v39  ;;  %v15268_v39 = vld [vmem:[%s28803_s3 + $0x970] sm:$0xff]  ;;  %v14899_v19 = vld [vmem:[%s28803_s3 + $0x3c0] sm:$0xff]  ;;  %v14902_v35 = vld [vmem:[%s28803_s3 + $0x3d8] sm:$0xff] }
 0x410   : >> { %19932 = vmatprep.mubr.f32.mxu0 %v15215_v34  ;;  %22291 = vmatprep.subr.bf16.mxu1 %v22290_v50  ;;  %v22318_v34 = vpack.c.bf16 %v14900_v16, %v14899_v19  ;;  %v22322_v22 = vpack.c.bf16 %v14902_v35, %v14901_v56  ;;  %v27669_v11 = vld [vmem:[%s26598_s21 + $0xd8] sm:$0xff]  ;;  %v15325_v19 = vld [vmem:[%s28803_s3 + $0xa28] sm:$0xff]  ;;  %v27686_v16 = vld [vmem:[%s26598_s21 + $0xe0] sm:$0xff] }
 0x411   : >> { %19261 = vmatmul.mubr.f32.gmra.mrb[10].mxu1 %v26978_v33  ;;  %22675 = vmatprep.subr.bf16.mxu0 %v22674_v20  ;;  %v15269_v33 = vld [vmem:[%s28803_s3 + $0x978] sm:$0xff]  ;;  %v27708_v35 = vld [vmem:[%s26598_s21 + $0xf0] sm:$0xff] }
 0x412   : >> { %19933 = vmatmul.mubr.f32.gmra.mrb[10].mxu0 %v15216_v52  ;;  %22293 = vmatpush3.bf16.msra.mxu1 %v22290_v50  ;;  %v22682_v5 = vpack.c.bf16 %v15269_v33, %v15268_v39  ;;  %v14850_v50 = vld [vmem:[%s26598_s21 + $0x82] sm:$0xff]  ;;  %v15297_v52 = vld [vmem:[%s28803_s3 + $0x9d0] sm:$0xff]  ;;  %v15327_v56 = vld [vmem:[%s28803_s3 + $0xa38] sm:$0xff] }
 0x413   : >> { %22677 = vmatpush3.bf16.msra.mxu0 %v22674_v20  ;;  %19263 = vmatprep.mubr.f32.mxu1 %v26995_v44  ;;  %v14892_v44 = vld [vmem:[%s28803_s3 + $0x388] sm:$0xff]  ;;  %v14903_v33 = vld [vmem:[%s28803_s3 + $0x3e0] sm:$0xff] }
 0x414   : >> { %19935 = vmatprep.mubr.f32.mxu0 %v15217_v9  ;;  %22295 = vmatprep.subr.bf16.mxu1 %v22294_v42  ;;  %v22302_v43 = vpack.c.bf16 %v14892_v44, %v14891_v21  ;;  %v15246_v20 = vld [vmem:[%s26598_s21 + $0x106] sm:$0xff]  ;;  %v15247_v9 = vld [vmem:[%s26598_s21 + $0x10e] sm:$0xff]  ;;  %v15249_v21 = vld [vmem:[%s26598_s21 + $0x11e] sm:$0xff] }
 0x415   : >> { %19264 = vmatmul.mubr.f32.gmra.mrb[12].mxu1 %v27000_v49  ;;  %22679 = vmatprep.subr.bf16.mxu0 %v22678_v47  ;;  %v15288_v49 = vld [vmem:[%s28803_s3 + $0x988] sm:$0xff] }
 0x416   : >> { %19936 = vmatmul.mubr.f32.gmra.mrb[12].mxu0 %v15218_v60  ;;  %22297 = vmatpush3.bf16.msra.mxu1 %v22294_v42  ;;  %v22686_v53 = vpack.c.bf16 %v15288_v49, %v15287_v17  ;;  %v15298_v42 = vld [vmem:[%s28803_s3 + $0x9d8] sm:$0xff]  ;;  %v14904_v60 = vld [vmem:[%s28803_s3 + $0x3e8] sm:$0xff] }
 0x417   : >> { %22681 = vmatpush3.bf16.msra.mxu0 %v22678_v47  ;;  %19266 = vmatprep.mubr.f32.mxu1 %v27017_v23  ;;  %v14894_v23 = vld [vmem:[%s28803_s3 + $0x398] sm:$0xff]  ;;  %v22706_v39 = vpack.c.bf16 %v15298_v42, %v15297_v52  ;;  %v14854_v44 = vld [vmem:[%s26598_s21 + $0xa2] sm:$0xff]  ;;  %v22326_v17 = vpack.c.bf16 %v14904_v60, %v14903_v33 }
 0x418   : >> { %19938 = vmatprep.mubr.f32.mxu0 %v15219_v4  ;;  %22299 = vmatprep.subr.bf16.mxu1 %v22298_v58  ;;  %v22306_v38 = vpack.c.bf16 %v14894_v23, %v14893_v2  ;;  %v14852_v47 = vld [vmem:[%s26598_s21 + $0x92] sm:$0xff]  ;;  %v15299_v4 = vld [vmem:[%s28803_s3 + $0x9e0] sm:$0xff]  ;;  %v15329_v33 = vld [vmem:[%s28803_s3 + $0xa48] sm:$0xff] }
 0x419   : >> { %19267 = vmatmul.mubr.f32.gmra.mrb[14].mxu1 %v27022_v1  ;;  %22683 = vmatprep.subr.bf16.mxu0 %v22682_v5  ;;  %v15289_v1 = vld [vmem:[%s28803_s3 + $0x990] sm:$0xff]  ;;  %v15250_v49 = vld [vmem:[%s26598_s21 + $0x126] sm:$0xff]  ;;  %v15302_v2 = vld [vmem:[%s28803_s3 + $0x9f8] sm:$0xff] }
 0x41a   : >> { %19939 = vmatmul.mubr.f32.gmra.mrb[14].mxu0 %v15220_v55  ;;  %22301 = vmatpush3.bf16.msra.mxu1 %v22298_v58  ;;  %v22690_v13 = vpack.c.bf16 %v15290_v8, %v15289_v1  ;;  %v14853_v58 = vld [vmem:[%s26598_s21 + $0x9a] sm:$0xff]  ;;  %v15251_v23 = vld [vmem:[%s26598_s21 + $0x12e] sm:$0xff] }
 0x41b   : >> { %22685 = vmatpush3.bf16.msra.mxu0 %v22682_v5  ;;  %19301 = vmatprep.mubr.f32.mxu1 %v14842_v59  ;;  %v15300_v5 = vld [vmem:[%s28803_s3 + $0x9e8] sm:$0xff]  ;;  %v14905_v59 = vld [vmem:[%s28803_s3 + $0x3f0] sm:$0xff]  ;;  %v27713_v42 = vld [vmem:[%s26598_s21 + $0xf8] sm:$0xff] }
 0x41c   : >> { %19973 = vmatprep.mubr.f32.mxu0 %v15238_v6  ;;  %22303 = vmatprep.subr.bf16.mxu1 %v22302_v43  ;;  %v22710_v55 = vpack.c.bf16 %v15300_v5, %v15299_v4  ;;  %v14855_v6 = vld [vmem:[%s26598_s21 + $0xaa] sm:$0xff]  ;;  %v15252_v8 = vld [vmem:[%s26598_s21 + $0x136] sm:$0xff]  ;;  %v27730_v60 = vld [vmem:[%s26598_s21 + $0x100] sm:$0xff] }
 0x41d   : >> { %19302 = vmatmul.mubr.f32.vlgmr.msra.gmra.mrb[0].mxu1 %v14843_v29  ;;  %22687 = vmatprep.subr.bf16.mxu0 %v22686_v53  ;;  %v14856_v29 = vld [vmem:[%s26598_s21 + $0xb2] sm:$0xff]  ;;  %v27735_v5 = vld [vmem:[%s26598_s21 + $0x108] sm:$0xff] }
 0x41e   : >> { %19974 = vmatmul.mubr.f32.vlgmr.msra.gmra.mrb[0].mxu0 %v15239_v14  ;;  %22305 = vmatpush3.bf16.msra.mxu1 %v22302_v43  ;;  %v14906_v43 = vld [vmem:[%s28803_s3 + $0x3f8] sm:$0xff] }
 0x41f   : >> { %22689 = vmatpush3.bf16.msra.mxu0 %v22686_v53  ;;  %19304 = vmatprep.mubr.f32.mxu1 %v14844_v31  ;;  %v15301_v53 = vld [vmem:[%s28803_s3 + $0x9f0] sm:$0xff]  ;;  %v22330_v1 = vpack.c.bf16 %v14906_v43, %v14905_v59  ;;  %v14924_v31 = vld [vmem:[%s28803_s3 + $0x400] sm:$0xff]  ;;  %v15331_v59 = vld [vmem:[%s28803_s3 + $0xa58] sm:$0xff] }
 0x420   : >> { %19976 = vmatprep.mubr.f32.mxu0 %v15240_v24  ;;  %22307 = vmatprep.subr.bf16.mxu1 %v22306_v38  ;;  %v22714_v14 = vpack.c.bf16 %v15302_v2, %v15301_v53  ;;  %v14857_v24 = vld [vmem:[%s26598_s21 + $0xba] sm:$0xff]  ;;  %v27752_v43 = vld [vmem:[%s26598_s21 + $0x110] sm:$0xff] }
 0x421   : >> { %19305 = vmatmul.mubr.f32.gmra.mrb[2].mxu1 %v14845_v25  ;;  %22691 = vmatprep.subr.bf16.mxu0 %v22690_v13  ;;  %v14875_v25 = vld [vmem:[%s26598_s21 + $0x44] sm:$0xff]  ;;  %v27757_v2 = vld [vmem:[%s26598_s21 + $0x118] sm:$0xff] }
 0x422   : >> { %19977 = vmatmul.mubr.f32.gmra.mrb[2].mxu0 %v15241_v62  ;;  %22309 = vmatpush3.bf16.msra.mxu1 %v22306_v38  ;;  %v14925_v38 = vld [vmem:[%s28803_s3 + $0x408] sm:$0xff] }
 0x423   : >> { %22693 = vmatpush3.bf16.msra.mxu0 %v22690_v13  ;;  %19307 = vmatprep.mubr.f32.mxu1 %v14846_v26  ;;  %v15320_v13 = vld [vmem:[%s28803_s3 + $0xa00] sm:$0xff]  ;;  %v22334_v18 = vpack.c.bf16 %v14925_v38, %v14924_v31  ;;  %v14926_v26 = vld [vmem:[%s28803_s3 + $0x410] sm:$0xff]  ;;  %v15333_v31 = vld [vmem:[%s28803_s3 + $0xa68] sm:$0xff] }
 0x424   : >> { %19979 = vmatprep.mubr.f32.mxu0 %v15242_v27  ;;  %22311 = vmatprep.subr.bf16.mxu1 %v22310_v46  ;;  %v22718_v62 = vpack.c.bf16 %v15321_v61, %v15320_v13  ;;  %v14876_v27 = vld [vmem:[%s26598_s21 + $0x4c] sm:$0xff]  ;;  %v27774_v38 = vld [vmem:[%s26598_s21 + $0x120] sm:$0xff] }
 0x425   : >> { %19308 = vmatmul.mubr.f32.gmra.mrb[4].mxu1 %v14847_v15  ;;  %22695 = vmatprep.subr.bf16.mxu0 %v22694_v28  ;;  %v14877_v15 = vld [vmem:[%s26598_s21 + $0x54] sm:$0xff]  ;;  %v27779_v61 = vld [vmem:[%s26598_s21 + $0x128] sm:$0xff] }
 0x426   : >> { %19980 = vmatmul.mubr.f32.gmra.mrb[4].mxu0 %v15243_v54  ;;  %22313 = vmatpush3.bf16.msra.mxu1 %v22310_v46  ;;  %v14927_v46 = vld [vmem:[%s28803_s3 + $0x418] sm:$0xff] }
 0x427   : >> { %22697 = vmatpush3.bf16.msra.mxu0 %v22694_v28  ;;  %19310 = vmatprep.mubr.f32.mxu1 %v14848_v57  ;;  %v15322_v28 = vld [vmem:[%s28803_s3 + $0xa10] sm:$0xff]  ;;  %v22338_v3 = vpack.c.bf16 %v14927_v46, %v14926_v26  ;;  %v14928_v57 = vld [vmem:[%s28803_s3 + $0x420] sm:$0xff]  ;;  %v15335_v46 = vld [vmem:[%s28803_s3 + $0xa78] sm:$0xff] }
 0x428   : >> { %19982 = vmatprep.mubr.f32.mxu0 %v15244_v12  ;;  %22315 = vmatprep.subr.bf16.mxu1 %v22314_v30  ;;  %v22722_v54 = vpack.c.bf16 %v15323_v40, %v15322_v28  ;;  %v14878_v12 = vld [vmem:[%s26598_s21 + $0x5c] sm:$0xff]  ;;  %v15334_v26 = vld [vmem:[%s28803_s3 + $0xa70] sm:$0xff] }
 0x429   : >> { %19311 = vmatmul.mubr.f32.gmra.mrb[6].mxu1 %v14849_v7  ;;  %22699 = vmatprep.subr.bf16.mxu0 %v22698_v41  ;;  %v14879_v7 = vld [vmem:[%s26598_s21 + $0x64] sm:$0xff]  ;;  %v14889_v28 = vld [vmem:[%s26598_s21 + $0xb4] sm:$0xff] }
 0x42a   : >> { %19983 = vmatmul.mubr.f32.gmra.mrb[6].mxu0 %v15245_v48  ;;  %22317 = vmatpush3.bf16.msra.mxu1 %v22314_v30  ;;  %v14929_v30 = vld [vmem:[%s28803_s3 + $0x428] sm:$0xff] }
 0x42b   : >> { %22701 = vmatpush3.bf16.msra.mxu0 %v22698_v41  ;;  %19313 = vmatprep.mubr.f32.mxu1 %v14850_v50  ;;  %v15324_v41 = vld [vmem:[%s28803_s3 + $0xa20] sm:$0xff]  ;;  %v22342_v63 = vpack.c.bf16 %v14929_v30, %v14928_v57  ;;  %v14930_v50 = vld [vmem:[%s28803_s3 + $0x430] sm:$0xff]  ;;  %v14958_v57 = vld [vmem:[%s28803_s3 + $0x488] sm:$0xff] }
 0x42c   : >> { %19985 = vmatprep.mubr.f32.mxu0 %v15246_v20  ;;  %22319 = vmatprep.subr.bf16.mxu1 %v22318_v34  ;;  %v22726_v48 = vpack.c.bf16 %v15325_v19, %v15324_v41  ;;  %v14880_v20 = vld [vmem:[%s26598_s21 + $0x6c] sm:$0xff]  ;;  %v14890_v30 = vld [vmem:[%s26598_s21 + $0xbc] sm:$0xff] }
 0x42d   : >> { %19314 = vmatmul.mubr.f32.gmra.mrb[8].mxu1 %v14851_v37  ;;  %22703 = vmatprep.subr.bf16.mxu0 %v22702_v32  ;;  %v14881_v37 = vld [vmem:[%s26598_s21 + $0x74] sm:$0xff]  ;;  %v15354_v41 = vld [vmem:[%s28803_s3 + $0xa88] sm:$0xff]  ;;  %v27818_v19 = vld [vmem:[%s26598_s21 + $0x140] sm:$0xff] }
 0x42e   : >> { %19986 = vmatmul.mubr.f32.gmra.mrb[8].mxu0 %v15247_v9  ;;  %22321 = vmatpush3.bf16.msra.mxu1 %v22318_v34  ;;  %v14931_v34 = vld [vmem:[%s28803_s3 + $0x438] sm:$0xff] }
 0x42f   : >> { %22705 = vmatpush3.bf16.msra.mxu0 %v22702_v32  ;;  %19316 = vmatprep.mubr.f32.mxu1 %v14852_v47  ;;  %v15326_v32 = vld [vmem:[%s28803_s3 + $0xa30] sm:$0xff]  ;;  %v22346_v52 = vpack.c.bf16 %v14931_v34, %v14930_v50  ;;  %v14932_v47 = vld [vmem:[%s28803_s3 + $0x440] sm:$0xff]  ;;  %v14960_v34 = vld [vmem:[%s28803_s3 + $0x498] sm:$0xff] }
 0x430   : >> { %19988 = vmatprep.mubr.f32.mxu0 %v15248_v51  ;;  %22323 = vmatprep.subr.bf16.mxu1 %v22322_v22  ;;  %v22730_v9 = vpack.c.bf16 %v15327_v56, %v15326_v32  ;;  %v14882_v51 = vld [vmem:[%s26598_s21 + $0x7c] sm:$0xff]  ;;  %v14959_v50 = vld [vmem:[%s28803_s3 + $0x490] sm:$0xff] }
 0x431   : >> { %19317 = vmatmul.mubr.f32.gmra.mrb[10].mxu1 %v14853_v58  ;;  %22707 = vmatprep.subr.bf16.mxu0 %v22706_v39  ;;  %v14883_v58 = vld [vmem:[%s26598_s21 + $0x84] sm:$0xff]  ;;  %v15355_v32 = vld [vmem:[%s28803_s3 + $0xa90] sm:$0xff]  ;;  %v15356_v56 = vld [vmem:[%s28803_s3 + $0xa98] sm:$0xff] }
 0x432   : >> { %19989 = vmatmul.mubr.f32.gmra.mrb[10].mxu0 %v15249_v21  ;;  %22325 = vmatpush3.bf16.msra.mxu1 %v22322_v22  ;;  %v14933_v22 = vld [vmem:[%s28803_s3 + $0x448] sm:$0xff] }
 0x433   : >> { %22709 = vmatpush3.bf16.msra.mxu0 %v22706_v39  ;;  %19319 = vmatprep.mubr.f32.mxu1 %v14854_v44  ;;  %v15328_v39 = vld [vmem:[%s28803_s3 + $0xa40] sm:$0xff]  ;;  %v22350_v4 = vpack.c.bf16 %v14933_v22, %v14932_v47  ;;  %v14934_v44 = vld [vmem:[%s28803_s3 + $0x450] sm:$0xff]  ;;  %v14962_v22 = vld [vmem:[%s28803_s3 + $0x4a8] sm:$0xff] }
 0x434   : >> { %19991 = vmatprep.mubr.f32.mxu0 %v15250_v49  ;;  %22327 = vmatprep.subr.bf16.mxu1 %v22326_v17  ;;  %v22734_v21 = vpack.c.bf16 %v15329_v33, %v15328_v39  ;;  %v14884_v49 = vld [vmem:[%s26598_s21 + $0x8c] sm:$0xff]  ;;  %v14961_v47 = vld [vmem:[%s28803_s3 + $0x4a0] sm:$0xff] }
 0x435   : >> { %19320 = vmatmul.mubr.f32.gmra.mrb[12].mxu1 %v14855_v6  ;;  %22711 = vmatprep.subr.bf16.mxu0 %v22710_v55  ;;  %v14885_v6 = vld [vmem:[%s26598_s21 + $0x94] sm:$0xff]  ;;  %v15357_v39 = vld [vmem:[%s28803_s3 + $0xaa0] sm:$0xff]  ;;  %v15358_v33 = vld [vmem:[%s28803_s3 + $0xaa8] sm:$0xff] }
 0x436   : >> { %19992 = vmatmul.mubr.f32.gmra.mrb[12].mxu0 %v15251_v23  ;;  %22329 = vmatpush3.bf16.msra.mxu1 %v22326_v17  ;;  %v14935_v17 = vld [vmem:[%s28803_s3 + $0x458] sm:$0xff] }
 0x437   : >> { %22713 = vmatpush3.bf16.msra.mxu0 %v22710_v55  ;;  %19322 = vmatprep.mubr.f32.mxu1 %v14856_v29  ;;  %v15330_v55 = vld [vmem:[%s28803_s3 + $0xa50] sm:$0xff]  ;;  %v22354_v53 = vpack.c.bf16 %v14935_v17, %v14934_v44  ;;  %v14936_v29 = vld [vmem:[%s28803_s3 + $0x460] sm:$0xff] }
 0x438   : >> { %19994 = vmatprep.mubr.f32.mxu0 %v15252_v8  ;;  %22331 = vmatprep.subr.bf16.mxu1 %v22330_v1  ;;  %v22738_v23 = vpack.c.bf16 %v15331_v59, %v15330_v55  ;;  %v14886_v8 = vld [vmem:[%s26598_s21 + $0x9c] sm:$0xff]  ;;  %v14913_v44 = vld [vmem:[%s26598_s21 + $0x6e] sm:$0xff] }
 0x439   : >> { %19323 = vmatmul.mubr.f32.gmra.mrb[14].mxu1 %v14857_v24  ;;  %22715 = vmatprep.subr.bf16.mxu0 %v22714_v14  ;;  %v14887_v24 = vld [vmem:[%s26598_s21 + $0xa4] sm:$0xff]  ;;  %v15359_v17 = vld [vmem:[%s28803_s3 + $0xab0] sm:$0xff] }
 0x43a   : >> { %19995 = vmatmul.mubr.f32.gmra.mrb[14].mxu0 %v15253_v36  ;;  %22333 = vmatpush3.bf16.msra.mxu1 %v22330_v1  ;;  %v14937_v1 = vld [vmem:[%s28803_s3 + $0x468] sm:$0xff]  ;;  %v14914_v55 = vld [vmem:[%s26598_s21 + $0x76] sm:$0xff] }
 0x43b   : >> { %22717 = vmatpush3.bf16.msra.mxu0 %v22714_v14  ;;  %19357 = vmatprep.mubr.f32.mxu1 %v14875_v25  ;;  %v15332_v14 = vld [vmem:[%s28803_s3 + $0xa60] sm:$0xff]  ;;  %v22358_v13 = vpack.c.bf16 %v14937_v1, %v14936_v29  ;;  %v14938_v25 = vld [vmem:[%s28803_s3 + $0x470] sm:$0xff]  ;;  %v15362_v29 = vld [vmem:[%s28803_s3 + $0xac8] sm:$0xff] }
 0x43c   : >> { %20029 = vmatprep.mubr.f32.mxu0 %v27648_v0  ;;  %22335 = vmatprep.subr.bf16.mxu1 %v22334_v18  ;;  %v22742_v36 = vpack.c.bf16 %v15333_v31, %v15332_v14  ;;  %v14916_v1 = vld [vmem:[%s26598_s21 + $0x86] sm:$0xff]  ;;  %v14967_v31 = vld [vmem:[%s28803_s3 + $0x4d0] sm:$0xff] }
 0x43d   : >> { %19358 = vmatmul.mubr.f32.vlgmr.msra.gmra.mrb[0].mxu1 %v14876_v27  ;;  %22719 = vmatprep.subr.bf16.mxu0 %v22718_v62  ;;  %v27796_v27 = vld [vmem:[%s26598_s21 + $0x130] sm:$0xff] }
 0x43e   : >> { %20030 = vmatmul.mubr.f32.vlgmr.msra.gmra.mrb[0].mxu0 %v27664_v10  ;;  %22337 = vmatpush3.bf16.msra.mxu1 %v22334_v18  ;;  %v14939_v18 = vld [vmem:[%s28803_s3 + $0x478] sm:$0xff] }
 0x43f   : >> { %22721 = vmatpush3.bf16.msra.mxu0 %v22718_v62  ;;  %19360 = vmatprep.mubr.f32.mxu1 %v14877_v15  ;;  %v14888_v62 = vld [vmem:[%s26598_s21 + $0xac] sm:$0xff]  ;;  %v22362_v40 = vpack.c.bf16 %v14939_v18, %v14938_v25  ;;  %v27801_v15 = vld [vmem:[%s26598_s21 + $0x138] sm:$0xff] }
 0x440   : >> { %20032 = vmatprep.mubr.f32.mxu0 %v27669_v11  ;;  %22339 = vmatprep.subr.bf16.mxu1 %v22338_v3  ;;  %v14918_v25 = vld [vmem:[%s26598_s21 + $0x96] sm:$0xff] }
 0x441   : >> { %19361 = vmatmul.mubr.f32.gmra.mrb[2].mxu1 %v14878_v12  ;;  %22723 = vmatprep.subr.bf16.mxu0 %v22722_v54  ;;  %v15353_v12 = vld [vmem:[%s28803_s3 + $0xa80] sm:$0xff] }
 0x442   : >> { %20033 = vmatmul.mubr.f32.gmra.mrb[2].mxu0 %v27686_v16  ;;  %22341 = vmatpush3.bf16.msra.mxu1 %v22338_v3  ;;  %v22746_v3 = vpack.c.bf16 %v15335_v46, %v15334_v26  ;;  %v14969_v46 = vld [vmem:[%s28803_s3 + $0x4e0] sm:$0xff] }
 0x443   : >> { %22725 = vmatpush3.bf16.msra.mxu0 %v22722_v54  ;;  %19363 = vmatprep.mubr.f32.mxu1 %v14879_v7  ;;  %v14957_v54 = vld [vmem:[%s28803_s3 + $0x480] sm:$0xff] }
 0x444   : >> { %20035 = vmatprep.mubr.f32.mxu0 %v27691_v45  ;;  %22343 = vmatprep.subr.bf16.mxu1 %v22342_v63  ;;  %v14908_v7 = vld [vmem:[%s26598_s21 + $0x46] sm:$0xff] }
 0x445   : >> { %19364 = vmatmul.mubr.f32.gmra.mrb[4].mxu1 %v14880_v20  ;;  %22727 = vmatprep.subr.bf16.mxu0 %v22726_v48  ;;  %v14909_v20 = vld [vmem:[%s26598_s21 + $0x4e] sm:$0xff] }
 0x446   : >> { %20036 = vmatmul.mubr.f32.gmra.mrb[4].mxu0 %v27708_v35  ;;  %22345 = vmatpush3.bf16.msra.mxu1 %v22342_v63  ;;  %v22366_v63 = vpack.c.bf16 %v14958_v57, %v14957_v54  ;;  %v14920_v54 = vld [vmem:[%s26598_s21 + $0xa6] sm:$0xff] }
 0x447   : >> { %22729 = vmatpush3.bf16.msra.mxu0 %v22726_v48  ;;  %19366 = vmatprep.mubr.f32.mxu1 %v14881_v37  ;;  %v22750_v48 = vpack.c.bf16 %v15354_v41, %v15353_v12  ;;  %v14910_v37 = vld [vmem:[%s26598_s21 + $0x56] sm:$0xff] }
 0x448   : >> { %20038 = vmatprep.mubr.f32.mxu0 %v27713_v42  ;;  %22347 = vmatprep.subr.bf16.mxu1 %v22346_v52  ;;  %v14971_v41 = vld [vmem:[%s28803_s3 + $0x4f0] sm:$0xff] }
 0x449   : >> { %19367 = vmatmul.mubr.f32.gmra.mrb[6].mxu1 %v14882_v51  ;;  %22731 = vmatprep.subr.bf16.mxu0 %v22730_v9  ;;  %v14911_v51 = vld [vmem:[%s26598_s21 + $0x5e] sm:$0xff] }
 0x44a   : >> { %20039 = vmatmul.mubr.f32.gmra.mrb[6].mxu0 %v27730_v60  ;;  %22349 = vmatpush3.bf16.msra.mxu1 %v22346_v52  ;;  %v22370_v52 = vpack.c.bf16 %v14960_v34, %v14959_v50  ;;  %v27945_v50 = vld [vmem:[%s26598_s21 + $0x168] sm:$0xff]  ;;  %v14922_v34 = vld [vmem:[%s26598_s21 + $0xb6] sm:$0xff] }
 0x44b   : >> { %22733 = vmatpush3.bf16.msra.mxu0 %v22730_v9  ;;  %19369 = vmatprep.mubr.f32.mxu1 %v14883_v58  ;;  %v22754_v9 = vpack.c.bf16 %v15356_v56, %v15355_v32  ;;  %v22374_v58 = vpack.c.bf16 %v14962_v22, %v14961_v47  ;;  %v27950_v32 = vld [vmem:[%s26598_s21 + $0x170] sm:$0xff]  ;;  %v15386_v47 = vld [vmem:[%s28803_s3 + $0xb00] sm:$0xff]  ;;  %v15387_v22 = vld [vmem:[%s28803_s3 + $0xb08] sm:$0xff] }
 0x44c   : >> { %20041 = vmatprep.mubr.f32.mxu0 %v27735_v5  ;;  %22351 = vmatprep.subr.bf16.mxu1 %v22350_v4 }
 0x44d   : >> { %19370 = vmatmul.mubr.f32.gmra.mrb[8].mxu1 %v14884_v49  ;;  %22735 = vmatprep.subr.bf16.mxu0 %v22734_v21  ;;  %v15360_v49 = vld [vmem:[%s28803_s3 + $0xab8] sm:$0xff] }
 0x44e   : >> { %20042 = vmatmul.mubr.f32.gmra.mrb[8].mxu0 %v27752_v43  ;;  %22353 = vmatpush3.bf16.msra.mxu1 %v22350_v4  ;;  %v22758_v4 = vpack.c.bf16 %v15358_v33, %v15357_v39  ;;  %v14941_v39 = vld [vmem:[%s26598_s21 + $0x48] sm:$0xff] }
 0x44f   : >> { %22737 = vmatpush3.bf16.msra.mxu0 %v22734_v21  ;;  %19372 = vmatprep.mubr.f32.mxu1 %v14885_v6  ;;  %v14964_v21 = vld [vmem:[%s28803_s3 + $0x4b8] sm:$0xff]  ;;  %v14965_v6 = vld [vmem:[%s28803_s3 + $0x4c0] sm:$0xff] }
 0x450   : >> { %20044 = vmatprep.mubr.f32.mxu0 %v27757_v2  ;;  %22355 = vmatprep.subr.bf16.mxu1 %v22354_v53 }
 0x451   : >> { %19373 = vmatmul.mubr.f32.gmra.mrb[10].mxu1 %v14886_v8  ;;  %22739 = vmatprep.subr.bf16.mxu0 %v22738_v23 }
 0x452   : >> { %20045 = vmatmul.mubr.f32.gmra.mrb[10].mxu0 %v27774_v38  ;;  %22357 = vmatpush3.bf16.msra.mxu1 %v22354_v53  ;;  %v14966_v53 = vld [vmem:[%s28803_s3 + $0x4c8] sm:$0xff] }
 0x453   : >> { %22741 = vmatpush3.bf16.msra.mxu0 %v22738_v23  ;;  %19375 = vmatprep.mubr.f32.mxu1 %v14887_v24  ;;  %v15361_v23 = vld [vmem:[%s28803_s3 + $0xac0] sm:$0xff]  ;;  %v22382_v8 = vpack.c.bf16 %v14966_v53, %v14965_v6  ;;  %v14917_v24 = vld [vmem:[%s26598_s21 + $0x8e] sm:$0xff] }
 0x454   : >> { %20047 = vmatprep.mubr.f32.mxu0 %v27779_v61  ;;  %22359 = vmatprep.subr.bf16.mxu1 %v22358_v13  ;;  %v22766_v14 = vpack.c.bf16 %v15362_v29, %v15361_v23  ;;  %v14994_v53 = vld [vmem:[%s28803_s3 + $0x520] sm:$0xff] }
 0x455   : >> { %19376 = vmatmul.mubr.f32.gmra.mrb[12].mxu1 %v14888_v62  ;;  %22743 = vmatprep.subr.bf16.mxu0 %v22742_v36  ;;  %v27906_v62 = vld [vmem:[%s26598_s21 + $0x150] sm:$0xff]  ;;  %v14944_v23 = vld [vmem:[%s26598_s21 + $0x60] sm:$0xff] }
 0x456   : >> { %20048 = vmatmul.mubr.f32.gmra.mrb[12].mxu0 %v27796_v27  ;;  %22361 = vmatpush3.bf16.msra.mxu1 %v22358_v13  ;;  %v15363_v13 = vld [vmem:[%s28803_s3 + $0xad0] sm:$0xff]  ;;  %v15390_v29 = vld [vmem:[%s28803_s3 + $0xb20] sm:$0xff] }
 0x457   : >> { %22745 = vmatpush3.bf16.msra.mxu0 %v22742_v36  ;;  %19378 = vmatprep.mubr.f32.mxu1 %v14889_v28  ;;  %v27901_v36 = vld [vmem:[%s26598_s21 + $0x148] sm:$0xff]  ;;  %v14919_v28 = vld [vmem:[%s26598_s21 + $0x9e] sm:$0xff] }
 0x458   : >> { %20050 = vmatprep.mubr.f32.mxu0 %v27801_v15  ;;  %22363 = vmatprep.subr.bf16.mxu1 %v22362_v40 }
 0x459   : >> { %19379 = vmatmul.mubr.f32.gmra.mrb[14].mxu1 %v14890_v30  ;;  %22747 = vmatprep.subr.bf16.mxu0 %v22746_v3  ;;  %v27928_v30 = vld [vmem:[%s26598_s21 + $0x160] sm:$0xff] }
 0x45a   : >> { %20051 = vmatmul.mubr.f32.gmra.mrb[14].mxu0 %v27818_v19  ;;  %22365 = vmatpush3.bf16.msra.mxu1 %v22362_v40  ;;  %v15365_v40 = vld [vmem:[%s28803_s3 + $0xae0] sm:$0xff] }
 0x45b   : >> { %22749 = vmatpush3.bf16.msra.mxu0 %v22746_v3  ;;  %19413 = vmatprep.mubr.f32.mxu1 %v14908_v7  ;;  %v27923_v3 = vld [vmem:[%s26598_s21 + $0x158] sm:$0xff]  ;;  %v14921_v7 = vld [vmem:[%s26598_s21 + $0xae] sm:$0xff] }
 0x45c   : >> { %20085 = vmatprep.mubr.f32.mxu0 %v27730_v60  ;;  %22367 = vmatprep.subr.bf16.mxu1 %v22366_v63  ;;  %v14912_v60 = vld [vmem:[%s26598_s21 + $0x66] sm:$0xff] }
 0x45d   : >> { %19414 = vmatmul.mubr.f32.vlgmr.msra.gmra.mrb[0].mxu1 %v14909_v20  ;;  %22751 = vmatprep.subr.bf16.mxu0 %v22750_v48 }
 0x45e   : >> { %20086 = vmatmul.mubr.f32.vlgmr.msra.gmra.mrb[0].mxu0 %v27735_v5  ;;  %22369 = vmatpush3.bf16.msra.mxu1 %v22366_v63  ;;  %v14963_v5 = vld [vmem:[%s28803_s3 + $0x4b0] sm:$0xff] }
 0x45f   : >> { %22753 = vmatpush3.bf16.msra.mxu0 %v22750_v48  ;;  %19416 = vmatprep.mubr.f32.mxu1 %v14910_v37  ;;  %v22378_v59 = vpack.c.bf16 %v14964_v21, %v14963_v5  ;;  %v15367_v63 = vld [vmem:[%s28803_s3 + $0xaf0] sm:$0xff]  ;;  %v15368_v48 = vld [vmem:[%s28803_s3 + $0xaf8] sm:$0xff]  ;;  %v14990_v37 = vld [vmem:[%s28803_s3 + $0x500] sm:$0xff] }
 0x460   : >> { %20088 = vmatprep.mubr.f32.mxu0 %v27752_v43  ;;  %22371 = vmatprep.subr.bf16.mxu1 %v22370_v52  ;;  %v22762_v43 = vpack.c.bf16 %v15360_v49, %v15359_v17  ;;  %v22778_v56 = vpack.c.bf16 %v15368_v48, %v15367_v63  ;;  %v14993_v5 = vld [vmem:[%s28803_s3 + $0x518] sm:$0xff]  ;;  %v14942_v21 = vld [vmem:[%s26598_s21 + $0x50] sm:$0xff]  ;;  %v28038_v63 = vld [vmem:[%s26598_s21 + $0x88] sm:$0xff] }
 0x461   : >> { %19417 = vmatmul.mubr.f32.gmra.mrb[2].mxu1 %v14911_v51  ;;  %22755 = vmatprep.subr.bf16.mxu0 %v22754_v9  ;;  %v27967_v51 = vld [vmem:[%s26598_s21 + $0x178] sm:$0xff]  ;;  %v15338_v49 = vld [vmem:[%s26598_s21 + $0x10a] sm:$0xff] }
 0x462   : >> { %20089 = vmatmul.mubr.f32.gmra.mrb[2].mxu0 %v27757_v2  ;;  %22373 = vmatpush3.bf16.msra.mxu1 %v22370_v52  ;;  %v14915_v2 = vld [vmem:[%s26598_s21 + $0x7e] sm:$0xff]  ;;  %v14991_v52 = vld [vmem:[%s28803_s3 + $0x508] sm:$0xff] }
 0x463   : >> { %22757 = vmatpush3.bf16.msra.mxu0 %v22754_v9  ;;  %19419 = vmatprep.mubr.f32.mxu1 %v14912_v60  ;;  %v14923_v9 = vld [vmem:[%s26598_s21 + $0xbe] sm:$0xff]  ;;  %v22398_v33 = vpack.c.bf16 %v14991_v52, %v14990_v37  ;;  %v28049_v52 = vld [vmem:[%s26598_s21 + $0x90] sm:$0xff] }
 0x464   : >> { %20091 = vmatprep.mubr.f32.mxu0 %v27774_v38  ;;  %22375 = vmatprep.subr.bf16.mxu1 %v22374_v58  ;;  %v14968_v38 = vld [vmem:[%s28803_s3 + $0x4d8] sm:$0xff]  ;;  %v15337_v60 = vld [vmem:[%s26598_s21 + $0x102] sm:$0xff] }
 0x465   : >> { %19420 = vmatmul.mubr.f32.gmra.mrb[4].mxu1 %v14913_v44  ;;  %22759 = vmatprep.subr.bf16.mxu0 %v22758_v4  ;;  %v22386_v18 = vpack.c.bf16 %v14968_v38, %v14967_v31  ;;  %v15388_v44 = vld [vmem:[%s28803_s3 + $0xb10] sm:$0xff]  ;;  %v15389_v17 = vld [vmem:[%s28803_s3 + $0xb18] sm:$0xff]  ;;  %v15341_v38 = vld [vmem:[%s26598_s21 + $0x122] sm:$0xff] }
 0x466   : >> { %20092 = vmatmul.mubr.f32.gmra.mrb[4].mxu0 %v27779_v61  ;;  %22377 = vmatpush3.bf16.msra.mxu1 %v22374_v58  ;;  %v15364_v61 = vld [vmem:[%s28803_s3 + $0xad8] sm:$0xff]  ;;  %v22782_v58 = vpack.c.bf16 %v15387_v22, %v15386_v47  ;;  %v22786_v6 = vpack.c.bf16 %v15389_v17, %v15388_v44  ;;  %v15346_v22 = vld [vmem:[%s26598_s21 + $0x14a] sm:$0xff]  ;;  %v15398_v44 = vld [vmem:[%s28803_s3 + $0xb60] sm:$0xff] }
 0x467   : >> { %22761 = vmatpush3.bf16.msra.mxu0 %v22758_v4  ;;  %19422 = vmatprep.mubr.f32.mxu1 %v14914_v55  ;;  %v22770_v26 = vpack.c.bf16 %v15364_v61, %v15363_v13  ;;  %v14992_v4 = vld [vmem:[%s28803_s3 + $0x510] sm:$0xff]  ;;  %v14943_v55 = vld [vmem:[%s26598_s21 + $0x58] sm:$0xff]  ;;  %v15399_v17 = vld [vmem:[%s28803_s3 + $0xb68] sm:$0xff] }
 0x468   : >> { %20094 = vmatprep.mubr.f32.mxu0 %v27796_v27  ;;  %22379 = vmatprep.subr.bf16.mxu1 %v22378_v59  ;;  %v14970_v27 = vld [vmem:[%s28803_s3 + $0x4e8] sm:$0xff]  ;;  %v14996_v13 = vld [vmem:[%s28803_s3 + $0x530] sm:$0xff]  ;;  %v14997_v61 = vld [vmem:[%s28803_s3 + $0x538] sm:$0xff] }
 0x469   : >> { %19423 = vmatmul.mubr.f32.gmra.mrb[6].mxu1 %v14915_v2  ;;  %22763 = vmatprep.subr.bf16.mxu0 %v22762_v43  ;;  %v22390_v57 = vpack.c.bf16 %v14970_v27, %v14969_v46  ;;  %v14995_v2 = vld [vmem:[%s28803_s3 + $0x528] sm:$0xff]  ;;  %v14947_v27 = vld [vmem:[%s26598_s21 + $0x78] sm:$0xff] }
 0x46a   : >> { %20095 = vmatmul.mubr.f32.gmra.mrb[6].mxu0 %v27801_v15  ;;  %22381 = vmatpush3.bf16.msra.mxu1 %v22378_v59  ;;  %v15366_v15 = vld [vmem:[%s28803_s3 + $0xae8] sm:$0xff]  ;;  %v22402_v59 = vpack.c.bf16 %v14993_v5, %v14992_v4  ;;  %v22406_v31 = vpack.c.bf16 %v14995_v2, %v14994_v53  ;;  %v15001_v37 = vld [vmem:[%s28803_s3 + $0x558] sm:$0xff]  ;;  %v15002_v4 = vld [vmem:[%s28803_s3 + $0x560] sm:$0xff] }
 0x46b   : >> { %22765 = vmatpush3.bf16.msra.mxu0 %v22762_v43  ;;  %19425 = vmatprep.mubr.f32.mxu1 %v14916_v1  ;;  %v22774_v12 = vpack.c.bf16 %v15366_v15, %v15365_v40  ;;  %v15339_v43 = vld [vmem:[%s26598_s21 + $0x112] sm:$0xff]  ;;  %v15391_v1 = vld [vmem:[%s28803_s3 + $0xb28] sm:$0xff] }
 0x46c   : >> { %20097 = vmatprep.mubr.f32.mxu0 %v27818_v19  ;;  %22383 = vmatprep.subr.bf16.mxu1 %v22382_v8  ;;  %v14972_v19 = vld [vmem:[%s28803_s3 + $0x4f8] sm:$0xff]  ;;  %v15342_v46 = vld [vmem:[%s26598_s21 + $0x12a] sm:$0xff] }
 0x46d   : >> { %19426 = vmatmul.mubr.f32.gmra.mrb[8].mxu1 %v14917_v24  ;;  %22767 = vmatprep.subr.bf16.mxu0 %v22766_v14  ;;  %v22394_v20 = vpack.c.bf16 %v14972_v19, %v14971_v41  ;;  %v22790_v24 = vpack.c.bf16 %v15391_v1, %v15390_v29  ;;  %v15343_v40 = vld [vmem:[%s26598_s21 + $0x132] sm:$0xff]  ;;  %v15394_v41 = vld [vmem:[%s28803_s3 + $0xb40] sm:$0xff]  ;;  %v15395_v19 = vld [vmem:[%s28803_s3 + $0xb48] sm:$0xff] }
 0x46e   : >> { %20098 = vmatmul.mubr.f32.gmra.mrb[8].mxu0 %v27901_v36  ;;  %22385 = vmatpush3.bf16.msra.mxu1 %v22382_v8  ;;  %v15340_v8 = vld [vmem:[%s26598_s21 + $0x11a] sm:$0xff]  ;;  %v15003_v5 = vld [vmem:[%s28803_s3 + $0x568] sm:$0xff]  ;;  %v15004_v53 = vld [vmem:[%s28803_s3 + $0x570] sm:$0xff] }
 0x46f   : >> { %22769 = vmatpush3.bf16.msra.mxu0 %v22766_v14  ;;  %19428 = vmatprep.mubr.f32.mxu1 %v14918_v25  ;;  %v14945_v14 = vld [vmem:[%s26598_s21 + $0x68] sm:$0xff]  ;;  %v14946_v25 = vld [vmem:[%s26598_s21 + $0x70] sm:$0xff]  ;;  %v15397_v47 = vld [vmem:[%s28803_s3 + $0xb58] sm:$0xff] }
 0x470   : >> { %20100 = vmatprep.mubr.f32.mxu0 %v27906_v62  ;;  %22387 = vmatprep.subr.bf16.mxu1 %v22386_v18  ;;  %v15005_v2 = vld [vmem:[%s28803_s3 + $0x578] sm:$0xff]  ;;  %v15400_v29 = vld [vmem:[%s28803_s3 + $0xb70] sm:$0xff] }
 0x471   : >> { %19429 = vmatmul.mubr.f32.gmra.mrb[10].mxu1 %v14919_v28  ;;  %22771 = vmatprep.subr.bf16.mxu0 %v22770_v26  ;;  %v22410_v28 = vpack.c.bf16 %v14997_v61, %v14996_v13  ;;  %v15401_v1 = vld [vmem:[%s28803_s3 + $0xb78] sm:$0xff]  ;;  %v15023_v13 = vld [vmem:[%s28803_s3 + $0x580] sm:$0xff]  ;;  %v15024_v61 = vld [vmem:[%s28803_s3 + $0x588] sm:$0xff] }
 0x472   : >> { %20101 = vmatmul.mubr.f32.gmra.mrb[10].mxu0 %v27923_v3  ;;  %22389 = vmatpush3.bf16.msra.mxu1 %v22386_v18  ;;  %v15392_v18 = vld [vmem:[%s28803_s3 + $0xb30] sm:$0xff] }
 0x473   : >> { %22773 = vmatpush3.bf16.msra.mxu0 %v22770_v26  ;;  %19431 = vmatprep.mubr.f32.mxu1 %v14920_v54  ;;  %v15393_v26 = vld [vmem:[%s28803_s3 + $0xb38] sm:$0xff]  ;;  %v14998_v54 = vld [vmem:[%s28803_s3 + $0x540] sm:$0xff] }
 0x474   : >> { %20103 = vmatprep.mubr.f32.mxu0 %v27928_v30  ;;  %22391 = vmatprep.subr.bf16.mxu1 %v22390_v57  ;;  %v22794_v15 = vpack.c.bf16 %v15393_v26, %v15392_v18  ;;  %v15419_v18 = vld [vmem:[%s28803_s3 + $0xb80] sm:$0xff]  ;;  %v15420_v26 = vld [vmem:[%s28803_s3 + $0xb88] sm:$0xff] }
 0x475   : >> { %19432 = vmatmul.mubr.f32.gmra.mrb[12].mxu1 %v14921_v7  ;;  %22775 = vmatprep.subr.bf16.mxu0 %v22774_v12  ;;  %v15344_v7 = vld [vmem:[%s26598_s21 + $0x13a] sm:$0xff] }
 0x476   : >> { %20104 = vmatmul.mubr.f32.gmra.mrb[12].mxu0 %v27945_v50  ;;  %22393 = vmatpush3.bf16.msra.mxu1 %v22390_v57  ;;  %v14999_v57 = vld [vmem:[%s28803_s3 + $0x548] sm:$0xff] }
 0x477   : >> { %22777 = vmatpush3.bf16.msra.mxu0 %v22774_v12  ;;  %19434 = vmatprep.mubr.f32.mxu1 %v14922_v34  ;;  %v28028_v12 = vld [vmem:[%s26598_s21 + $0x80] sm:$0xff]  ;;  %v22414_v48 = vpack.c.bf16 %v14999_v57, %v14998_v54  ;;  %v15026_v54 = vld [vmem:[%s28803_s3 + $0x598] sm:$0xff]  ;;  %v15421_v57 = vld [vmem:[%s28803_s3 + $0xb90] sm:$0xff] }
 0x478   : >> { %20106 = vmatprep.mubr.f32.mxu0 %v27950_v32  ;;  %22395 = vmatprep.subr.bf16.mxu1 %v22394_v20  ;;  %v15345_v34 = vld [vmem:[%s26598_s21 + $0x142] sm:$0xff] }
 0x479   : >> { %19435 = vmatmul.mubr.f32.gmra.mrb[14].mxu1 %v14923_v9  ;;  %22779 = vmatprep.subr.bf16.mxu0 %v22778_v56  ;;  %v15396_v9 = vld [vmem:[%s28803_s3 + $0xb50] sm:$0xff] }
 0x47a   : >> { %20107 = vmatmul.mubr.f32.gmra.mrb[14].mxu0 %v27967_v51  ;;  %22397 = vmatpush3.bf16.msra.mxu1 %v22394_v20  ;;  %v22798_v20 = vpack.c.bf16 %v15395_v19, %v15394_v41  ;;  %v15422_v41 = vld [vmem:[%s28803_s3 + $0xb98] sm:$0xff]  ;;  %v15371_v19 = vld [vmem:[%s26598_s21 + $0x10c] sm:$0xff] }
 0x47b   : >> { %22781 = vmatpush3.bf16.msra.mxu0 %v22778_v56  ;;  %19469 = vmatprep.mubr.f32.mxu1 %v14941_v39  ;;  %v15000_v56 = vld [vmem:[%s28803_s3 + $0x550] sm:$0xff]  ;;  %v28060_v39 = vld [vmem:[%s26598_s21 + $0x98] sm:$0xff] }
 0x47c   : >> { %20141 = vmatprep.mubr.f32.mxu0 %v15337_v60  ;;  %22399 = vmatprep.subr.bf16.mxu1 %v22398_v33  ;;  %v15347_v60 = vld [vmem:[%s26598_s21 + $0x152] sm:$0xff] }
 0x47d   : >> { %19470 = vmatmul.mubr.f32.vlgmr.msra.gmra.mrb[0].mxu1 %v14942_v21  ;;  %22783 = vmatprep.subr.bf16.mxu0 %v22782_v58  ;;  %v28071_v21 = vld [vmem:[%s26598_s21 + $0xa0] sm:$0xff] }
 0x47e   : >> { %20142 = vmatmul.mubr.f32.vlgmr.msra.gmra.mrb[0].mxu0 %v15338_v49  ;;  %22401 = vmatpush3.bf16.msra.mxu1 %v22398_v33  ;;  %v22418_v33 = vpack.c.bf16 %v15001_v37, %v15000_v56  ;;  %v15348_v49 = vld [vmem:[%s26598_s21 + $0x15a] sm:$0xff]  ;;  %v15028_v56 = vld [vmem:[%s28803_s3 + $0x5a8] sm:$0xff] }
 0x47f   : >> { %22785 = vmatpush3.bf16.msra.mxu0 %v22782_v58  ;;  %19472 = vmatprep.mubr.f32.mxu1 %v14943_v55  ;;  %v22802_v58 = vpack.c.bf16 %v15397_v47, %v15396_v9  ;;  %v28082_v55 = vld [vmem:[%s26598_s21 + $0xa8] sm:$0xff]  ;;  %v15373_v37 = vld [vmem:[%s26598_s21 + $0x11c] sm:$0xff] }
 0x480   : >> { %20144 = vmatprep.mubr.f32.mxu0 %v15339_v43  ;;  %22403 = vmatprep.subr.bf16.mxu1 %v22402_v59  ;;  %v15349_v43 = vld [vmem:[%s26598_s21 + $0x162] sm:$0xff] }
 0x481   : >> { %19473 = vmatmul.mubr.f32.gmra.mrb[2].mxu1 %v14944_v23  ;;  %22787 = vmatprep.subr.bf16.mxu0 %v22786_v6  ;;  %v28093_v23 = vld [vmem:[%s26598_s21 + $0xb0] sm:$0xff]  ;;  %v15374_v47 = vld [vmem:[%s26598_s21 + $0x124] sm:$0xff] }
 0x482   : >> { %20145 = vmatmul.mubr.f32.gmra.mrb[2].mxu0 %v15340_v8  ;;  %22405 = vmatpush3.bf16.msra.mxu1 %v22402_v59  ;;  %v22422_v59 = vpack.c.bf16 %v15003_v5, %v15002_v4  ;;  %v15350_v8 = vld [vmem:[%s26598_s21 + $0x16a] sm:$0xff]  ;;  %v15376_v5 = vld [vmem:[%s26598_s21 + $0x134] sm:$0xff] }
 0x483   : >> { %22789 = vmatpush3.bf16.msra.mxu0 %v22786_v6  ;;  %19475 = vmatprep.mubr.f32.mxu1 %v14945_v14  ;;  %v22806_v6 = vpack.c.bf16 %v15399_v17, %v15398_v44  ;;  %v28104_v14 = vld [vmem:[%s26598_s21 + $0xb8] sm:$0xff]  ;;  %v15031_v17 = vld [vmem:[%s28803_s3 + $0x5c0] sm:$0xff] }
 0x484   : >> { %20147 = vmatprep.mubr.f32.mxu0 %v15341_v38  ;;  %22407 = vmatprep.subr.bf16.mxu1 %v22406_v31  ;;  %v15351_v38 = vld [vmem:[%s26598_s21 + $0x172] sm:$0xff] }
 0x485   : >> { %19476 = vmatmul.mubr.f32.gmra.mrb[4].mxu1 %v14946_v25  ;;  %22791 = vmatprep.subr.bf16.mxu0 %v22790_v24  ;;  %v28115_v25 = vld [vmem:[%s26598_s21 + $0xc0] sm:$0xff] }
 0x486   : >> { %20148 = vmatmul.mubr.f32.gmra.mrb[4].mxu0 %v15342_v46  ;;  %22409 = vmatpush3.bf16.msra.mxu1 %v22406_v31  ;;  %v22426_v31 = vpack.c.bf16 %v15005_v2, %v15004_v53  ;;  %v15352_v46 = vld [vmem:[%s26598_s21 + $0x17a] sm:$0xff]  ;;  %v15033_v2 = vld [vmem:[%s28803_s3 + $0x5d0] sm:$0xff] }
 0x487   : >> { %22793 = vmatpush3.bf16.msra.mxu0 %v22790_v24  ;;  %19478 = vmatprep.mubr.f32.mxu1 %v14947_v27  ;;  %v22810_v24 = vpack.c.bf16 %v15401_v1, %v15400_v29  ;;  %v22430_v27 = vpack.c.bf16 %v15024_v61, %v15023_v13  ;;  %v15034_v29 = vld [vmem:[%s28803_s3 + $0x5d8] sm:$0xff]  ;;  %v15036_v13 = vld [vmem:[%s28803_s3 + $0x5e8] sm:$0xff]  ;;  %v15431_v61 = vld [vmem:[%s28803_s3 + $0xbe0] sm:$0xff] }
 0x488   : >> { %20150 = vmatprep.mubr.f32.mxu0 %v15343_v40  ;;  %22411 = vmatprep.subr.bf16.mxu1 %v22410_v28  ;;  %v22814_v40 = vpack.c.bf16 %v15420_v26, %v15419_v18  ;;  %v15430_v1 = vld [vmem:[%s28803_s3 + $0xbd8] sm:$0xff]  ;;  %v15382_v26 = vld [vmem:[%s26598_s21 + $0x164] sm:$0xff] }
 0x489   : >> { %19479 = vmatmul.mubr.f32.gmra.mrb[6].mxu1 %v28028_v12  ;;  %22795 = vmatprep.subr.bf16.mxu0 %v22794_v15 }
 0x48a   : >> { %20151 = vmatmul.mubr.f32.gmra.mrb[6].mxu0 %v15344_v7  ;;  %22413 = vmatpush3.bf16.msra.mxu1 %v22410_v28  ;;  %v15370_v28 = vld [vmem:[%s26598_s21 + $0x104] sm:$0xff] }
 0x48b   : >> { %22797 = vmatpush3.bf16.msra.mxu0 %v22794_v15  ;;  %19481 = vmatprep.mubr.f32.mxu1 %v28038_v63  ;;  %v15025_v15 = vld [vmem:[%s28803_s3 + $0x590] sm:$0xff] }
 0x48c   : >> { %20153 = vmatprep.mubr.f32.mxu0 %v15345_v34  ;;  %22415 = vmatprep.subr.bf16.mxu1 %v22414_v48  ;;  %v22434_v7 = vpack.c.bf16 %v15026_v54, %v15025_v15  ;;  %v22818_v34 = vpack.c.bf16 %v15422_v41, %v15421_v57  ;;  %v15384_v54 = vld [vmem:[%s26598_s21 + $0x174] sm:$0xff]  ;;  %v15452_v41 = vld [vmem:[%s28803_s3 + $0xc00] sm:$0xff] }
 0x48d   : >> { %19482 = vmatmul.mubr.f32.gmra.mrb[8].mxu1 %v28049_v52  ;;  %22799 = vmatprep.subr.bf16.mxu0 %v22798_v20 }
 0x48e   : >> { %20154 = vmatmul.mubr.f32.gmra.mrb[8].mxu0 %v15346_v22  ;;  %22417 = vmatpush3.bf16.msra.mxu1 %v22414_v48  ;;  %v15372_v48 = vld [vmem:[%s26598_s21 + $0x114] sm:$0xff] }
 0x48f   : >> { %22801 = vmatpush3.bf16.msra.mxu0 %v22798_v20  ;;  %19484 = vmatprep.mubr.f32.mxu1 %v28060_v39  ;;  %v15027_v20 = vld [vmem:[%s28803_s3 + $0x5a0] sm:$0xff] }
 0x490   : >> { %20156 = vmatprep.mubr.f32.mxu0 %v15347_v60  ;;  %22419 = vmatprep.subr.bf16.mxu1 %v22418_v33  ;;  %v22438_v9 = vpack.c.bf16 %v15028_v56, %v15027_v20  ;;  %v15030_v60 = vld [vmem:[%s28803_s3 + $0x5b8] sm:$0xff]  ;;  %v15008_v20 = vld [vmem:[%s26598_s21 + $0x8a] sm:$0xff] }
 0x491   : >> { %19485 = vmatmul.mubr.f32.gmra.mrb[10].mxu1 %v28071_v21  ;;  %22803 = vmatprep.subr.bf16.mxu0 %v22802_v58  ;;  %v15404_v56 = vld [vmem:[%s26598_s21 + $0x10e] sm:$0xff] }
 0x492   : >> { %20157 = vmatmul.mubr.f32.gmra.mrb[10].mxu0 %v15348_v49  ;;  %22421 = vmatpush3.bf16.msra.mxu1 %v22418_v33  ;;  %v15029_v33 = vld [vmem:[%s28803_s3 + $0x5b0] sm:$0xff]  ;;  %v15032_v49 = vld [vmem:[%s28803_s3 + $0x5c8] sm:$0xff] }
 0x493   : >> { %22805 = vmatpush3.bf16.msra.mxu0 %v22802_v58  ;;  %19487 = vmatprep.mubr.f32.mxu1 %v28082_v55  ;;  %v15375_v58 = vld [vmem:[%s26598_s21 + $0x12c] sm:$0xff]  ;;  %v22442_v4 = vpack.c.bf16 %v15030_v60, %v15029_v33  ;;  %v15011_v33 = vld [vmem:[%s26598_s21 + $0xa2] sm:$0xff] }
 0x494   : >> { %20159 = vmatprep.mubr.f32.mxu0 %v15349_v43  ;;  %22423 = vmatprep.subr.bf16.mxu1 %v22422_v59  ;;  %v22446_v43 = vpack.c.bf16 %v15032_v49, %v15031_v17  ;;  %v15409_v49 = vld [vmem:[%s26598_s21 + $0x136] sm:$0xff] }
 0x495   : >> { %19488 = vmatmul.mubr.f32.gmra.mrb[12].mxu1 %v28093_v23  ;;  %22807 = vmatprep.subr.bf16.mxu0 %v22806_v6 }
 0x496   : >> { %20160 = vmatmul.mubr.f32.gmra.mrb[12].mxu0 %v15350_v8  ;;  %22425 = vmatpush3.bf16.msra.mxu1 %v22422_v59  ;;  %v15377_v59 = vld [vmem:[%s26598_s21 + $0x13c] sm:$0xff]  ;;  %v15379_v8 = vld [vmem:[%s26598_s21 + $0x14c] sm:$0xff] }
 0x497   : >> { %22809 = vmatpush3.bf16.msra.mxu0 %v22806_v6  ;;  %19490 = vmatprep.mubr.f32.mxu1 %v28104_v14  ;;  %v15378_v6 = vld [vmem:[%s26598_s21 + $0x144] sm:$0xff] }
 0x498   : >> { %20162 = vmatprep.mubr.f32.mxu0 %v15351_v38  ;;  %22427 = vmatprep.subr.bf16.mxu1 %v22426_v31 }
 0x499   : >> { %19491 = vmatmul.mubr.f32.gmra.mrb[14].mxu1 %v28115_v25  ;;  %22811 = vmatprep.subr.bf16.mxu0 %v22810_v24 }
 0x49a   : >> { %20163 = vmatmul.mubr.f32.gmra.mrb[14].mxu0 %v15352_v46  ;;  %22429 = vmatpush3.bf16.msra.mxu1 %v22426_v31  ;;  %v15380_v31 = vld [vmem:[%s26598_s21 + $0x154] sm:$0xff] }
 0x49b   : >> { %22813 = vmatpush3.bf16.msra.mxu0 %v22810_v24  ;;  %19525 = vmatprep.mubr.f32.mxu1 %v28028_v12  ;;  %v15423_v12 = vld [vmem:[%s28803_s3 + $0xba0] sm:$0xff] }
 0x49c   : >> { %20197 = vmatprep.mubr.f32.mxu0 %v15370_v28  ;;  %22431 = vmatprep.subr.bf16.mxu1 %v22430_v27  ;;  %v15035_v24 = vld [vmem:[%s28803_s3 + $0x5e0] sm:$0xff]  ;;  %v15038_v28 = vld [vmem:[%s28803_s3 + $0x5f8] sm:$0xff] }
 0x49d   : >> { %19526 = vmatmul.mubr.f32.vlgmr.msra.gmra.mrb[0].mxu1 %v28038_v63  ;;  %22815 = vmatprep.subr.bf16.mxu0 %v22814_v40  ;;  %v15424_v63 = vld [vmem:[%s28803_s3 + $0xba8] sm:$0xff]  ;;  %v22454_v18 = vpack.c.bf16 %v15036_v13, %v15035_v24  ;;  %v15464_v24 = vld [vmem:[%s28803_s3 + $0xc60] sm:$0xff] }
 0x49e   : >> { %20198 = vmatmul.mubr.f32.vlgmr.msra.gmra.mrb[0].mxu0 %v15371_v19  ;;  %22433 = vmatpush3.bf16.msra.mxu1 %v22430_v27  ;;  %v22822_v22 = vpack.c.bf16 %v15424_v63, %v15423_v12  ;;  %v15037_v27 = vld [vmem:[%s28803_s3 + $0x5f0] sm:$0xff]  ;;  %v15453_v19 = vld [vmem:[%s28803_s3 + $0xc08] sm:$0xff] }
 0x49f   : >> { %22817 = vmatpush3.bf16.msra.mxu0 %v22814_v40  ;;  %19528 = vmatprep.mubr.f32.mxu1 %v28049_v52  ;;  %v15425_v52 = vld [vmem:[%s28803_s3 + $0xbb0] sm:$0xff]  ;;  %v22458_v15 = vpack.c.bf16 %v15038_v28, %v15037_v27  ;;  %v15465_v13 = vld [vmem:[%s28803_s3 + $0xc68] sm:$0xff]  ;;  %v15467_v27 = vld [vmem:[%s28803_s3 + $0xc78] sm:$0xff] }
 0x4a0   : >> { %20200 = vmatprep.mubr.f32.mxu0 %v15372_v48  ;;  %22435 = vmatprep.subr.bf16.mxu1 %v22434_v7  ;;  %v15383_v40 = vld [vmem:[%s26598_s21 + $0x16c] sm:$0xff]  ;;  %v15405_v63 = vld [vmem:[%s26598_s21 + $0x116] sm:$0xff] }
 0x4a1   : >> { %19529 = vmatmul.mubr.f32.gmra.mrb[2].mxu1 %v28060_v39  ;;  %22819 = vmatprep.subr.bf16.mxu0 %v22818_v34  ;;  %v15426_v39 = vld [vmem:[%s28803_s3 + $0xbb8] sm:$0xff]  ;;  %v15403_v48 = vld [vmem:[%s26598_s21 + $0x106] sm:$0xff] }
 0x4a2   : >> { %20201 = vmatmul.mubr.f32.gmra.mrb[2].mxu0 %v15373_v37  ;;  %22437 = vmatpush3.bf16.msra.mxu1 %v22434_v7  ;;  %v22826_v44 = vpack.c.bf16 %v15426_v39, %v15425_v52  ;;  %v22846_v7 = vpack.c.bf16 %v15453_v19, %v15452_v41  ;;  %v15456_v37 = vld [vmem:[%s28803_s3 + $0xc20] sm:$0xff]  ;;  %v15458_v39 = vld [vmem:[%s28803_s3 + $0xc30] sm:$0xff]  ;;  %v15436_v41 = vld [vmem:[%s26598_s21 + $0x108] sm:$0xff] }
 0x4a3   : >> { %22821 = vmatpush3.bf16.msra.mxu0 %v22818_v34  ;;  %19531 = vmatprep.mubr.f32.mxu1 %v28071_v21  ;;  %v15427_v21 = vld [vmem:[%s28803_s3 + $0xbc0] sm:$0xff]  ;;  %v15454_v34 = vld [vmem:[%s28803_s3 + $0xc10] sm:$0xff] }
 0x4a4   : >> { %20203 = vmatprep.mubr.f32.mxu0 %v15374_v47  ;;  %22439 = vmatprep.subr.bf16.mxu1 %v22438_v9  ;;  %v15010_v47 = vld [vmem:[%s26598_s21 + $0x9a] sm:$0xff]  ;;  %v15407_v52 = vld [vmem:[%s26598_s21 + $0x126] sm:$0xff]  ;;  %v15437_v19 = vld [vmem:[%s26598_s21 + $0x110] sm:$0xff] }
 0x4a5   : >> { %19532 = vmatmul.mubr.f32.gmra.mrb[4].mxu1 %v28082_v55  ;;  %22823 = vmatprep.subr.bf16.mxu0 %v22822_v22  ;;  %v15428_v55 = vld [vmem:[%s28803_s3 + $0xbc8] sm:$0xff] }
 0x4a6   : >> { %20204 = vmatmul.mubr.f32.gmra.mrb[4].mxu0 %v15375_v58  ;;  %22441 = vmatpush3.bf16.msra.mxu1 %v22438_v9  ;;  %v22830_v53 = vpack.c.bf16 %v15428_v55, %v15427_v21  ;;  %v15457_v9 = vld [vmem:[%s28803_s3 + $0xc28] sm:$0xff]  ;;  %v15459_v58 = vld [vmem:[%s28803_s3 + $0xc38] sm:$0xff]  ;;  %v15460_v21 = vld [vmem:[%s28803_s3 + $0xc40] sm:$0xff] }
 0x4a7   : >> { %22825 = vmatpush3.bf16.msra.mxu0 %v22822_v22  ;;  %19534 = vmatprep.mubr.f32.mxu1 %v28093_v23  ;;  %v15429_v23 = vld [vmem:[%s28803_s3 + $0xbd0] sm:$0xff]  ;;  %v15406_v22 = vld [vmem:[%s26598_s21 + $0x11e] sm:$0xff]  ;;  %v22854_v60 = vpack.c.bf16 %v15457_v9, %v15456_v37  ;;  %v22858_v17 = vpack.c.bf16 %v15459_v58, %v15458_v39  ;;  %v15461_v55 = vld [vmem:[%s28803_s3 + $0xc48] sm:$0xff] }
 0x4a8   : >> { %20206 = vmatprep.mubr.f32.mxu0 %v15376_v5  ;;  %22443 = vmatprep.subr.bf16.mxu1 %v22442_v4  ;;  %v22834_v38 = vpack.c.bf16 %v15430_v1, %v15429_v23  ;;  %v15408_v5 = vld [vmem:[%s26598_s21 + $0x12e] sm:$0xff]  ;;  %v15463_v23 = vld [vmem:[%s28803_s3 + $0xc58] sm:$0xff] }
 0x4a9   : >> { %19535 = vmatmul.mubr.f32.gmra.mrb[6].mxu1 %v28104_v14  ;;  %22827 = vmatprep.subr.bf16.mxu0 %v22826_v44  ;;  %v22450_v14 = vpack.c.bf16 %v15034_v29, %v15033_v2  ;;  %v15411_v2 = vld [vmem:[%s26598_s21 + $0x146] sm:$0xff]  ;;  %v15462_v29 = vld [vmem:[%s28803_s3 + $0xc50] sm:$0xff] }
 0x4aa   : >> { %20207 = vmatmul.mubr.f32.gmra.mrb[6].mxu0 %v15377_v59  ;;  %22445 = vmatpush3.bf16.msra.mxu1 %v22442_v4  ;;  %v15012_v4 = vld [vmem:[%s26598_s21 + $0xaa] sm:$0xff]  ;;  %v15014_v59 = vld [vmem:[%s26598_s21 + $0xba] sm:$0xff] }
 0x4ab   : >> { %22829 = vmatpush3.bf16.msra.mxu0 %v22826_v44  ;;  %19537 = vmatprep.mubr.f32.mxu1 %v28115_v25  ;;  %v15381_v25 = vld [vmem:[%s26598_s21 + $0x15c] sm:$0xff]  ;;  %v15013_v44 = vld [vmem:[%s26598_s21 + $0xb2] sm:$0xff]  ;;  %v15016_v1 = vld [vmem:[%s26598_s21 + $0xca] sm:$0xff] }
 0x4ac   : >> { %20209 = vmatprep.mubr.f32.mxu0 %v15378_v6  ;;  %22447 = vmatprep.subr.bf16.mxu1 %v22446_v43  ;;  %v15015_v6 = vld [vmem:[%s26598_s21 + $0xc2] sm:$0xff]  ;;  %v15020_v28 = vld [vmem:[%s26598_s21 + $0xea] sm:$0xff] }
 0x4ad   : >> { %19538 = vmatmul.mubr.f32.gmra.mrb[8].mxu1 %v27648_v0  ;;  %22831 = vmatprep.subr.bf16.mxu0 %v22830_v53  ;;  %v15432_v0 = vld [vmem:[%s28803_s3 + $0xbe8] sm:$0xff] }
 0x4ae   : >> { %20210 = vmatmul.mubr.f32.gmra.mrb[8].mxu0 %v15379_v8  ;;  %22449 = vmatpush3.bf16.msra.mxu1 %v22446_v43  ;;  %v22838_v46 = vpack.c.bf16 %v15432_v0, %v15431_v61  ;;  %v15410_v43 = vld [vmem:[%s26598_s21 + $0x13e] sm:$0xff]  ;;  %v15412_v8 = vld [vmem:[%s26598_s21 + $0x14e] sm:$0xff] }
 0x4af   : >> { %22833 = vmatpush3.bf16.msra.mxu0 %v22830_v53  ;;  %19540 = vmatprep.mubr.f32.mxu1 %v27664_v10  ;;  %v15433_v10 = vld [vmem:[%s28803_s3 + $0xbf0] sm:$0xff]  ;;  %v22862_v53 = vpack.c.bf16 %v15461_v55, %v15460_v21  ;;  %v15018_v61 = vld [vmem:[%s26598_s21 + $0xda] sm:$0xff] }
 0x4b0   : >> { %20212 = vmatprep.mubr.f32.mxu0 %v15380_v31  ;;  %22451 = vmatprep.subr.bf16.mxu1 %v22450_v14  ;;  %v22866_v31 = vpack.c.bf16 %v15463_v23, %v15462_v29  ;;  %v15414_v0 = vld [vmem:[%s26598_s21 + $0x15e] sm:$0xff] }
 0x4b1   : >> { %19541 = vmatmul.mubr.f32.gmra.mrb[10].mxu1 %v27669_v11  ;;  %22835 = vmatprep.subr.bf16.mxu0 %v22834_v38  ;;  %v15434_v11 = vld [vmem:[%s28803_s3 + $0xbf8] sm:$0xff]  ;;  %v28351_v29 = vld [vmem:[%s28804_s4] ss:$0 sm:$0xff] }
 0x4b2   : >> { %20213 = vmatmul.mubr.f32.gmra.mrb[10].mxu0 %v15381_v25  ;;  %22453 = vmatpush3.bf16.msra.mxu1 %v22450_v14  ;;  %v22842_v57 = vpack.c.bf16 %v15434_v11, %v15433_v10  ;;  %v15017_v14 = vld [vmem:[%s26598_s21 + $0xd2] sm:$0xff]  ;;  %v15019_v25 = vld [vmem:[%s26598_s21 + $0xe2] sm:$0xff] }
 0x4b3   : >> { %22837 = vmatpush3.bf16.msra.mxu0 %v22834_v38  ;;  %19543 = vmatprep.mubr.f32.mxu1 %v27686_v16  ;;  %v15385_v16 = vld [vmem:[%s26598_s21 + $0x17c] sm:$0xff]  ;;  %v15416_v10 = vld [vmem:[%s26598_s21 + $0x16e] sm:$0xff] }
 0x4b4   : >> { %20215 = vmatprep.mubr.f32.mxu0 %v15382_v26  ;;  %22455 = vmatprep.subr.bf16.mxu1 %v22454_v18  ;;  %v15413_v38 = vld [vmem:[%s26598_s21 + $0x156] sm:$0xff]  ;;  %v15415_v26 = vld [vmem:[%s26598_s21 + $0x166] sm:$0xff] }
 0x4b5   : >> { %19544 = vmatmul.mubr.f32.gmra.mrb[12].mxu1 %v27691_v45  ;;  %22839 = vmatprep.subr.bf16.mxu0 %v22838_v46  ;;  %v15007_v45 = vld [vmem:[%s26598_s21 + $0x82] sm:$0xff]  ;;  %v15021_v11 = vld [vmem:[%s26598_s21 + $0xf2] sm:$0xff] }
 0x4b6   : >> { %20216 = vmatmul.mubr.f32.gmra.mrb[12].mxu0 %v15383_v40  ;;  %22457 = vmatpush3.bf16.msra.mxu1 %v22454_v18  ;;  %v22870_v18 = vpack.c.bf16 %v15465_v13, %v15464_v24 }
 0x4b7   : >> { %22841 = vmatpush3.bf16.msra.mxu0 %v22838_v46  ;;  %19546 = vmatprep.mubr.f32.mxu1 %v27708_v35  ;;  %v15455_v35 = vld [vmem:[%s28803_s3 + $0xc18] sm:$0xff]  ;;  %v15466_v46 = vld [vmem:[%s28803_s3 + $0xc70] sm:$0xff] }
 0x4b8   : >> { %20218 = vmatprep.mubr.f32.mxu0 %v15384_v54  ;;  %22459 = vmatprep.subr.bf16.mxu1 %v22458_v15  ;;  %v22850_v12 = vpack.c.bf16 %v15455_v35, %v15454_v34  ;;  %v22874_v40 = vpack.c.bf16 %v15467_v27, %v15466_v46  ;;  %v15022_v54 = vld [vmem:[%s26598_s21 + $0xfa] sm:$0xff] }
 0x4b9   : >> { %19547 = vmatmul.mubr.f32.gmra.mrb[14].mxu1 %v27713_v42  ;;  %22843 = vmatprep.subr.bf16.mxu0 %v22842_v57  ;;  %v15009_v42 = vld [vmem:[%s26598_s21 + $0x92] sm:$0xff] }
 0x4ba   : >> { %20219 = vmatmul.mubr.f32.gmra.mrb[14].mxu0 %v15385_v16  ;;  %22461 = vmatpush3.bf16.msra.mxu1 %v22458_v15  ;;  %v15417_v15 = vld [vmem:[%s26598_s21 + $0x176] sm:$0xff] }
 0x4bb   : >> { %22845 = vmatpush3.bf16.msra.mxu0 %v22842_v57  ;;  %19581 = vmatprep.mubr.f32.mxu1 %v15007_v45  ;;  %v15418_v57 = vld [vmem:[%s26598_s21 + $0x17e] sm:$0xff] }
 0x4bc   : >> { %20253 = vmatprep.mubr.f32.mxu0 %v15403_v48  ;;  %22847 = vmatprep.subr.bf16.mxu0 %v22846_v7  ;;  %v15438_v16 = vld [vmem:[%s26598_s21 + $0x118] sm:$0xff]  ;;  %v15439_v45 = vld [vmem:[%s26598_s21 + $0x120] sm:$0xff]  ;;  %v15441_v48 = vld [vmem:[%s26598_s21 + $0x130] sm:$0xff] }
 0x4bd   : >> { %19582 = vmatmul.mubr.f32.vlgmr.msra.gmra.mrb[0].mxu1 %v15008_v20  ;;  %23926 = vmatprep.subr.bf16.mxu1 %v22846_v7  ;;  %v15442_v34 = vld [vmem:[%s26598_s21 + $0x138] sm:$0xff] }
 0x4be   : >> { %20254 = vmatmul.mubr.f32.vlgmr.msra.gmra.mrb[0].mxu0 %v15404_v56  ;;  %23934 = vmatpush3.bf16.msra.mxu1 %v22846_v7 }
 0x4bf   : >> { %22849 = vmatpush3.bf16.msra.mxu0 %v22846_v7  ;;  %19584 = vmatprep.mubr.f32.mxu1 %v15009_v42  ;;  %v15440_v7 = vld [vmem:[%s26598_s21 + $0x128] sm:$0xff] }
 0x4c0   : >> { %20256 = vmatprep.mubr.f32.mxu0 %v15405_v63  ;;  %22851 = vmatprep.subr.bf16.mxu0 %v22850_v12 }
 0x4c1   : >> { %19585 = vmatmul.mubr.f32.gmra.mrb[2].mxu1 %v15010_v47  ;;  %23927 = vmatprep.subr.bf16.mxu1 %v22850_v12 }
 0x4c2   : >> { %20257 = vmatmul.mubr.f32.gmra.mrb[2].mxu0 %v15406_v22  ;;  %23935 = vmatpush3.bf16.msra.mxu1 %v22850_v12 }
 0x4c3   : >> { %22853 = vmatpush3.bf16.msra.mxu0 %v22850_v12  ;;  %19587 = vmatprep.mubr.f32.mxu1 %v15011_v33 }
 0x4c4   : >> { %20259 = vmatprep.mubr.f32.mxu0 %v15407_v52  ;;  %22855 = vmatprep.subr.bf16.mxu0 %v22854_v60 }
 0x4c5   : >> { %19588 = vmatmul.mubr.f32.gmra.mrb[4].mxu1 %v15012_v4  ;;  %23928 = vmatprep.subr.bf16.mxu1 %v22854_v60 }
 0x4c6   : >> { %20260 = vmatmul.mubr.f32.gmra.mrb[4].mxu0 %v15408_v5  ;;  %23936 = vmatpush3.bf16.msra.mxu1 %v22854_v60 }
 0x4c7   : >> { %22857 = vmatpush3.bf16.msra.mxu0 %v22854_v60  ;;  %19590 = vmatprep.mubr.f32.mxu1 %v15013_v44 }
 0x4c8   : >> { %20262 = vmatprep.mubr.f32.mxu0 %v15409_v49  ;;  %22859 = vmatprep.subr.bf16.mxu0 %v22858_v17 }
 0x4c9   : >> { %19591 = vmatmul.mubr.f32.gmra.mrb[6].mxu1 %v15014_v59  ;;  %23929 = vmatprep.subr.bf16.mxu1 %v22858_v17 }
 0x4ca   : >> { %20263 = vmatmul.mubr.f32.gmra.mrb[6].mxu0 %v15410_v43  ;;  %23937 = vmatpush3.bf16.msra.mxu1 %v22858_v17 }
 0x4cb   : >> { %22861 = vmatpush3.bf16.msra.mxu0 %v22858_v17  ;;  %19593 = vmatprep.mubr.f32.mxu1 %v15015_v6 }
 0x4cc   : >> { %20265 = vmatprep.mubr.f32.mxu0 %v15411_v2  ;;  %22863 = vmatprep.subr.bf16.mxu0 %v22862_v53 }
 0x4cd   : >> { %19594 = vmatmul.mubr.f32.gmra.mrb[8].mxu1 %v15016_v1  ;;  %23930 = vmatprep.subr.bf16.mxu1 %v22862_v53 }
 0x4ce   : >> { %20266 = vmatmul.mubr.f32.gmra.mrb[8].mxu0 %v15412_v8  ;;  %23938 = vmatpush3.bf16.msra.mxu1 %v22862_v53 }
 0x4cf   : >> { %22865 = vmatpush3.bf16.msra.mxu0 %v22862_v53  ;;  %19596 = vmatprep.mubr.f32.mxu1 %v15017_v14 }
 0x4d0   : >> { %20268 = vmatprep.mubr.f32.mxu0 %v15413_v38  ;;  %22867 = vmatprep.subr.bf16.mxu0 %v22866_v31 }
 0x4d1   : >> { %19597 = vmatmul.mubr.f32.gmra.mrb[10].mxu1 %v15018_v61  ;;  %23931 = vmatprep.subr.bf16.mxu1 %v22866_v31 }
 0x4d2   : >> { %20269 = vmatmul.mubr.f32.gmra.mrb[10].mxu0 %v15414_v0  ;;  %23939 = vmatpush3.bf16.msra.mxu1 %v22866_v31 }
 0x4d3   : >> { %22869 = vmatpush3.bf16.msra.mxu0 %v22866_v31  ;;  %19599 = vmatprep.mubr.f32.mxu1 %v15019_v25 }
 0x4d4   : >> { %20271 = vmatprep.mubr.f32.mxu0 %v15415_v26  ;;  %22871 = vmatprep.subr.bf16.mxu0 %v22870_v18 }
 0x4d5   : >> { %19600 = vmatmul.mubr.f32.gmra.mrb[12].mxu1 %v15020_v28  ;;  %23932 = vmatprep.subr.bf16.mxu1 %v22870_v18 }
 0x4d6   : >> { %20272 = vmatmul.mubr.f32.gmra.mrb[12].mxu0 %v15416_v10  ;;  %23940 = vmatpush3.bf16.msra.mxu1 %v22870_v18 }
 0x4d7   : >> { %22873 = vmatpush3.bf16.msra.mxu0 %v22870_v18  ;;  %19602 = vmatprep.mubr.f32.mxu1 %v15021_v11 }
 0x4d8   : >> { %20274 = vmatprep.mubr.f32.mxu0 %v15417_v15  ;;  %22875 = vmatprep.subr.bf16.mxu0 %v22874_v40 }
 0x4d9   : >> { %19603 = vmatmul.mubr.f32.gmra.mrb[14].mxu1 %v15022_v54  ;;  %23933 = vmatprep.subr.bf16.mxu1 %v22874_v40 }
 0x4da   : >> { %20275 = vmatmul.mubr.f32.gmra.mrb[14].mxu0 %v15418_v57  ;;  %23941 = vmatpush3.bf16.msra.mxu1 %v22874_v40 }
 0x4db   : >> { %22877 = vmatpush3.bf16.msra.mxu0 %v22874_v40  ;;  %20309 = vmatprep.mubr.f32.mxu0 %v15436_v41 }
 0x4dc   : >> { %20321 = vmatprep.mubr.f32.mxu1 %v27901_v36  ;;  %v15451_v36 = vld [vmem:[%s26598_s21 + $0x180] sm:$0xff] }
 0x4dd   : >> { %20322 = vmatmul.mubr.f32.vlgmr.msra.gmra.mrb[16].mxu1 %v27906_v62  ;;  %v15443_v62 = vld [vmem:[%s26598_s21 + $0x140] sm:$0xff] }
 0x4de   : >> { %20310 = vmatmul.mubr.f32.vlgmr.msra.gmra.mrb[0].mxu0 %v15437_v19  ;;  %20324 = vmatprep.mubr.f32.mxu1 %v27923_v3 }
 0x4df   : >> { %20312 = vmatprep.mubr.f32.mxu0 %v15438_v16 }
 0x4e1   : >> { %20325 = vmatmul.mubr.f32.gmra.mrb[18].mxu1 %v27928_v30 }
 0x4e2   : >> { %20313 = vmatmul.mubr.f32.gmra.mrb[2].mxu0 %v15439_v45  ;;  %20327 = vmatprep.mubr.f32.mxu1 %v27945_v50 }
 0x4e3   : >> { %20315 = vmatprep.mubr.f32.mxu0 %v15440_v7 }
 0x4e5   : >> { %20328 = vmatmul.mubr.f32.gmra.mrb[20].mxu1 %v27950_v32 }
 0x4e6   : >> { %20316 = vmatmul.mubr.f32.gmra.mrb[4].mxu0 %v15441_v48  ;;  %20330 = vmatprep.mubr.f32.mxu1 %v27967_v51 }
 0x4e7   : >> { %20318 = vmatprep.mubr.f32.mxu0 %v15442_v34 }
 0x4e9   : >> { %20331 = vmatmul.mubr.f32.gmra.mrb[22].mxu1 %v15451_v36 }
 0x4ea   : >> { %20319 = vmatmul.mubr.f32.gmra.mrb[6].mxu0 %v15443_v62 }
 0x590   : >> { %v19583_v3 = vpop.f32.mrb[0].mxu1 }
 0x591   : >> { %v8156_v35 = vpop.f32.mrb[1].mxu1 }
 0x594   : >> { %v19586_v20 = vpop.f32.mrb[2].mxu1 }
 0x595   : >> { %v8166_v30 = vpop.f32.mrb[3].mxu1 }
 0x598   : >> { %v28338_v56 = vpop.f32.mrb[4].mxu1 }
 0x599   : >> { %v28340_v50 = vpop.f32.mrb[5].mxu1 }
 0x59c   : >> { %v28342_v42 = vpop.f32.mrb[6].mxu1 }
 0x59d   : >> { %v28344_v12 = vpop.f32.mrb[7].mxu1 }
 0x5a0   : >> { %v19595_v32 = vpop.f32.mrb[8].mxu1 }
 0x5a1   : >> { %v20267_v63 = vpop.f32.mrb[8].mxu0  ;;  %v8196_v51 = vpop.f32.mrb[9].mxu1 }
 0x5a2   : >> { %v23950_v37 = vadd.f32 %v20267_v63, %v19595_v32  ;;  %v10548_v9 = vpop.f32.mrb[9].mxu0 }
 0x5a3   : >> { %v23952_v47 = vadd.f32 %v10548_v9, %v8196_v51 }
 0x5a4   : >> { %v19598_v22 = vpop.f32.mrb[10].mxu1 }
 0x5a5   : >> { %v20270_v33 = vpop.f32.mrb[10].mxu0  ;;  %v8206_v60 = vpop.f32.mrb[11].mxu1 }
 0x5a6   : >> { %v23954_v52 = vadd.f32 %v20270_v33, %v19598_v22  ;;  %v10558_v39 = vpop.f32.mrb[11].mxu0 }
 0x5a7   : >> { %v23956_v58 = vadd.f32 %v10558_v39, %v8206_v60 }
 0x5a8   : >> { %v19601_v4 = vpop.f32.mrb[12].mxu1 }
 0x5a9   : >> { %v20273_v5 = vpop.f32.mrb[12].mxu0  ;;  %v8216_v44 = vpop.f32.mrb[13].mxu1 }
 0x5aa   : >> { %v23958_v17 = vadd.f32 %v20273_v5, %v19601_v4  ;;  %v10568_v49 = vpop.f32.mrb[13].mxu0 }
 0x5ab   : >> { %v23960_v21 = vadd.f32 %v10568_v49, %v8216_v44 }
 0x5ac   : >> { %v19604_v55 = vpop.f32.mrb[14].mxu1 }
 0x5ad   : >> { %v20276_v59 = vpop.f32.mrb[14].mxu0  ;;  %v8226_v43 = vpop.f32.mrb[15].mxu1 }
 0x5ae   : >> { %v23962_v6 = vadd.f32 %v20276_v59, %v19604_v55  ;;  %v10578_v53 = vpop.f32.mrb[15].mxu0 }
 0x5af   : >> { %v28346_v2 = vadd.f32 %v10578_v53, %v8226_v43 }
 0x5b0   : >> { %v20323_v23 = vpop.f32.mrb[16].mxu1 }
 0x5b1   : >> { %v20311_v1 = vpop.f32.mrb[0].mxu0  ;;  %v23951_v8 = vadd.f32 %v23950_v37, %v20323_v23  ;;  %v10744_v14 = vpop.f32.mrb[17].mxu1 }
 0x5b2   : >> { %v23942_v31 = vadd.f32 %v20311_v1, %v19583_v3  ;;  %v10704_v38 = vpop.f32.mrb[1].mxu0  ;;  %v23953_v24 = vadd.f32 %v23952_v47, %v10744_v14  ;;  %v11234_v14 = vld [vmem:[#allocation6 + $0x88] sm:$0xff] (%p5928_p10) }
 0x5b3   : >> { %v10815_v13 = vadd.f32 %v23951_v8, %v28351_v29  ;;  %v23943_v61 = vadd.f32 %v10704_v38, %v8156_v35  ;;  %v11233_v8 = vld [vmem:[#allocation6 + $0x80] sm:$0xff] (%p5928_p10)  ;;  %v11216_v38 = vld [vmem:[#allocation6 + $0x8] sm:$0xff] (%p5928_p10) }
 0x5b4   : >> { %v10807_v0 = vadd.f32 %v23942_v31, %v28351_v29  ;;  %v10814_v25 = vadd.f32 %v23953_v24, %v28351_v29  ;;  %v20326_v18 = vpop.f32.mrb[18].mxu1  ;;  %v11215_v31 = vld [vmem:[#allocation6] sm:$0xff] (%p5928_p10)  ;;  %v11235_v24 = vld [vmem:[#allocation6 + $0x90] sm:$0xff] (%p5928_p10) }
 0x5b5   : >> { %v10831_v26 = vmax.f32 %v10815_v13, 0.0  ;;  %v10806_v46 = vadd.f32 %v23943_v61, %v28351_v29  ;;  %v20314_v27 = vpop.f32.mrb[2].mxu0  ;;  %v23955_v28 = vadd.f32 %v23954_v52, %v20326_v18  ;;  %v10754_v10 = vpop.f32.mrb[19].mxu1  ;;  %v11236_v13 = vld [vmem:[#allocation6 + $0x98] sm:$0xff] (%p5928_p10)  ;;  %v11217_v61 = vld [vmem:[#allocation6 + $0x10] sm:$0xff] (%p5928_p10)  ;;  %v22903_v18 = vpack.c.bf16 (%p5928_p10), %v11216_v38, %v11215_v31 }
 0x5b6   : >> { %v10823_v11 = vmax.f32 %v10807_v0, 0.0  ;;  %v10830_v40 = vmax.f32 %v10814_v25, 0.0  ;;  %v23944_v15 = vadd.f32 %v20314_v27, %v19586_v20  ;;  %v10714_v54 = vpop.f32.mrb[3].mxu0  ;;  %v23957_v57 = vadd.f32 %v23956_v58, %v10754_v10  ;;  %v11218_v0 = vld [vmem:[#allocation6 + $0x18] sm:$0xff] (%p5928_p10)  ;;  %v11237_v27 = vld [vmem:[#allocation6 + $0xa0] sm:$0xff] (%p5928_p10)  ;;  %v11229_v31 = vld [vmem:[#allocation6 + $0x70] sm:$0xff] (%p5928_p10) }
 0x5b7   : >> { %10848 = vst [vmem:[%s28359_s25 + $0x48] sm:$0xff] %v10831_v26  ;;  %v10822_v41 = vmax.f32 %v10806_v46, 0.0  ;;  %v10817_v19 = vadd.f32 %v23955_v28, %v28351_v29  ;;  %v23945_v16 = vadd.f32 %v10714_v54, %v8166_v30  ;;  %v22879_v25 = vpack.c.bf16 (%p5928_p10), %v11234_v14, %v11233_v8  ;;  %v11238_v28 = vld [vmem:[#allocation6 + $0xa8] sm:$0xff] (%p5928_p10)  ;;  %v11219_v10 = vld [vmem:[#allocation6 + $0x20] sm:$0xff] (%p5928_p10)  ;;  %v11240_v54 = vld [vmem:[#allocation6 + $0xb8] sm:$0xff] (%p5928_p10) }
 0x5b8   : >> { %10840 = vst [vmem:[%s28359_s25 + $0x8] sm:$0xff] %v10823_v11  ;;  %10847 = vst [vmem:[%s28359_s25 + $0x40] sm:$0xff] %v10830_v40  ;;  %v10809_v45 = vadd.f32 %v23944_v15, %v28351_v29  ;;  %v10816_v7 = vadd.f32 %v23957_v57, %v28351_v29  ;;  %v20329_v48 = vpop.f32.mrb[20].mxu1  ;;  %v22882_v26 = vpack.c.bf16 (%p5928_p10), %v11236_v13, %v11235_v24  ;;  %v11220_v11 = vld [vmem:[#allocation6 + $0x28] sm:$0xff] (%p5928_p10)  ;;  %v11239_v15 = vld [vmem:[#allocation6 + $0xb0] sm:$0xff] (%p5928_p10) }
 0x5b9   : >> { %10839 = vst [vmem:[%s28359_s25] sm:$0xff] %v10822_v41  ;;  %v10833_v34 = vmax.f32 %v10817_v19, 0.0  ;;  %v10808_v36 = vadd.f32 %v23945_v16, %v28351_v29  ;;  %v20317_v62 = vpop.f32.mrb[4].mxu0  ;;  %v23959_v3 = vadd.f32 %v23958_v17, %v20329_v48  ;;  %v10764_v35 = vpop.f32.mrb[21].mxu1  ;;  %v22906_v46 = vpack.c.bf16 (%p5928_p10), %v11218_v0, %v11217_v61  ;;  %v11247_v8 = vld [vmem:[#allocation6 + $0xf0] sm:$0xff] (%p5928_p10)  ;;  %v11248_v14 = vld [vmem:[#allocation6 + $0xf8] sm:$0xff] (%p5928_p10)  ;;  %v11391_v0 = vld [vmem:[#allocation6 + $0x100] sm:$0xff] (%p5928_p10) }
 0x5ba   : >> { %v10825_v20 = vmax.f32 %v10809_v45, 0.0  ;;  %v10832_v30 = vmax.f32 %v10816_v7, 0.0  ;;  %v23946_v32 = vadd.f32 %v20317_v62, %v28338_v56  ;;  %v10724_v63 = vpop.f32.mrb[5].mxu0  ;;  %v23961_v51 = vadd.f32 %v23960_v21, %v10764_v35  ;;  %v11222_v62 = vld [vmem:[#allocation6 + $0x38] sm:$0xff] (%p5928_p10) }
 0x5bb   : >> { %10850 = vst [vmem:[%s28359_s25 + $0x58] sm:$0xff] %v10833_v34  ;;  %v10824_v37 = vmax.f32 %v10808_v36, 0.0  ;;  %v10819_v9 = vadd.f32 %v23959_v3, %v28351_v29  ;;  %v23947_v47 = vadd.f32 %v10724_v63, %v28340_v50  ;;  %v22885_v16 = vpack.c.bf16 (%p5928_p10), %v11238_v28, %v11237_v27  ;;  %v11221_v36 = vld [vmem:[#allocation6 + $0x30] sm:$0xff] (%p5928_p10)  ;;  %v11230_v38 = vld [vmem:[#allocation6 + $0x78] sm:$0xff] (%p5928_p10) }
 0x5bc   : >> { %10842 = vst [vmem:[%s28359_s25 + $0x18] sm:$0xff] %v10825_v20  ;;  %10849 = vst [vmem:[%s28359_s25 + $0x50] sm:$0xff] %v10832_v30  ;;  %v10811_v22 = vadd.f32 %v23946_v32, %v28351_v29  ;;  %v10818_v33 = vadd.f32 %v23961_v51, %v28351_v29  ;;  %v20332_v60 = vpop.f32.mrb[22].mxu1  ;;  %v22909_v45 = vpack.c.bf16 (%p5928_p10), %v11220_v11, %v11219_v10  ;;  %v11394_v27 = vld [vmem:[#allocation6 + $0x118] sm:$0xff] (%p5928_p10) }
 0x5bd   : >> { %10841 = vst [vmem:[%s28359_s25 + $0x10] sm:$0xff] %v10824_v37  ;;  %v10835_v56 = vmax.f32 %v10819_v9, 0.0  ;;  %v10810_v52 = vadd.f32 %v23947_v47, %v28351_v29  ;;  %v20320_v39 = vpop.f32.mrb[6].mxu0  ;;  %v23963_v58 = vadd.f32 %v23962_v6, %v20332_v60  ;;  %v10774_v4 = vpop.f32.mrb[23].mxu1  ;;  %v22888_v51 = vpack.c.bf16 (%p5928_p10), %v11240_v54, %v11239_v15  ;;  %v11241_v9 = vld [vmem:[#allocation6 + $0xc0] sm:$0xff] (%p5928_p10)  ;;  %v11224_v60 = vld [vmem:[#allocation6 + $0x48] sm:$0xff] (%p5928_p10) }
 0x5be   : >> { %v10827_v5 = vmax.f32 %v10811_v22, 0.0  ;;  %v10834_v50 = vmax.f32 %v10818_v33, 0.0  ;;  %v23948_v44 = vadd.f32 %v20320_v39, %v28342_v42  ;;  %v10734_v17 = vpop.f32.mrb[7].mxu0  ;;  %v23965_v49 = vadd.f32 %v28346_v2, %v10774_v4  ;;  %v11242_v22 = vld [vmem:[#allocation6 + $0xc8] sm:$0xff] (%p5928_p10)  ;;  %v11223_v33 = vld [vmem:[#allocation6 + $0x40] sm:$0xff] (%p5928_p10)  ;;  %v11243_v39 = vld [vmem:[#allocation6 + $0xd0] sm:$0xff] (%p5928_p10) }
 0x5bf   : >> { %10852 = vst [vmem:[%s28359_s25 + $0x68] sm:$0xff] %v10835_v56  ;;  %v10826_v21 = vmax.f32 %v10810_v52, 0.0  ;;  %v10821_v55 = vadd.f32 %v23963_v58, %v28351_v29  ;;  %v23949_v59 = vadd.f32 %v10734_v17, %v28344_v12  ;;  %5930 = sbr.rel (!%p5928_p10) target bundleno = 826 (0x33a), region = 252  ;;  %v24469_v12 = vmov (%p5928_p10), 0.0|0.0   ;;  %v11244_v58 = vld [vmem:[#allocation6 + $0xd8] sm:$0xff] (%p5928_p10)  ;;  %v11225_v4 = vld [vmem:[#allocation6 + $0x50] sm:$0xff] (%p5928_p10) }
 0x5c0   : >> { %10844 = vst [vmem:[%s28359_s25 + $0x28] sm:$0xff] %v10827_v5  ;;  %10851 = vst [vmem:[%s28359_s25 + $0x60] sm:$0xff] %v10834_v50  ;;  %v10813_v43 = vadd.f32 %v23948_v44, %v28351_v29  ;;  %v10820_v6 = vadd.f32 %v23965_v49, %v28351_v29  ;;  %22878 = vmatprep.subr.bf16.mxu0 (%p5928_p10), %v24469_v12  ;;  %22902 = vmatprep.subr.bf16.mxu1 (%p5928_p10), %v24469_v12  ;;  %v11226_v5 = vld [vmem:[#allocation6 + $0x58] sm:$0xff] (%p5928_p10)  ;;  %v11245_v50 = vld [vmem:[#allocation6 + $0xe0] sm:$0xff] (%p5928_p10) }
 0x5c1   : >> { %10843 = vst [vmem:[%s28359_s25 + $0x20] sm:$0xff] %v10826_v21  ;;  %v10837_v42 = vmax.f32 %v10821_v55, 0.0  ;;  %v10812_v53 = vadd.f32 %v23949_v59, %v28351_v29  ;;  %v24471_v29 = vmov (%p5928_p10), 0.0   ;;  %22880 = vmatpush3.bf16.msra.mxu0 (%p5928_p10), %v22879_v25  ;;  %22904 = vmatpush3.bf16.msra.mxu1 (%p5928_p10), %v22903_v18  ;;  %v22912_v37 = vpack.c.bf16 (%p5928_p10), %v11222_v62, %v11221_v36  ;;  %v11246_v49 = vld [vmem:[#allocation6 + $0xe8] sm:$0xff] (%p5928_p10)  ;;  %v11227_v21 = vld [vmem:[#allocation6 + $0x60] sm:$0xff] (%p5928_p10)  ;;  %v11483_v15 = vld [vmem:[#allocation6 + $0x198] sm:$0xff] (%p5928_p10) }
 0x5c2   : >> { %v10829_v2 = vmax.f32 %v10813_v43, 0.0  ;;  %v10836_v23 = vmax.f32 %v10820_v6, 0.0  ;;  %20365 = vmatprep.mubr.msk.f32.mxu0 (%p5928_p10), %vm24470_vm0, %v24471_v29  ;;  %20400 = vmatprep.mubr.msk.f32.mxu1 (%p5928_p10), %vm24470_vm0, %v24471_v29  ;;  %v22891_v56 = vpack.c.bf16 (%p5928_p10), %v11242_v22, %v11241_v9  ;;  %v22915_v52 = vpack.c.bf16 (%p5928_p10), %v11224_v60, %v11223_v33  ;;  %v11228_v59 = vld [vmem:[#allocation6 + $0x68] sm:$0xff] (%p5928_p10)  ;;  %v11480_v18 = vld [vmem:[#allocation6 + $0x180] sm:$0xff] (%p5928_p10) }
 0x5c3   : >> { %10854 = vst [vmem:[%s28359_s25 + $0x78] sm:$0xff] %v10837_v42  ;;  %v10828_v1 = vmax.f32 %v10812_v53, 0.0  ;;  %22881 = vmatprep.subr.bf16.mxu0 (%p5928_p10), %v24469_v12  ;;  %22905 = vmatprep.subr.bf16.mxu1 (%p5928_p10), %v24469_v12  ;;  %v22894_v44 = vpack.c.bf16 (%p5928_p10), %v11244_v58, %v11243_v39  ;;  %v22918_v17 = vpack.c.bf16 (%p5928_p10), %v11226_v5, %v11225_v4  ;;  %v11392_v25 = vld [vmem:[#allocation6 + $0x108] sm:$0xff] (%p5928_p10)  ;;  %v11484_v62 = vld [vmem:[#allocation6 + $0x1a0] sm:$0xff] (%p5928_p10) }
 0x5c4   : >> { %10846 = vst [vmem:[%s28359_s25 + $0x38] sm:$0xff] %v10829_v2  ;;  %10853 = vst [vmem:[%s28359_s25 + $0x70] sm:$0xff] %v10836_v23  ;;  %v22897_v23 = vpack.c.bf16 (%p5928_p10), %v11246_v49, %v11245_v50  ;;  %v22900_v13 = vpack.c.bf16 (%p5928_p10), %v11248_v14, %v11247_v8  ;;  %v22924_v61 = vpack.c.bf16 (%p5928_p10), %v11230_v38, %v11229_v31  ;;  %v11396_v36 = vld [vmem:[#allocation6 + $0x128] sm:$0xff] (%p5928_p10)  ;;  %v11399_v9 = vld [vmem:[#allocation6 + $0x140] sm:$0xff] (%p5928_p10) }
 0x5c5   : >> { %10845 = vst [vmem:[%s28359_s25 + $0x30] sm:$0xff] %v10828_v1  ;;  %22883 = vmatpush3.bf16.msra.mxu0 (%p5928_p10), %v22882_v26  ;;  %22907 = vmatpush3.bf16.msra.mxu1 (%p5928_p10), %v22906_v46  ;;  %v22921_v1 = vpack.c.bf16 (%p5928_p10), %v11228_v59, %v11227_v21  ;;  %v11481_v26 = vld [vmem:[#allocation6 + $0x188] sm:$0xff] (%p5928_p10)  ;;  %v11393_v46 = vld [vmem:[#allocation6 + $0x110] sm:$0xff] (%p5928_p10)  ;;  %v22927_v10 = vpack.c.bf16 (%p5928_p10), %v11392_v25, %v11391_v0  ;;  %v11402_v59 = vld [vmem:[#allocation6 + $0x158] sm:$0xff] (%p5928_p10) }
 0x5c6   : > { %22884 = vmatprep.subr.bf16.mxu0 %v24469_v12  ;;  %22908 = vmatprep.subr.bf16.mxu1 %v24469_v12  ;;  %v22951_v11 = vpack.c.bf16 %v11481_v26, %v11480_v18  ;;  %v11400_v22 = vld [vmem:[#allocation6 + $0x148] sm:$0xff]  ;;  %v11401_v21 = vld [vmem:[#allocation6 + $0x150] sm:$0xff]  ;;  %v11495_v25 = vld [vmem:[#allocation6 + $0x1f8] sm:$0xff] }
 0x5c7   : > { %v11493_v8 = vld [vmem:[#allocation6 + $0x1e8] sm:$0xff]  ;;  %v11405_v14 = vld [vmem:[#allocation6 + $0x170] sm:$0xff] }
 0x5c9   : > { %22886 = vmatpush3.bf16.msra.mxu0 %v22885_v16  ;;  %22910 = vmatpush3.bf16.msra.mxu1 %v22909_v45 }
 0x5ca   : > { %22887 = vmatprep.subr.bf16.mxu0 %v24469_v12  ;;  %22911 = vmatprep.subr.bf16.mxu1 %v24469_v12 }
 0x5cc   : > { %v10855_v40 = vld [vmem:[#allocation4] sm:$0xff]  ;;  %v10856_v57 = vld [vmem:[#allocation4 + $0x8] sm:$0xff]  ;;  %v10857_v55 = vld [vmem:[#allocation4 + $0x10] sm:$0xff] }
 0x5cd   : > { %v10863_v41 = vld [vmem:[#allocation4 + $0x40] sm:$0xff]  ;;  %v10864_v19 = vld [vmem:[#allocation4 + $0x48] sm:$0xff]  ;;  %22889 = vmatpush3.bf16.msra.mxu0 %v22888_v51  ;;  %22913 = vmatpush3.bf16.msra.mxu1 %v22912_v37  ;;  %v10865_v43 = vld [vmem:[#allocation4 + $0x50] sm:$0xff] }
 0x5ce   : > { %v10922_v7 = vld [vmem:[#allocation4 + $0x2] sm:$0xff]  ;;  %v10923_v48 = vld [vmem:[#allocation4 + $0xa] sm:$0xff]  ;;  %22890 = vmatprep.subr.bf16.mxu0 %v24469_v12  ;;  %22914 = vmatprep.subr.bf16.mxu1 %v24469_v12  ;;  %v10924_v6 = vld [vmem:[#allocation4 + $0x12] sm:$0xff] }
 0x5cf   : > { %v10930_v34 = vld [vmem:[#allocation4 + $0x42] sm:$0xff]  ;;  %v10931_v3 = vld [vmem:[#allocation4 + $0x4a] sm:$0xff]  ;;  %v10989_v35 = vmax.f32 %v10855_v40, %v10922_v7  ;;  %v10990_v20 = vmax.f32 %v10856_v57, %v10923_v48  ;;  %v10932_v42 = vld [vmem:[#allocation4 + $0x52] sm:$0xff]  ;;  %v10991_v53 = vmax.f32 %v10857_v55, %v10924_v6  ;;  %v22930_v7 = vpack.c.bf16 %v11394_v27, %v11393_v46 }
 0x5d0   : > { %v10997_v30 = vmax.f32 %v10863_v41, %v10930_v34  ;;  %v10998_v32 = vmax.f32 %v10864_v19, %v10931_v3  ;;  %v10999_v2 = vmax.f32 %v10865_v43, %v10932_v42  ;;  %v11482_v40 = vld [vmem:[#allocation6 + $0x190] sm:$0xff]  ;;  %v10871_v54 = vld [vmem:[#allocation4 + $0x80] sm:$0xff]  ;;  %v11395_v34 = vld [vmem:[#allocation6 + $0x120] sm:$0xff]  ;;  %v22942_v42 = vpack.c.bf16 %v11402_v59, %v11401_v21 }
 0x5d1   : > { %22892 = vmatpush3.bf16.msra.mxu0 %v22891_v56  ;;  %22916 = vmatpush3.bf16.msra.mxu1 %v22915_v52  ;;  %v10879_v57 = vld [vmem:[#allocation4 + $0xc0] sm:$0xff]  ;;  %v22954_v48 = vpack.c.bf16 %v11483_v15, %v11482_v40  ;;  %v11486_v51 = vld [vmem:[#allocation6 + $0x1b0] sm:$0xff]  ;;  %v11487_v37 = vld [vmem:[#allocation6 + $0x1b8] sm:$0xff] }
 0x5d2   : > { %v28407_v63 = vmax.f32 %v10989_v35, %v10997_v30  ;;  %v28409_v47 = vmax.f32 %v10990_v20, %v10998_v32  ;;  %22893 = vmatprep.subr.bf16.mxu0 %v24469_v12  ;;  %22917 = vmatprep.subr.bf16.mxu1 %v24469_v12  ;;  %v28421_v24 = vmax.f32 %v10991_v53, %v10999_v2  ;;  %v10938_v41 = vld [vmem:[#allocation4 + $0x82] sm:$0xff]  ;;  %v11488_v56 = vld [vmem:[#allocation6 + $0x1c0] sm:$0xff]  ;;  %v10939_v4 = vld [vmem:[#allocation4 + $0x8a] sm:$0xff] }
 0x5d3   : > { %v10946_v19 = vld [vmem:[#allocation4 + $0xc2] sm:$0xff]  ;;  %v11005_v16 = vmax.f32 %v10871_v54, %v10938_v41  ;;  %v22933_v20 = vpack.c.bf16 %v11396_v36, %v11395_v34  ;;  %v22960_v60 = vpack.c.bf16 %v11487_v37, %v11486_v51  ;;  %v10947_v5 = vld [vmem:[#allocation4 + $0xca] sm:$0xff]  ;;  %v11403_v2 = vld [vmem:[#allocation6 + $0x160] sm:$0xff] }
 0x5d4   : > { %11147 = vst [vmem:[#allocation5] sm:$0xff] %v28407_v63  ;;  %11148 = vst [vmem:[#allocation5 + $0x8] sm:$0xff] %v28409_v47  ;;  %v11013_v45 = vmax.f32 %v10879_v57, %v10946_v19  ;;  %v11485_v3 = vld [vmem:[#allocation6 + $0x1a8] sm:$0xff]  ;;  %v11397_v32 = vld [vmem:[#allocation6 + $0x130] sm:$0xff] }
 0x5d5   : > { %22895 = vmatpush3.bf16.msra.mxu0 %v22894_v44  ;;  %22919 = vmatpush3.bf16.msra.mxu1 %v22918_v17  ;;  %11149 = vst [vmem:[#allocation5 + $0x10] sm:$0xff] %v28421_v24  ;;  %v22957_v30 = vpack.c.bf16 %v11485_v3, %v11484_v62  ;;  %v11489_v52 = vld [vmem:[#allocation6 + $0x1c8] sm:$0xff]  ;;  %v10872_v39 = vld [vmem:[#allocation4 + $0x88] sm:$0xff]  ;;  %v22939_v17 = vpack.c.bf16 %v11400_v22, %v11399_v9  ;;  %v11491_v6 = vld [vmem:[#allocation6 + $0x1d8] sm:$0xff] }
 0x5d6   : > { %22896 = vmatprep.subr.bf16.mxu0 %v24469_v12  ;;  %22920 = vmatprep.subr.bf16.mxu1 %v24469_v12  ;;  %v28431_v35 = vmax.f32 %v11005_v16, %v11013_v45  ;;  %v10880_v58 = vld [vmem:[#allocation4 + $0xc8] sm:$0xff]  ;;  %v11006_v50 = vmax.f32 %v10872_v39, %v10939_v4  ;;  %v22963_v49 = vpack.c.bf16 %v11489_v52, %v11488_v56  ;;  %v10873_v0 = vld [vmem:[#allocation4 + $0x90] sm:$0xff]  ;;  %v11569_v40 = vld [vmem:[#allocation6 + $0x200] sm:$0xff] }
 0x5d7   : > { %v11014_v44 = vmax.f32 %v10880_v58, %v10947_v5  ;;  %v11490_v43 = vld [vmem:[#allocation6 + $0x1d0] sm:$0xff]  ;;  %v10881_v18 = vld [vmem:[#allocation4 + $0xd0] sm:$0xff]  ;;  %v11570_v15 = vld [vmem:[#allocation6 + $0x208] sm:$0xff] }
 0x5d8   : > { %11163 = vst [vmem:[#allocation5 + $0x80] sm:$0xff] %v28431_v35  ;;  %v22966_v53 = vpack.c.bf16 %v11491_v6, %v11490_v43  ;;  %v10940_v26 = vld [vmem:[#allocation4 + $0x92] sm:$0xff]  ;;  %v11659_v57 = vld [vmem:[#allocation6 + $0x288] sm:$0xff]  ;;  %v22975_v19 = vpack.c.bf16 %v11570_v15, %v11569_v40  ;;  %v11660_v34 = vld [vmem:[#allocation6 + $0x290] sm:$0xff] }
 0x5d9   : > { %22898 = vmatpush3.bf16.msra.mxu0 %v22897_v23  ;;  %22922 = vmatpush3.bf16.msra.mxu1 %v22921_v1  ;;  %v28442_v55 = vmax.f32 %v11006_v50, %v11014_v44  ;;  %v11404_v23 = vld [vmem:[#allocation6 + $0x168] sm:$0xff]  ;;  %v11492_v1 = vld [vmem:[#allocation6 + $0x1e0] sm:$0xff]  ;;  %v11007_v27 = vmax.f32 %v10873_v0, %v10940_v26  ;;  %v11661_v36 = vld [vmem:[#allocation6 + $0x298] sm:$0xff] }
 0x5da   : > { %22899 = vmatprep.subr.bf16.mxu0 %v24469_v12  ;;  %22923 = vmatprep.subr.bf16.mxu1 %v24469_v12  ;;  %v22945_v31 = vpack.c.bf16 %v11404_v23, %v11403_v2  ;;  %v22969_v38 = vpack.c.bf16 %v11493_v8, %v11492_v1  ;;  %v10948_v46 = vld [vmem:[#allocation4 + $0xd2] sm:$0xff]  ;;  %v10887_v51 = vld [vmem:[#allocation4 + $0x100] sm:$0xff]  ;;  %v10896_v56 = vld [vmem:[#allocation4 + $0x148] sm:$0xff] }
 0x5db   : > { %v11231_v28 = vld [vmem:[#allocation5 + $0x4] sm:$0xff]  ;;  %11164 = vst [vmem:[#allocation5 + $0x88] sm:$0xff] %v28442_v55  ;;  %v11658_v54 = vld [vmem:[#allocation6 + $0x280] sm:$0xff]  ;;  %v11576_v50 = vld [vmem:[#allocation6 + $0x238] sm:$0xff] }
 0x5dc   : > { %v11478_v16 = vld [vmem:[#allocation5 + $0xc] sm:$0xff]  ;;  %v22999_v45 = vpack.c.bf16 %v11659_v57, %v11658_v54  ;;  %v11573_v62 = vld [vmem:[#allocation6 + $0x220] sm:$0xff]  ;;  %v10895_v37 = vld [vmem:[#allocation4 + $0x140] sm:$0xff] }
 0x5dd   : > { %22901 = vmatpush3.bf16.msra.mxu0 %v22900_v13  ;;  %22925 = vmatpush3.bf16.msra.mxu1 %v22924_v61  ;;  %v11406_v13 = vld [vmem:[#allocation6 + $0x178] sm:$0xff]  ;;  %v11494_v61 = vld [vmem:[#allocation6 + $0x1f0] sm:$0xff]  ;;  %v11578_v2 = vld [vmem:[#allocation6 + $0x248] sm:$0xff] }
 0x5de   : > { %22926 = vmatprep.subr.bf16.mxu0 %v24469_v12  ;;  %22950 = vmatprep.subr.bf16.mxu1 %v24469_v12  ;;  %v10954_v9 = vld [vmem:[#allocation4 + $0x102] sm:$0xff]  ;;  %v10955_v4 = vld [vmem:[#allocation4 + $0x10a] sm:$0xff]  ;;  %v11666_v23 = vld [vmem:[#allocation6 + $0x2c0] sm:$0xff] }
 0x5df   : > { %v11021_v22 = vmax.f32 %v10887_v51, %v10954_v9  ;;  %v11575_v58 = vld [vmem:[#allocation6 + $0x230] sm:$0xff]  ;;  %v11667_v1 = vld [vmem:[#allocation6 + $0x2c8] sm:$0xff]  ;;  %v10889_v15 = vld [vmem:[#allocation4 + $0x110] sm:$0xff] }
 0x5e0   : > { %20366 = vmatmul.mubr.f32.vlgmr.msra.gmra.mrb[0].mxu0 %v11231_v28  ;;  %20401 = vmatmul.mubr.f32.vlgmr.msra.gmra.mrb[0].mxu1 %v28407_v63  ;;  %v11398_v63 = vld [vmem:[#allocation6 + $0x138] sm:$0xff]  ;;  %v11015_v28 = vmax.f32 %v10881_v18, %v10948_v46  ;;  %v11664_v44 = vld [vmem:[#allocation6 + $0x2b0] sm:$0xff]  ;;  %v22984_v6 = vpack.c.bf16 %v11576_v50, %v11575_v58  ;;  %v11581_v18 = vld [vmem:[#allocation6 + $0x260] sm:$0xff] }
 0x5e1   : > { %22928 = vmatpush3.bf16.msra.mxu0 %v22927_v10  ;;  %22952 = vmatpush3.bf16.msra.mxu1 %v22951_v11  ;;  %v22936_v33 = vpack.c.bf16 %v11398_v63, %v11397_v32  ;;  %v22948_v10 = vpack.c.bf16 %v11406_v13, %v11405_v14  ;;  %v22972_v11 = vpack.c.bf16 %v11495_v25, %v11494_v61  ;;  %v11662_v32 = vld [vmem:[#allocation6 + $0x2a0] sm:$0xff]  ;;  %v11663_v63 = vld [vmem:[#allocation6 + $0x2a8] sm:$0xff]  ;;  %v10963_v5 = vld [vmem:[#allocation4 + $0x14a] sm:$0xff] }
 0x5e2   : > { %22929 = vmatprep.subr.bf16.mxu0 %v24469_v12  ;;  %22953 = vmatprep.subr.bf16.mxu1 %v24469_v12  ;;  %v28453_v41 = vmax.f32 %v11007_v27, %v11015_v28  ;;  %v23005_v39 = vpack.c.bf16 %v11663_v63, %v11662_v32  ;;  %v11030_v59 = vmax.f32 %v10896_v56, %v10963_v5  ;;  %v11668_v13 = vld [vmem:[#allocation6 + $0x2d0] sm:$0xff]  ;;  %v11669_v61 = vld [vmem:[#allocation6 + $0x2d8] sm:$0xff]  ;;  %v11582_v26 = vld [vmem:[#allocation6 + $0x268] sm:$0xff] }
 0x5e3   : > { %20435 = vmatprep.mubr.msk.f32.mxu0 %vm24470_vm0, %v24471_v29  ;;  %20470 = vmatprep.mubr.msk.f32.mxu1 %vm24470_vm0, %v24471_v29  ;;  %v23011_v14 = vpack.c.bf16 %v11667_v1, %v11666_v23  ;;  %v23014_v25 = vpack.c.bf16 %v11669_v61, %v11668_v13  ;;  %v11670_v46 = vld [vmem:[#allocation6 + $0x2e0] sm:$0xff]  ;;  %v11671_v27 = vld [vmem:[#allocation6 + $0x2e8] sm:$0xff]  ;;  %v11583_v28 = vld [vmem:[#allocation6 + $0x270] sm:$0xff] }
 0x5e4   : > { %11165 = vst [vmem:[#allocation5 + $0x90] sm:$0xff] %v28453_v41  ;;  %v23017_v40 = vpack.c.bf16 %v11671_v27, %v11670_v46  ;;  %v10897_v54 = vld [vmem:[#allocation4 + $0x150] sm:$0xff]  ;;  %v11837_v32 = vld [vmem:[#allocation6 + $0x388] sm:$0xff]  ;;  %v11751_v56 = vld [vmem:[#allocation6 + $0x320] sm:$0xff] }
 0x5e5   : > { %22931 = vmatpush3.bf16.msra.mxu0 %v22930_v7  ;;  %22955 = vmatpush3.bf16.msra.mxu1 %v22954_v48  ;;  %v11571_v7 = vld [vmem:[#allocation6 + $0x210] sm:$0xff]  ;;  %v11572_v48 = vld [vmem:[#allocation6 + $0x218] sm:$0xff]  ;;  %v11841_v58 = vld [vmem:[#allocation6 + $0x3a8] sm:$0xff] }
 0x5e6   : > { %22932 = vmatprep.subr.bf16.mxu0 %v24469_v12  ;;  %22956 = vmatprep.subr.bf16.mxu1 %v24469_v12  ;;  %v22978_v3 = vpack.c.bf16 %v11572_v48, %v11571_v7  ;;  %v10956_v57 = vld [vmem:[#allocation4 + $0x112] sm:$0xff]  ;;  %v11842_v50 = vld [vmem:[#allocation6 + $0x3b0] sm:$0xff] }
 0x5e7   : > { %v11023_v7 = vmax.f32 %v10889_v15, %v10956_v57  ;;  %v11750_v9 = vld [vmem:[#allocation6 + $0x318] sm:$0xff]  ;;  %v11757_v1 = vld [vmem:[#allocation6 + $0x350] sm:$0xff]  ;;  %v11759_v61 = vld [vmem:[#allocation6 + $0x360] sm:$0xff] }
 0x5e8   : > { %v11754_v5 = vld [vmem:[#allocation6 + $0x338] sm:$0xff]  ;;  %v11761_v27 = vld [vmem:[#allocation6 + $0x370] sm:$0xff]  ;;  %v11926_v57 = vld [vmem:[#allocation6 + $0x408] sm:$0xff] }
 0x5e9   : > { %22934 = vmatpush3.bf16.msra.mxu0 %v22933_v20  ;;  %22958 = vmatpush3.bf16.msra.mxu1 %v22957_v30  ;;  %v23002_v20 = vpack.c.bf16 %v11661_v36, %v11660_v34  ;;  %v11574_v30 = vld [vmem:[#allocation6 + $0x228] sm:$0xff] }
 0x5ea   : > { %22935 = vmatprep.subr.bf16.mxu0 %v24469_v12  ;;  %22959 = vmatprep.subr.bf16.mxu1 %v24469_v12  ;;  %v22981_v52 = vpack.c.bf16 %v11574_v30, %v11573_v62  ;;  %v11747_v62 = vld [vmem:[#allocation6 + $0x300] sm:$0xff] }
 0x5eb   : > { %v11836_v30 = vld [vmem:[#allocation6 + $0x380] sm:$0xff] }
 0x5ec   : > { %v23047_v51 = vpack.c.bf16 %v11837_v32, %v11836_v30  ;;  %v10970_v30 = vld [vmem:[#allocation4 + $0x182] sm:$0xff] }
 0x5ed   : > { %22937 = vmatpush3.bf16.msra.mxu0 %v22936_v33  ;;  %22961 = vmatpush3.bf16.msra.mxu1 %v22960_v60  ;;  %v10888_v60 = vld [vmem:[#allocation4 + $0x108] sm:$0xff] }
 0x5ee   : > { %22938 = vmatprep.subr.bf16.mxu0 %v24469_v12  ;;  %22962 = vmatprep.subr.bf16.mxu1 %v24469_v12  ;;  %v11022_v21 = vmax.f32 %v10888_v60, %v10955_v4  ;;  %v11753_v4 = vld [vmem:[#allocation6 + $0x330] sm:$0xff] }
 0x5ef   : > { %v12016_v32 = vld [vmem:[#allocation6 + $0x490] sm:$0xff] }
 0x5f0   : > { %v28470_v43 = vmax.f32 %v11022_v21, %v11030_v59  ;;  %v11755_v59 = vld [vmem:[#allocation6 + $0x340] sm:$0xff] }
 0x5f1   : > { %22940 = vmatpush3.bf16.msra.mxu0 %v22939_v17  ;;  %22964 = vmatpush3.bf16.msra.mxu1 %v22963_v49  ;;  %v11665_v17 = vld [vmem:[#allocation6 + $0x2b8] sm:$0xff] }
 0x5f2   : > { %22941 = vmatprep.subr.bf16.mxu0 %v24469_v12  ;;  %22965 = vmatprep.subr.bf16.mxu1 %v24469_v12  ;;  %11180 = vst [vmem:[#allocation5 + $0x108] sm:$0xff] %v28470_v43 }
 0x5f5   : > { %22943 = vmatpush3.bf16.msra.mxu0 %v22942_v42  ;;  %22967 = vmatpush3.bf16.msra.mxu1 %v22966_v53  ;;  %v23008_v42 = vpack.c.bf16 %v11665_v17, %v11664_v44  ;;  %v11577_v53 = vld [vmem:[#allocation6 + $0x240] sm:$0xff]  ;;  %v11843_v44 = vld [vmem:[#allocation6 + $0x3b8] sm:$0xff]  ;;  %v23032_v17 = vpack.c.bf16 %v11754_v5, %v11753_v4  ;;  %v12020_v4 = vld [vmem:[#allocation6 + $0x4b0] sm:$0xff] }
 0x5f6   : > { %22944 = vmatprep.subr.bf16.mxu0 %v24469_v12  ;;  %22968 = vmatprep.subr.bf16.mxu1 %v24469_v12  ;;  %v22987_v8 = vpack.c.bf16 %v11578_v2, %v11577_v53  ;;  %v23056_v21 = vpack.c.bf16 %v11843_v44, %v11842_v50  ;;  %v11845_v53 = vld [vmem:[#allocation6 + $0x3c8] sm:$0xff]  ;;  %v12021_v5 = vld [vmem:[#allocation6 + $0x4b8] sm:$0xff] }
 0x5f7   : > { %v23104_v44 = vpack.c.bf16 %v12021_v5, %v12020_v4 }
 0x5f9   : > { %22946 = vmatpush3.bf16.msra.mxu0 %v22945_v31  ;;  %22970 = vmatpush3.bf16.msra.mxu1 %v22969_v38  ;;  %v11579_v31 = vld [vmem:[#allocation6 + $0x250] sm:$0xff]  ;;  %v11580_v38 = vld [vmem:[#allocation6 + $0x258] sm:$0xff] }
 0x5fa   : > { %22947 = vmatprep.subr.bf16.mxu0 %v24469_v12  ;;  %22971 = vmatprep.subr.bf16.mxu1 %v24469_v12  ;;  %v22990_v0 = vpack.c.bf16 %v11580_v38, %v11579_v31  ;;  %v11847_v31 = vld [vmem:[#allocation6 + $0x3d8] sm:$0xff] }
 0x5fd   : > { %22949 = vmatpush3.bf16.msra.mxu0 %v22948_v10  ;;  %22973 = vmatpush3.bf16.msra.mxu1 %v22972_v11  ;;  %v11584_v10 = vld [vmem:[#allocation6 + $0x278] sm:$0xff]  ;;  %v22993_v11 = vpack.c.bf16 %v11582_v26, %v11581_v18  ;;  %v11849_v18 = vld [vmem:[#allocation6 + $0x3e8] sm:$0xff] }
 0x5fe   : > { %22974 = vmatprep.subr.bf16.mxu0 %v24469_v12  ;;  %22998 = vmatprep.subr.bf16.mxu1 %v24469_v12  ;;  %v22996_v34 = vpack.c.bf16 %v11584_v10, %v11583_v28  ;;  %v11762_v28 = vld [vmem:[#allocation6 + $0x378] sm:$0xff]  ;;  %v11850_v10 = vld [vmem:[#allocation6 + $0x3f0] sm:$0xff] }
 0x600   : > { %20436 = vmatmul.mubr.f32.vlgmr.msra.gmra.mrb[2].mxu0 %v28409_v47  ;;  %20471 = vmatmul.mubr.f32.vlgmr.msra.gmra.mrb[2].mxu1 %v11478_v16  ;;  %v10962_v47 = vld [vmem:[#allocation4 + $0x142] sm:$0xff]  ;;  %v11673_v16 = vld [vmem:[#allocation6 + $0x2f8] sm:$0xff] }
 0x601   : > { %22976 = vmatpush3.bf16.msra.mxu0 %v22975_v19  ;;  %23000 = vmatpush3.bf16.msra.mxu1 %v22999_v45  ;;  %v11029_v33 = vmax.f32 %v10895_v37, %v10962_v47  ;;  %v11672_v19 = vld [vmem:[#allocation6 + $0x2f0] sm:$0xff]  ;;  %v10964_v45 = vld [vmem:[#allocation4 + $0x152] sm:$0xff] }
 0x602   : > { %22977 = vmatprep.subr.bf16.mxu0 %v24469_v12  ;;  %23001 = vmatprep.subr.bf16.mxu1 %v24469_v12  ;;  %v11031_v48 = vmax.f32 %v10897_v54, %v10964_v45  ;;  %v23020_v36 = vpack.c.bf16 %v11673_v16, %v11672_v19  ;;  %v11749_v37 = vld [vmem:[#allocation6 + $0x310] sm:$0xff]  ;;  %v11925_v54 = vld [vmem:[#allocation6 + $0x400] sm:$0xff]  ;;  %v12015_v16 = vld [vmem:[#allocation6 + $0x488] sm:$0xff] }
 0x603   : > { %20505 = vmatprep.mubr.msk.f32.mxu0 %vm24470_vm0, %v24471_v29  ;;  %20540 = vmatprep.mubr.msk.f32.mxu1 %vm24470_vm0, %v24471_v29  ;;  %v28467_v49 = vmax.f32 %v11021_v22, %v11029_v33  ;;  %v11838_v47 = vld [vmem:[#allocation6 + $0x390] sm:$0xff]  ;;  %v11839_v22 = vld [vmem:[#allocation6 + $0x398] sm:$0xff]  ;;  %v23026_v33 = vpack.c.bf16 %v11750_v9, %v11749_v37  ;;  %v12014_v19 = vld [vmem:[#allocation6 + $0x480] sm:$0xff] }
 0x604   : > { %v23050_v60 = vpack.c.bf16 %v11839_v22, %v11838_v47  ;;  %v11745_v45 = vld [vmem:[#allocation5 + $0x84] sm:$0xff] }
 0x605   : > { %22979 = vmatpush3.bf16.msra.mxu0 %v22978_v3  ;;  %23003 = vmatpush3.bf16.msra.mxu1 %v23002_v20  ;;  %11179 = vst [vmem:[#allocation5 + $0x100] sm:$0xff] %v28467_v49  ;;  %v28481_v3 = vmax.f32 %v11023_v7, %v11031_v48  ;;  %v11748_v20 = vld [vmem:[#allocation6 + $0x308] sm:$0xff]  ;;  %v11927_v7 = vld [vmem:[#allocation6 + $0x410] sm:$0xff]  ;;  %v11928_v48 = vld [vmem:[#allocation6 + $0x418] sm:$0xff] }
 0x606   : > { %22980 = vmatprep.subr.bf16.mxu0 %v24469_v12  ;;  %23004 = vmatprep.subr.bf16.mxu1 %v24469_v12  ;;  %v23023_v63 = vpack.c.bf16 %v11748_v20, %v11747_v62  ;;  %v10903_v62 = vld [vmem:[#allocation4 + $0x180] sm:$0xff]  ;;  %v23074_v47 = vpack.c.bf16 %v11928_v48, %v11927_v7  ;;  %v12103_v7 = vld [vmem:[#allocation6 + $0x500] sm:$0xff] }
 0x607   : > { %11181 = vst [vmem:[#allocation5 + $0x110] sm:$0xff] %v28481_v3  ;;  %v10911_v20 = vld [vmem:[#allocation4 + $0x1c0] sm:$0xff]  ;;  %v11037_v37 = vmax.f32 %v10903_v62, %v10970_v30  ;;  %v11923_v62 = vld [vmem:[#allocation5 + $0x8c] sm:$0xff] }
 0x608   : > { %v12104_v48 = vld [vmem:[#allocation6 + $0x508] sm:$0xff] }
 0x609   : > { %22982 = vmatpush3.bf16.msra.mxu0 %v22981_v52  ;;  %23006 = vmatpush3.bf16.msra.mxu1 %v23005_v39  ;;  %v11752_v52 = vld [vmem:[#allocation6 + $0x328] sm:$0xff]  ;;  %v11840_v39 = vld [vmem:[#allocation6 + $0x3a0] sm:$0xff] }
 0x60a   : > { %22983 = vmatprep.subr.bf16.mxu0 %v24469_v12  ;;  %23007 = vmatprep.subr.bf16.mxu1 %v24469_v12 }
 0x60d   : > { %22985 = vmatpush3.bf16.msra.mxu0 %v22984_v6  ;;  %23009 = vmatpush3.bf16.msra.mxu1 %v23008_v42  ;;  %v11756_v6 = vld [vmem:[#allocation6 + $0x348] sm:$0xff]  ;;  %v11844_v42 = vld [vmem:[#allocation6 + $0x3c0] sm:$0xff] }
 0x60e   : > { %22986 = vmatprep.subr.bf16.mxu0 %v24469_v12  ;;  %23010 = vmatprep.subr.bf16.mxu1 %v24469_v12  ;;  %v23035_v2 = vpack.c.bf16 %v11756_v6, %v11755_v59  ;;  %v23059_v23 = vpack.c.bf16 %v11845_v53, %v11844_v42  ;;  %v12022_v59 = vld [vmem:[#allocation6 + $0x4c0] sm:$0xff]  ;;  %v12023_v6 = vld [vmem:[#allocation6 + $0x4c8] sm:$0xff] }
 0x60f   : > { %v23107_v53 = vpack.c.bf16 %v12023_v6, %v12022_v59 }
 0x611   : > { %22988 = vmatpush3.bf16.msra.mxu0 %v22987_v8  ;;  %23012 = vmatpush3.bf16.msra.mxu1 %v23011_v14  ;;  %v11758_v8 = vld [vmem:[#allocation6 + $0x358] sm:$0xff]  ;;  %v11846_v14 = vld [vmem:[#allocation6 + $0x3d0] sm:$0xff] }
 0x612   : > { %22989 = vmatprep.subr.bf16.mxu0 %v24469_v12  ;;  %23013 = vmatprep.subr.bf16.mxu1 %v24469_v12  ;;  %v23038_v38 = vpack.c.bf16 %v11758_v8, %v11757_v1  ;;  %v23062_v13 = vpack.c.bf16 %v11847_v31, %v11846_v14  ;;  %v12024_v1 = vld [vmem:[#allocation6 + $0x4d0] sm:$0xff]  ;;  %v12025_v8 = vld [vmem:[#allocation6 + $0x4d8] sm:$0xff] }
 0x613   : > { %v23110_v31 = vpack.c.bf16 %v12025_v8, %v12024_v1 }
 0x615   : > { %22991 = vmatpush3.bf16.msra.mxu0 %v22990_v0  ;;  %23015 = vmatpush3.bf16.msra.mxu1 %v23014_v25  ;;  %v11760_v0 = vld [vmem:[#allocation6 + $0x368] sm:$0xff]  ;;  %v11848_v25 = vld [vmem:[#allocation6 + $0x3e0] sm:$0xff] }
 0x616   : > { %22992 = vmatprep.subr.bf16.mxu0 %v24469_v12  ;;  %23016 = vmatprep.subr.bf16.mxu1 %v24469_v12  ;;  %v23041_v26 = vpack.c.bf16 %v11760_v0, %v11759_v61  ;;  %v23065_v46 = vpack.c.bf16 %v11849_v18, %v11848_v25  ;;  %v12026_v61 = vld [vmem:[#allocation6 + $0x4e0] sm:$0xff]  ;;  %v12027_v0 = vld [vmem:[#allocation6 + $0x4e8] sm:$0xff]  ;;  %v10904_v25 = vld [vmem:[#allocation4 + $0x188] sm:$0xff] }
 0x617   : > { %v10912_v18 = vld [vmem:[#allocation4 + $0x1c8] sm:$0xff] }
 0x619   : > { %22994 = vmatpush3.bf16.msra.mxu0 %v22993_v11  ;;  %23018 = vmatpush3.bf16.msra.mxu1 %v23017_v40  ;;  %v11851_v11 = vld [vmem:[#allocation6 + $0x3f8] sm:$0xff]  ;;  %v23044_v40 = vpack.c.bf16 %v11762_v28, %v11761_v27 }
 0x61a   : > { %22995 = vmatprep.subr.bf16.mxu0 %v24469_v12  ;;  %23019 = vmatprep.subr.bf16.mxu1 %v24469_v12  ;;  %v23068_v15 = vpack.c.bf16 %v11851_v11, %v11850_v10  ;;  %v23113_v10 = vpack.c.bf16 %v12027_v0, %v12026_v61  ;;  %v11939_v11 = vld [vmem:[#allocation6 + $0x470] sm:$0xff]  ;;  %v10905_v61 = vld [vmem:[#allocation4 + $0x190] sm:$0xff] }
 0x61b   : > { %v10913_v0 = vld [vmem:[#allocation4 + $0x1d0] sm:$0xff] }
 0x61d   : > { %22997 = vmatpush3.bf16.msra.mxu0 %v22996_v34  ;;  %23021 = vmatpush3.bf16.msra.mxu1 %v23020_v36  ;;  %v23071_v34 = vpack.c.bf16 %v11926_v57, %v11925_v54  ;;  %v23095_v36 = vpack.c.bf16 %v12015_v16, %v12014_v19  ;;  %v12028_v54 = vld [vmem:[#allocation6 + $0x4f0] sm:$0xff]  ;;  %v12029_v57 = vld [vmem:[#allocation6 + $0x4f8] sm:$0xff] }
 0x61e   : > { %23022 = vmatprep.subr.bf16.mxu0 %v24469_v12  ;;  %23046 = vmatprep.subr.bf16.mxu1 %v24469_v12 }
 0x620   : > { %20506 = vmatmul.mubr.f32.vlgmr.msra.gmra.mrb[4].mxu0 %v28421_v24  ;;  %20541 = vmatmul.mubr.f32.vlgmr.msra.gmra.mrb[4].mxu1 %v28431_v35  ;;  %v23029_v24 = vpack.c.bf16 %v11752_v52, %v11751_v56  ;;  %v23053_v35 = vpack.c.bf16 %v11841_v58, %v11840_v39  ;;  %v11930_v56 = vld [vmem:[#allocation6 + $0x428] sm:$0xff]  ;;  %v12018_v52 = vld [vmem:[#allocation6 + $0x4a0] sm:$0xff] }
 0x621   : > { %23024 = vmatpush3.bf16.msra.mxu0 %v23023_v63  ;;  %23048 = vmatpush3.bf16.msra.mxu1 %v23047_v51  ;;  %v12017_v63 = vld [vmem:[#allocation6 + $0x498] sm:$0xff]  ;;  %v10978_v51 = vld [vmem:[#allocation4 + $0x1c2] sm:$0xff] }
 0x622   : > { %23025 = vmatprep.subr.bf16.mxu0 %v24469_v12  ;;  %23049 = vmatprep.subr.bf16.mxu1 %v24469_v12  ;;  %v11045_v9 = vmax.f32 %v10911_v20, %v10978_v51  ;;  %v23098_v22 = vpack.c.bf16 %v12017_v63, %v12016_v32  ;;  %v12019_v39 = vld [vmem:[#allocation6 + $0x4a8] sm:$0xff]  ;;  %v23119_v20 = vpack.c.bf16 %v12104_v48, %v12103_v7  ;;  %v12105_v32 = vld [vmem:[#allocation6 + $0x510] sm:$0xff]  ;;  %v12106_v63 = vld [vmem:[#allocation6 + $0x518] sm:$0xff] }
 0x623   : > { %20575 = vmatprep.mubr.msk.f32.mxu0 %vm24470_vm0, %v24471_v29  ;;  %20610 = vmatprep.mubr.msk.f32.mxu1 %vm24470_vm0, %v24471_v29  ;;  %v23101_v58 = vpack.c.bf16 %v12019_v39, %v12018_v52  ;;  %v12194_v51 = vld [vmem:[#allocation6 + $0x590] sm:$0xff]  ;;  %v12197_v52 = vld [vmem:[#allocation6 + $0x5a8] sm:$0xff]  ;;  %v12370_v48 = vld [vmem:[#allocation6 + $0x680] sm:$0xff] }
 0x624   : > { %v12282_v7 = vld [vmem:[#allocation6 + $0x608] sm:$0xff] }
 0x625   : > { %23027 = vmatpush3.bf16.msra.mxu0 %v23026_v33  ;;  %23051 = vmatpush3.bf16.msra.mxu1 %v23050_v60  ;;  %v11929_v33 = vld [vmem:[#allocation6 + $0x420] sm:$0xff]  ;;  %v28511_v60 = vmax.f32 %v11037_v37, %v11045_v9  ;;  %v12195_v37 = vld [vmem:[#allocation6 + $0x598] sm:$0xff]  ;;  %v23122_v9 = vpack.c.bf16 %v12106_v63, %v12105_v32  ;;  %v12372_v63 = vld [vmem:[#allocation6 + $0x690] sm:$0xff] }
 0x626   : > { %23028 = vmatprep.subr.bf16.mxu0 %v24469_v12  ;;  %23052 = vmatprep.subr.bf16.mxu1 %v24469_v12  ;;  %v12284_v32 = vld [vmem:[#allocation6 + $0x618] sm:$0xff] }
 0x627   : > { %11195 = vst [vmem:[#allocation5 + $0x180] sm:$0xff] %v28511_v60 }
 0x629   : > { %23030 = vmatpush3.bf16.msra.mxu0 %v23029_v24  ;;  %23054 = vmatpush3.bf16.msra.mxu1 %v23053_v35  ;;  %v11931_v24 = vld [vmem:[#allocation6 + $0x430] sm:$0xff]  ;;  %v11932_v35 = vld [vmem:[#allocation6 + $0x438] sm:$0xff] }
 0x62a   : > { %23031 = vmatprep.subr.bf16.mxu0 %v24469_v12  ;;  %23055 = vmatprep.subr.bf16.mxu1 %v24469_v12  ;;  %v23080_v50 = vpack.c.bf16 %v11932_v35, %v11931_v24  ;;  %v12198_v24 = vld [vmem:[#allocation6 + $0x5b0] sm:$0xff]  ;;  %v12199_v35 = vld [vmem:[#allocation6 + $0x5b8] sm:$0xff] }
 0x62b   : > { %v23152_v5 = vpack.c.bf16 %v12199_v35, %v12198_v24 }
 0x62d   : > { %23033 = vmatpush3.bf16.msra.mxu0 %v23032_v17  ;;  %23057 = vmatpush3.bf16.msra.mxu1 %v23056_v21  ;;  %v11933_v17 = vld [vmem:[#allocation6 + $0x440] sm:$0xff]  ;;  %v11934_v21 = vld [vmem:[#allocation6 + $0x448] sm:$0xff] }
 0x62e   : > { %23034 = vmatprep.subr.bf16.mxu0 %v24469_v12  ;;  %23058 = vmatprep.subr.bf16.mxu1 %v24469_v12  ;;  %v23083_v42 = vpack.c.bf16 %v11934_v21, %v11933_v17  ;;  %v12200_v17 = vld [vmem:[#allocation6 + $0x5c0] sm:$0xff]  ;;  %v12201_v21 = vld [vmem:[#allocation6 + $0x5c8] sm:$0xff] }
 0x62f   : > { %v23155_v6 = vpack.c.bf16 %v12201_v21, %v12200_v17 }
 0x631   : > { %23036 = vmatpush3.bf16.msra.mxu0 %v23035_v2  ;;  %23060 = vmatpush3.bf16.msra.mxu1 %v23059_v23  ;;  %v11935_v2 = vld [vmem:[#allocation6 + $0x450] sm:$0xff]  ;;  %v11936_v23 = vld [vmem:[#allocation6 + $0x458] sm:$0xff] }
 0x632   : > { %23037 = vmatprep.subr.bf16.mxu0 %v24469_v12  ;;  %23061 = vmatprep.subr.bf16.mxu1 %v24469_v12  ;;  %v23086_v14 = vpack.c.bf16 %v11936_v23, %v11935_v2  ;;  %v12202_v2 = vld [vmem:[#allocation6 + $0x5d0] sm:$0xff]  ;;  %v12203_v23 = vld [vmem:[#allocation6 + $0x5d8] sm:$0xff] }
 0x633   : > { %v23158_v8 = vpack.c.bf16 %v12203_v23, %v12202_v2 }
 0x635   : > { %23039 = vmatpush3.bf16.msra.mxu0 %v23038_v38  ;;  %23063 = vmatpush3.bf16.msra.mxu1 %v23062_v13  ;;  %v11937_v38 = vld [vmem:[#allocation6 + $0x460] sm:$0xff]  ;;  %v11938_v13 = vld [vmem:[#allocation6 + $0x468] sm:$0xff] }
 0x636   : > { %23040 = vmatprep.subr.bf16.mxu0 %v24469_v12  ;;  %23064 = vmatprep.subr.bf16.mxu1 %v24469_v12  ;;  %v23089_v28 = vpack.c.bf16 %v11938_v13, %v11937_v38  ;;  %v12204_v38 = vld [vmem:[#allocation6 + $0x5e0] sm:$0xff]  ;;  %v12205_v13 = vld [vmem:[#allocation6 + $0x5e8] sm:$0xff] }
 0x639   : > { %23042 = vmatpush3.bf16.msra.mxu0 %v23041_v26  ;;  %23066 = vmatpush3.bf16.msra.mxu1 %v23065_v46  ;;  %v10971_v26 = vld [vmem:[#allocation4 + $0x18a] sm:$0xff] }
 0x63a   : > { %23043 = vmatprep.subr.bf16.mxu0 %v24469_v12  ;;  %23067 = vmatprep.subr.bf16.mxu1 %v24469_v12  ;;  %v10979_v46 = vld [vmem:[#allocation4 + $0x1ca] sm:$0xff]  ;;  %v11038_v27 = vmax.f32 %v10904_v25, %v10971_v26  ;;  %v10972_v25 = vld [vmem:[#allocation4 + $0x192] sm:$0xff] }
 0x63b   : > { %v11039_v26 = vmax.f32 %v10905_v61, %v10972_v25  ;;  %v10919_v25 = vld [vmem:[#allocation4 + $0x200] sm:$0xff] }
 0x63d   : > { %23045 = vmatpush3.bf16.msra.mxu0 %v23044_v40  ;;  %23069 = vmatpush3.bf16.msra.mxu1 %v23068_v15  ;;  %v11046_v40 = vmax.f32 %v10912_v18, %v10979_v46  ;;  %v11940_v15 = vld [vmem:[#allocation6 + $0x478] sm:$0xff] }
 0x63e   : > { %23070 = vmatprep.subr.bf16.mxu0 %v24469_v12  ;;  %23094 = vmatprep.subr.bf16.mxu1 %v24469_v12  ;;  %v23092_v16 = vpack.c.bf16 %v11940_v15, %v11939_v11  ;;  %v10980_v18 = vld [vmem:[#allocation4 + $0x1d2] sm:$0xff] }
 0x63f   : > { %v28530_v19 = vmax.f32 %v11038_v27, %v11046_v40  ;;  %v23161_v27 = vpack.c.bf16 %v12205_v13, %v12204_v38  ;;  %v12118_v11 = vld [vmem:[#allocation6 + $0x578] sm:$0xff]  ;;  %v12206_v40 = vld [vmem:[#allocation6 + $0x5f0] sm:$0xff] }
 0x640   : > { %20576 = vmatmul.mubr.f32.vlgmr.msra.gmra.mrb[6].mxu0 %v11745_v45  ;;  %20611 = vmatmul.mubr.f32.vlgmr.msra.gmra.mrb[6].mxu1 %v28442_v55  ;;  %v23077_v55 = vpack.c.bf16 %v11930_v56, %v11929_v33  ;;  %v23116_v45 = vpack.c.bf16 %v12029_v57, %v12028_v54  ;;  %v12108_v33 = vld [vmem:[#allocation6 + $0x528] sm:$0xff]  ;;  %v12196_v56 = vld [vmem:[#allocation6 + $0x5a0] sm:$0xff]  ;;  %v12207_v15 = vld [vmem:[#allocation6 + $0x5f8] sm:$0xff] }
 0x641   : > { %23072 = vmatpush3.bf16.msra.mxu0 %v23071_v34  ;;  %23096 = vmatpush3.bf16.msra.mxu1 %v23095_v36  ;;  %11196 = vst [vmem:[#allocation5 + $0x188] sm:$0xff] %v28530_v19  ;;  %v12192_v34 = vld [vmem:[#allocation6 + $0x580] sm:$0xff]  ;;  %v12193_v36 = vld [vmem:[#allocation6 + $0x588] sm:$0xff]  ;;  %v23149_v39 = vpack.c.bf16 %v12197_v52, %v12196_v56  ;;  %v12295_v38 = vld [vmem:[#allocation6 + $0x670] sm:$0xff] }
 0x642   : > { %23073 = vmatprep.subr.bf16.mxu0 %v24469_v12  ;;  %23097 = vmatprep.subr.bf16.mxu1 %v24469_v12  ;;  %v23143_v30 = vpack.c.bf16 %v12193_v36, %v12192_v34  ;;  %v12371_v34 = vld [vmem:[#allocation6 + $0x688] sm:$0xff]  ;;  %v12296_v13 = vld [vmem:[#allocation6 + $0x678] sm:$0xff] }
 0x643   : > { %20645 = vmatprep.mubr.msk.f32.mxu0 %vm24470_vm0, %v24471_v29  ;;  %20680 = vmatprep.mubr.msk.f32.mxu1 %vm24470_vm0, %v24471_v29  ;;  %v12375_v56 = vld [vmem:[#allocation6 + $0x6a8] sm:$0xff] }
 0x645   : > { %23075 = vmatpush3.bf16.msra.mxu0 %v23074_v47  ;;  %23099 = vmatpush3.bf16.msra.mxu1 %v23098_v22  ;;  %v23146_v47 = vpack.c.bf16 %v12195_v37, %v12194_v51  ;;  %v12107_v22 = vld [vmem:[#allocation6 + $0x520] sm:$0xff]  ;;  %v12373_v51 = vld [vmem:[#allocation6 + $0x698] sm:$0xff] }
 0x646   : > { %23076 = vmatprep.subr.bf16.mxu0 %v24469_v12  ;;  %23100 = vmatprep.subr.bf16.mxu1 %v24469_v12 }
 0x649   : > { %23078 = vmatpush3.bf16.msra.mxu0 %v23077_v55  ;;  %23102 = vmatpush3.bf16.msra.mxu1 %v23101_v58  ;;  %v12109_v55 = vld [vmem:[#allocation6 + $0x530] sm:$0xff]  ;;  %v12110_v58 = vld [vmem:[#allocation6 + $0x538] sm:$0xff] }
 0x64a   : > { %23079 = vmatprep.subr.bf16.mxu0 %v24469_v12  ;;  %23103 = vmatprep.subr.bf16.mxu1 %v24469_v12  ;;  %v23128_v4 = vpack.c.bf16 %v12110_v58, %v12109_v55  ;;  %v12376_v55 = vld [vmem:[#allocation6 + $0x6b0] sm:$0xff]  ;;  %v12377_v58 = vld [vmem:[#allocation6 + $0x6b8] sm:$0xff] }
 0x64b   : > { %v23200_v35 = vpack.c.bf16 %v12377_v58, %v12376_v55  ;;  %v12552_v55 = vld [vmem:[#allocation6 + $0x7a0] sm:$0xff]  ;;  %v12553_v58 = vld [vmem:[#allocation6 + $0x7a8] sm:$0xff] }
 0x64d   : > { %23081 = vmatpush3.bf16.msra.mxu0 %v23080_v50  ;;  %23105 = vmatpush3.bf16.msra.mxu1 %v23104_v44  ;;  %v12111_v50 = vld [vmem:[#allocation6 + $0x540] sm:$0xff]  ;;  %v12112_v44 = vld [vmem:[#allocation6 + $0x548] sm:$0xff] }
 0x64e   : > { %23082 = vmatprep.subr.bf16.mxu0 %v24469_v12  ;;  %23106 = vmatprep.subr.bf16.mxu1 %v24469_v12  ;;  %v23131_v59 = vpack.c.bf16 %v12112_v44, %v12111_v50  ;;  %v12378_v50 = vld [vmem:[#allocation6 + $0x6c0] sm:$0xff]  ;;  %v12379_v44 = vld [vmem:[#allocation6 + $0x6c8] sm:$0xff] }
 0x64f   : > { %v23203_v21 = vpack.c.bf16 %v12379_v44, %v12378_v50  ;;  %v12555_v50 = vld [vmem:[#allocation6 + $0x7b8] sm:$0xff] }
 0x651   : > { %23084 = vmatpush3.bf16.msra.mxu0 %v23083_v42  ;;  %23108 = vmatpush3.bf16.msra.mxu1 %v23107_v53  ;;  %v12113_v42 = vld [vmem:[#allocation6 + $0x550] sm:$0xff]  ;;  %v12114_v53 = vld [vmem:[#allocation6 + $0x558] sm:$0xff] }
 0x652   : > { %23085 = vmatprep.subr.bf16.mxu0 %v24469_v12  ;;  %23109 = vmatprep.subr.bf16.mxu1 %v24469_v12  ;;  %v23134_v1 = vpack.c.bf16 %v12114_v53, %v12113_v42  ;;  %v12380_v42 = vld [vmem:[#allocation6 + $0x6d0] sm:$0xff]  ;;  %v12381_v53 = vld [vmem:[#allocation6 + $0x6d8] sm:$0xff] }
 0x653   : > { %v23206_v23 = vpack.c.bf16 %v12381_v53, %v12380_v42  ;;  %v12557_v42 = vld [vmem:[#allocation6 + $0x7c8] sm:$0xff] }
 0x655   : > { %23087 = vmatpush3.bf16.msra.mxu0 %v23086_v14  ;;  %23111 = vmatpush3.bf16.msra.mxu1 %v23110_v31  ;;  %v12115_v14 = vld [vmem:[#allocation6 + $0x560] sm:$0xff]  ;;  %v12116_v31 = vld [vmem:[#allocation6 + $0x568] sm:$0xff] }
 0x656   : > { %23088 = vmatprep.subr.bf16.mxu0 %v24469_v12  ;;  %23112 = vmatprep.subr.bf16.mxu1 %v24469_v12  ;;  %v23137_v46 = vpack.c.bf16 %v12116_v31, %v12115_v14  ;;  %v12382_v14 = vld [vmem:[#allocation6 + $0x6e0] sm:$0xff]  ;;  %v12383_v31 = vld [vmem:[#allocation6 + $0x6e8] sm:$0xff] }
 0x659   : > { %23090 = vmatpush3.bf16.msra.mxu0 %v23089_v28  ;;  %23114 = vmatpush3.bf16.msra.mxu1 %v23113_v10  ;;  %v12117_v28 = vld [vmem:[#allocation6 + $0x570] sm:$0xff]  ;;  %v11047_v10 = vmax.f32 %v10913_v0, %v10980_v18  ;;  %v23209_v0 = vpack.c.bf16 %v12383_v31, %v12382_v14  ;;  %v12559_v14 = vld [vmem:[#allocation6 + $0x7d8] sm:$0xff] }
 0x65a   : > { %23091 = vmatprep.subr.bf16.mxu0 %v24469_v12  ;;  %23115 = vmatprep.subr.bf16.mxu1 %v24469_v12  ;;  %v23140_v57 = vpack.c.bf16 %v12118_v11, %v12117_v28  ;;  %v10986_v18 = vld [vmem:[#allocation4 + $0x202] sm:$0xff] }
 0x65b   : > { %v28554_v54 = vmax.f32 %v11039_v26, %v11047_v10  ;;  %v11061_v26 = vld [vmem:[#allocation4 + $0x240] sm:$0xff]  ;;  %v11053_v28 = vmax.f32 %v10919_v25, %v10986_v18 }
 0x65c   : > { %v11069_v10 = vld [vmem:[#allocation4 + $0x242] sm:$0xff] }
 0x65d   : > { %23093 = vmatpush3.bf16.msra.mxu0 %v23092_v16  ;;  %23117 = vmatpush3.bf16.msra.mxu1 %v23116_v45  ;;  %v23164_v16 = vpack.c.bf16 %v12207_v15, %v12206_v40  ;;  %v12281_v45 = vld [vmem:[#allocation6 + $0x600] sm:$0xff]  ;;  %11197 = vst [vmem:[#allocation5 + $0x190] sm:$0xff] %v28554_v54  ;;  %v11077_v11 = vmax.f32 %v11061_v26, %v11069_v10  ;;  %v10920_v40 = vld [vmem:[#allocation4 + $0x208] sm:$0xff]  ;;  %v12561_v25 = vld [vmem:[#allocation6 + $0x7e8] sm:$0xff] }
 0x65e   : > { %23118 = vmatprep.subr.bf16.mxu0 %v24469_v12  ;;  %23142 = vmatprep.subr.bf16.mxu1 %v24469_v12  ;;  %v23167_v36 = vpack.c.bf16 %v12282_v7, %v12281_v45  ;;  %v10987_v15 = vld [vmem:[#allocation4 + $0x20a] sm:$0xff] }
 0x65f   : > { %v11054_v45 = vmax.f32 %v10920_v40, %v10987_v15  ;;  %v11070_v7 = vld [vmem:[#allocation4 + $0x24a] sm:$0xff] }
 0x660   : > { %20646 = vmatmul.mubr.f32.vlgmr.msra.gmra.mrb[8].mxu0 %v11923_v62  ;;  %20681 = vmatmul.mubr.f32.vlgmr.msra.gmra.mrb[8].mxu1 %v28453_v41  ;;  %v23125_v41 = vpack.c.bf16 %v12108_v33, %v12107_v22  ;;  %v12190_v62 = vld [vmem:[#allocation5 + $0x104] sm:$0xff]  ;;  %v12374_v33 = vld [vmem:[#allocation6 + $0x6a0] sm:$0xff]  ;;  %v12474_v10 = vld [vmem:[#allocation6 + $0x778] sm:$0xff] }
 0x661   : > { %23120 = vmatpush3.bf16.msra.mxu0 %v23119_v20  ;;  %23144 = vmatpush3.bf16.msra.mxu1 %v23143_v30  ;;  %v23191_v20 = vpack.c.bf16 %v12371_v34, %v12370_v48  ;;  %v12283_v30 = vld [vmem:[#allocation6 + $0x610] sm:$0xff]  ;;  %v12286_v22 = vld [vmem:[#allocation6 + $0x628] sm:$0xff]  ;;  %v23197_v52 = vpack.c.bf16 %v12375_v56, %v12374_v33  ;;  %v12459_v34 = vld [vmem:[#allocation6 + $0x700] sm:$0xff] }
 0x662   : > { %23121 = vmatprep.subr.bf16.mxu0 %v24469_v12  ;;  %23145 = vmatprep.subr.bf16.mxu1 %v24469_v12  ;;  %v23170_v37 = vpack.c.bf16 %v12284_v32, %v12283_v30  ;;  %v12548_v30 = vld [vmem:[#allocation6 + $0x780] sm:$0xff]  ;;  %v12549_v32 = vld [vmem:[#allocation6 + $0x788] sm:$0xff]  ;;  %v12550_v33 = vld [vmem:[#allocation6 + $0x790] sm:$0xff] }
 0x663   : > { %20715 = vmatprep.mubr.msk.f32.mxu0 %vm24470_vm0, %v24471_v29  ;;  %20750 = vmatprep.mubr.msk.f32.mxu1 %vm24470_vm0, %v24471_v29  ;;  %v12551_v56 = vld [vmem:[#allocation6 + $0x798] sm:$0xff] }
 0x665   : > { %23123 = vmatpush3.bf16.msra.mxu0 %v23122_v9  ;;  %23147 = vmatpush3.bf16.msra.mxu1 %v23146_v47  ;;  %v23194_v9 = vpack.c.bf16 %v12373_v51, %v12372_v63  ;;  %v12285_v47 = vld [vmem:[#allocation6 + $0x620] sm:$0xff] }
 0x666   : > { %23124 = vmatprep.subr.bf16.mxu0 %v24469_v12  ;;  %23148 = vmatprep.subr.bf16.mxu1 %v24469_v12 }
 0x669   : > { %23126 = vmatpush3.bf16.msra.mxu0 %v23125_v41  ;;  %23150 = vmatpush3.bf16.msra.mxu1 %v23149_v39  ;;  %v12287_v41 = vld [vmem:[#allocation6 + $0x630] sm:$0xff]  ;;  %v12288_v39 = vld [vmem:[#allocation6 + $0x638] sm:$0xff] }
 0x66a   : > { %23127 = vmatprep.subr.bf16.mxu0 %v24469_v12  ;;  %23151 = vmatprep.subr.bf16.mxu1 %v24469_v12  ;;  %v23176_v24 = vpack.c.bf16 %v12288_v39, %v12287_v41  ;;  %v12463_v41 = vld [vmem:[#allocation6 + $0x720] sm:$0xff]  ;;  %v12464_v39 = vld [vmem:[#allocation6 + $0x728] sm:$0xff] }
 0x66d   : > { %23129 = vmatpush3.bf16.msra.mxu0 %v23128_v4  ;;  %23153 = vmatpush3.bf16.msra.mxu1 %v23152_v5  ;;  %v12289_v4 = vld [vmem:[#allocation6 + $0x640] sm:$0xff]  ;;  %v12290_v5 = vld [vmem:[#allocation6 + $0x648] sm:$0xff] }
 0x66e   : > { %23130 = vmatprep.subr.bf16.mxu0 %v24469_v12  ;;  %23154 = vmatprep.subr.bf16.mxu1 %v24469_v12  ;;  %v23179_v17 = vpack.c.bf16 %v12290_v5, %v12289_v4  ;;  %v12466_v4 = vld [vmem:[#allocation6 + $0x738] sm:$0xff]  ;;  %v12554_v5 = vld [vmem:[#allocation6 + $0x7b0] sm:$0xff] }
 0x671   : > { %23132 = vmatpush3.bf16.msra.mxu0 %v23131_v59  ;;  %23156 = vmatpush3.bf16.msra.mxu1 %v23155_v6  ;;  %v12291_v59 = vld [vmem:[#allocation6 + $0x650] sm:$0xff]  ;;  %v12292_v6 = vld [vmem:[#allocation6 + $0x658] sm:$0xff] }
 0x672   : > { %23133 = vmatprep.subr.bf16.mxu0 %v24469_v12  ;;  %23157 = vmatprep.subr.bf16.mxu1 %v24469_v12  ;;  %v23182_v2 = vpack.c.bf16 %v12292_v6, %v12291_v59  ;;  %v12468_v59 = vld [vmem:[#allocation6 + $0x748] sm:$0xff]  ;;  %v12556_v6 = vld [vmem:[#allocation6 + $0x7c0] sm:$0xff] }
 0x675   : > { %23135 = vmatpush3.bf16.msra.mxu0 %v23134_v1  ;;  %23159 = vmatpush3.bf16.msra.mxu1 %v23158_v8  ;;  %v12293_v1 = vld [vmem:[#allocation6 + $0x660] sm:$0xff]  ;;  %v12294_v8 = vld [vmem:[#allocation6 + $0x668] sm:$0xff] }
 0x676   : > { %23136 = vmatprep.subr.bf16.mxu0 %v24469_v12  ;;  %23160 = vmatprep.subr.bf16.mxu1 %v24469_v12  ;;  %v23185_v61 = vpack.c.bf16 %v12294_v8, %v12293_v1  ;;  %v12470_v1 = vld [vmem:[#allocation6 + $0x758] sm:$0xff]  ;;  %v12558_v8 = vld [vmem:[#allocation6 + $0x7d0] sm:$0xff] }
 0x679   : > { %23138 = vmatpush3.bf16.msra.mxu0 %v23137_v46  ;;  %23162 = vmatpush3.bf16.msra.mxu1 %v23161_v27  ;;  %v12384_v46 = vld [vmem:[#allocation6 + $0x6f0] sm:$0xff]  ;;  %v12385_v27 = vld [vmem:[#allocation6 + $0x6f8] sm:$0xff] }
 0x67a   : > { %23139 = vmatprep.subr.bf16.mxu0 %v24469_v12  ;;  %23163 = vmatprep.subr.bf16.mxu1 %v24469_v12  ;;  %v23212_v48 = vpack.c.bf16 %v12385_v27, %v12384_v46 }
 0x67d   : > { %23141 = vmatpush3.bf16.msra.mxu0 %v23140_v57  ;;  %23165 = vmatpush3.bf16.msra.mxu1 %v23164_v16  ;;  %v11062_v57 = vld [vmem:[#allocation4 + $0x248] sm:$0xff]  ;;  %v23188_v16 = vpack.c.bf16 %v12296_v13, %v12295_v38  ;;  %v23254_v38 = vpack.c.bf16 %v12559_v14, %v12558_v8  ;;  %v12471_v13 = vld [vmem:[#allocation6 + $0x760] sm:$0xff]  ;;  %v12648_v14 = vld [vmem:[#allocation6 + $0x858] sm:$0xff] }
 0x67e   : > { %23166 = vmatprep.subr.bf16.mxu0 %v24469_v12  ;;  %23190 = vmatprep.subr.bf16.mxu1 %v24469_v12  ;;  %v12647_v8 = vld [vmem:[#allocation6 + $0x850] sm:$0xff] }
 0x680   : > { %20716 = vmatmul.mubr.f32.vlgmr.msra.gmra.mrb[10].mxu0 %v28467_v49  ;;  %20751 = vmatmul.mubr.f32.vlgmr.msra.gmra.mrb[10].mxu1 %v12190_v62  ;;  %v23173_v49 = vpack.c.bf16 %v12286_v22, %v12285_v47  ;;  %v11078_v62 = vmax.f32 %v11062_v57, %v11070_v7  ;;  %v12461_v47 = vld [vmem:[#allocation6 + $0x710] sm:$0xff]  ;;  %v12462_v22 = vld [vmem:[#allocation6 + $0x718] sm:$0xff] }
 0x681   : > { %23168 = vmatpush3.bf16.msra.mxu0 %v23167_v36  ;;  %23192 = vmatpush3.bf16.msra.mxu1 %v23191_v20  ;;  %v28578_v36 = vmax.f32 %v11053_v28, %v11077_v11  ;;  %v12460_v20 = vld [vmem:[#allocation6 + $0x708] sm:$0xff]  ;;  %v12473_v28 = vld [vmem:[#allocation6 + $0x770] sm:$0xff]  ;;  %v10921_v57 = vld [vmem:[#allocation4 + $0x210] sm:$0xff] }
 0x682   : > { %23169 = vmatprep.subr.bf16.mxu0 %v24469_v12  ;;  %23193 = vmatprep.subr.bf16.mxu1 %v24469_v12  ;;  %v28583_v63 = vmax.f32 %v11054_v45, %v11078_v62  ;;  %v23215_v51 = vpack.c.bf16 %v12460_v20, %v12459_v34  ;;  %v11063_v45 = vld [vmem:[#allocation4 + $0x250] sm:$0xff]  ;;  %v12562_v7 = vld [vmem:[#allocation6 + $0x7f0] sm:$0xff] }
 0x683   : > { %20785 = vmatprep.mubr.msk.f32.mxu0 %vm24470_vm0, %v24471_v29  ;;  %20820 = vmatprep.mubr.msk.f32.mxu1 %vm24470_vm0, %v24471_v29  ;;  %11211 = vst [vmem:[#allocation5 + $0x200] sm:$0xff] %v28578_v36  ;;  %v11071_v62 = vld [vmem:[#allocation4 + $0x252] sm:$0xff] }
 0x684   : > { %11212 = vst [vmem:[#allocation5 + $0x208] sm:$0xff] %v28583_v63  ;;  %v11079_v20 = vmax.f32 %v11063_v45, %v11071_v62 }
 0x685   : > { %23171 = vmatpush3.bf16.msra.mxu0 %v23170_v37  ;;  %23195 = vmatpush3.bf16.msra.mxu1 %v23194_v9  ;;  %v12368_v37 = vld [vmem:[#allocation5 + $0x10c] sm:$0xff]  ;;  %v23239_v9 = vpack.c.bf16 %v12549_v32, %v12548_v30  ;;  %v23236_v30 = vpack.c.bf16 %v12474_v10, %v12473_v28 }
 0x686   : > { %23172 = vmatprep.subr.bf16.mxu0 %v24469_v12  ;;  %23196 = vmatprep.subr.bf16.mxu1 %v24469_v12 }
 0x689   : > { %23174 = vmatpush3.bf16.msra.mxu0 %v23173_v49  ;;  %23198 = vmatpush3.bf16.msra.mxu1 %v23197_v52  ;;  %v23218_v49 = vpack.c.bf16 %v12462_v22, %v12461_v47  ;;  %v23242_v52 = vpack.c.bf16 %v12551_v56, %v12550_v33  ;;  %v12726_v47 = vld [vmem:[#allocation6 + $0x880] sm:$0xff]  ;;  %v12727_v22 = vld [vmem:[#allocation6 + $0x888] sm:$0xff] }
 0x68a   : > { %23175 = vmatprep.subr.bf16.mxu0 %v24469_v12  ;;  %23199 = vmatprep.subr.bf16.mxu1 %v24469_v12  ;;  %v23287_v56 = vpack.c.bf16 %v12727_v22, %v12726_v47 }
 0x68d   : > { %23177 = vmatpush3.bf16.msra.mxu0 %v23176_v24  ;;  %23201 = vmatpush3.bf16.msra.mxu1 %v23200_v35  ;;  %v23245_v24 = vpack.c.bf16 %v12553_v58, %v12552_v55  ;;  %v12465_v35 = vld [vmem:[#allocation6 + $0x730] sm:$0xff] }
 0x68e   : > { %23178 = vmatprep.subr.bf16.mxu0 %v24469_v12  ;;  %23202 = vmatprep.subr.bf16.mxu1 %v24469_v12  ;;  %v23224_v44 = vpack.c.bf16 %v12466_v4, %v12465_v35  ;;  %v12730_v35 = vld [vmem:[#allocation6 + $0x8a0] sm:$0xff]  ;;  %v12731_v4 = vld [vmem:[#allocation6 + $0x8a8] sm:$0xff] }
 0x691   : > { %23180 = vmatpush3.bf16.msra.mxu0 %v23179_v17  ;;  %23204 = vmatpush3.bf16.msra.mxu1 %v23203_v21  ;;  %v23248_v17 = vpack.c.bf16 %v12555_v50, %v12554_v5  ;;  %v12467_v21 = vld [vmem:[#allocation6 + $0x740] sm:$0xff]  ;;  %v12643_v5 = vld [vmem:[#allocation6 + $0x830] sm:$0xff]  ;;  %v12644_v50 = vld [vmem:[#allocation6 + $0x838] sm:$0xff] }
 0x692   : > { %23181 = vmatprep.subr.bf16.mxu0 %v24469_v12  ;;  %23205 = vmatprep.subr.bf16.mxu1 %v24469_v12  ;;  %v23227_v53 = vpack.c.bf16 %v12468_v59, %v12467_v21  ;;  %v23272_v21 = vpack.c.bf16 %v12644_v50, %v12643_v5  ;;  %v12911_v5 = vld [vmem:[#allocation6 + $0x9b8] sm:$0xff] }
 0x695   : > { %23183 = vmatpush3.bf16.msra.mxu0 %v23182_v2  ;;  %23207 = vmatpush3.bf16.msra.mxu1 %v23206_v23  ;;  %v23251_v2 = vpack.c.bf16 %v12557_v42, %v12556_v6  ;;  %v12469_v23 = vld [vmem:[#allocation6 + $0x750] sm:$0xff]  ;;  %v12645_v6 = vld [vmem:[#allocation6 + $0x840] sm:$0xff]  ;;  %v12646_v42 = vld [vmem:[#allocation6 + $0x848] sm:$0xff] }
 0x696   : > { %23184 = vmatprep.subr.bf16.mxu0 %v24469_v12  ;;  %23208 = vmatprep.subr.bf16.mxu1 %v24469_v12  ;;  %v23230_v31 = vpack.c.bf16 %v12470_v1, %v12469_v23  ;;  %v23275_v23 = vpack.c.bf16 %v12646_v42, %v12645_v6  ;;  %v12913_v6 = vld [vmem:[#allocation6 + $0x9c8] sm:$0xff] }
 0x699   : > { %23186 = vmatpush3.bf16.msra.mxu0 %v23185_v61  ;;  %23210 = vmatpush3.bf16.msra.mxu1 %v23209_v0  ;;  %v12472_v61 = vld [vmem:[#allocation6 + $0x768] sm:$0xff]  ;;  %v12560_v0 = vld [vmem:[#allocation6 + $0x7e0] sm:$0xff] }
 0x69a   : > { %23187 = vmatprep.subr.bf16.mxu0 %v24469_v12  ;;  %23211 = vmatprep.subr.bf16.mxu1 %v24469_v12  ;;  %v23233_v40 = vpack.c.bf16 %v12472_v61, %v12471_v13  ;;  %v23257_v15 = vpack.c.bf16 %v12561_v25, %v12560_v0  ;;  %v23278_v13 = vpack.c.bf16 %v12648_v14, %v12647_v8  ;;  %v12649_v0 = vld [vmem:[#allocation6 + $0x860] sm:$0xff]  ;;  %v12650_v25 = vld [vmem:[#allocation6 + $0x868] sm:$0xff]  ;;  %v12915_v8 = vld [vmem:[#allocation6 + $0x9d8] sm:$0xff] }
 0x69d   : > { %23189 = vmatpush3.bf16.msra.mxu0 %v23188_v16  ;;  %23213 = vmatpush3.bf16.msra.mxu1 %v23212_v48  ;;  %v10988_v16 = vld [vmem:[#allocation4 + $0x212] sm:$0xff] }
 0x69e   : > { %23214 = vmatprep.subr.bf16.mxu0 %v24469_v12  ;;  %23238 = vmatprep.subr.bf16.mxu1 %v24469_v12  ;;  %v12563_v48 = vld [vmem:[#allocation6 + $0x7f8] sm:$0xff]  ;;  %v11055_v34 = vmax.f32 %v10921_v57, %v10988_v16  ;;  %v12651_v16 = vld [vmem:[#allocation6 + $0x870] sm:$0xff] }
 0x69f   : > { %v23260_v32 = vpack.c.bf16 %v12563_v48, %v12562_v7  ;;  %v12652_v7 = vld [vmem:[#allocation6 + $0x878] sm:$0xff]  ;;  %v12740_v48 = vld [vmem:[#allocation6 + $0x8f0] sm:$0xff] }
 0x6a0   : > { %20786 = vmatmul.mubr.f32.vlgmr.msra.gmra.mrb[12].mxu0 %v28470_v43  ;;  %20821 = vmatmul.mubr.f32.vlgmr.msra.gmra.mrb[12].mxu1 %v12368_v37  ;;  %v23221_v43 = vpack.c.bf16 %v12464_v39, %v12463_v41  ;;  %v28607_v37 = vmax.f32 %v11055_v34, %v11079_v20  ;;  %v12728_v41 = vld [vmem:[#allocation6 + $0x890] sm:$0xff]  ;;  %v12729_v39 = vld [vmem:[#allocation6 + $0x898] sm:$0xff]  ;;  %v23284_v62 = vpack.c.bf16 %v12652_v7, %v12651_v16  ;;  %v12815_v20 = vld [vmem:[#allocation6 + $0x900] sm:$0xff] }
 0x6a1   : > { %23216 = vmatpush3.bf16.msra.mxu0 %v23215_v51  ;;  %23240 = vmatpush3.bf16.msra.mxu1 %v23239_v9  ;;  %v12637_v51 = vld [vmem:[#allocation6 + $0x800] sm:$0xff]  ;;  %v12638_v9 = vld [vmem:[#allocation6 + $0x808] sm:$0xff]  ;;  %v23290_v58 = vpack.c.bf16 %v12729_v39, %v12728_v41  ;;  %v12741_v34 = vld [vmem:[#allocation6 + $0x8f8] sm:$0xff] }
 0x6a2   : > { %23217 = vmatprep.subr.bf16.mxu0 %v24469_v12  ;;  %23241 = vmatprep.subr.bf16.mxu1 %v24469_v12  ;;  %11213 = vst [vmem:[#allocation5 + $0x210] sm:$0xff] %v28607_v37  ;;  %v23263_v33 = vpack.c.bf16 %v12638_v9, %v12637_v51  ;;  %v12905_v51 = vld [vmem:[#allocation6 + $0x988] sm:$0xff]  ;;  %v12918_v16 = vld [vmem:[#allocation6 + $0x9f0] sm:$0xff]  ;;  %v12919_v7 = vld [vmem:[#allocation6 + $0x9f8] sm:$0xff] }
 0x6a3   : > { %20855 = vmatprep.mubr.msk.f32.mxu0 %vm24470_vm0, %v24471_v29  ;;  %20890 = vmatprep.mubr.msk.f32.mxu1 %vm24470_vm0, %v24471_v29  ;;  %v12635_v9 = vld [vmem:[#allocation5 + $0x184] sm:$0xff] }
 0x6a5   : > { %23219 = vmatpush3.bf16.msra.mxu0 %v23218_v49  ;;  %23243 = vmatpush3.bf16.msra.mxu1 %v23242_v52  ;;  %v12639_v49 = vld [vmem:[#allocation6 + $0x810] sm:$0xff]  ;;  %v12640_v52 = vld [vmem:[#allocation6 + $0x818] sm:$0xff] }
 0x6a6   : > { %23220 = vmatprep.subr.bf16.mxu0 %v24469_v12  ;;  %23244 = vmatprep.subr.bf16.mxu1 %v24469_v12  ;;  %v23266_v55 = vpack.c.bf16 %v12640_v52, %v12639_v49  ;;  %v12906_v49 = vld [vmem:[#allocation6 + $0x990] sm:$0xff]  ;;  %v12907_v52 = vld [vmem:[#allocation6 + $0x998] sm:$0xff] }
 0x6a7   : > { %v23338_v39 = vpack.c.bf16 %v12907_v52, %v12906_v49  ;;  %v12997_v52 = vld [vmem:[#allocation6 + $0xa20] sm:$0xff] }
 0x6a9   : > { %23222 = vmatpush3.bf16.msra.mxu0 %v23221_v43  ;;  %23246 = vmatpush3.bf16.msra.mxu1 %v23245_v24  ;;  %v12641_v43 = vld [vmem:[#allocation6 + $0x820] sm:$0xff]  ;;  %v12642_v24 = vld [vmem:[#allocation6 + $0x828] sm:$0xff] }
 0x6aa   : > { %23223 = vmatprep.subr.bf16.mxu0 %v24469_v12  ;;  %23247 = vmatprep.subr.bf16.mxu1 %v24469_v12 }
 0x6ad   : > { %23225 = vmatpush3.bf16.msra.mxu0 %v23224_v44  ;;  %23249 = vmatpush3.bf16.msra.mxu1 %v23248_v17  ;;  %v12732_v44 = vld [vmem:[#allocation6 + $0x8b0] sm:$0xff]  ;;  %v12733_v17 = vld [vmem:[#allocation6 + $0x8b8] sm:$0xff] }
 0x6ae   : > { %23226 = vmatprep.subr.bf16.mxu0 %v24469_v12  ;;  %23250 = vmatprep.subr.bf16.mxu1 %v24469_v12  ;;  %v23296_v59 = vpack.c.bf16 %v12733_v17, %v12732_v44  ;;  %v12823_v17 = vld [vmem:[#allocation6 + $0x940] sm:$0xff] }
 0x6b1   : > { %23228 = vmatpush3.bf16.msra.mxu0 %v23227_v53  ;;  %23252 = vmatpush3.bf16.msra.mxu1 %v23251_v2  ;;  %v12734_v53 = vld [vmem:[#allocation6 + $0x8c0] sm:$0xff]  ;;  %v12735_v2 = vld [vmem:[#allocation6 + $0x8c8] sm:$0xff] }
 0x6b2   : > { %23229 = vmatprep.subr.bf16.mxu0 %v24469_v12  ;;  %23253 = vmatprep.subr.bf16.mxu1 %v24469_v12  ;;  %v23299_v1 = vpack.c.bf16 %v12735_v2, %v12734_v53  ;;  %v12825_v2 = vld [vmem:[#allocation6 + $0x950] sm:$0xff] }
 0x6b3   : > { %v11315_v18 = vpop.f32.mrb[0].mxu0  ;;  %v11385_v26 = vpop.f32.mrb[0].mxu1 }
 0x6b4   : > { %v20367_v46 = vpop.f32.mrb[1].mxu0  ;;  %v28603_v27 = vadd.f32 %v11385_v26, %v11315_v18  ;;  %v20402_v11 = vpop.f32.mrb[1].mxu1  ;;  %v12738_v18 = vld [vmem:[#allocation6 + $0x8e0] sm:$0xff]  ;;  %v12739_v26 = vld [vmem:[#allocation6 + $0x8e8] sm:$0xff] }
 0x6b5   : > { %23231 = vmatpush3.bf16.msra.mxu0 %v23230_v31  ;;  %23255 = vmatpush3.bf16.msra.mxu1 %v23254_v38  ;;  %v12736_v31 = vld [vmem:[#allocation6 + $0x8d0] sm:$0xff]  ;;  %v12737_v38 = vld [vmem:[#allocation6 + $0x8d8] sm:$0xff]  ;;  %v23305_v57 = vpack.c.bf16 %v12739_v26, %v12738_v18 }
 0x6b6   : > { %23232 = vmatprep.subr.bf16.mxu0 %v24469_v12  ;;  %23256 = vmatprep.subr.bf16.mxu1 %v24469_v12  ;;  %v23302_v61 = vpack.c.bf16 %v12737_v38, %v12736_v31  ;;  %v12827_v38 = vld [vmem:[#allocation6 + $0x960] sm:$0xff] }
 0x6b9   : > { %23234 = vmatpush3.bf16.msra.mxu0 %v23233_v40  ;;  %23258 = vmatpush3.bf16.msra.mxu1 %v23257_v15  ;;  %v23281_v15 = vpack.c.bf16 %v12650_v25, %v12649_v0  ;;  %v12917_v0 = vld [vmem:[#allocation6 + $0x9e8] sm:$0xff] }
 0x6ba   : > { %23235 = vmatprep.subr.bf16.mxu0 %v24469_v12  ;;  %23259 = vmatprep.subr.bf16.mxu1 %v24469_v12 }
 0x6bd   : > { %23237 = vmatpush3.bf16.msra.mxu0 %v23236_v30  ;;  %23261 = vmatpush3.bf16.msra.mxu1 %v23260_v32  ;;  %v12816_v30 = vld [vmem:[#allocation6 + $0x908] sm:$0xff]  ;;  %v12904_v32 = vld [vmem:[#allocation6 + $0x980] sm:$0xff] }
 0x6be   : > { %23262 = vmatprep.subr.bf16.mxu0 %v24469_v12  ;;  %23286 = vmatprep.subr.bf16.mxu1 %v24469_v12  ;;  %v23311_v47 = vpack.c.bf16 %v12816_v30, %v12815_v20  ;;  %v23335_v22 = vpack.c.bf16 %v12905_v51, %v12904_v32  ;;  %v13083_v20 = vld [vmem:[#allocation6 + $0xa88] sm:$0xff]  ;;  %v12813_v30 = vld [vmem:[#allocation5 + $0x18c] sm:$0xff] }
 0x6c0   : > { %20856 = vmatmul.mubr.f32.vlgmr.msra.gmra.mrb[14].mxu0 %v28481_v3  ;;  %20891 = vmatmul.mubr.f32.vlgmr.msra.gmra.mrb[14].mxu1 %v28511_v60  ;;  %v23269_v3 = vpack.c.bf16 %v12642_v24, %v12641_v43  ;;  %v23293_v60 = vpack.c.bf16 %v12731_v4, %v12730_v35  ;;  %v12908_v43 = vld [vmem:[#allocation6 + $0x9a0] sm:$0xff]  ;;  %v12909_v24 = vld [vmem:[#allocation6 + $0x9a8] sm:$0xff]  ;;  %v12821_v4 = vld [vmem:[#allocation6 + $0x930] sm:$0xff] }
 0x6c1   : > { %23264 = vmatpush3.bf16.msra.mxu0 %v23263_v33  ;;  %23288 = vmatpush3.bf16.msra.mxu1 %v23287_v56  ;;  %v12817_v33 = vld [vmem:[#allocation6 + $0x910] sm:$0xff]  ;;  %v12818_v56 = vld [vmem:[#allocation6 + $0x918] sm:$0xff]  ;;  %v23341_v35 = vpack.c.bf16 %v12909_v24, %v12908_v43 }
 0x6c2   : > { %23265 = vmatprep.subr.bf16.mxu0 %v24469_v12  ;;  %23289 = vmatprep.subr.bf16.mxu1 %v24469_v12  ;;  %v23314_v41 = vpack.c.bf16 %v12818_v56, %v12817_v33  ;;  %v13085_v33 = vld [vmem:[#allocation6 + $0xa98] sm:$0xff]  ;;  %v12999_v43 = vld [vmem:[#allocation6 + $0xa30] sm:$0xff] }
 0x6c3   : > { %20925 = vmatprep.mubr.msk.f32.mxu0 %vm24470_vm0, %v24471_v29  ;;  %20960 = vmatprep.mubr.msk.f32.mxu1 %vm24470_vm0, %v24471_v29  ;;  %v13000_v24 = vld [vmem:[#allocation6 + $0xa38] sm:$0xff] }
 0x6c5   : > { %23267 = vmatpush3.bf16.msra.mxu0 %v23266_v55  ;;  %23291 = vmatpush3.bf16.msra.mxu1 %v23290_v58  ;;  %v12819_v55 = vld [vmem:[#allocation6 + $0x920] sm:$0xff]  ;;  %v12820_v58 = vld [vmem:[#allocation6 + $0x928] sm:$0xff] }
 0x6c6   : > { %23268 = vmatprep.subr.bf16.mxu0 %v24469_v12  ;;  %23292 = vmatprep.subr.bf16.mxu1 %v24469_v12 }
 0x6c9   : > { %23270 = vmatpush3.bf16.msra.mxu0 %v23269_v3  ;;  %23294 = vmatpush3.bf16.msra.mxu1 %v23293_v60  ;;  %v12822_v3 = vld [vmem:[#allocation6 + $0x938] sm:$0xff]  ;;  %v12910_v60 = vld [vmem:[#allocation6 + $0x9b0] sm:$0xff] }
 0x6ca   : > { %23271 = vmatprep.subr.bf16.mxu0 %v24469_v12  ;;  %23295 = vmatprep.subr.bf16.mxu1 %v24469_v12  ;;  %v23320_v50 = vpack.c.bf16 %v12822_v3, %v12821_v4  ;;  %v23344_v44 = vpack.c.bf16 %v12911_v5, %v12910_v60  ;;  %v23368_v4 = vpack.c.bf16 %v13000_v24, %v12999_v43  ;;  %v13001_v60 = vld [vmem:[#allocation6 + $0xa40] sm:$0xff]  ;;  %v13002_v5 = vld [vmem:[#allocation6 + $0xa48] sm:$0xff] }
 0x6cb   : > { %v13179_v24 = vld [vmem:[#allocation6 + $0xb40] sm:$0xff] }
 0x6cd   : > { %23273 = vmatpush3.bf16.msra.mxu0 %v23272_v21  ;;  %23297 = vmatpush3.bf16.msra.mxu1 %v23296_v59  ;;  %v12824_v21 = vld [vmem:[#allocation6 + $0x948] sm:$0xff]  ;;  %v12912_v59 = vld [vmem:[#allocation6 + $0x9c0] sm:$0xff] }
 0x6ce   : > { %23274 = vmatprep.subr.bf16.mxu0 %v24469_v12  ;;  %23298 = vmatprep.subr.bf16.mxu1 %v24469_v12  ;;  %v23323_v42 = vpack.c.bf16 %v12824_v21, %v12823_v17  ;;  %v23347_v53 = vpack.c.bf16 %v12913_v6, %v12912_v59  ;;  %v23371_v17 = vpack.c.bf16 %v13002_v5, %v13001_v60  ;;  %v13003_v59 = vld [vmem:[#allocation6 + $0xa50] sm:$0xff]  ;;  %v13004_v6 = vld [vmem:[#allocation6 + $0xa58] sm:$0xff] }
 0x6cf   : > { %v13181_v5 = vld [vmem:[#allocation6 + $0xb50] sm:$0xff] }
 0x6d1   : > { %23276 = vmatpush3.bf16.msra.mxu0 %v23275_v23  ;;  %23300 = vmatpush3.bf16.msra.mxu1 %v23299_v1  ;;  %v12826_v23 = vld [vmem:[#allocation6 + $0x958] sm:$0xff]  ;;  %v12914_v1 = vld [vmem:[#allocation6 + $0x9d0] sm:$0xff] }
 0x6d2   : > { %23277 = vmatprep.subr.bf16.mxu0 %v24469_v12  ;;  %23301 = vmatprep.subr.bf16.mxu1 %v24469_v12  ;;  %v23326_v14 = vpack.c.bf16 %v12826_v23, %v12825_v2  ;;  %v23350_v31 = vpack.c.bf16 %v12915_v8, %v12914_v1  ;;  %v23374_v2 = vpack.c.bf16 %v13004_v6, %v13003_v59  ;;  %v13005_v1 = vld [vmem:[#allocation6 + $0xa60] sm:$0xff]  ;;  %v13006_v8 = vld [vmem:[#allocation6 + $0xa68] sm:$0xff] }
 0x6d3   : > { %v11473_v46 = vpop.f32.mrb[2].mxu0  ;;  %v11562_v28 = vpop.f32.mrb[2].mxu1  ;;  %v13183_v6 = vld [vmem:[#allocation6 + $0xb60] sm:$0xff] }
 0x6d4   : > { %v11477_v10 = vadd.f32 %v11473_v46, %v28603_v27  ;;  %v20437_v11 = vpop.f32.mrb[3].mxu0  ;;  %v20472_v40 = vpop.f32.mrb[3].mxu1  ;;  %v23308_v27 = vpack.c.bf16 %v12741_v34, %v12740_v48  ;;  %v12993_v34 = vld [vmem:[#allocation6 + $0xa00] sm:$0xff] }
 0x6d5   : > { %23279 = vmatpush3.bf16.msra.mxu0 %v23278_v13  ;;  %23303 = vmatpush3.bf16.msra.mxu1 %v23302_v61  ;;  %v12828_v13 = vld [vmem:[#allocation6 + $0x968] sm:$0xff]  ;;  %v12916_v61 = vld [vmem:[#allocation6 + $0x9e0] sm:$0xff]  ;;  %v12829_v40 = vld [vmem:[#allocation6 + $0x970] sm:$0xff] }
 0x6d6   : > { %v28631_v45 = vadd.f32 %v11562_v28, %v11477_v10  ;;  %23280 = vmatprep.subr.bf16.mxu0 %v24469_v12  ;;  %23304 = vmatprep.subr.bf16.mxu1 %v24469_v12  ;;  %v23329_v10 = vpack.c.bf16 %v12828_v13, %v12827_v38  ;;  %v23353_v11 = vpack.c.bf16 %v12917_v0, %v12916_v61 }
 0x6d9   : > { %23282 = vmatpush3.bf16.msra.mxu0 %v23281_v15  ;;  %23306 = vmatpush3.bf16.msra.mxu1 %v23305_v57  ;;  %v12830_v57 = vld [vmem:[#allocation6 + $0x978] sm:$0xff] }
 0x6da   : > { %23283 = vmatprep.subr.bf16.mxu0 %v24469_v12  ;;  %23307 = vmatprep.subr.bf16.mxu1 %v24469_v12  ;;  %v23332_v48 = vpack.c.bf16 %v12830_v57, %v12829_v40  ;;  %v13097_v40 = vld [vmem:[#allocation6 + $0xaf8] sm:$0xff] }
 0x6dd   : > { %23285 = vmatpush3.bf16.msra.mxu0 %v23284_v62  ;;  %23309 = vmatpush3.bf16.msra.mxu1 %v23308_v27  ;;  %v12994_v62 = vld [vmem:[#allocation6 + $0xa08] sm:$0xff]  ;;  %v13082_v27 = vld [vmem:[#allocation6 + $0xa80] sm:$0xff] }
 0x6de   : > { %23310 = vmatprep.subr.bf16.mxu0 %v24469_v12  ;;  %23334 = vmatprep.subr.bf16.mxu1 %v24469_v12  ;;  %v23359_v32 = vpack.c.bf16 %v12994_v62, %v12993_v34  ;;  %v23383_v51 = vpack.c.bf16 %v13083_v20, %v13082_v27  ;;  %v13080_v62 = vld [vmem:[#allocation5 + $0x204] sm:$0xff] }
 0x6df   : > { %v13173_v20 = vld [vmem:[#allocation6 + $0xb10] sm:$0xff] }
 0x6e0   : > { %20926 = vmatmul.mubr.f32.vlgmr.msra.gmra.mrb[16].mxu0 %v12635_v9  ;;  %20961 = vmatmul.mubr.f32.vlgmr.msra.gmra.mrb[16].mxu1 %v28530_v19  ;;  %v23317_v19 = vpack.c.bf16 %v12820_v58, %v12819_v55  ;;  %v12995_v9 = vld [vmem:[#allocation6 + $0xa10] sm:$0xff]  ;;  %v13087_v55 = vld [vmem:[#allocation6 + $0xaa8] sm:$0xff] }
 0x6e1   : > { %23312 = vmatpush3.bf16.msra.mxu0 %v23311_v47  ;;  %23336 = vmatpush3.bf16.msra.mxu1 %v23335_v22  ;;  %v12996_v47 = vld [vmem:[#allocation6 + $0xa18] sm:$0xff]  ;;  %v13084_v22 = vld [vmem:[#allocation6 + $0xa90] sm:$0xff] }
 0x6e2   : > { %23313 = vmatprep.subr.bf16.mxu0 %v24469_v12  ;;  %23337 = vmatprep.subr.bf16.mxu1 %v24469_v12  ;;  %v23362_v56 = vpack.c.bf16 %v12996_v47, %v12995_v9  ;;  %v23386_v49 = vpack.c.bf16 %v13085_v33, %v13084_v22  ;;  %v13175_v22 = vld [vmem:[#allocation6 + $0xb20] sm:$0xff]  ;;  %v13176_v33 = vld [vmem:[#allocation6 + $0xb28] sm:$0xff] }
 0x6e3   : > { %20995 = vmatprep.mubr.msk.f32.mxu0 %vm24470_vm0, %v24471_v29  ;;  %21030 = vmatprep.mubr.msk.f32.mxu1 %vm24470_vm0, %v24471_v29 }
 0x6e5   : > { %23315 = vmatpush3.bf16.msra.mxu0 %v23314_v41  ;;  %23339 = vmatpush3.bf16.msra.mxu1 %v23338_v39  ;;  %v12998_v41 = vld [vmem:[#allocation6 + $0xa28] sm:$0xff]  ;;  %v13086_v39 = vld [vmem:[#allocation6 + $0xaa0] sm:$0xff] }
 0x6e6   : > { %23316 = vmatprep.subr.bf16.mxu0 %v24469_v12  ;;  %23340 = vmatprep.subr.bf16.mxu1 %v24469_v12  ;;  %v23389_v58 = vpack.c.bf16 %v13087_v55, %v13086_v39  ;;  %v13178_v39 = vld [vmem:[#allocation6 + $0xb38] sm:$0xff]  ;;  %v13266_v55 = vld [vmem:[#allocation6 + $0xbb0] sm:$0xff] }
 0x6e9   : > { %23318 = vmatpush3.bf16.msra.mxu0 %v23317_v19  ;;  %23342 = vmatpush3.bf16.msra.mxu1 %v23341_v35  ;;  %v13088_v19 = vld [vmem:[#allocation6 + $0xab0] sm:$0xff]  ;;  %v13089_v35 = vld [vmem:[#allocation6 + $0xab8] sm:$0xff] }
 0x6ea   : > { %23319 = vmatprep.subr.bf16.mxu0 %v24469_v12  ;;  %23343 = vmatprep.subr.bf16.mxu1 %v24469_v12  ;;  %v23392_v3 = vpack.c.bf16 %v13089_v35, %v13088_v19  ;;  %v13180_v19 = vld [vmem:[#allocation6 + $0xb48] sm:$0xff]  ;;  %v13268_v35 = vld [vmem:[#allocation6 + $0xbc0] sm:$0xff] }
 0x6ed   : > { %23321 = vmatpush3.bf16.msra.mxu0 %v23320_v50  ;;  %23345 = vmatpush3.bf16.msra.mxu1 %v23344_v44  ;;  %v13090_v50 = vld [vmem:[#allocation6 + $0xac0] sm:$0xff]  ;;  %v13091_v44 = vld [vmem:[#allocation6 + $0xac8] sm:$0xff] }
 0x6ee   : > { %23322 = vmatprep.subr.bf16.mxu0 %v24469_v12  ;;  %23346 = vmatprep.subr.bf16.mxu1 %v24469_v12  ;;  %v23395_v21 = vpack.c.bf16 %v13091_v44, %v13090_v50  ;;  %v13182_v50 = vld [vmem:[#allocation6 + $0xb58] sm:$0xff]  ;;  %v13270_v44 = vld [vmem:[#allocation6 + $0xbd0] sm:$0xff] }
 0x6f1   : > { %23324 = vmatpush3.bf16.msra.mxu0 %v23323_v42  ;;  %23348 = vmatpush3.bf16.msra.mxu1 %v23347_v53  ;;  %v13092_v42 = vld [vmem:[#allocation6 + $0xad0] sm:$0xff]  ;;  %v13093_v53 = vld [vmem:[#allocation6 + $0xad8] sm:$0xff] }
 0x6f2   : > { %23325 = vmatprep.subr.bf16.mxu0 %v24469_v12  ;;  %23349 = vmatprep.subr.bf16.mxu1 %v24469_v12  ;;  %v23398_v23 = vpack.c.bf16 %v13093_v53, %v13092_v42  ;;  %v13184_v42 = vld [vmem:[#allocation6 + $0xb68] sm:$0xff]  ;;  %v13272_v53 = vld [vmem:[#allocation6 + $0xbe0] sm:$0xff] }
 0x6f3   : > { %v11651_v25 = vpop.f32.mrb[4].mxu0  ;;  %v11740_v18 = vpop.f32.mrb[4].mxu1 }
 0x6f4   : > { %v11655_v26 = vadd.f32 %v11651_v25, %v28631_v45  ;;  %v20507_v46 = vpop.f32.mrb[5].mxu0  ;;  %v20542_v28 = vpop.f32.mrb[5].mxu1  ;;  %v23356_v45 = vpack.c.bf16 %v12919_v7, %v12918_v16  ;;  %v13171_v16 = vld [vmem:[#allocation6 + $0xb00] sm:$0xff]  ;;  %v13172_v7 = vld [vmem:[#allocation6 + $0xb08] sm:$0xff] }
 0x6f5   : > { %23327 = vmatpush3.bf16.msra.mxu0 %v23326_v14  ;;  %23351 = vmatpush3.bf16.msra.mxu1 %v23350_v31  ;;  %v13094_v14 = vld [vmem:[#allocation6 + $0xae0] sm:$0xff]  ;;  %v13095_v31 = vld [vmem:[#allocation6 + $0xae8] sm:$0xff]  ;;  %v13007_v46 = vld [vmem:[#allocation6 + $0xa70] sm:$0xff]  ;;  %v23407_v34 = vpack.c.bf16 %v13172_v7, %v13171_v16 }
 0x6f6   : > { %v28655_v15 = vadd.f32 %v11740_v18, %v11655_v26  ;;  %23328 = vmatprep.subr.bf16.mxu0 %v24469_v12  ;;  %23352 = vmatprep.subr.bf16.mxu1 %v24469_v12  ;;  %v23377_v18 = vpack.c.bf16 %v13006_v8, %v13005_v1  ;;  %v23401_v26 = vpack.c.bf16 %v13095_v31, %v13094_v14  ;;  %v13352_v16 = vld [vmem:[#allocation6 + $0xc18] sm:$0xff] }
 0x6f9   : > { %23330 = vmatpush3.bf16.msra.mxu0 %v23329_v10  ;;  %23354 = vmatpush3.bf16.msra.mxu1 %v23353_v11  ;;  %v13008_v10 = vld [vmem:[#allocation6 + $0xa78] sm:$0xff]  ;;  %v13096_v11 = vld [vmem:[#allocation6 + $0xaf0] sm:$0xff] }
 0x6fa   : > { %23331 = vmatprep.subr.bf16.mxu0 %v24469_v12  ;;  %23355 = vmatprep.subr.bf16.mxu1 %v24469_v12  ;;  %v23380_v57 = vpack.c.bf16 %v13008_v10, %v13007_v46 }
 0x6fd   : > { %23333 = vmatpush3.bf16.msra.mxu0 %v23332_v48  ;;  %23357 = vmatpush3.bf16.msra.mxu1 %v23356_v45  ;;  %v13260_v48 = vld [vmem:[#allocation6 + $0xb80] sm:$0xff]  ;;  %v13261_v45 = vld [vmem:[#allocation6 + $0xb88] sm:$0xff] }
 0x6fe   : > { %23358 = vmatprep.subr.bf16.mxu0 %v24469_v12  ;;  %23382 = vmatprep.subr.bf16.mxu1 %v24469_v12  ;;  %v23431_v27 = vpack.c.bf16 %v13261_v45, %v13260_v48  ;;  %v13353_v48 = vld [vmem:[#allocation6 + $0xc20] sm:$0xff]  ;;  %v13354_v45 = vld [vmem:[#allocation6 + $0xc28] sm:$0xff] }
 0x700   : > { %20996 = vmatmul.mubr.f32.vlgmr.msra.gmra.mrb[18].mxu0 %v12813_v30  ;;  %21031 = vmatmul.mubr.f32.vlgmr.msra.gmra.mrb[18].mxu1 %v28554_v54  ;;  %v23365_v54 = vpack.c.bf16 %v12998_v41, %v12997_v52  ;;  %v13174_v30 = vld [vmem:[#allocation6 + $0xb18] sm:$0xff]  ;;  %v13177_v41 = vld [vmem:[#allocation6 + $0xb30] sm:$0xff] }
 0x701   : > { %23360 = vmatpush3.bf16.msra.mxu0 %v23359_v32  ;;  %23384 = vmatpush3.bf16.msra.mxu1 %v23383_v51  ;;  %v13262_v32 = vld [vmem:[#allocation6 + $0xb90] sm:$0xff]  ;;  %v13263_v51 = vld [vmem:[#allocation6 + $0xb98] sm:$0xff]  ;;  %v23410_v9 = vpack.c.bf16 %v13174_v30, %v13173_v20  ;;  %v13357_v20 = vld [vmem:[#allocation6 + $0xc40] sm:$0xff] }
 0x702   : > { %23361 = vmatprep.subr.bf16.mxu0 %v24469_v12  ;;  %23385 = vmatprep.subr.bf16.mxu1 %v24469_v12  ;;  %v23434_v47 = vpack.c.bf16 %v13263_v51, %v13262_v32  ;;  %v13358_v30 = vld [vmem:[#allocation6 + $0xc48] sm:$0xff]  ;;  %v13359_v51 = vld [vmem:[#allocation6 + $0xc50] sm:$0xff] }
 0x703   : > { %21065 = vmatprep.mubr.msk.f32.mxu0 %vm24470_vm0, %v24471_v29  ;;  %21100 = vmatprep.mubr.msk.f32.mxu1 %vm24470_vm0, %v24471_v29  ;;  %v23467_v32 = vpack.c.bf16 %v13358_v30, %v13357_v20  ;;  %v13542_v30 = vld [vmem:[#allocation8 + $0x18] sm:$0xff] }
 0x705   : > { %23363 = vmatpush3.bf16.msra.mxu0 %v23362_v56  ;;  %23387 = vmatpush3.bf16.msra.mxu1 %v23386_v49  ;;  %v13264_v56 = vld [vmem:[#allocation6 + $0xba0] sm:$0xff]  ;;  %v13265_v49 = vld [vmem:[#allocation6 + $0xba8] sm:$0xff] }
 0x706   : > { %23364 = vmatprep.subr.bf16.mxu0 %v24469_v12  ;;  %23388 = vmatprep.subr.bf16.mxu1 %v24469_v12  ;;  %v23437_v52 = vpack.c.bf16 %v13265_v49, %v13264_v56 }
 0x709   : > { %23366 = vmatpush3.bf16.msra.mxu0 %v23365_v54  ;;  %23390 = vmatpush3.bf16.msra.mxu1 %v23389_v58  ;;  %v13267_v54 = vld [vmem:[#allocation6 + $0xbb8] sm:$0xff]  ;;  %v23416_v58 = vpack.c.bf16 %v13178_v39, %v13177_v41 }
 0x70a   : > { %23367 = vmatprep.subr.bf16.mxu0 %v24469_v12  ;;  %23391 = vmatprep.subr.bf16.mxu1 %v24469_v12  ;;  %v23440_v43 = vpack.c.bf16 %v13267_v54, %v13266_v55  ;;  %v13363_v54 = vld [vmem:[#allocation6 + $0xc70] sm:$0xff] }
 0x70d   : > { %23369 = vmatpush3.bf16.msra.mxu0 %v23368_v4  ;;  %23393 = vmatpush3.bf16.msra.mxu1 %v23392_v3  ;;  %v13269_v4 = vld [vmem:[#allocation6 + $0xbc8] sm:$0xff]  ;;  %v23419_v3 = vpack.c.bf16 %v13180_v19, %v13179_v24 }
 0x70e   : > { %23370 = vmatprep.subr.bf16.mxu0 %v24469_v12  ;;  %23394 = vmatprep.subr.bf16.mxu1 %v24469_v12  ;;  %v23443_v60 = vpack.c.bf16 %v13269_v4, %v13268_v35 }
 0x711   : > { %23372 = vmatpush3.bf16.msra.mxu0 %v23371_v17  ;;  %23396 = vmatpush3.bf16.msra.mxu1 %v23395_v21  ;;  %v13271_v17 = vld [vmem:[#allocation6 + $0xbd8] sm:$0xff]  ;;  %v23422_v21 = vpack.c.bf16 %v13182_v50, %v13181_v5 }
 0x712   : > { %23373 = vmatprep.subr.bf16.mxu0 %v24469_v12  ;;  %23397 = vmatprep.subr.bf16.mxu1 %v24469_v12  ;;  %v23446_v59 = vpack.c.bf16 %v13271_v17, %v13270_v44 }
 0x713   : > { %v11829_v38 = vpop.f32.mrb[6].mxu0  ;;  %v11918_v13 = vpop.f32.mrb[6].mxu1 }
 0x714   : > { %v11833_v61 = vadd.f32 %v11829_v38, %v28655_v15  ;;  %v20577_v0 = vpop.f32.mrb[7].mxu0  ;;  %v20612_v25 = vpop.f32.mrb[7].mxu1  ;;  %v23404_v15 = vpack.c.bf16 %v13097_v40, %v13096_v11  ;;  %v23425_v38 = vpack.c.bf16 %v13184_v42, %v13183_v6  ;;  %v13350_v11 = vld [vmem:[#allocation6 + $0xc08] sm:$0xff]  ;;  %v13445_v6 = vld [vmem:[%s28807_s7] sm:$0xff] }
 0x715   : > { %23375 = vmatpush3.bf16.msra.mxu0 %v23374_v2  ;;  %23399 = vmatpush3.bf16.msra.mxu1 %v23398_v23  ;;  %v13273_v2 = vld [vmem:[#allocation6 + $0xbe8] sm:$0xff]  ;;  %v13186_v25 = vld [vmem:[#allocation6 + $0xb78] sm:$0xff] }
 0x716   : > { %v28679_v28 = vadd.f32 %v11918_v13, %v11833_v61  ;;  %23376 = vmatprep.subr.bf16.mxu0 %v24469_v12  ;;  %23400 = vmatprep.subr.bf16.mxu1 %v24469_v12  ;;  %v23449_v13 = vpack.c.bf16 %v13273_v2, %v13272_v53  ;;  %v13185_v61 = vld [vmem:[#allocation6 + $0xb70] sm:$0xff] }
 0x717   : > { %v23428_v46 = vpack.c.bf16 %v13186_v25, %v13185_v61  ;;  %v13448_v53 = vld [vmem:[%s28807_s7 + $0x18] sm:$0xff]  ;;  %v13454_v61 = vld [vmem:[%s28807_s7 + $0x48] sm:$0xff]  ;;  %v13455_v25 = vld [vmem:[%s28807_s7 + $0x50] sm:$0xff] }
 0x719   : > { %23378 = vmatpush3.bf16.msra.mxu0 %v23377_v18  ;;  %23402 = vmatpush3.bf16.msra.mxu1 %v23401_v26  ;;  %v13274_v18 = vld [vmem:[#allocation6 + $0xbf0] sm:$0xff]  ;;  %v13275_v26 = vld [vmem:[#allocation6 + $0xbf8] sm:$0xff] }
 0x71a   : > { %23379 = vmatprep.subr.bf16.mxu0 %v24469_v12  ;;  %23403 = vmatprep.subr.bf16.mxu1 %v24469_v12  ;;  %v23452_v10 = vpack.c.bf16 %v13275_v26, %v13274_v18  ;;  %v13456_v18 = vld [vmem:[%s28807_s7 + $0x58] sm:$0xff] }
 0x71b   : > { %v23494_v26 = vpack.c.bf16 %v13456_v18, %v13455_v25 }
 0x71d   : > { %23381 = vmatpush3.bf16.msra.mxu0 %v23380_v57  ;;  %23405 = vmatpush3.bf16.msra.mxu1 %v23404_v15  ;;  %v13258_v57 = vld [vmem:[#allocation5 + $0x20c] sm:$0xff] }
 0x71e   : > { %23406 = vmatprep.subr.bf16.mxu0 %v24469_v12  ;;  %23430 = vmatprep.subr.bf16.mxu1 %v24469_v12  ;;  %v13351_v15 = vld [vmem:[#allocation6 + $0xc10] sm:$0xff] }
 0x71f   : > { %v23458_v7 = vpack.c.bf16 %v13352_v16, %v13351_v15 }
 0x720   : > { %21066 = vmatmul.mubr.f32.vlgmr.msra.gmra.mrb[20].mxu0 %v28578_v36  ;;  %21101 = vmatmul.mubr.f32.vlgmr.msra.gmra.mrb[20].mxu1 %v13080_v62  ;;  %v23413_v36 = vpack.c.bf16 %v13176_v33, %v13175_v22  ;;  %v13355_v62 = vld [vmem:[#allocation6 + $0xc30] sm:$0xff]  ;;  %v13361_v22 = vld [vmem:[#allocation6 + $0xc60] sm:$0xff]  ;;  %v13362_v33 = vld [vmem:[#allocation6 + $0xc68] sm:$0xff] }
 0x721   : > { %23408 = vmatpush3.bf16.msra.mxu0 %v23407_v34  ;;  %23432 = vmatpush3.bf16.msra.mxu1 %v23431_v27  ;;  %v23461_v34 = vpack.c.bf16 %v13354_v45, %v13353_v48  ;;  %v13356_v27 = vld [vmem:[#allocation6 + $0xc38] sm:$0xff]  ;;  %v23473_v39 = vpack.c.bf16 %v13362_v33, %v13361_v22  ;;  %v13460_v48 = vld [vmem:[%s28807_s7 + $0x78] sm:$0xff] }
 0x722   : > { %23409 = vmatprep.subr.bf16.mxu0 %v24469_v12  ;;  %23433 = vmatprep.subr.bf16.mxu1 %v24469_v12  ;;  %v13545_v22 = vld [vmem:[#allocation8 + $0x30] sm:$0xff]  ;;  %v13546_v33 = vld [vmem:[#allocation8 + $0x38] sm:$0xff] }
 0x723   : > { %21135 = vmatprep.mubr.msk.f32.mxu0 %vm24470_vm0, %v24471_v29  ;;  %21170 = vmatprep.mubr.msk.f32.mxu1 %vm24470_vm0, %v24471_v29 }
 0x725   : > { %23411 = vmatpush3.bf16.msra.mxu0 %v23410_v9  ;;  %23435 = vmatpush3.bf16.msra.mxu1 %v23434_v47  ;;  %v13360_v9 = vld [vmem:[#allocation6 + $0xc58] sm:$0xff] }
 0x726   : > { %23412 = vmatprep.subr.bf16.mxu0 %v24469_v12  ;;  %23436 = vmatprep.subr.bf16.mxu1 %v24469_v12  ;;  %v23470_v47 = vpack.c.bf16 %v13360_v9, %v13359_v51  ;;  %v13543_v51 = vld [vmem:[#allocation8 + $0x20] sm:$0xff]  ;;  %v13544_v9 = vld [vmem:[#allocation8 + $0x28] sm:$0xff] }
 0x729   : > { %23414 = vmatpush3.bf16.msra.mxu0 %v23413_v36  ;;  %23438 = vmatpush3.bf16.msra.mxu1 %v23437_v52 }
 0x72a   : > { %23415 = vmatprep.subr.bf16.mxu0 %v24469_v12  ;;  %23439 = vmatprep.subr.bf16.mxu1 %v24469_v12 }
 0x72d   : > { %23417 = vmatpush3.bf16.msra.mxu0 %v23416_v58  ;;  %23441 = vmatpush3.bf16.msra.mxu1 %v23440_v43  ;;  %v13364_v58 = vld [vmem:[#allocation6 + $0xc78] sm:$0xff] }
 0x72e   : > { %23418 = vmatprep.subr.bf16.mxu0 %v24469_v12  ;;  %23442 = vmatprep.subr.bf16.mxu1 %v24469_v12  ;;  %v23476_v43 = vpack.c.bf16 %v13364_v58, %v13363_v54  ;;  %v13551_v54 = vld [vmem:[#allocation8 + $0x60] sm:$0xff]  ;;  %v13552_v58 = vld [vmem:[#allocation8 + $0x68] sm:$0xff] }
 0x731   : > { %23420 = vmatpush3.bf16.msra.mxu0 %v23419_v3  ;;  %23444 = vmatpush3.bf16.msra.mxu1 %v23443_v60 }
 0x732   : > { %23421 = vmatprep.subr.bf16.mxu0 %v24469_v12  ;;  %23445 = vmatprep.subr.bf16.mxu1 %v24469_v12 }
 0x733   : > { %v12007_v23 = vpop.f32.mrb[8].mxu0  ;;  %v12096_v1 = vpop.f32.mrb[8].mxu1 }
 0x734   : > { %v12011_v8 = vadd.f32 %v12007_v23, %v28679_v28  ;;  %v20647_v14 = vpop.f32.mrb[9].mxu0  ;;  %v20682_v31 = vpop.f32.mrb[9].mxu1  ;;  %v13349_v28 = vld [vmem:[#allocation6 + $0xc00] sm:$0xff]  ;;  %v13449_v23 = vld [vmem:[%s28807_s7 + $0x20] sm:$0xff] }
 0x735   : > { %23423 = vmatpush3.bf16.msra.mxu0 %v23422_v21  ;;  %23447 = vmatpush3.bf16.msra.mxu1 %v23446_v59  ;;  %v23455_v40 = vpack.c.bf16 %v13350_v11, %v13349_v28  ;;  %v13451_v14 = vld [vmem:[%s28807_s7 + $0x30] sm:$0xff]  ;;  %v13452_v31 = vld [vmem:[%s28807_s7 + $0x38] sm:$0xff] }
 0x736   : > { %v12100_v0 = vadd.f32 %v12096_v1, %v12011_v8  ;;  %23424 = vmatprep.subr.bf16.mxu0 %v24469_v12  ;;  %23448 = vmatprep.subr.bf16.mxu1 %v24469_v12  ;;  %v13450_v1 = vld [vmem:[%s28807_s7 + $0x28] sm:$0xff] }
 0x737   : > { %v23485_v8 = vpack.c.bf16 %v13450_v1, %v13449_v23  ;;  %v15469_v1 = vld [vmem:[%s28806_s6] ss:$0 sm:$0xff] }
 0x739   : > { %23426 = vmatpush3.bf16.msra.mxu0 %v23425_v38  ;;  %23450 = vmatpush3.bf16.msra.mxu1 %v23449_v13  ;;  %v23488_v38 = vpack.c.bf16 %v13452_v31, %v13451_v14  ;;  %v13453_v13 = vld [vmem:[%s28807_s7 + $0x40] sm:$0xff] }
 0x73a   : > { %23427 = vmatprep.subr.bf16.mxu0 %v24469_v12  ;;  %23451 = vmatprep.subr.bf16.mxu1 %v24469_v12 }
 0x73d   : > { %23429 = vmatpush3.bf16.msra.mxu0 %v23428_v46  ;;  %23453 = vmatpush3.bf16.msra.mxu1 %v23452_v10  ;;  %v13457_v46 = vld [vmem:[%s28807_s7 + $0x60] sm:$0xff]  ;;  %v13458_v10 = vld [vmem:[%s28807_s7 + $0x68] sm:$0xff] }
 0x73e   : > { %23454 = vmatprep.subr.bf16.mxu0 %v24469_v12  ;;  %23478 = vmatprep.subr.bf16.mxu1 %v24469_v12  ;;  %v23497_v28 = vpack.c.bf16 %v13458_v10, %v13457_v46  ;;  %v15471_v10 = vld [vmem:[%s28810_s10] ss:$0 sm:$0xff] }
 0x740   : > { %21136 = vmatmul.mubr.f32.vlgmr.msra.gmra.mrb[22].mxu0 %v28583_v63  ;;  %21171 = vmatmul.mubr.f32.vlgmr.msra.gmra.mrb[22].mxu1 %v13258_v57  ;;  %v23464_v63 = vpack.c.bf16 %v13356_v27, %v13355_v62  ;;  %v13539_v62 = vld [vmem:[#allocation8] sm:$0xff]  ;;  %v13540_v27 = vld [vmem:[#allocation8 + $0x8] sm:$0xff] }
 0x741   : > { %23456 = vmatpush3.bf16.msra.mxu0 %v23455_v40  ;;  %21205 = vmatprep.mubr.msk.f32.mxu0 %vm24470_vm0, %v24471_v29  ;;  %v23503_v20 = vpack.c.bf16 %v13540_v27, %v13539_v62 }
 0x742   : > { %23457 = vmatprep.subr.bf16.mxu0 %v24469_v12  ;;  %21240 = vmatprep.mubr.msk.f32.mxu1 %vm24470_vm0, %v24471_v29 }
 0x745   : > { %23459 = vmatpush3.bf16.msra.mxu0 %v23458_v7  ;;  %v13459_v7 = vld [vmem:[%s28807_s7 + $0x70] sm:$0xff] }
 0x746   : > { %23460 = vmatprep.subr.bf16.mxu0 %v24469_v12  ;;  %v23500_v45 = vpack.c.bf16 %v13460_v48, %v13459_v7 }
 0x749   : > { %23462 = vmatpush3.bf16.msra.mxu0 %v23461_v34 }
 0x74a   : > { %23463 = vmatprep.subr.bf16.mxu0 %v24469_v12 }
 0x74d   : > { %23465 = vmatpush3.bf16.msra.mxu0 %v23464_v63  ;;  %v13541_v63 = vld [vmem:[#allocation8 + $0x10] sm:$0xff] }
 0x74e   : > { %23466 = vmatprep.subr.bf16.mxu0 %v24469_v12 }
 0x751   : > { %23468 = vmatpush3.bf16.msra.mxu0 %v23467_v32  ;;  %v23506_v32 = vpack.c.bf16 %v13542_v30, %v13541_v63 }
 0x752   : > { %23469 = vmatprep.subr.bf16.mxu0 %v24469_v12 }
 0x753   : > { %v12185_v56 = vpop.f32.mrb[10].mxu0  ;;  %v12274_v49 = vpop.f32.mrb[10].mxu1 }
 0x754   : > { %v12189_v36 = vadd.f32 %v12185_v56, %v12100_v0  ;;  %v20717_v52 = vpop.f32.mrb[11].mxu0  ;;  %v20752_v41 = vpop.f32.mrb[11].mxu1  ;;  %v23491_v0 = vpack.c.bf16 %v13454_v61, %v13453_v13  ;;  %v23512_v56 = vpack.c.bf16 %v13546_v33, %v13545_v22  ;;  %v13554_v13 = vld [vmem:[#allocation8 + $0x78] sm:$0xff] }
 0x755   : > { %23471 = vmatpush3.bf16.msra.mxu0 %v23470_v47  ;;  %v23509_v47 = vpack.c.bf16 %v13544_v9, %v13543_v51  ;;  %v13549_v41 = vld [vmem:[#allocation8 + $0x50] sm:$0xff] }
 0x756   : > { %v12278_v55 = vadd.f32 %v12274_v49, %v12189_v36  ;;  %23472 = vmatprep.subr.bf16.mxu0 %v24469_v12  ;;  %v13547_v49 = vld [vmem:[#allocation8 + $0x40] sm:$0xff]  ;;  %v13548_v36 = vld [vmem:[#allocation8 + $0x48] sm:$0xff] }
 0x757   : > { %v23515_v52 = vpack.c.bf16 %v13548_v36, %v13547_v49 }
 0x759   : > { %23474 = vmatpush3.bf16.msra.mxu0 %v23473_v39  ;;  %v13550_v39 = vld [vmem:[#allocation8 + $0x58] sm:$0xff] }
 0x75a   : > { %23475 = vmatprep.subr.bf16.mxu0 %v24469_v12 }
 0x75d   : > { %23477 = vmatpush3.bf16.msra.mxu0 %v23476_v43  ;;  %v23521_v43 = vpack.c.bf16 %v13552_v58, %v13551_v54 }
 0x75e   : > { %23502 = vmatprep.subr.bf16.mxu0 %v24469_v12 }
 0x760   : > { %21206 = vmatmul.mubr.f32.vlgmr.msra.gmra.mrb[24].mxu0 %v28607_v37  ;;  %v13447_v37 = vld [vmem:[%s28807_s7 + $0x10] sm:$0xff] }
 0x761   : > { %21275 = vmatprep.mubr.msk.f32.mxu0 %vm24470_vm0, %v24471_v29  ;;  %v13446_v29 = vld [vmem:[%s28807_s7 + $0x8] sm:$0xff]  ;;  %v23482_v2 = vpack.c.bf16 %v13448_v53, %v13447_v37  ;;  %23504 = vmatpush3.bf16.msra.mxu0 %v23503_v20 }
 0x762   : > { %v23479_v42 = vpack.c.bf16 %v13446_v29, %v13445_v6  ;;  %23505 = vmatprep.subr.bf16.mxu0 %v24469_v12 }
 0x764   : > { %23480 = vmatpush3.bf16.msra.mxu1 %v23479_v42 }
 0x765   : > { %23481 = vmatprep.subr.bf16.mxu1 %v24469_v12  ;;  %23507 = vmatpush3.bf16.msra.mxu0 %v23506_v32 }
 0x766   : > { %23508 = vmatprep.subr.bf16.mxu0 %v24469_v12 }
 0x768   : > { %23483 = vmatpush3.bf16.msra.mxu1 %v23482_v2 }
 0x769   : > { %23484 = vmatprep.subr.bf16.mxu1 %v24469_v12  ;;  %23510 = vmatpush3.bf16.msra.mxu0 %v23509_v47 }
 0x76a   : > { %23511 = vmatprep.subr.bf16.mxu0 %v24469_v12 }
 0x76c   : > { %23486 = vmatpush3.bf16.msra.mxu1 %v23485_v8 }
 0x76d   : > { %23487 = vmatprep.subr.bf16.mxu1 %v24469_v12  ;;  %23513 = vmatpush3.bf16.msra.mxu0 %v23512_v56 }
 0x76e   : > { %23514 = vmatprep.subr.bf16.mxu0 %v24469_v12 }
 0x770   : > { %23489 = vmatpush3.bf16.msra.mxu1 %v23488_v38  ;;  %v13553_v38 = vld [vmem:[#allocation8 + $0x70] sm:$0xff] }
 0x771   : > { %23490 = vmatprep.subr.bf16.mxu1 %v24469_v12  ;;  %23516 = vmatpush3.bf16.msra.mxu0 %v23515_v52  ;;  %v23524_v61 = vpack.c.bf16 %v13554_v13, %v13553_v38 }
 0x772   : > { %23517 = vmatprep.subr.bf16.mxu0 %v24469_v12 }
 0x773   : > { %v12363_v24 = vpop.f32.mrb[12].mxu0  ;;  %v12452_v19 = vpop.f32.mrb[12].mxu1 }
 0x774   : > { %v12367_v35 = vadd.f32 %v12363_v24, %v12278_v55  ;;  %v20787_v4 = vpop.f32.mrb[13].mxu0  ;;  %v20822_v3 = vpop.f32.mrb[13].mxu1  ;;  %23492 = vmatpush3.bf16.msra.mxu1 %v23491_v0  ;;  %v23518_v55 = vpack.c.bf16 %v13550_v39, %v13549_v41  ;;  %v15470_v0 = vld [vmem:[%s28808_s8] ss:$0 sm:$0xff] }
 0x775   : > { %23493 = vmatprep.subr.bf16.mxu1 %v24469_v12 }
 0x776   : > { %v12456_v60 = vadd.f32 %v12452_v19, %v12367_v35  ;;  %23519 = vmatpush3.bf16.msra.mxu0 %v23518_v55 }
 0x777   : > { %23520 = vmatprep.subr.bf16.mxu0 %v24469_v12 }
 0x778   : > { %23495 = vmatpush3.bf16.msra.mxu1 %v23494_v26 }
 0x779   : > { %23496 = vmatprep.subr.bf16.mxu1 %v24469_v12 }
 0x77a   : > { %23522 = vmatpush3.bf16.msra.mxu0 %v23521_v43 }
 0x77b   : > { %23523 = vmatprep.subr.bf16.mxu0 %v24469_v12 }
 0x77c   : > { %23498 = vmatpush3.bf16.msra.mxu1 %v23497_v28 }
 0x77d   : > { %23499 = vmatprep.subr.bf16.mxu1 %v24469_v12 }
 0x77e   : > { %23525 = vmatpush3.bf16.msra.mxu0 %v23524_v61 }
 0x780   : > { %23501 = vmatpush3.bf16.msra.mxu1 %v23500_v45 }
 0x793   : > { %v12541_v5 = vpop.f32.mrb[14].mxu0  ;;  %v12630_v50 = vpop.f32.mrb[14].mxu1 }
 0x794   : > { %v12545_v44 = vadd.f32 %v12541_v5, %v12456_v60  ;;  %v20857_v17 = vpop.f32.mrb[15].mxu0  ;;  %v20892_v21 = vpop.f32.mrb[15].mxu1 }
 0x796   : > { %v12634_v59 = vadd.f32 %v12630_v50, %v12545_v44 }
 0x7b3   : > { %v12719_v11 = vpop.f32.mrb[16].mxu0  ;;  %v12808_v40 = vpop.f32.mrb[16].mxu1 }
 0x7b4   : > { %v12723_v57 = vadd.f32 %v12719_v11, %v12634_v59  ;;  %v20927_v15 = vpop.f32.mrb[17].mxu0  ;;  %v20962_v16 = vpop.f32.mrb[17].mxu1 }
 0x7b6   : > { %v12812_v34 = vadd.f32 %v12808_v40, %v12723_v57 }
 0x7d3   : > { %v12897_v24 = vpop.f32.mrb[18].mxu0  ;;  %v12986_v19 = vpop.f32.mrb[18].mxu1 }
 0x7d4   : > { %v12901_v35 = vadd.f32 %v12897_v24, %v12812_v34  ;;  %v20997_v4 = vpop.f32.mrb[19].mxu0  ;;  %v21032_v3 = vpop.f32.mrb[19].mxu1 }
 0x7d6   : > { %v12990_v60 = vadd.f32 %v12986_v19, %v12901_v35 }
 0x7f3   : > { %v13075_v5 = vpop.f32.mrb[20].mxu0  ;;  %v13164_v50 = vpop.f32.mrb[20].mxu1 }
 0x7f4   : > { %v13079_v44 = vadd.f32 %v13075_v5, %v12990_v60  ;;  %v21067_v17 = vpop.f32.mrb[21].mxu0  ;;  %v21102_v21 = vpop.f32.mrb[21].mxu1 }
 0x7f6   : > { %v13168_v59 = vadd.f32 %v13164_v50, %v13079_v44 }
 0x813   : > { %v13253_v6 = vpop.f32.mrb[22].mxu0  ;;  %v13342_v29 = vpop.f32.mrb[22].mxu1 }
 0x814   : > { %v13257_v37 = vadd.f32 %v13253_v6, %v13168_v59  ;;  %v21137_v42 = vpop.f32.mrb[23].mxu0  ;;  %v21172_v53 = vpop.f32.mrb[23].mxu1 }
 0x816   : > { %v13346_v2 = vadd.f32 %v13342_v29, %v13257_v37 }
 0x833   : > { %v13431_v23 = vpop.f32.mrb[24].mxu0 }
 0x834   : > { %v13435_v8 = vadd.f32 %v13431_v23, %v13346_v2  ;;  %v21207_v14 = vpop.f32.mrb[25].mxu0 }
 0x836   : > { %v13443_v12 = vadd.f32 %v15469_v1, %v13435_v8 }
 0x838   : > { %v13444_v31 = vmax.f32 %v13443_v12, 0.0 }
 0x83a   : > { %21241 = vmatmul.mubr.f32.vlgmr.msra.gmra.mrb[24].mxu1 %v13444_v31 }
 0x90d   : > { %v13534_v25 = vpop.f32.mrb[24].mxu1 }
 0x90e   : > { %v13535_v18 = vadd.f32 %v15470_v0, %v13534_v25  ;;  %v21242_v26 = vpop.f32.mrb[25].mxu1 }
 0x910   : > { %v13538_v46 = vmax.f32 %v13535_v18, 0.0 }
 0x912   : > { %21276 = vmatmul.mubr.f32.vlgmr.msra.gmra.mrb[26].mxu0 %v13538_v46 }
 0x9e5   : > { %v13628_v28 = vpop.f32.mrb[26].mxu0 }
 0x9e6   : > { %v13629_v11 = vadd.f32 %v15471_v10, %v13628_v28  ;;  %v21277_v40 = vpop.f32.mrb[27].mxu0 }
 0x9e8   : > { %13632 = vst [vmem:[%s24619_s15] sm:$0xff] %v13629_v11 }
 0x9e9 PF: > { %s23_s17 = sadd.s32 1, %s24455_s17  }
 0x9ea   : > { %p20_p11 = scmp.ge.s32.totalorder %s23_s17, 4  }
 0x9ec   :  { %22 = sbr.rel (!%p20_p11) target bundleno = 2 (0x2), region = 263 }
 0x9f3   :  { %13652 = vsyncpa [#allocation7], 1 }
 0x9f4   :  { %13654 = vsyncpa [#allocation7 + $0x1], 1 }
 0x9f5   :  { %13655 = vsyncpa [#allocation9], 1 }

</bundles_post_ra>
